<compile_context>
chip_gen: v7x
topology: tpu7x:2x2x1
jax: 0.10.0
libtpu: 0.0.40
codegen_flags: <defaults>
</compile_context>

<pallas_src>
import math
import jax
import jax.numpy as jnp
from jax import lax
from jax.experimental import pallas as pl
from jax.experimental.pallas import tpu as pltpu

CH = 26                    # channel_num
H = 9
W = 9
HID = 81                   # Q_K_V hidden dim (=9*9)
BN_EPS = 1e-5
LSTM_H = 9
LSTM_LAYERS = 9
FEAT = CH * HID + CH * 9 * 2 * LSTM_H       # 2106 + 4212 = 6318
FEAT_PAD = 6400                             # K padded so MLP tiles are 128-aligned
K_TILE = 3200                               # 2 K-steps for the MLP
BT_MAX = 64                                 # batch tile for kernels A/B (bt*26 >= 256,
                                            # VMEM-safe on v7x's 64 MiB)

_DN_B = (((2,), (1,)), ((0,), (0,)))        # batched matmul: contract lhs[2] w/ rhs[1]
_DN_BT = (((2,), (2,)), ((0,), (0,)))       # batched matmul: contract last dims


# --------------------------------------------------------------------------
# Pallas kernel A: conv branches + per-channel outer product -> xm (bt,26,81)
# --------------------------------------------------------------------------
def conv_xm_kernel(x_ref, dwdt_ref, dwst_ref, pwd_ref, pws_ref, ba_ref, bb_ref,
                   ehT_ref, ewT_ref, eh_ref, ew_ref, out_ref):
    f32 = jnp.float32
    x = x_ref[...]                                          # (bt, 26, 81)  lane l = h*9+w
    bt = x.shape[0]

    # depthwise (1,9): collapse w  /  depthwise (9,1): collapse h
    ehT = jnp.broadcast_to(ehT_ref[...], (bt, HID, 9))      # (81,9) selector (l -> h)
    ewT = jnp.broadcast_to(ewT_ref[...], (bt, HID, 9))      # (81,9) selector (l -> w)
    d1 = lax.dot_general(x * dwdt_ref[...][None], ehT, _DN_B,
                         preferred_element_type=f32)        # (bt, 26, 9)  [b,c,h]
    d2 = lax.dot_general(x * dwst_ref[...][None], ewT, _DN_B,
                         preferred_element_type=f32)        # (bt, 26, 9)  [b,c,w]

    # pointwise 1x1 conv (+ folded BN + folded depthwise bias) + ReLU
    pwd = jnp.broadcast_to(pwd_ref[...], (bt, CH, CH))
    pws = jnp.broadcast_to(pws_ref[...], (bt, CH, CH))
    xa = jnp.maximum(lax.dot_general(pwd, d1, _DN_B, preferred_element_type=f32)
                     + ba_ref[...][None], 0.0)              # (bt, 26, 9)  [b,o,h]
    xb = jnp.maximum(lax.dot_general(pws, d2, _DN_B, preferred_element_type=f32)
                     + bb_ref[...][None], 0.0)              # (bt, 26, 9)  [b,o,w]

    # torch.matmul(x1, x2): per-(sample, channel) outer product, emitted lane-dense
    eh = jnp.broadcast_to(eh_ref[...], (bt, 9, HID))        # expand over w
    ew = jnp.broadcast_to(ew_ref[...], (bt, 9, HID))        # expand over h
    xm = (lax.dot_general(xa, eh, _DN_B, preferred_element_type=f32) *
          lax.dot_general(xb, ew, _DN_B, preferred_element_type=f32))   # (bt, 26, 81)
    out_ref[...] = xm


# --------------------------------------------------------------------------
# Pallas kernel B: spatiotemporal attention + Q_K_V self attention
# --------------------------------------------------------------------------
def attn_qkv_kernel(xmf_ref, xm3_ref, w1m_ref, b1_ref, eh_ref, mqk_ref, wvt_ref,
                    out_ref):
    f32 = jnp.float32
    xmf = xmf_ref[...]                                      # (bt, 2106)  flat (c,h,w)
    bt = xmf.shape[0]

    # attention conv1 (kernel (26,9)) as ONE 2D MXU matmul, BN folded, ReLU, softmax
    c1 = jnp.dot(xmf, w1m_ref[...], preferred_element_type=f32) + b1_ref[...]  # (bt, 9)
    c1 = jnp.maximum(c1, 0.0)
    c1 = c1 - jnp.max(c1, axis=1, keepdims=True)
    e1 = jnp.exp(c1)
    s1 = e1 * pl.reciprocal(jnp.sum(e1, axis=1, keepdims=True), approx=True)
    # conv2/conv3 branches: softmax over a size-1 channel dim is exactly 1, so each
    # contributes "+ x"; fold into a per-(sample, h) scale (s1 + 2) over the lanes.
    scale = jnp.dot(s1 + 2.0, eh_ref[...], preferred_element_type=f32)          # (bt, 81)

    att = xm3_ref[...] * scale[:, None, :]                  # (bt, 26, 81)

    # Q_K_V self attention with Wq^T Wk folded into a single (81,81) matrix.
    mqk = jnp.broadcast_to(mqk_ref[...], (bt, HID, HID))
    t = lax.dot_general(att, mqk, _DN_B, preferred_element_type=f32)            # (bt,26,81)
    scores = lax.dot_general(t, att, _DN_BT, preferred_element_type=f32)        # (bt,26,26)
    scores = scores - jnp.max(scores, axis=2, keepdims=True)
    e2 = jnp.exp(scores)
    alpha = e2 * pl.reciprocal(jnp.sum(e2, axis=2, keepdims=True), approx=True)

    z = lax.dot_general(alpha, att, _DN_B, preferred_element_type=f32)          # (bt,26,81)
    wvt = jnp.broadcast_to(wvt_ref[...], (bt, HID, HID))
    out_ref[...] = lax.dot_general(z, wvt, _DN_B, preferred_element_type=f32)   # (bt,26,81)


# --------------------------------------------------------------------------
# Pallas kernel C: K-tiled MLP head (fc1 streamed in bf16, f32 accumulator)
# --------------------------------------------------------------------------
def mlp_kernel(x_ref, w1_ref, b1_ref, w2_ref, b2_ref, w3_ref, b3_ref, out_ref, acc_ref):
    k = pl.program_id(1)

    @pl.when(k == 0)
    def _init():
        acc_ref[...] = jnp.zeros_like(acc_ref)

    acc_ref[...] += jnp.dot(x_ref[...].astype(jnp.bfloat16), w1_ref[...],
                            preferred_element_type=jnp.float32)

    @pl.when(k == pl.num_programs(1) - 1)
    def _finish():
        h1 = jnp.maximum(acc_ref[...] + b1_ref[...], 0.0)
        # TODO(synk): nn.Dropout(p=0.5) uses eval-mode identity semantics here.
        h2 = jnp.maximum(jnp.dot(h1, w2_ref[...], preferred_element_type=jnp.float32)
                         + b2_ref[...], 0.0)
        out_ref[...] = (jnp.dot(h2, w3_ref[...], preferred_element_type=jnp.float32)
                        + b3_ref[...])


# --------------------------------------------------------------------------
# pallas_call wrappers
# --------------------------------------------------------------------------
def _batch_tile(n):
    if n <= BT_MAX:
        return n, 1
    bt = BT_MAX
    return bt, (n + bt - 1) // bt


def conv_xm_call(x3, p):
    n = x3.shape[0]
    bt, nb = _batch_tile(n)
    n_pad = bt * nb
    if n_pad != n:
        x3 = jnp.concatenate([x3, jnp.zeros((n_pad - n, CH, HID), x3.dtype)], axis=0)
    small = lambda i: (0, 0)
    xm = pl.pallas_call(
        conv_xm_kernel,
        out_shape=jax.ShapeDtypeStruct((n_pad, CH, HID), jnp.float32),
        grid=(nb,),
        in_specs=[
            pl.BlockSpec((bt, CH, HID), lambda i: (i, 0, 0)),
            pl.BlockSpec((CH, HID), small),     # dwd_tile
            pl.BlockSpec((CH, HID), small),     # dws_tile
            pl.BlockSpec((CH, CH), small),      # pwd (BN folded)
            pl.BlockSpec((CH, CH), small),      # pws (BN folded)
            pl.BlockSpec((CH, 1), small),       # bias_a
            pl.BlockSpec((CH, 1), small),       # bias_b
            pl.BlockSpec((HID, 9), small),      # ehT
            pl.BlockSpec((HID, 9), small),      # ewT
            pl.BlockSpec((9, HID), small),      # eh
            pl.BlockSpec((9, HID), small),      # ew
        ],
        out_specs=pl.BlockSpec((bt, CH, HID), lambda i: (i, 0, 0)),
        compiler_params=pltpu.CompilerParams(dimension_semantics=("parallel",)),
    )(x3, p["dwd_tile"], p["dws_tile"], p["pwd"], p["pws"], p["ba"], p["bb"],
      p["ehT"], p["ewT"], p["eh"], p["ew"])
    return xm                               # padded to n_pad


def attn_qkv_call(xm_pad, p, n):
    n_pad = xm_pad.shape[0]
    bt, nb = _batch_tile(n_pad)
    xmf = xm_pad.reshape(n_pad, CH * HID)   # free XLA-level view of the same data
    small = lambda i: (0, 0)
    out = pl.pallas_call(
        attn_qkv_kernel,
        out_shape=jax.ShapeDtypeStruct((n_pad, CH, HID), jnp.float32),
        grid=(nb,),
        in_specs=[
            pl.BlockSpec((bt, CH * HID), lambda i: (i, 0)),
            pl.BlockSpec((bt, CH, HID), lambda i: (i, 0, 0)),
            pl.BlockSpec((CH * HID, 9), small),   # attention conv1 weight, flattened
            pl.BlockSpec((1, 9), small),          # attention conv1 bias
            pl.BlockSpec((9, HID), small),        # eh (h -> lanes expander)
            pl.BlockSpec((HID, HID), small),      # Wq^T Wk
            pl.BlockSpec((HID, HID), small),      # Wv^T
        ],
        out_specs=pl.BlockSpec((bt, CH, HID), lambda i: (i, 0, 0)),
        compiler_params=pltpu.CompilerParams(dimension_semantics=("parallel",)),
    )(xmf, xm_pad, p["w1m"], p["b1"], p["eh"], p["mqk"], p["wvt"])
    return out[:n]


def mlp_call(feat, p):
    n = feat.shape[0]
    if n <= 256:
        bm, mb, n_pad = n, 1, n
    else:
        bm = 256
        mb = (n + bm - 1) // bm
        n_pad = bm * mb
        if n_pad != n:
            feat = jnp.concatenate(
                [feat, jnp.zeros((n_pad - n, FEAT_PAD), feat.dtype)], axis=0)
    # TODO(synk): on v7x the fc1 weight stream could be split over both TensorCores
    # (parallel N split + cross-core combine); single reduction grid kept for clarity.
    out = pl.pallas_call(
        mlp_kernel,
        out_shape=jax.ShapeDtypeStruct((n_pad, 128), jnp.float32),
        grid=(mb, FEAT_PAD // K_TILE),
        in_specs=[
            pl.BlockSpec((bm, K_TILE), lambda i, k: (i, k)),
            pl.BlockSpec((K_TILE, 800), lambda i, k: (k, 0)),
            pl.BlockSpec((1, 800), lambda i, k: (0, 0)),
            pl.BlockSpec((800, 100), lambda i, k: (0, 0)),
            pl.BlockSpec((1, 100), lambda i, k: (0, 0)),
            pl.BlockSpec((100, 128), lambda i, k: (0, 0)),
            pl.BlockSpec((1, 128), lambda i, k: (0, 0)),
        ],
        out_specs=pl.BlockSpec((bm, 128), lambda i, k: (i, 0)),
        scratch_shapes=[pltpu.VMEM((bm, 800), jnp.float32)],
        compiler_params=pltpu.CompilerParams(
            dimension_semantics=("parallel", "arbitrary")),
    )(feat, p["fc1_w"], p["fc1_b"], p["fc2_w"], p["fc2_b"], p["fc3_w"], p["fc3_b"])
    return out[:n, :5]


# --------------------------------------------------------------------------
# LSTM branch (plain JAX glue)
# TODO(synk): nn.LSTM(9, 9, num_layers=9, bidirectional=True) is a tiny serial
# recurrence; kept in lax.scan (fwd/bwd directions batched per step) not Pallas.
# --------------------------------------------------------------------------
def lstm_forward(x_seq, layers):
    out = x_seq                                             # (T, B, 9)
    for (w_ih, w_hh, b_ih, b_hh) in layers:                 # stacked (2, ...) over dir
        bias = (b_ih + b_hh)[:, None, :]                    # (2, 1, 36)
        bsz = out.shape[1]
        x_pair = jnp.stack([out, jnp.flip(out, 0)], axis=1)  # (T, 2, B, in)

        def step(carry, x_t, w_ih=w_ih, w_hh=w_hh, bias=bias):
            h, c = carry                                    # (2, B, 9) each
            gates = (jnp.einsum('dbi,dgi->dbg', x_t, w_ih)
                     + jnp.einsum('dbh,dgh->dbg', h, w_hh) + bias)
            i_g, f_g, g_g, o_g = jnp.split(gates, 4, axis=-1)
            c = jax.nn.sigmoid(f_g) * c + jax.nn.sigmoid(i_g) * jnp.tanh(g_g)
            h = jax.nn.sigmoid(o_g) * jnp.tanh(c)
            return (h, c), h

        init = (jnp.zeros((2, bsz, LSTM_H), out.dtype),
                jnp.zeros((2, bsz, LSTM_H), out.dtype))
        _, hs = lax.scan(step, init, x_pair)                # (T, 2, B, 9)
        out = jnp.concatenate([hs[:, 0], jnp.flip(hs[:, 1], 0)], axis=-1)   # (T, B, 18)
    return out


# --------------------------------------------------------------------------
# Parameters (deterministic PyTorch-style uniform init; BN eval-mode stats)
# --------------------------------------------------------------------------
def init_params(key):
    kit = iter(jax.random.split(key, 128))

    def uni(shape, fan_in):
        bound = 1.0 / math.sqrt(fan_in)
        return jax.random.uniform(next(kit), shape, jnp.float32, -bound, bound)

    bn_scale = 1.0 / math.sqrt(1.0 + BN_EPS)   # gamma=1, beta=0, mean=0, var=1 (eval)
    p = {}

    # SeparableConv2d: depthwise (1,9) + pointwise 1x1 + folded BN
    dwd_w = uni((CH, 9), 9)                     # [c, w]
    dwd_b = uni((CH,), 9)
    pwd_w = uni((CH, CH), CH)                   # [o, c]
    pwd_b = uni((CH,), CH)
    p["dwd_tile"] = jnp.tile(dwd_w, (1, 9))                            # [c, h*9+w]
    p["pwd"] = pwd_w * bn_scale
    p["ba"] = ((pwd_w @ dwd_b + pwd_b) * bn_scale).reshape(CH, 1)

    # Separable: depthwise (9,1) + pointwise 1x1 + folded BN
    dws_w = uni((CH, 9), 9)                     # [c, h]
    dws_b = uni((CH,), 9)
    pws_w = uni((CH, CH), CH)
    pws_b = uni((CH,), CH)
    p["dws_tile"] = jnp.repeat(dws_w, 9, axis=1)                       # [c, h*9+w]
    p["pws"] = pws_w * bn_scale
    p["bb"] = ((pws_w @ dws_b + pws_b) * bn_scale).reshape(CH, 1)

    # lane selector / expander matrices (lane l = h*9 + w)
    lane = jnp.arange(HID)
    p["eh"] = (lane[None, :] // 9 == jnp.arange(9)[:, None]).astype(jnp.float32)   # (9,81)
    p["ew"] = (lane[None, :] % 9 == jnp.arange(9)[:, None]).astype(jnp.float32)    # (9,81)
    p["ehT"] = p["eh"].T                                                            # (81,9)
    p["ewT"] = p["ew"].T

    # Spatiotemporal attention conv1 (BN folded) as a flat (2106, 9) matmul weight.
    # torch weight layout: (o, in=h, kh=c, kw=w)  ->  (c, h, w, o)
    w1 = uni((9, 9, CH, 9), 9 * CH * 9)
    p["w1m"] = jnp.transpose(w1, (2, 1, 3, 0)).reshape(CH * HID, 9) * bn_scale
    p["b1"] = (uni((9,), 9 * CH * 9) * bn_scale).reshape(1, 9)
    # conv2/conv3/bn2/bn3 branches are not materialized: softmax over their size-1
    # channel dim is identically 1, so each branch reduces to "+ x".

    # Q_K_V (bias-free Linears): fold Wq^T Wk; keep Wv^T.
    wq = uni((HID, HID), HID)
    wk = uni((HID, HID), HID)
    wv = uni((HID, HID), HID)
    p["mqk"] = wq.T @ wk
    p["wvt"] = wv.T

    # fc head; fc1 weight stored bf16 and zero-padded along K to FEAT_PAD.
    # TODO(synk): bf16 fc1 stream halves HBM traffic vs the f32 torch Linear.
    fc1 = uni((800, FEAT), FEAT).T                                     # (6318, 800)
    fc1 = jnp.concatenate([fc1, jnp.zeros((FEAT_PAD - FEAT, 800), jnp.float32)], 0)
    p["fc1_w"] = fc1.astype(jnp.bfloat16)
    p["fc1_b"] = uni((800,), FEAT).reshape(1, 800)
    p["fc2_w"] = uni((100, 800), 800).T
    p["fc2_b"] = uni((100,), 800).reshape(1, 100)
    fc3 = uni((5, 100), 100).T                                         # (100, 5)
    p["fc3_w"] = jnp.concatenate([fc3, jnp.zeros((100, 123), jnp.float32)], axis=1)
    p["fc3_b"] = jnp.concatenate(
        [uni((5,), 100), jnp.zeros((123,), jnp.float32)]).reshape(1, 128)

    # LSTM(9, 9, num_layers=9, bidirectional=True); weights stacked over direction.
    lstm = []
    for layer in range(LSTM_LAYERS):
        in_dim = 9 if layer == 0 else 2 * LSTM_H
        w_ih = jnp.stack([uni((4 * LSTM_H, in_dim), LSTM_H) for _ in range(2)])
        w_hh = jnp.stack([uni((4 * LSTM_H, LSTM_H), LSTM_H) for _ in range(2)])
        b_ih = jnp.stack([uni((4 * LSTM_H,), LSTM_H) for _ in range(2)])
        b_hh = jnp.stack([uni((4 * LSTM_H,), LSTM_H) for _ in range(2)])
        lstm.append((w_ih, w_hh, b_ih, b_hh))
    p["lstm"] = lstm
    return p


# --------------------------------------------------------------------------
# Full forward pass
# --------------------------------------------------------------------------
def forward(x, params):
    n = x.shape[0]
    # LSTM branch: x.view(-1, 26*9, 9) -> (seq=n, batch=234, feat=9) for nn.LSTM
    y = lstm_forward(x.reshape(n, CH * 9, 9), params["lstm"])          # (n, 234, 18)
    y = y.reshape(n, CH * 9 * 2 * LSTM_H)                              # (n, 4212)

    x3 = x.reshape(n, CH, HID)                                         # lane-dense input
    xm = conv_xm_call(x3, params)                                      # (n_pad, 26, 81)
    att = attn_qkv_call(xm, params, n)                                 # (n, 26, 81)

    feat = jnp.concatenate(
        [att.reshape(n, CH * HID), y,
         jnp.zeros((n, FEAT_PAD - FEAT), jnp.float32)], axis=1)        # (n, 6400)
    return mlp_call(feat, params)                                      # (n, 5)


if __name__ == "__main__":
    key = jax.random.PRNGKey(0)
    pkey, xkey = jax.random.split(key)
    params = init_params(pkey)
    x = jax.random.normal(xkey, (2, CH, H, W), jnp.float32)   # NCHW, like PyTorch
    out = jax.jit(forward)(x, params)
    out = jax.block_until_ready(out)
    assert out.shape == (2, 5)
    assert bool(jnp.all(jnp.isfinite(out)))
    print("KERNEL_OK")
</pallas_src>

<mosaic_0001>
module attributes {stable_mosaic.version = 11 : i64} {
  func.func @conv_xm_kernel(%arg0: i32, %arg1: memref<2x26x81xf32, #tpu.memory_space<vmem>>, %arg2: memref<26x81xf32, #tpu.memory_space<vmem>>, %arg3: memref<26x81xf32, #tpu.memory_space<vmem>>, %arg4: memref<26x26xf32, #tpu.memory_space<vmem>>, %arg5: memref<26x26xf32, #tpu.memory_space<vmem>>, %arg6: memref<26x1xf32, #tpu.memory_space<vmem>>, %arg7: memref<26x1xf32, #tpu.memory_space<vmem>>, %arg8: memref<81x9xf32, #tpu.memory_space<vmem>>, %arg9: memref<81x9xf32, #tpu.memory_space<vmem>>, %arg10: memref<9x81xf32, #tpu.memory_space<vmem>>, %arg11: memref<9x81xf32, #tpu.memory_space<vmem>>, %arg12: memref<2x26x81xf32, #tpu.memory_space<vmem>>) attributes {dimension_semantics = [#tpu.dimension_semantics<parallel>], iteration_bounds = array<i64: 1>, scalar_prefetch = 0 : i64, scratch_operands = 0 : i64, tpu.core_type = #tpu.core_type<tc>, window_params = [{transform_indices = @transform_0, window_bounds = array<i64: 2, 26, 81>}, {pipeline_mode = #tpu.pipeline_mode<synchronous>, transform_indices = @transform_1, window_bounds = array<i64: 26, 81>}, {pipeline_mode = #tpu.pipeline_mode<synchronous>, transform_indices = @transform_2, window_bounds = array<i64: 26, 81>}, {pipeline_mode = #tpu.pipeline_mode<synchronous>, transform_indices = @transform_3, window_bounds = array<i64: 26, 26>}, {pipeline_mode = #tpu.pipeline_mode<synchronous>, transform_indices = @transform_4, window_bounds = array<i64: 26, 26>}, {pipeline_mode = #tpu.pipeline_mode<synchronous>, transform_indices = @transform_5, window_bounds = array<i64: 26, 1>}, {pipeline_mode = #tpu.pipeline_mode<synchronous>, transform_indices = @transform_6, window_bounds = array<i64: 26, 1>}, {pipeline_mode = #tpu.pipeline_mode<synchronous>, transform_indices = @transform_7, window_bounds = array<i64: 81, 9>}, {pipeline_mode = #tpu.pipeline_mode<synchronous>, transform_indices = @transform_8, window_bounds = array<i64: 81, 9>}, {pipeline_mode = #tpu.pipeline_mode<synchronous>, transform_indices = @transform_9, window_bounds = array<i64: 9, 81>}, {pipeline_mode = #tpu.pipeline_mode<synchronous>, transform_indices = @transform_10, window_bounds = array<i64: 9, 81>}, {transform_indices = @transform_11, window_bounds = array<i64: 2, 26, 81>}]} {
    %c0 = arith.constant 0 : index
    %c0_0 = arith.constant 0 : index
    %c0_1 = arith.constant 0 : index
    %0 = vector.load %arg1[%c0, %c0_0, %c0_1] : memref<2x26x81xf32, #tpu.memory_space<vmem>>, vector<2x26x81xf32>
    %c0_2 = arith.constant 0 : index
    %c0_3 = arith.constant 0 : index
    %1 = vector.load %arg8[%c0_2, %c0_3] : memref<81x9xf32, #tpu.memory_space<vmem>>, vector<81x9xf32>
    %2 = vector.shape_cast %1 : vector<81x9xf32> to vector<1x81x9xf32>
    %3 = vector.broadcast %2 : vector<1x81x9xf32> to vector<2x81x9xf32>
    %c0_4 = arith.constant 0 : index
    %c0_5 = arith.constant 0 : index
    %4 = vector.load %arg9[%c0_4, %c0_5] : memref<81x9xf32, #tpu.memory_space<vmem>>, vector<81x9xf32>
    %5 = vector.shape_cast %4 : vector<81x9xf32> to vector<1x81x9xf32>
    %6 = vector.broadcast %5 : vector<1x81x9xf32> to vector<2x81x9xf32>
    %c0_6 = arith.constant 0 : index
    %c0_7 = arith.constant 0 : index
    %7 = vector.load %arg2[%c0_6, %c0_7] : memref<26x81xf32, #tpu.memory_space<vmem>>, vector<26x81xf32>
    %8 = vector.shape_cast %7 : vector<26x81xf32> to vector<1x26x81xf32>
    %9 = vector.broadcast %8 : vector<1x26x81xf32> to vector<2x26x81xf32>
    %10 = arith.mulf %0, %9 : vector<2x26x81xf32>
    %cst = arith.constant dense<0.000000e+00> : vector<2x26x9xf32>
    %11 = tpu.matmul %10, %3, %cst {dimension_numbers = #tpu.dot_dimension_numbers<[2], [1], [1], [2], [0, 0, 0, 1, 1, 2], [0], [0]>} : vector<2x26x81xf32>, vector<2x81x9xf32>, vector<2x26x9xf32> -> vector<2x26x9xf32>
    %c0_8 = arith.constant 0 : index
    %c0_9 = arith.constant 0 : index
    %12 = vector.load %arg3[%c0_8, %c0_9] : memref<26x81xf32, #tpu.memory_space<vmem>>, vector<26x81xf32>
    %13 = vector.shape_cast %12 : vector<26x81xf32> to vector<1x26x81xf32>
    %14 = vector.broadcast %13 : vector<1x26x81xf32> to vector<2x26x81xf32>
    %15 = arith.mulf %0, %14 : vector<2x26x81xf32>
    %cst_10 = arith.constant dense<0.000000e+00> : vector<2x26x9xf32>
    %16 = tpu.matmul %15, %6, %cst_10 {dimension_numbers = #tpu.dot_dimension_numbers<[2], [1], [1], [2], [0, 0, 0, 1, 1, 2], [0], [0]>} : vector<2x26x81xf32>, vector<2x81x9xf32>, vector<2x26x9xf32> -> vector<2x26x9xf32>
    %c0_11 = arith.constant 0 : index
    %c0_12 = arith.constant 0 : index
    %17 = vector.load %arg4[%c0_11, %c0_12] : memref<26x26xf32, #tpu.memory_space<vmem>>, vector<26x26xf32>
    %18 = vector.shape_cast %17 : vector<26x26xf32> to vector<1x26x26xf32>
    %19 = vector.broadcast %18 : vector<1x26x26xf32> to vector<2x26x26xf32>
    %c0_13 = arith.constant 0 : index
    %c0_14 = arith.constant 0 : index
    %20 = vector.load %arg5[%c0_13, %c0_14] : memref<26x26xf32, #tpu.memory_space<vmem>>, vector<26x26xf32>
    %21 = vector.shape_cast %20 : vector<26x26xf32> to vector<1x26x26xf32>
    %22 = vector.broadcast %21 : vector<1x26x26xf32> to vector<2x26x26xf32>
    %cst_15 = arith.constant dense<0.000000e+00> : vector<2x26x9xf32>
    %23 = tpu.matmul %19, %11, %cst_15 {dimension_numbers = #tpu.dot_dimension_numbers<[2], [1], [1], [2], [0, 0, 0, 1, 1, 2], [0], [0]>} : vector<2x26x26xf32>, vector<2x26x9xf32>, vector<2x26x9xf32> -> vector<2x26x9xf32>
    %c0_16 = arith.constant 0 : index
    %c0_17 = arith.constant 0 : index
    %24 = vector.load %arg6[%c0_16, %c0_17] : memref<26x1xf32, #tpu.memory_space<vmem>>, vector<26x1xf32>
    %25 = vector.shape_cast %24 : vector<26x1xf32> to vector<1x26x1xf32>
    %26 = vector.broadcast %25 : vector<1x26x1xf32> to vector<2x26x9xf32>
    %27 = arith.addf %23, %26 : vector<2x26x9xf32>
    %cst_18 = arith.constant 0.000000e+00 : f32
    %28 = vector.broadcast %cst_18 : f32 to vector<2x26x9xf32>
    %29 = arith.maximumf %27, %28 : vector<2x26x9xf32>
    %cst_19 = arith.constant dense<0.000000e+00> : vector<2x26x9xf32>
    %30 = tpu.matmul %22, %16, %cst_19 {dimension_numbers = #tpu.dot_dimension_numbers<[2], [1], [1], [2], [0, 0, 0, 1, 1, 2], [0], [0]>} : vector<2x26x26xf32>, vector<2x26x9xf32>, vector<2x26x9xf32> -> vector<2x26x9xf32>
    %c0_20 = arith.constant 0 : index
    %c0_21 = arith.constant 0 : index
    %31 = vector.load %arg7[%c0_20, %c0_21] : memref<26x1xf32, #tpu.memory_space<vmem>>, vector<26x1xf32>
    %32 = vector.shape_cast %31 : vector<26x1xf32> to vector<1x26x1xf32>
    %33 = vector.broadcast %32 : vector<1x26x1xf32> to vector<2x26x9xf32>
    %34 = arith.addf %30, %33 : vector<2x26x9xf32>
    %cst_22 = arith.constant 0.000000e+00 : f32
    %35 = vector.broadcast %cst_22 : f32 to vector<2x26x9xf32>
    %36 = arith.maximumf %34, %35 : vector<2x26x9xf32>
    %c0_23 = arith.constant 0 : index
    %c0_24 = arith.constant 0 : index
    %37 = vector.load %arg10[%c0_23, %c0_24] : memref<9x81xf32, #tpu.memory_space<vmem>>, vector<9x81xf32>
    %38 = vector.shape_cast %37 : vector<9x81xf32> to vector<1x9x81xf32>
    %39 = vector.broadcast %38 : vector<1x9x81xf32> to vector<2x9x81xf32>
    %c0_25 = arith.constant 0 : index
    %c0_26 = arith.constant 0 : index
    %40 = vector.load %arg11[%c0_25, %c0_26] : memref<9x81xf32, #tpu.memory_space<vmem>>, vector<9x81xf32>
    %41 = vector.shape_cast %40 : vector<9x81xf32> to vector<1x9x81xf32>
    %42 = vector.broadcast %41 : vector<1x9x81xf32> to vector<2x9x81xf32>
    %cst_27 = arith.constant dense<0.000000e+00> : vector<2x26x81xf32>
    %43 = tpu.matmul %29, %39, %cst_27 {dimension_numbers = #tpu.dot_dimension_numbers<[2], [1], [1], [2], [0, 0, 0, 1, 1, 2], [0], [0]>} : vector<2x26x9xf32>, vector<2x9x81xf32>, vector<2x26x81xf32> -> vector<2x26x81xf32>
    %cst_28 = arith.constant dense<0.000000e+00> : vector<2x26x81xf32>
    %44 = tpu.matmul %36, %42, %cst_28 {dimension_numbers = #tpu.dot_dimension_numbers<[2], [1], [1], [2], [0, 0, 0, 1, 1, 2], [0], [0]>} : vector<2x26x9xf32>, vector<2x9x81xf32>, vector<2x26x81xf32> -> vector<2x26x81xf32>
    %45 = arith.mulf %43, %44 : vector<2x26x81xf32>
    %c0_29 = arith.constant 0 : index
    %c0_30 = arith.constant 0 : index
    %c0_31 = arith.constant 0 : index
    %46 = vector.load %arg12[%c0_29, %c0_30, %c0_31] : memref<2x26x81xf32, #tpu.memory_space<vmem>>, vector<2x26x81xf32>
    tpu.vector_store %arg12[%c0_29, %c0_30, %c0_31], %45 {strides = array<i32>} : memref<2x26x81xf32, #tpu.memory_space<vmem>>, vector<2x26x81xf32>,
    return
  }
  func.func @transform_0(%arg0: i32) -> (i32, i32, i32) {
    %c0_i32 = arith.constant 0 : i32
    %c0_i32_0 = arith.constant 0 : i32
    %c0_i32_1 = arith.constant 0 : i32
    return %arg0, %c0_i32, %c0_i32_0 : i32, i32, i32
  }
  func.func @transform_1(%arg0: i32) -> (i32, i32) {
    %c0_i32 = arith.constant 0 : i32
    %c0_i32_0 = arith.constant 0 : i32
    %c0_i32_1 = arith.constant 0 : i32
    return %c0_i32, %c0_i32_0 : i32, i32
  }
  func.func @transform_2(%arg0: i32) -> (i32, i32) {
    %c0_i32 = arith.constant 0 : i32
    %c0_i32_0 = arith.constant 0 : i32
    %c0_i32_1 = arith.constant 0 : i32
    return %c0_i32, %c0_i32_0 : i32, i32
  }
  func.func @transform_3(%arg0: i32) -> (i32, i32) {
    %c0_i32 = arith.constant 0 : i32
    %c0_i32_0 = arith.constant 0 : i32
    %c0_i32_1 = arith.constant 0 : i32
    return %c0_i32, %c0_i32_0 : i32, i32
  }
  func.func @transform_4(%arg0: i32) -> (i32, i32) {
    %c0_i32 = arith.constant 0 : i32
    %c0_i32_0 = arith.constant 0 : i32
    %c0_i32_1 = arith.constant 0 : i32
    return %c0_i32, %c0_i32_0 : i32, i32
  }
  func.func @transform_5(%arg0: i32) -> (i32, i32) {
    %c0_i32 = arith.constant 0 : i32
    %c0_i32_0 = arith.constant 0 : i32
    %c0_i32_1 = arith.constant 0 : i32
    return %c0_i32, %c0_i32_0 : i32, i32
  }
  func.func @transform_6(%arg0: i32) -> (i32, i32) {
    %c0_i32 = arith.constant 0 : i32
    %c0_i32_0 = arith.constant 0 : i32
    %c0_i32_1 = arith.constant 0 : i32
    return %c0_i32, %c0_i32_0 : i32, i32
  }
  func.func @transform_7(%arg0: i32) -> (i32, i32) {
    %c0_i32 = arith.constant 0 : i32
    %c0_i32_0 = arith.constant 0 : i32
    %c0_i32_1 = arith.constant 0 : i32
    return %c0_i32, %c0_i32_0 : i32, i32
  }
  func.func @transform_8(%arg0: i32) -> (i32, i32) {
    %c0_i32 = arith.constant 0 : i32
    %c0_i32_0 = arith.constant 0 : i32
    %c0_i32_1 = arith.constant 0 : i32
    return %c0_i32, %c0_i32_0 : i32, i32
  }
  func.func @transform_9(%arg0: i32) -> (i32, i32) {
    %c0_i32 = arith.constant 0 : i32
    %c0_i32_0 = arith.constant 0 : i32
    %c0_i32_1 = arith.constant 0 : i32
    return %c0_i32, %c0_i32_0 : i32, i32
  }
  func.func @transform_10(%arg0: i32) -> (i32, i32) {
    %c0_i32 = arith.constant 0 : i32
    %c0_i32_0 = arith.constant 0 : i32
    %c0_i32_1 = arith.constant 0 : i32
    return %c0_i32, %c0_i32_0 : i32, i32
  }
  func.func @transform_11(%arg0: i32) -> (i32, i32, i32) {
    %c0_i32 = arith.constant 0 : i32
    %c0_i32_0 = arith.constant 0 : i32
    %c0_i32_1 = arith.constant 0 : i32
    return %arg0, %c0_i32, %c0_i32_0 : i32, i32, i32
  }
}

module attributes {stable_mosaic.version = 11 : i64} {
  func.func @attn_qkv_kernel(%arg0: i32, %arg1: memref<2x2106xf32, #tpu.memory_space<vmem>>, %arg2: memref<2x26x81xf32, #tpu.memory_space<vmem>>, %arg3: memref<2106x9xf32, #tpu.memory_space<vmem>>, %arg4: memref<1x9xf32, #tpu.memory_space<vmem>>, %arg5: memref<9x81xf32, #tpu.memory_space<vmem>>, %arg6: memref<81x81xf32, #tpu.memory_space<vmem>>, %arg7: memref<81x81xf32, #tpu.memory_space<vmem>>, %arg8: memref<2x26x81xf32, #tpu.memory_space<vmem>>) attributes {dimension_semantics = [#tpu.dimension_semantics<parallel>], iteration_bounds = array<i64: 1>, scalar_prefetch = 0 : i64, scratch_operands = 0 : i64, tpu.core_type = #tpu.core_type<tc>, window_params = [{transform_indices = @transform_0, window_bounds = array<i64: 2, 2106>}, {transform_indices = @transform_1, window_bounds = array<i64: 2, 26, 81>}, {pipeline_mode = #tpu.pipeline_mode<synchronous>, transform_indices = @transform_2, window_bounds = array<i64: 2106, 9>}, {pipeline_mode = #tpu.pipeline_mode<synchronous>, transform_indices = @transform_3, window_bounds = array<i64: 1, 9>}, {pipeline_mode = #tpu.pipeline_mode<synchronous>, transform_indices = @transform_4, window_bounds = array<i64: 9, 81>}, {pipeline_mode = #tpu.pipeline_mode<synchronous>, transform_indices = @transform_5, window_bounds = array<i64: 81, 81>}, {pipeline_mode = #tpu.pipeline_mode<synchronous>, transform_indices = @transform_6, window_bounds = array<i64: 81, 81>}, {transform_indices = @transform_7, window_bounds = array<i64: 2, 26, 81>}]} {
    %c0 = arith.constant 0 : index
    %c0_0 = arith.constant 0 : index
    %0 = vector.load %arg1[%c0, %c0_0] : memref<2x2106xf32, #tpu.memory_space<vmem>>, vector<2x2106xf32>
    %c0_1 = arith.constant 0 : index
    %c0_2 = arith.constant 0 : index
    %1 = vector.load %arg3[%c0_1, %c0_2] : memref<2106x9xf32, #tpu.memory_space<vmem>>, vector<2106x9xf32>
    %cst = arith.constant dense<0.000000e+00> : vector<2x9xf32>
    %2 = tpu.matmul %0, %1, %cst {dimension_numbers = #tpu.dot_dimension_numbers<[1], [0], [0], [1], [0, 0, 1, 1], [], []>} : vector<2x2106xf32>, vector<2106x9xf32>, vector<2x9xf32> -> vector<2x9xf32>
    %c0_3 = arith.constant 0 : index
    %c0_4 = arith.constant 0 : index
    %3 = vector.load %arg4[%c0_3, %c0_4] : memref<1x9xf32, #tpu.memory_space<vmem>>, vector<1x9xf32>
    %4 = vector.broadcast %3 : vector<1x9xf32> to vector<2x9xf32>
    %5 = arith.addf %2, %4 : vector<2x9xf32>
    %cst_5 = arith.constant 0.000000e+00 : f32
    %6 = vector.broadcast %cst_5 : f32 to vector<2x9xf32>
    %7 = arith.maximumf %5, %6 : vector<2x9xf32>
    %cst_6 = arith.constant dense<0xFF800000> : vector<2xf32>
    %8 = vector.multi_reduction <maximumf>, %7, %cst_6 [1] : vector<2x9xf32> to vector<2xf32>
    %9 = vector.shape_cast %8 : vector<2xf32> to vector<2x1xf32>
    %10 = vector.broadcast %9 : vector<2x1xf32> to vector<2x9xf32>
    %11 = arith.subf %7, %10 : vector<2x9xf32>
    %12 = math.exp %11 : vector<2x9xf32>
    %cst_7 = arith.constant dense<0.000000e+00> : vector<2xf32>
    %13 = vector.multi_reduction <add>, %12, %cst_7 [1] : vector<2x9xf32> to vector<2xf32>
    %14 = vector.shape_cast %13 : vector<2xf32> to vector<2x1xf32>
    %15 = tpu.reciprocal %14 {approx = true} : vector<2x1xf32> -> vector<2x1xf32>
    %16 = vector.broadcast %15 : vector<2x1xf32> to vector<2x9xf32>
    %17 = arith.mulf %12, %16 : vector<2x9xf32>
    %cst_8 = arith.constant 2.000000e+00 : f32
    %18 = vector.broadcast %cst_8 : f32 to vector<2x9xf32>
    %19 = arith.addf %17, %18 : vector<2x9xf32>
    %c0_9 = arith.constant 0 : index
    %c0_10 = arith.constant 0 : index
    %20 = vector.load %arg5[%c0_9, %c0_10] : memref<9x81xf32, #tpu.memory_space<vmem>>, vector<9x81xf32>
    %cst_11 = arith.constant dense<0.000000e+00> : vector<2x81xf32>
    %21 = tpu.matmul %19, %20, %cst_11 {dimension_numbers = #tpu.dot_dimension_numbers<[1], [0], [0], [1], [0, 0, 1, 1], [], []>} : vector<2x9xf32>, vector<9x81xf32>, vector<2x81xf32> -> vector<2x81xf32>
    %c0_12 = arith.constant 0 : index
    %c0_13 = arith.constant 0 : index
    %c0_14 = arith.constant 0 : index
    %22 = vector.load %arg2[%c0_12, %c0_13, %c0_14] : memref<2x26x81xf32, #tpu.memory_space<vmem>>, vector<2x26x81xf32>
    %23 = vector.shape_cast %21 : vector<2x81xf32> to vector<2x1x81xf32>
    %24 = vector.broadcast %23 : vector<2x1x81xf32> to vector<2x26x81xf32>
    %25 = arith.mulf %22, %24 : vector<2x26x81xf32>
    %c0_15 = arith.constant 0 : index
    %c0_16 = arith.constant 0 : index
    %26 = vector.load %arg6[%c0_15, %c0_16] : memref<81x81xf32, #tpu.memory_space<vmem>>, vector<81x81xf32>
    %27 = vector.shape_cast %26 : vector<81x81xf32> to vector<1x81x81xf32>
    %28 = vector.broadcast %27 : vector<1x81x81xf32> to vector<2x81x81xf32>
    %cst_17 = arith.constant dense<0.000000e+00> : vector<2x26x81xf32>
    %29 = tpu.matmul %25, %28, %cst_17 {dimension_numbers = #tpu.dot_dimension_numbers<[2], [1], [1], [2], [0, 0, 0, 1, 1, 2], [0], [0]>} : vector<2x26x81xf32>, vector<2x81x81xf32>, vector<2x26x81xf32> -> vector<2x26x81xf32>
    %cst_18 = arith.constant dense<0.000000e+00> : vector<2x26x26xf32>
    %30 = tpu.matmul %29, %25, %cst_18 {dimension_numbers = #tpu.dot_dimension_numbers<[2], [2], [1], [1], [0, 0, 0, 1, 1, 1], [0], [0]>} : vector<2x26x81xf32>, vector<2x26x81xf32>, vector<2x26x26xf32> -> vector<2x26x26xf32>
    %cst_19 = arith.constant dense<0xFF800000> : vector<2x26xf32>
    %31 = vector.multi_reduction <maximumf>, %30, %cst_19 [2] : vector<2x26x26xf32> to vector<2x26xf32>
    %32 = vector.shape_cast %31 : vector<2x26xf32> to vector<2x26x1xf32>
    %33 = vector.broadcast %32 : vector<2x26x1xf32> to vector<2x26x26xf32>
    %34 = arith.subf %30, %33 : vector<2x26x26xf32>
    %35 = math.exp %34 : vector<2x26x26xf32>
    %cst_20 = arith.constant dense<0.000000e+00> : vector<2x26xf32>
    %36 = vector.multi_reduction <add>, %35, %cst_20 [2] : vector<2x26x26xf32> to vector<2x26xf32>
    %37 = vector.shape_cast %36 : vector<2x26xf32> to vector<2x26x1xf32>
    %38 = tpu.reciprocal %37 {approx = true} : vector<2x26x1xf32> -> vector<2x26x1xf32>
    %39 = vector.broadcast %38 : vector<2x26x1xf32> to vector<2x26x26xf32>
    %40 = arith.mulf %35, %39 : vector<2x26x26xf32>
    %cst_21 = arith.constant dense<0.000000e+00> : vector<2x26x81xf32>
    %41 = tpu.matmul %40, %25, %cst_21 {dimension_numbers = #tpu.dot_dimension_numbers<[2], [1], [1], [2], [0, 0, 0, 1, 1, 2], [0], [0]>} : vector<2x26x26xf32>, vector<2x26x81xf32>, vector<2x26x81xf32> -> vector<2x26x81xf32>
    %c0_22 = arith.constant 0 : index
    %c0_23 = arith.constant 0 : index
    %42 = vector.load %arg7[%c0_22, %c0_23] : memref<81x81xf32, #tpu.memory_space<vmem>>, vector<81x81xf32>
    %43 = vector.shape_cast %42 : vector<81x81xf32> to vector<1x81x81xf32>
    %44 = vector.broadcast %43 : vector<1x81x81xf32> to vector<2x81x81xf32>
    %cst_24 = arith.constant dense<0.000000e+00> : vector<2x26x81xf32>
    %45 = tpu.matmul %41, %44, %cst_24 {dimension_numbers = #tpu.dot_dimension_numbers<[2], [1], [1], [2], [0, 0, 0, 1, 1, 2], [0], [0]>} : vector<2x26x81xf32>, vector<2x81x81xf32>, vector<2x26x81xf32> -> vector<2x26x81xf32>
    %c0_25 = arith.constant 0 : index
    %c0_26 = arith.constant 0 : index
    %c0_27 = arith.constant 0 : index
    %46 = vector.load %arg8[%c0_25, %c0_26, %c0_27] : memref<2x26x81xf32, #tpu.memory_space<vmem>>, vector<2x26x81xf32>
    tpu.vector_store %arg8[%c0_25, %c0_26, %c0_27], %45 {strides = array<i32>} : memref<2x26x81xf32, #tpu.memory_space<vmem>>, vector<2x26x81xf32>,
    return
  }
  func.func @transform_0(%arg0: i32) -> (i32, i32) {
    %c0_i32 = arith.constant 0 : i32
    %c0_i32_0 = arith.constant 0 : i32
    return %arg0, %c0_i32 : i32, i32
  }
  func.func @transform_1(%arg0: i32) -> (i32, i32, i32) {
    %c0_i32 = arith.constant 0 : i32
    %c0_i32_0 = arith.constant 0 : i32
    %c0_i32_1 = arith.constant 0 : i32
    return %arg0, %c0_i32, %c0_i32_0 : i32, i32, i32
  }
  func.func @transform_2(%arg0: i32) -> (i32, i32) {
    %c0_i32 = arith.constant 0 : i32
    %c0_i32_0 = arith.constant 0 : i32
    %c0_i32_1 = arith.constant 0 : i32
    return %c0_i32, %c0_i32_0 : i32, i32
  }
  func.func @transform_3(%arg0: i32) -> (i32, i32) {
    %c0_i32 = arith.constant 0 : i32
    %c0_i32_0 = arith.constant 0 : i32
    %c0_i32_1 = arith.constant 0 : i32
    return %c0_i32, %c0_i32_0 : i32, i32
  }
  func.func @transform_4(%arg0: i32) -> (i32, i32) {
    %c0_i32 = arith.constant 0 : i32
    %c0_i32_0 = arith.constant 0 : i32
    %c0_i32_1 = arith.constant 0 : i32
    return %c0_i32, %c0_i32_0 : i32, i32
  }
  func.func @transform_5(%arg0: i32) -> (i32, i32) {
    %c0_i32 = arith.constant 0 : i32
    %c0_i32_0 = arith.constant 0 : i32
    %c0_i32_1 = arith.constant 0 : i32
    return %c0_i32, %c0_i32_0 : i32, i32
  }
  func.func @transform_6(%arg0: i32) -> (i32, i32) {
    %c0_i32 = arith.constant 0 : i32
    %c0_i32_0 = arith.constant 0 : i32
    %c0_i32_1 = arith.constant 0 : i32
    return %c0_i32, %c0_i32_0 : i32, i32
  }
  func.func @transform_7(%arg0: i32) -> (i32, i32, i32) {
    %c0_i32 = arith.constant 0 : i32
    %c0_i32_0 = arith.constant 0 : i32
    %c0_i32_1 = arith.constant 0 : i32
    return %arg0, %c0_i32, %c0_i32_0 : i32, i32, i32
  }
}

module attributes {stable_mosaic.version = 11 : i64} {
  func.func @mlp_kernel(%arg0: i32, %arg1: i32, %arg2: memref<2x3200xf32, #tpu.memory_space<vmem>>, %arg3: memref<3200x800xbf16, #tpu.memory_space<vmem>>, %arg4: memref<1x800xf32, #tpu.memory_space<vmem>>, %arg5: memref<800x100xf32, #tpu.memory_space<vmem>>, %arg6: memref<1x100xf32, #tpu.memory_space<vmem>>, %arg7: memref<100x128xf32, #tpu.memory_space<vmem>>, %arg8: memref<1x128xf32, #tpu.memory_space<vmem>>, %arg9: memref<2x128xf32, #tpu.memory_space<vmem>>, %arg10: memref<2x800xf32, #tpu.memory_space<vmem>>) attributes {dimension_semantics = [#tpu.dimension_semantics<parallel>, #tpu.dimension_semantics<arbitrary>], iteration_bounds = array<i64: 1, 2>, scalar_prefetch = 0 : i64, scratch_operands = 1 : i64, tpu.core_type = #tpu.core_type<tc>, window_params = [{transform_indices = @transform_0, window_bounds = array<i64: 2, 3200>}, {transform_indices = @transform_1, window_bounds = array<i64: 3200, 800>}, {pipeline_mode = #tpu.pipeline_mode<synchronous>, transform_indices = @transform_2, window_bounds = array<i64: 1, 800>}, {pipeline_mode = #tpu.pipeline_mode<synchronous>, transform_indices = @transform_3, window_bounds = array<i64: 800, 100>}, {pipeline_mode = #tpu.pipeline_mode<synchronous>, transform_indices = @transform_4, window_bounds = array<i64: 1, 100>}, {pipeline_mode = #tpu.pipeline_mode<synchronous>, transform_indices = @transform_5, window_bounds = array<i64: 100, 128>}, {pipeline_mode = #tpu.pipeline_mode<synchronous>, transform_indices = @transform_6, window_bounds = array<i64: 1, 128>}, {transform_indices = @transform_7, window_bounds = array<i64: 2, 128>}]} {
    %c0_i32 = arith.constant 0 : i32
    %0 = arith.cmpi eq, %arg1, %c0_i32 : i32
    %1 = arith.extui %0 : i1 to i32
    %c0_i32_0 = arith.constant 0 : i32
    %2 = arith.cmpi ne, %1, %c0_i32_0 : i32
    scf.if %2 {
      %cst_9 = arith.constant 0.000000e+00 : f32
      %13 = vector.broadcast %cst_9 : f32 to vector<2x800xf32>
      %c0_10 = arith.constant 0 : index
      %c0_11 = arith.constant 0 : index
      %14 = vector.load %arg10[%c0_10, %c0_11] : memref<2x800xf32, #tpu.memory_space<vmem>>, vector<2x800xf32>
      tpu.vector_store %arg10[%c0_10, %c0_11], %13 {strides = array<i32>} : memref<2x800xf32, #tpu.memory_space<vmem>>, vector<2x800xf32>,
    } else {
    }
    %c0 = arith.constant 0 : index
    %c0_1 = arith.constant 0 : index
    %3 = vector.load %arg10[%c0, %c0_1] : memref<2x800xf32, #tpu.memory_space<vmem>>, vector<2x800xf32>
    %c0_2 = arith.constant 0 : index
    %c0_3 = arith.constant 0 : index
    %4 = vector.load %arg2[%c0_2, %c0_3] : memref<2x3200xf32, #tpu.memory_space<vmem>>, vector<2x3200xf32>
    %5 = arith.truncf %4 : vector<2x3200xf32> to vector<2x3200xbf16>
    %c0_4 = arith.constant 0 : index
    %c0_5 = arith.constant 0 : index
    %6 = vector.load %arg3[%c0_4, %c0_5] : memref<3200x800xbf16, #tpu.memory_space<vmem>>, vector<3200x800xbf16>
    %cst = arith.constant dense<0.000000e+00> : vector<2x800xf32>
    %7 = tpu.matmul %5, %6, %cst {dimension_numbers = #tpu.dot_dimension_numbers<[1], [0], [0], [1], [0, 0, 1, 1], [], []>} : vector<2x3200xbf16>, vector<3200x800xbf16>, vector<2x800xf32> -> vector<2x800xf32>
    %8 = arith.addf %3, %7 : vector<2x800xf32>
    %c0_6 = arith.constant 0 : index
    %c0_7 = arith.constant 0 : index
    %9 = vector.load %arg10[%c0_6, %c0_7] : memref<2x800xf32, #tpu.memory_space<vmem>>, vector<2x800xf32>
    tpu.vector_store %arg10[%c0_6, %c0_7], %8 {strides = array<i32>} : memref<2x800xf32, #tpu.memory_space<vmem>>, vector<2x800xf32>,
    %c1_i32 = arith.constant 1 : i32
    %10 = arith.cmpi eq, %arg1, %c1_i32 : i32
    %11 = arith.extui %10 : i1 to i32
    %c0_i32_8 = arith.constant 0 : i32
    %12 = arith.cmpi ne, %11, %c0_i32_8 : i32
    scf.if %12 {
      %c0_9 = arith.constant 0 : index
      %c0_10 = arith.constant 0 : index
      %13 = vector.load %arg10[%c0_9, %c0_10] : memref<2x800xf32, #tpu.memory_space<vmem>>, vector<2x800xf32>
      %c0_11 = arith.constant 0 : index
      %c0_12 = arith.constant 0 : index
      %14 = vector.load %arg4[%c0_11, %c0_12] : memref<1x800xf32, #tpu.memory_space<vmem>>, vector<1x800xf32>
      %15 = vector.broadcast %14 : vector<1x800xf32> to vector<2x800xf32>
      %16 = arith.addf %13, %15 : vector<2x800xf32>
      %cst_13 = arith.constant 0.000000e+00 : f32
      %17 = vector.broadcast %cst_13 : f32 to vector<2x800xf32>
      %18 = arith.maximumf %16, %17 : vector<2x800xf32>
      %c0_14 = arith.constant 0 : index
      %c0_15 = arith.constant 0 : index
      %19 = vector.load %arg5[%c0_14, %c0_15] : memref<800x100xf32, #tpu.memory_space<vmem>>, vector<800x100xf32>
      %cst_16 = arith.constant dense<0.000000e+00> : vector<2x100xf32>
      %20 = tpu.matmul %18, %19, %cst_16 {dimension_numbers = #tpu.dot_dimension_numbers<[1], [0], [0], [1], [0, 0, 1, 1], [], []>} : vector<2x800xf32>, vector<800x100xf32>, vector<2x100xf32> -> vector<2x100xf32>
      %c0_17 = arith.constant 0 : index
      %c0_18 = arith.constant 0 : index
      %21 = vector.load %arg6[%c0_17, %c0_18] : memref<1x100xf32, #tpu.memory_space<vmem>>, vector<1x100xf32>
      %22 = vector.broadcast %21 : vector<1x100xf32> to vector<2x100xf32>
      %23 = arith.addf %20, %22 : vector<2x100xf32>
      %cst_19 = arith.constant 0.000000e+00 : f32
      %24 = vector.broadcast %cst_19 : f32 to vector<2x100xf32>
      %25 = arith.maximumf %23, %24 : vector<2x100xf32>
      %c0_20 = arith.constant 0 : index
      %c0_21 = arith.constant 0 : index
      %26 = vector.load %arg7[%c0_20, %c0_21] : memref<100x128xf32, #tpu.memory_space<vmem>>, vector<100x128xf32>
      %cst_22 = arith.constant dense<0.000000e+00> : vector<2x128xf32>
      %27 = tpu.matmul %25, %26, %cst_22 {dimension_numbers = #tpu.dot_dimension_numbers<[1], [0], [0], [1], [0, 0, 1, 1], [], []>} : vector<2x100xf32>, vector<100x128xf32>, vector<2x128xf32> -> vector<2x128xf32>
      %c0_23 = arith.constant 0 : index
      %c0_24 = arith.constant 0 : index
      %28 = vector.load %arg8[%c0_23, %c0_24] : memref<1x128xf32, #tpu.memory_space<vmem>>, vector<1x128xf32>
      %29 = vector.broadcast %28 : vector<1x128xf32> to vector<2x128xf32>
      %30 = arith.addf %27, %29 : vector<2x128xf32>
      %c0_25 = arith.constant 0 : index
      %c0_26 = arith.constant 0 : index
      %31 = vector.load %arg9[%c0_25, %c0_26] : memref<2x128xf32, #tpu.memory_space<vmem>>, vector<2x128xf32>
      tpu.vector_store %arg9[%c0_25, %c0_26], %30 {strides = array<i32>} : memref<2x128xf32, #tpu.memory_space<vmem>>, vector<2x128xf32>,
    } else {
    }
    return
  }
  func.func @transform_0(%arg0: i32, %arg1: i32) -> (i32, i32) {
    %c0_i32 = arith.constant 0 : i32
    return %arg0, %arg1 : i32, i32
  }
  func.func @transform_1(%arg0: i32, %arg1: i32) -> (i32, i32) {
    %c0_i32 = arith.constant 0 : i32
    %c0_i32_0 = arith.constant 0 : i32
    return %arg1, %c0_i32 : i32, i32
  }
  func.func @transform_2(%arg0: i32, %arg1: i32) -> (i32, i32) {
    %c0_i32 = arith.constant 0 : i32
    %c0_i32_0 = arith.constant 0 : i32
    %c0_i32_1 = arith.constant 0 : i32
    return %c0_i32, %c0_i32_0 : i32, i32
  }
  func.func @transform_3(%arg0: i32, %arg1: i32) -> (i32, i32) {
    %c0_i32 = arith.constant 0 : i32
    %c0_i32_0 = arith.constant 0 : i32
    %c0_i32_1 = arith.constant 0 : i32
    return %c0_i32, %c0_i32_0 : i32, i32
  }
  func.func @transform_4(%arg0: i32, %arg1: i32) -> (i32, i32) {
    %c0_i32 = arith.constant 0 : i32
    %c0_i32_0 = arith.constant 0 : i32
    %c0_i32_1 = arith.constant 0 : i32
    return %c0_i32, %c0_i32_0 : i32, i32
  }
  func.func @transform_5(%arg0: i32, %arg1: i32) -> (i32, i32) {
    %c0_i32 = arith.constant 0 : i32
    %c0_i32_0 = arith.constant 0 : i32
    %c0_i32_1 = arith.constant 0 : i32
    return %c0_i32, %c0_i32_0 : i32, i32
  }
  func.func @transform_6(%arg0: i32, %arg1: i32) -> (i32, i32) {
    %c0_i32 = arith.constant 0 : i32
    %c0_i32_0 = arith.constant 0 : i32
    %c0_i32_1 = arith.constant 0 : i32
    return %c0_i32, %c0_i32_0 : i32, i32
  }
  func.func @transform_7(%arg0: i32, %arg1: i32) -> (i32, i32) {
    %c0_i32 = arith.constant 0 : i32
    %c0_i32_0 = arith.constant 0 : i32
    return %arg0, %c0_i32 : i32, i32
  }
}

</mosaic_0001>

<bundles_post_ra>
// kernel: custom-call.17
= control target key start
LH: loop header
LB: loop body
LE: loop exit
PB: predicated region body
PF: predicated region fallthrough
CT: control target
= control target key end

     0   :  { %s6_s0 = inlined_call_operand.vmem [shape: f32[2,234,9], index: 0, kind: output, shape index: {}]  }

// kernel: custom-call.16
= control target key start
LH: loop header
LB: loop body
LE: loop exit
PB: predicated region body
PF: predicated region fallthrough
CT: control target
= control target key end

     0   :  { %s6_s0 = inlined_call_operand.vmem [shape: bf16[2,234,9], index: 0, kind: output, shape index: {}]  }

// kernel: custom-call.18
= control target key start
LH: loop header
LB: loop body
LE: loop exit
PB: predicated region body
PF: predicated region fallthrough
CT: control target
= control target key end

     0   :  { %s6_s0 = inlined_call_operand.vmem [shape: f32[2,2,234,9], index: 0, kind: output, shape index: {}]  }

// kernel: forward.3
= control target key start
LH: loop header
LB: loop body
LE: loop exit
PB: predicated region body
PF: predicated region fallthrough
CT: control target
= control target key end

     0   :  { %16 = vsyncpa [#allocation3], 0  ;;  %s2572_s0 = inlined_call_operand.vmem [shape: f32[2,26,81], index: 0, kind: input, shape index: {}]   ;;  %s2573_s1 = inlined_call_operand.hbm [shape: f32[26,81], index: 1, kind: input, shape index: {}]   ;;  %s2574_s2 = inlined_call_operand.hbm [shape: f32[26,81], index: 2, kind: input, shape index: {}]   ;;  %s2575_s3 = inlined_call_operand.hbm [shape: f32[26,26], index: 3, kind: input, shape index: {}]   ;;  %s2576_s4 = inlined_call_operand.hbm [shape: f32[26,26], index: 4, kind: input, shape index: {}]   ;;  %s2577_s5 = inlined_call_operand.vmem [shape: f32[26,1], index: 5, kind: input, shape index: {}]   ;;  %s2578_s6 = inlined_call_operand.vmem [shape: f32[26,1], index: 6, kind: input, shape index: {}]   ;;  %s2579_s7 = inlined_call_operand.vmem [shape: f32[81,9], index: 7, kind: input, shape index: {}]   ;;  %s2580_s8 = inlined_call_operand.vmem [shape: f32[81,9], index: 8, kind: input, shape index: {}]   ;;  %s2581_s9 = inlined_call_operand.hbm [shape: f32[9,81], index: 9, kind: input, shape index: {}]   ;;  %s2582_s10 = inlined_call_operand.hbm [shape: f32[9,81], index: 10, kind: input, shape index: {}]   ;;  %s2583_s11 = inlined_call_operand.vmem [shape: f32[2,26,81], index: 11, kind: output, shape index: {}]  }
   0x1   :  { %17 = vsyncpa [#allocation5], 0 }
   0x2   :  { %18 = vsyncpa [#allocation8], 0 }
   0x3   :  { %19 = vsyncpa [#allocation11], 0  ;;  %s2124_s17 = smov [#allocation4]   ;;  %s2125_s19 = smov [#allocation7]  }
   0x4   :  { %s39_s18 = sshll.u32 %s2124_s17, 4  ;;  %s63_s20 = sshll.u32 %s2125_s19, 4  ;;  %s40_s18 = int_to_ptr.vmem [resolvable:$true] %s39_s18  ;;  %s2194_s20 = int_to_ptr.vmem [resolvable:$true] %s63_s20 }
   0x5   :  { %s1984_s23 = scalar_lea.hbm %s2574_s2, 512 }
   0x6   :  { %p1985_p0 = scmp.ne.s32.totalorder %s2574_s2, %s1984_s23  ;;  %p1988_p1 = scmp.lt.u32.totalorder %s1984_s23, %s2574_s2 }
   0x8   :  { %p1990_p2 = pnand %p1988_p1, %p1985_p0 }
   0xa   :  { %1993 = shalt.err (!%p1990_p2)
}
   0xb   :  { %s1994_s28 = scalar_lea.vmem %s40_s18, 512  ;;  %p1999_p4 = scmp.lt.s32.totalorder %s40_s18, %s40_s18 }
   0xc   :  { %p1995_p3 = scmp.ne.s32.totalorder %s40_s18, %s1994_s28  ;;  %p2000_p5 = scmp.lt.s32.totalorder %s1994_s28, %s1994_s28 }
   0xe   :  { %p2001_p6 = por %p2000_p5, %p1999_p4 }
  0x10   :  { %p2002_p7 = pnand %p2001_p6, %p1995_p3 }
  0x12   :  { %2005 = shalt.err (!%p2002_p7)
}
  0x13   :  { %s2126_s29 = smov 128   ;;  %s2127_s30 = smov 8  }
  0x14   :  { %45 = dma.hbm_to_vmem [thread:$0]  %s2574_s2, 512, %s40_s18, [#allocation5], %s2126_s29, %s2126_s29, %s2127_s30  }
  0x15   :  { %s2006_s16 = scalar_lea.hbm %s2576_s4, 512 }
  0x16   :  { %p2007_p8 = scmp.ne.s32.totalorder %s2576_s4, %s2006_s16  ;;  %p2010_p9 = scmp.lt.u32.totalorder %s2006_s16, %s2576_s4 }
  0x18   :  { %p2012_p10 = pnand %p2010_p9, %p2007_p8 }
  0x1a   :  { %2015 = shalt.err (!%p2012_p10)
}
  0x1b   :  { %s2016_s23 = scalar_lea.vmem %s2194_s20, 512  ;;  %p2021_p12 = scmp.lt.s32.totalorder %s2194_s20, %s2194_s20 }
  0x1c   :  { %p2017_p11 = scmp.ne.s32.totalorder %s2194_s20, %s2016_s23  ;;  %p2022_p13 = scmp.lt.s32.totalorder %s2016_s23, %s2016_s23 }
  0x1e   :  { %p2023_p0 = por %p2022_p13, %p2021_p12 }
  0x20   :  { %p2024_p1 = pnand %p2023_p0, %p2017_p11 }
  0x22   :  { %2027 = shalt.err (!%p2024_p1)
}
  0x23   :  { %69 = dma.hbm_to_vmem [thread:$0]  %s2576_s4, 512, %s2194_s20, [#allocation8], %s2126_s29, %s2126_s29, %s2127_s30  }
  0x24   :  { %s2128_s24 = smov [#allocation2]   ;;  %s2129_s26 = smov [#allocation6]  }
  0x25   :  { %s27_s25 = sshll.u32 %s2128_s24, 4  ;;  %s51_s27 = sshll.u32 %s2129_s26, 4  ;;  %s28_s25 = int_to_ptr.vmem [resolvable:$true] %s27_s25  ;;  %s2231_s27 = int_to_ptr.vmem [resolvable:$true] %s51_s27 }
  0x26   :  { %s2028_s13 = scalar_lea.hbm %s2573_s1, 512 }
  0x27   :  { %p2029_p2 = scmp.ne.s32.totalorder %s2573_s1, %s2028_s13  ;;  %p2032_p3 = scmp.lt.u32.totalorder %s2028_s13, %s2573_s1 }
  0x29   :  { %p2034_p4 = pnand %p2032_p3, %p2029_p2 }
  0x2b   :  { %2037 = shalt.err (!%p2034_p4)
}
  0x2c   :  { %s2038_s4 = scalar_lea.vmem %s28_s25, 512  ;;  %p2043_p6 = scmp.lt.s32.totalorder %s28_s25, %s28_s25 }
  0x2d   :  { %p2039_p5 = scmp.ne.s32.totalorder %s28_s25, %s2038_s4  ;;  %p2044_p7 = scmp.lt.s32.totalorder %s2038_s4, %s2038_s4 }
  0x2f   :  { %p2045_p8 = por %p2044_p7, %p2043_p6 }
  0x31   :  { %p2046_p9 = pnand %p2045_p8, %p2039_p5 }
  0x33   :  { %2049 = shalt.err (!%p2046_p9)
}
  0x34   :  { %33 = dma.hbm_to_vmem [thread:$0]  %s2573_s1, 512, %s28_s25, [#allocation3], %s2126_s29, %s2126_s29, %s2127_s30  }
  0x35   :  { %s2050_s23 = scalar_lea.hbm %s2575_s3, 512 }
  0x36   :  { %p2051_p10 = scmp.ne.s32.totalorder %s2575_s3, %s2050_s23  ;;  %p2054_p11 = scmp.lt.u32.totalorder %s2050_s23, %s2575_s3 }
  0x38   :  { %p2056_p12 = pnand %p2054_p11, %p2051_p10 }
  0x3a   :  { %2059 = shalt.err (!%p2056_p12)
}
  0x3b   :  { %s2060_s28 = scalar_lea.vmem %s2231_s27, 512  ;;  %p2065_p0 = scmp.lt.s32.totalorder %s2231_s27, %s2231_s27 }
  0x3c   :  { %p2061_p13 = scmp.ne.s32.totalorder %s2231_s27, %s2060_s28  ;;  %p2066_p1 = scmp.lt.s32.totalorder %s2060_s28, %s2060_s28 }
  0x3e   :  { %p2067_p2 = por %p2066_p1, %p2065_p0 }
  0x40   :  { %p2068_p3 = pnand %p2067_p2, %p2061_p13 }
  0x42   :  { %2071 = shalt.err (!%p2068_p3)
}
  0x43   :  { %57 = dma.hbm_to_vmem [thread:$0]  %s2575_s3, 512, %s2231_s27, [#allocation5], %s2126_s29, %s2126_s29, %s2127_s30  }
  0x44   :  { %s2130_s12 = smov [#allocation9]   ;;  %s2131_s14 = smov [#allocation10]  }
  0x45   :  { %s83_s13 = sshll.u32 %s2130_s12, 4  ;;  %s95_s15 = sshll.u32 %s2131_s14, 4  ;;  %s84_s13 = int_to_ptr.vmem [resolvable:$true] %s83_s13  ;;  %s2268_s15 = int_to_ptr.vmem [resolvable:$true] %s95_s15 }
  0x46   :  { %s2072_s4 = scalar_lea.hbm %s2581_s9, 256 }
  0x47   :  { %p2073_p4 = scmp.ne.s32.totalorder %s2581_s9, %s2072_s4  ;;  %p2076_p5 = scmp.lt.u32.totalorder %s2072_s4, %s2581_s9 }
  0x49   :  { %p2078_p6 = pnand %p2076_p5, %p2073_p4 }
  0x4b   :  { %2081 = shalt.err (!%p2078_p6)
}
  0x4c   :  { %s2082_s3 = scalar_lea.vmem %s84_s13, 256  ;;  %p2087_p8 = scmp.lt.s32.totalorder %s84_s13, %s84_s13 }
  0x4d   :  { %p2083_p7 = scmp.ne.s32.totalorder %s84_s13, %s2082_s3  ;;  %p2088_p9 = scmp.lt.s32.totalorder %s2082_s3, %s2082_s3 }
  0x4f   :  { %p2089_p10 = por %p2088_p9, %p2087_p8 }
  0x51   :  { %p2090_p11 = pnand %p2089_p10, %p2083_p7 }
  0x53   :  { %2093 = shalt.err (!%p2090_p11)
}
  0x54   :  { %89 = dma.hbm_to_vmem [thread:$0]  %s2581_s9, 256, %s84_s13, [#allocation8], %s2126_s29, %s2126_s29, %s2127_s30  }
  0x55   :  { %s2094_s24 = scalar_lea.hbm %s2582_s10, 256 }
  0x56   :  { %p2095_p12 = scmp.ne.s32.totalorder %s2582_s10, %s2094_s24  ;;  %p2098_p13 = scmp.lt.u32.totalorder %s2094_s24, %s2582_s10 }
  0x58   :  { %p2100_p0 = pnand %p2098_p13, %p2095_p12 }
  0x5a   :  { %2103 = shalt.err (!%p2100_p0)
}
  0x5b   :  { %s2104_s12 = scalar_lea.vmem %s2268_s15, 256  ;;  %p2109_p2 = scmp.lt.s32.totalorder %s2268_s15, %s2268_s15 }
  0x5c   :  { %p2105_p1 = scmp.ne.s32.totalorder %s2268_s15, %s2104_s12  ;;  %p2110_p3 = scmp.lt.s32.totalorder %s2104_s12, %s2104_s12 }
  0x5e   :  { %p2111_p4 = por %p2110_p3, %p2109_p2 }
  0x60   :  { %p2112_p5 = pnand %p2111_p4, %p2105_p1 }
  0x62   :  { %2115 = shalt.err (!%p2112_p5)
}
  0x63   :  { %101 = dma.hbm_to_vmem [thread:$0]  %s2582_s10, 256, %s2268_s15, [#allocation11], %s2126_s29, %s2126_s29, %s2127_s30  }
  0x64   :  { %2116 = dma.done.wait [#allocation3], 512  }
  0x65   :  { %2117 = vsyncadd [#allocation3], 4294966784 }
  0x66   :  { %2118 = dma.done.wait [#allocation5], 1024  }
  0x67   :  { %2119 = vsyncadd [#allocation5], 4294966272 }
  0x68   :  { %2120 = dma.done.wait [#allocation8], 768  }
  0x69   :  { %2121 = vsyncadd [#allocation8], 4294966528 }
  0x6a   :  { %2122 = dma.done.wait [#allocation11], 256  }
  0x6b   :  { %2123 = vsyncadd [#allocation11], 4294967040  ;;  %v128_v0 = vld [vmem:[%s2579_s7] sm:$0xff]  ;;  %v129_v1 = vld [vmem:[%s2579_s7 + $0x8] sm:$0xff]  ;;  %vm162_vm0 = vcmask 662528   ;;  %vm175_vm1 = vcmask 1040384  }
  0x6c   :  { %v130_v2 = vld [vmem:[%s2579_s7 + $0x10] sm:$0xff]  ;;  %v1828_v3 = vpack.c.bf16 %v129_v1, %v128_v0  ;;  %v131_v4 = vld [vmem:[%s2579_s7 + $0x18] sm:$0xff]  ;;  %v132_v6 = vld [vmem:[%s2579_s7 + $0x20] sm:$0xff]  ;;  %vm602_vm2 = vcmask 211968   ;;  %vm615_vm3 = vcmask 1041408   ;;  %vm2133_vm4 = vmmov 1  }
  0x6d   :  { %v1832_v5 = vpack.c.bf16 %v131_v4, %v130_v2  ;;  %v133_v7 = vld [vmem:[%s2579_s7 + $0x28] sm:$0xff]  ;;  %v2326_v8 = vld [vmem:[%s2572_s0] sm:$0xff]  ;;  %v134_v14 = vld [vmem:[%s2579_s7 + $0x30] sm:$0xff]  ;;  %vm1024_vm7 = vcmask 72704   ;;  %vm1430_vm8 = vcmask 656384  }
  0x6e   :  { %1829 = vmatprep.subr.bf16.mxu0 %v1828_v3  ;;  %1849 = vmatprep.subr.bf16.mxu1 %v1828_v3  ;;  %v150_v9 = vld [vmem:[#allocation2] sm:$0xff]  ;;  %v1836_v11 = vpack.c.bf16 %v133_v7, %v132_v6  ;;  %v135_v15 = vld [vmem:[%s2579_s7 + $0x38] sm:$0xff]  ;;  %v137_v18 = vld [vmem:[%s2579_s7 + $0x48] sm:$0xff] }
  0x6f   :  { %1831 = vmatpush3.bf16.msra.mxu0 %v1828_v3  ;;  %1851 = vmatpush3.bf16.msra.mxu1 %v1828_v3  ;;  %v2331_v10 = vld [vmem:[%s2572_s0 + $0x20] sm:$0xff]  ;;  %v154_v12 = vmul.f32 %v150_v9, %v2326_v8  ;;  %v1840_v16 = vpack.c.bf16 %v135_v15, %v134_v14  ;;  %v138_v20 = vld [vmem:[%s2579_s7 + $0x50] sm:$0x1]  ;;  %v2355_v21 = vld [vmem:[%s2572_s0 + $0x8] sm:$0xff]  ;;  %v2132_v3 = vmov 0  }
  0x70   :  { %1833 = vmatprep.subr.bf16.mxu0 %v1832_v5  ;;  %1853 = vmatprep.subr.bf16.mxu1 %v1832_v5  ;;  %v158_v13 = vmul.f32 %v150_v9, %v2331_v10  ;;  %v136_v17 = vld [vmem:[%s2579_s7 + $0x40] sm:$0xff]  ;;  %v151_v22 = vld [vmem:[#allocation2 + $0x8] sm:$0xff]  ;;  %v141_v28 = vld [vmem:[%s2580_s8 + $0x10] sm:$0xff] }
  0x71   :  { %1642 = vmatprep.mubr.msk.f32.mxu0 %vm162_vm0, %v154_v12  ;;  %v1844_v19 = vpack.c.bf16 %v137_v18, %v136_v17  ;;  %v2360_v23 = vld [vmem:[%s2572_s0 + $0x28] sm:$0xff]  ;;  %v139_v24 = vld [vmem:[%s2580_s8] sm:$0xff]  ;;  %v155_v26 = vmul.f32 %v151_v22, %v2355_v21  ;;  %v142_v29 = vld [vmem:[%s2580_s8 + $0x18] sm:$0xff]  ;;  %1982 = vset.pattern.permute.xlu0 %v2132_v3 }
  0x72   :  { %1670 = vmatprep.mubr.msk.f32.mxu1 %vm162_vm0, %v158_v13  ;;  %v140_v25 = vld [vmem:[%s2580_s8 + $0x8] sm:$0xff]  ;;  %v159_v27 = vmul.f32 %v151_v22, %v2360_v23  ;;  %v122_v31 = vld [vmem:[%s2572_s0 + $0x10] sm:$0xff]  ;;  %v2387_v34 = vld [vmem:[%s2572_s0 + $0x18] sm:$0x3]  ;;  %v1872_v37 = vpack.c.bf16 %v142_v29, %v141_v28  ;;  %1983 = vset.pattern.permute.xlu1 %v2132_v3 }
  0x73   :  { %1835 = vmatpush3.bf16.msra.mxu0 %v1832_v5  ;;  %1855 = vmatpush3.bf16.msra.mxu1 %v1832_v5  ;;  %v1868_v30 = vpack.c.bf16 %v140_v25, %v139_v24  ;;  %v152_v32 = vld [vmem:[#allocation2 + $0x10] sm:$0xff]  ;;  %v153_v35 = vld [vmem:[#allocation2 + $0x18] sm:$0x3]  ;;  %v143_v38 = vld [vmem:[%s2580_s8 + $0x20] sm:$0xff] }
  0x74   :  { %1837 = vmatprep.subr.bf16.mxu0 %v1836_v11  ;;  %1857 = vmatprep.subr.bf16.mxu1 %v1836_v11  ;;  %v126_v33 = vld [vmem:[%s2572_s0 + $0x30] sm:$0xff]  ;;  %v2392_v36 = vld [vmem:[%s2572_s0 + $0x38] sm:$0x3]  ;;  %v144_v39 = vld [vmem:[%s2580_s8 + $0x28] sm:$0xff]  ;;  %v156_v40 = vmul.f32 %v152_v32, %v122_v31  ;;  %v157_v43 = vmul.f32 %v153_v35, %v2387_v34 }
  0x75   :  { %v160_v41 = vmul.f32 %v152_v32, %v126_v33  ;;  %v361_v42 = vld [vmem:[#allocation4] sm:$0xff]  ;;  %v161_v44 = vmul.f32 %v153_v35, %v2392_v36  ;;  %v1876_v45 = vpack.c.bf16 %v144_v39, %v143_v38  ;;  %v145_v48 = vld [vmem:[%s2580_s8 + $0x30] sm:$0xff]  ;;  %v146_v49 = vld [vmem:[%s2580_s8 + $0x38] sm:$0xff] }
  0x76   :  { %v365_v46 = vmul.f32 %v361_v42, %v2326_v8  ;;  %v369_v47 = vmul.f32 %v361_v42, %v2331_v10  ;;  %v1880_v50 = vpack.c.bf16 %v146_v49, %v145_v48  ;;  %v147_v51 = vld [vmem:[%s2580_s8 + $0x40] sm:$0xff]  ;;  %v148_v52 = vld [vmem:[%s2580_s8 + $0x48] sm:$0xff]  ;;  %v149_v55 = vld [vmem:[%s2580_s8 + $0x50] sm:$0x1] }
  0x77   :  { %1839 = vmatpush3.bf16.msra.mxu0 %v1836_v11  ;;  %1859 = vmatpush3.bf16.msra.mxu1 %v1836_v11  ;;  %v1884_v53 = vpack.c.bf16 %v148_v52, %v147_v51  ;;  %v362_v54 = vld [vmem:[#allocation4 + $0x8] sm:$0xff]  ;;  %v363_v56 = vld [vmem:[#allocation4 + $0x10] sm:$0xff]  ;;  %v364_v61 = vld [vmem:[#allocation4 + $0x18] sm:$0x3] }
  0x78   :  { %1841 = vmatprep.subr.bf16.mxu0 %v1840_v16  ;;  %1861 = vmatprep.subr.bf16.mxu1 %v1840_v16  ;;  %v366_v57 = vmul.f32 %v362_v54, %v2355_v21  ;;  %v370_v58 = vmul.f32 %v362_v54, %v2360_v23  ;;  %v367_v59 = vmul.f32 %v363_v56, %v122_v31  ;;  %v570_v0 = vld [vmem:[#allocation6] sm:$0xff]  ;;  %v580_v2 = vld [vmem:[%s2577_s5 + $0x10] sm:$0xff]  ;;  %v579_v4 = vld [vmem:[%s2577_s5 + $0x8] sm:$0xff] }
  0x79   :  { %v371_v60 = vmul.f32 %v363_v56, %v126_v33  ;;  %v368_v62 = vmul.f32 %v364_v61, %v2387_v34  ;;  %v372_v63 = vmul.f32 %v364_v61, %v2392_v36  ;;  %v578_v1 = vld [vmem:[%s2577_s5] sm:$0xff]  ;;  %594 = vperm.xlu1 %1983, %v580_v2   ;;  %v581_v5 = vld [vmem:[%s2577_s5 + $0x18] sm:$0x3]  ;;  %v801_v7 = vld [vmem:[%s2578_s6 + $0x8] sm:$0xff] }
  0x7a   :  { %584 = vperm.xlu0 %1982, %v578_v1   ;;  %v800_v6 = vld [vmem:[%s2578_s6] sm:$0xff]  ;;  %v802_v8 = vld [vmem:[%s2578_s6 + $0x10] sm:$0xff]  ;;  %v803_v9 = vld [vmem:[%s2578_s6 + $0x18] sm:$0x3] }
  0x7b   :  { %1843 = vmatpush3.bf16.msra.mxu0 %v1840_v16  ;;  %1863 = vmatpush3.bf16.msra.mxu1 %v1840_v16  ;;  %vm2470_vm5 = vmpackc.low %vm615_vm3, %vm2133_vm4  ;;  %v571_v23 = vld [vmem:[#allocation6 + $0x8] sm:$0xff]  ;;  %v572_v24 = vld [vmem:[#allocation6 + $0x10] sm:$0xff] }
  0x7c   :  { %1845 = vmatprep.subr.bf16.mxu0 %v1844_v19  ;;  %1865 = vmatprep.subr.bf16.mxu1 %v1844_v19  ;;  %v573_v25 = vld [vmem:[#allocation6 + $0x18] sm:$0x3]  ;;  %v575_v39 = vld [vmem:[#allocation7 + $0x8] sm:$0xff]  ;;  %v1020_v42 = vld [vmem:[#allocation9] sm:$0xff] }
  0x7d   :  { %599 = vperm.xlu1 %1983, %v581_v5   ;;  %vm2506_vm6 = vmpackc.low %vm175_vm1, %vm2133_vm4 }
  0x7e   :  { %589 = vperm.xlu0 %1982, %v579_v4  }
  0x7f   :  { %1847 = vmatpush3.bf16.msra.mxu0 %v1844_v19  ;;  %1867 = vmatpush3.bf16.msra.mxu1 %v1844_v19 }
  0x80   :  { %1640 = vmatprep.subr.msk.mxu0 %vm175_vm1, %v138_v20  ;;  %1668 = vmatprep.subr.msk.mxu1 %vm175_vm1, %v138_v20 }
  0x81   :  { %811 = vperm.xlu1 %1983, %v801_v7  }
  0x82   :  { %806 = vperm.xlu0 %1982, %v800_v6  }
  0x83   :  { %1641 = vmatpush3.msk.msra.mxu0 %vm175_vm1, %v138_v20  ;;  %1669 = vmatpush3.msk.msra.mxu1 %vm175_vm1, %v138_v20 }
  0x84   :  { %1643 = vmatmul.mubr.msk.f32.vlgmr.msra.gmra.mrb[0].mxu0 %vm162_vm0, %v155_v26  ;;  %1671 = vmatmul.mubr.msk.f32.vlgmr.msra.gmra.mrb[0].mxu1 %vm162_vm0, %v159_v27  ;;  %v574_v26 = vld [vmem:[#allocation7] sm:$0xff] }
  0x85   :  { %1869 = vmatprep.subr.bf16.mxu0 %v1868_v30  ;;  %1889 = vmatprep.subr.bf16.mxu1 %v1868_v30 }
  0x86   :  { %1871 = vmatpush3.bf16.msra.mxu0 %v1868_v30  ;;  %1891 = vmatpush3.bf16.msra.mxu1 %v1868_v30 }
  0x87   :  { %1873 = vmatprep.subr.bf16.mxu0 %v1872_v37  ;;  %1893 = vmatprep.subr.bf16.mxu1 %v1872_v37 }
  0x88   :  { %1645 = vmatprep.mubr.msk.f32.mxu0 %vm162_vm0, %v156_v40  ;;  %1673 = vmatprep.mubr.msk.f32.mxu1 %vm162_vm0, %v160_v41  ;;  %v576_v40 = vld [vmem:[#allocation7 + $0x10] sm:$0xff]  ;;  %v577_v41 = vld [vmem:[#allocation7 + $0x18] sm:$0x3] }
  0x89   :  { %1646 = vmatmul.mubr.msk.f32.gmra.mrb[2].mxu0 %vm162_vm0, %v157_v43  ;;  %1674 = vmatmul.mubr.msk.f32.gmra.mrb[2].mxu1 %vm162_vm0, %v161_v44  ;;  %v1021_v43 = vld [vmem:[#allocation9 + $0x8] sm:$0x1] }
  0x8a   :  { %1875 = vmatpush3.bf16.msra.mxu0 %v1872_v37  ;;  %1895 = vmatpush3.bf16.msra.mxu1 %v1872_v37 }
  0x8b   :  { %1877 = vmatprep.subr.bf16.mxu0 %v1876_v45  ;;  %1897 = vmatprep.subr.bf16.mxu1 %v1876_v45 }
  0x8c   :  { %1698 = vmatprep.mubr.msk.f32.mxu0 %vm162_vm0, %v365_v46  ;;  %1726 = vmatprep.mubr.msk.f32.mxu1 %vm162_vm0, %v369_v47  ;;  %v1022_v46 = vld [vmem:[#allocation10] sm:$0xff]  ;;  %v1023_v47 = vld [vmem:[#allocation10 + $0x8] sm:$0x1] }
  0x8d   :  { %816 = vperm.xlu0 %1982, %v802_v8   ;;  %821 = vperm.xlu1 %1983, %v803_v9   ;;  %v1960_v48 = vpack.c.bf16 %v1023_v47, %v1022_v46 }
  0x8e   :  { %1879 = vmatpush3.bf16.msra.mxu0 %v1876_v45  ;;  %1899 = vmatpush3.bf16.msra.mxu1 %v1876_v45  ;;  %v1948_v45 = vpack.c.bf16 %v1021_v43, %v1020_v42 }
  0x8f   :  { %1881 = vmatprep.subr.bf16.mxu0 %v1880_v50  ;;  %1901 = vmatprep.subr.bf16.mxu1 %v1880_v50 }
  0x92   :  { %1883 = vmatpush3.bf16.msra.mxu0 %v1880_v50  ;;  %1903 = vmatpush3.bf16.msra.mxu1 %v1880_v50 }
  0x93   :  { %1885 = vmatprep.subr.bf16.mxu0 %v1884_v53  ;;  %1905 = vmatprep.subr.bf16.mxu1 %v1884_v53 }
  0x96   :  { %1887 = vmatpush3.bf16.msra.mxu0 %v1884_v53  ;;  %1907 = vmatpush3.bf16.msra.mxu1 %v1884_v53 }
  0x97   :  { %1696 = vmatprep.subr.msk.mxu0 %vm175_vm1, %v149_v55  ;;  %1724 = vmatprep.subr.msk.mxu1 %vm175_vm1, %v149_v55 }
  0x9a   :  { %1697 = vmatpush3.msk.msra.mxu0 %vm175_vm1, %v149_v55  ;;  %1725 = vmatpush3.msk.msra.mxu1 %vm175_vm1, %v149_v55 }
  0x9b   :  { %1699 = vmatmul.mubr.msk.f32.vlgmr.msra.gmra.mrb[4].mxu0 %vm162_vm0, %v366_v57  ;;  %1727 = vmatmul.mubr.msk.f32.vlgmr.msra.gmra.mrb[4].mxu1 %vm162_vm0, %v370_v58 }
  0x9c   :  { %1701 = vmatprep.mubr.msk.f32.mxu0 %vm162_vm0, %v367_v59  ;;  %1729 = vmatprep.mubr.msk.f32.mxu1 %vm162_vm0, %v371_v60 }
  0x9f   :  { %1702 = vmatmul.mubr.msk.f32.gmra.mrb[6].mxu0 %vm162_vm0, %v368_v62  ;;  %1730 = vmatmul.mubr.msk.f32.gmra.mrb[6].mxu1 %vm162_vm0, %v372_v63 }
  0xa0   :  { %1740 = vmatprep.mubr.msk.f32.mxu0 %vm602_vm2, %v570_v0  ;;  %1754 = vmatprep.mubr.msk.f32.mxu1 %vm602_vm2, %v570_v0 }
  0xf8   :  { %v595_v50 = vpop.permute.xlu1 %594 }
  0xf9   :  { %v585_v49 = vpop.permute.xlu0 %584 }
  0xfc   :  { %v600_v60 = vpop.permute.xlu1 %599 }
  0xfd   :  { %v590_v51 = vpop.permute.xlu0 %589 }
 0x157   :  { %v1644_v10 = vpop.f32.mrb[0].mxu0  ;;  %v1672_v11 = vpop.f32.mrb[0].mxu1 }
 0x158   :  { %v245_v12 = vpop.f32.mrb[1].mxu0  ;;  %v342_v13 = vpop.f32.mrb[1].mxu1 }
 0x159   :  { %v1908_v14 = vpack.c.bf16 %v1644_v10, %v245_v12  ;;  %v1918_v15 = vpack.c.bf16 %v1672_v11, %v342_v13  ;;  %v807_v13 = vpop.permute.xlu0 %806 }
 0x15b   :  { %1909 = vmatprep.subr.bf16.mxu0 %v1908_v14  ;;  %1919 = vmatprep.subr.bf16.mxu1 %v1918_v15 }
 0x15c   :  { %1911 = vmatpush3.bf16.msra.mxu0 %v1908_v14  ;;  %1921 = vmatpush3.bf16.msra.mxu1 %v1918_v15  ;;  %v1647_v16 = vpop.f32.mrb[2].mxu0  ;;  %v1675_v17 = vpop.f32.mrb[2].mxu1 }
 0x15d   :  { %v255_v18 = vpop.f32.mrb[3].mxu0  ;;  %v352_v19 = vpop.f32.mrb[3].mxu1 }
 0x15e   :  { %v1912_v21 = vpack.c.bf16 %v1647_v16, %v255_v18  ;;  %v1922_v22 = vpack.c.bf16 %v1675_v17, %v352_v19  ;;  %v812_v14 = vpop.permute.xlu1 %811 }
 0x160   :  { %1914 = vmatprep.subr.msk.bf16.mxu0 %vm2470_vm5, %v1912_v21  ;;  %1924 = vmatprep.subr.msk.bf16.mxu1 %vm2470_vm5, %v1922_v22 }
 0x161   :  { %1917 = vmatpush3.bf16.msk.msra.mxu0 %vm2470_vm5, %v1912_v21  ;;  %1927 = vmatpush3.bf16.msk.msra.mxu1 %vm2470_vm5, %v1922_v22 }
 0x164   :  { %1741 = vmatmul.mubr.msk.f32.vlgmr.msra.gmra.mrb[8].mxu0 %vm602_vm2, %v571_v23  ;;  %1755 = vmatmul.mubr.msk.f32.vlgmr.msra.gmra.mrb[8].mxu1 %vm602_vm2, %v571_v23  ;;  %v817_v23 = vpop.permute.xlu0 %816 }
 0x165   :  { %1743 = vmatprep.mubr.msk.f32.mxu0 %vm602_vm2, %v572_v24  ;;  %1757 = vmatprep.mubr.msk.f32.mxu1 %vm602_vm2, %v572_v24  ;;  %v822_v24 = vpop.permute.xlu1 %821 }
 0x168   :  { %1744 = vmatmul.mubr.msk.f32.gmra.mrb[10].mxu0 %vm602_vm2, %v573_v25  ;;  %1758 = vmatmul.mubr.msk.f32.gmra.mrb[10].mxu1 %vm602_vm2, %v573_v25 }
 0x169   :  { %1768 = vmatprep.mubr.msk.f32.mxu0 %vm602_vm2, %v574_v26  ;;  %1782 = vmatprep.mubr.msk.f32.mxu1 %vm602_vm2, %v574_v26 }
 0x16e   :  { %v1700_v27 = vpop.f32.mrb[4].mxu0  ;;  %v1728_v28 = vpop.f32.mrb[4].mxu1 }
 0x16f   :  { %v454_v29 = vpop.f32.mrb[5].mxu0  ;;  %v551_v30 = vpop.f32.mrb[5].mxu1 }
 0x170   :  { %v1928_v31 = vpack.c.bf16 %v1700_v27, %v454_v29  ;;  %v1938_v32 = vpack.c.bf16 %v1728_v28, %v551_v30 }
 0x172   :  { %v1703_v33 = vpop.f32.mrb[6].mxu0  ;;  %v1731_v34 = vpop.f32.mrb[6].mxu1  ;;  %1929 = vmatprep.subr.bf16.mxu0 %v1928_v31  ;;  %1939 = vmatprep.subr.bf16.mxu1 %v1938_v32 }
 0x173   :  { %v464_v35 = vpop.f32.mrb[7].mxu0  ;;  %v561_v36 = vpop.f32.mrb[7].mxu1  ;;  %1931 = vmatpush3.bf16.msra.mxu0 %v1928_v31  ;;  %1941 = vmatpush3.bf16.msra.mxu1 %v1938_v32 }
 0x174   :  { %v1932_v37 = vpack.c.bf16 %v1703_v33, %v464_v35  ;;  %v1942_v38 = vpack.c.bf16 %v1731_v34, %v561_v36 }
 0x176   :  { %1934 = vmatprep.subr.msk.bf16.mxu0 %vm2470_vm5, %v1932_v37  ;;  %1944 = vmatprep.subr.msk.bf16.mxu1 %vm2470_vm5, %v1942_v38 }
 0x177   :  { %1937 = vmatpush3.bf16.msk.msra.mxu0 %vm2470_vm5, %v1932_v37  ;;  %1947 = vmatpush3.bf16.msk.msra.mxu1 %vm2470_vm5, %v1942_v38 }
 0x178   :  { %1950 = vmatprep.subr.msk.bf16.mxu0 %vm2506_vm6, %v1948_v45  ;;  %1956 = vmatprep.subr.msk.bf16.mxu1 %vm2506_vm6, %v1948_v45 }
 0x17a   :  { %1769 = vmatmul.mubr.msk.f32.vlgmr.msra.gmra.mrb[12].mxu0 %vm602_vm2, %v575_v39  ;;  %1783 = vmatmul.mubr.msk.f32.vlgmr.msra.gmra.mrb[12].mxu1 %vm602_vm2, %v575_v39 }
 0x17b   :  { %1771 = vmatprep.mubr.msk.f32.mxu0 %vm602_vm2, %v576_v40  ;;  %1785 = vmatprep.mubr.msk.f32.mxu1 %vm602_vm2, %v576_v40 }
 0x17c   :  { %1953 = vmatpush3.bf16.msk.msra.mxu0 %vm2506_vm6, %v1948_v45  ;;  %1959 = vmatpush3.bf16.msk.msra.mxu1 %vm2506_vm6, %v1948_v45 }
 0x17d   :  { %1962 = vmatprep.subr.msk.bf16.mxu0 %vm2506_vm6, %v1960_v48  ;;  %1968 = vmatprep.subr.msk.bf16.mxu1 %vm2506_vm6, %v1960_v48 }
 0x17e   :  { %1772 = vmatmul.mubr.msk.f32.gmra.mrb[14].mxu0 %vm602_vm2, %v577_v41  ;;  %1786 = vmatmul.mubr.msk.f32.gmra.mrb[14].mxu1 %vm602_vm2, %v577_v41 }
 0x237   :  { %v1742_v52 = vpop.f32.mrb[8].mxu0  ;;  %v1756_v53 = vpop.f32.mrb[8].mxu1 }
 0x238   :  { %v691_v54 = vadd.f32 %v1742_v52, %v590_v51  ;;  %v779_v55 = vadd.f32 %v1756_v53, %v590_v51  ;;  %v685_v56 = vpop.f32.mrb[9].mxu0  ;;  %v773_v57 = vpop.f32.mrb[9].mxu1 }
 0x239   :  { %v686_v58 = vadd.f32 %v685_v56, %v585_v49  ;;  %v774_v59 = vadd.f32 %v773_v57, %v585_v49 }
 0x23a   :  { %v793_v61 = vmax.f32 %v691_v54, 0.0  ;;  %v797_v62 = vmax.f32 %v779_v55, 0.0 }
 0x23b   :  { %v792_v63 = vmax.f32 %v686_v58, 0.0  ;;  %v796_v0 = vmax.f32 %v774_v59, 0.0  ;;  %v1745_v1 = vpop.f32.mrb[10].mxu0  ;;  %v1759_v2 = vpop.f32.mrb[10].mxu1 }
 0x23c   :  { %v701_v3 = vadd.f32 %v1745_v1, %v600_v60  ;;  %v789_v4 = vadd.f32 %v1759_v2, %v600_v60  ;;  %v695_v5 = vpop.f32.mrb[11].mxu0  ;;  %v783_v6 = vpop.f32.mrb[11].mxu1 }
 0x23d   :  { %v696_v7 = vadd.f32 %v695_v5, %v595_v50  ;;  %v784_v8 = vadd.f32 %v783_v6, %v595_v50  ;;  %1792 = vmatprep.mubr.msk.f32.mxu0 %vm1024_vm7, %v792_v63  ;;  %1802 = vmatprep.mubr.msk.f32.mxu1 %vm1024_vm7, %v796_v0 }
 0x23e   :  { %v795_v9 = vmax.f32 %v701_v3, 0.0  ;;  %v799_v10 = vmax.f32 %v789_v4, 0.0  ;;  %1793 = vmatmul.mubr.msk.f32.vlgmr.msra.gmra.mrb[16].mxu0 %vm1024_vm7, %v793_v61  ;;  %1803 = vmatmul.mubr.msk.f32.vlgmr.msra.gmra.mrb[16].mxu1 %vm1024_vm7, %v797_v62 }
 0x23f   :  { %v794_v11 = vmax.f32 %v696_v7, 0.0  ;;  %v798_v12 = vmax.f32 %v784_v8, 0.0  ;;  %1965 = vmatpush3.bf16.msk.msra.mxu0 %vm2506_vm6, %v1960_v48  ;;  %1971 = vmatpush3.bf16.msk.msra.mxu1 %vm2506_vm6, %v1960_v48 }
 0x241   :  { %1795 = vmatprep.mubr.msk.f32.mxu0 %vm1024_vm7, %v794_v11  ;;  %1805 = vmatprep.mubr.msk.f32.mxu1 %vm1024_vm7, %v798_v12 }
 0x242   :  { %1796 = vmatmul.mubr.msk.f32.gmra.mrb[18].mxu0 %vm1024_vm7, %v795_v9  ;;  %1806 = vmatmul.mubr.msk.f32.gmra.mrb[18].mxu1 %vm1024_vm7, %v799_v10 }
 0x24d   :  { %v1770_v15 = vpop.f32.mrb[12].mxu0  ;;  %v1784_v16 = vpop.f32.mrb[12].mxu1 }
 0x24e   :  { %v911_v17 = vadd.f32 %v1770_v15, %v812_v14  ;;  %v999_v18 = vadd.f32 %v1784_v16, %v812_v14  ;;  %v905_v19 = vpop.f32.mrb[13].mxu0  ;;  %v993_v20 = vpop.f32.mrb[13].mxu1 }
 0x24f   :  { %v906_v21 = vadd.f32 %v905_v19, %v807_v13  ;;  %v994_v22 = vadd.f32 %v993_v20, %v807_v13 }
 0x250   :  { %v1013_v29 = vmax.f32 %v911_v17, 0.0  ;;  %v1017_v30 = vmax.f32 %v999_v18, 0.0 }
 0x251   :  { %v1012_v25 = vmax.f32 %v906_v21, 0.0  ;;  %v1016_v26 = vmax.f32 %v994_v22, 0.0  ;;  %v1773_v27 = vpop.f32.mrb[14].mxu0  ;;  %v1787_v28 = vpop.f32.mrb[14].mxu1 }
 0x252   :  { %v921_v31 = vadd.f32 %v1773_v27, %v822_v24  ;;  %v1009_v32 = vadd.f32 %v1787_v28, %v822_v24  ;;  %v915_v33 = vpop.f32.mrb[15].mxu0  ;;  %v1003_v34 = vpop.f32.mrb[15].mxu1 }
 0x253   :  { %v916_v35 = vadd.f32 %v915_v33, %v817_v23  ;;  %v1004_v36 = vadd.f32 %v1003_v34, %v817_v23  ;;  %1812 = vmatprep.mubr.msk.f32.mxu0 %vm1024_vm7, %v1012_v25  ;;  %1822 = vmatprep.mubr.msk.f32.mxu1 %vm1024_vm7, %v1016_v26 }
 0x254   :  { %1813 = vmatmul.mubr.msk.f32.vlgmr.msra.gmra.mrb[20].mxu0 %vm1024_vm7, %v1013_v29  ;;  %1823 = vmatmul.mubr.msk.f32.vlgmr.msra.gmra.mrb[20].mxu1 %vm1024_vm7, %v1017_v30  ;;  %v1015_v39 = vmax.f32 %v921_v31, 0.0  ;;  %v1019_v40 = vmax.f32 %v1009_v32, 0.0 }
 0x255   :  { %v1014_v37 = vmax.f32 %v916_v35, 0.0  ;;  %v1018_v38 = vmax.f32 %v1004_v36, 0.0 }
 0x257   :  { %1815 = vmatprep.mubr.msk.f32.mxu0 %vm1024_vm7, %v1014_v37  ;;  %1825 = vmatprep.mubr.msk.f32.mxu1 %vm1024_vm7, %v1018_v38 }
 0x258   :  { %1816 = vmatmul.mubr.msk.f32.gmra.mrb[22].mxu0 %vm1024_vm7, %v1015_v39  ;;  %1826 = vmatmul.mubr.msk.f32.gmra.mrb[22].mxu1 %vm1024_vm7, %v1019_v40 }
 0x311   :  { %v1794_v41 = vpop.f32.mrb[16].mxu0  ;;  %v1804_v42 = vpop.f32.mrb[16].mxu1 }
 0x312   :  { %v1106_v43 = vpop.f32.mrb[17].mxu0  ;;  %v1203_v44 = vpop.f32.mrb[17].mxu1 }
 0x315   :  { %v1797_v45 = vpop.f32.mrb[18].mxu0  ;;  %v1807_v46 = vpop.f32.mrb[18].mxu1 }
 0x316   :  { %v1116_v47 = vpop.f32.mrb[19].mxu0  ;;  %v1213_v48 = vpop.f32.mrb[19].mxu1 }
 0x327   :  { %v1814_v49 = vpop.f32.mrb[20].mxu0  ;;  %v1824_v50 = vpop.f32.mrb[20].mxu1 }
 0x328   :  { %v1420_v51 = vmul.f32 %v1814_v49, %v1794_v41  ;;  %v1424_v52 = vmul.f32 %v1824_v50, %v1804_v42  ;;  %v1303_v53 = vpop.f32.mrb[21].mxu0  ;;  %v1400_v54 = vpop.f32.mrb[21].mxu1 }
 0x329   :  { %v1419_v55 = vmul.f32 %v1303_v53, %v1106_v43  ;;  %v1423_v56 = vmul.f32 %v1400_v54, %v1203_v44 }
 0x32a   :  { %1428 = vst.msk [vmem:[%s2583_s11 + $0x8] sm:$0xff] %vm162_vm0, %v1420_v51  ;;  %1433 = vst.msk [vmem:[%s2583_s11 + $0x28] sm:$0xff] %vm162_vm0, %v1424_v52 }
 0x32b   :  { %1427 = vst.msk [vmem:[%s2583_s11] sm:$0xff] %vm162_vm0, %v1419_v55  ;;  %1432 = vst.msk [vmem:[%s2583_s11 + $0x20] sm:$0xff] %vm162_vm0, %v1423_v56  ;;  %v1817_v57 = vpop.f32.mrb[22].mxu0  ;;  %v1827_v58 = vpop.f32.mrb[22].mxu1 }
 0x32c   :  { %v1422_v59 = vmul.f32 %v1817_v57, %v1797_v45  ;;  %v1426_v60 = vmul.f32 %v1827_v58, %v1807_v46  ;;  %v1313_v61 = vpop.f32.mrb[23].mxu0  ;;  %v1410_v62 = vpop.f32.mrb[23].mxu1 }
 0x32d   :  { %v1421_v63 = vmul.f32 %v1313_v61, %v1116_v47  ;;  %v1425_v0 = vmul.f32 %v1410_v62, %v1213_v48 }
 0x32e   :  { %1431 = vst.msk [vmem:[%s2583_s11 + $0x18] sm:$0x3] %vm1430_vm8, %v1422_v59  ;;  %1435 = vst.msk [vmem:[%s2583_s11 + $0x38] sm:$0x3] %vm1430_vm8, %v1426_v60 }
 0x32f   :  { %1429 = vst.msk [vmem:[%s2583_s11 + $0x10] sm:$0xff] %vm162_vm0, %v1421_v63  ;;  %1434 = vst.msk [vmem:[%s2583_s11 + $0x30] sm:$0xff] %vm162_vm0, %v1425_v0 }
 0x330   :  { %1440 = vsyncpa [#allocation3], 1 }
 0x331   :  { %1441 = vsyncpa [#allocation5], 1 }
 0x332   :  { %1442 = vsyncpa [#allocation8], 1 }
 0x333   :  { %1443 = vsyncpa [#allocation11], 1 }

// kernel: forward.4
= control target key start
LH: loop header
LB: loop body
LE: loop exit
PB: predicated region body
PF: predicated region fallthrough
CT: control target
= control target key end

     0   :  { %v3163_v43 = vmov 1983009808   ;;  %v311_v45 = vlaneseq  ;;  %vm3165_vm0 = vmmov 0   ;;  %vm401_vm1 = vcmask 1041408   ;;  %s4341_s2 = inlined_call_operand.vmem [shape: f32[2106,9], index: 2, kind: input, shape index: {}]   ;;  %s4342_s0 = inlined_call_operand.vmem [shape: f32[2,2106], index: 0, kind: input, shape index: {}]   ;;  %s4343_s3 = inlined_call_operand.vmem [shape: f32[1,9], index: 3, kind: input, shape index: {}]   ;;  %s4344_s4 = inlined_call_operand.vmem [shape: f32[9,81], index: 4, kind: input, shape index: {}]   ;;  %s4345_s5 = inlined_call_operand.vmem [shape: f32[81,81], index: 5, kind: input, shape index: {}]   ;;  %s4346_s1 = inlined_call_operand.vmem [shape: f32[2,26,81], index: 1, kind: input, shape index: {}]   ;;  %s4347_s6 = inlined_call_operand.vmem [shape: f32[81,81], index: 6, kind: input, shape index: {}]   ;;  %s4348_s7 = inlined_call_operand.vmem [shape: f32[2,26,81], index: 7, kind: output, shape index: {}]  }
   0x1   :  { %v47_v0 = vld [vmem:[%s4341_s2 + $0x80] sm:$0xff]  ;;  %v48_v1 = vld [vmem:[%s4341_s2 + $0x88] sm:$0xff]  ;;  %v49_v11 = vld [vmem:[%s4341_s2 + $0x90] sm:$0xff]  ;;  %v309_v44 = vunpack.c.l.s4 %v3163_v43  ;;  %vm3167_vm2 = vmmov 1   ;;  %vm398_vm4 = vcmask 474112   ;;  %vm1036_vm5 = vcmask 66560  }
   0x2   :  { %v31_v2 = vld [vmem:[%s4341_s2] sm:$0xff]  ;;  %v2720_v3 = vpack.c.bf16 %v48_v1, %v47_v0  ;;  %v32_v4 = vld [vmem:[%s4341_s2 + $0x8] sm:$0xff]  ;;  %v50_v13 = vld [vmem:[%s4341_s2 + $0x98] sm:$0xff]  ;;  %v3326_v60 = vshrl.u32 %v311_v45, 7  ;;  %vm1055_vm6 = vcmask 1040384   ;;  %vm1051_vm8 = vcmask 72704  }
   0x3   :  { %v79_v5 = vld [vmem:[%s4341_s2 + $0x180] sm:$0xff]  ;;  %v80_v6 = vld [vmem:[%s4341_s2 + $0x188] sm:$0xff]  ;;  %v2722_v7 = vpack.c.bf16 %v32_v4, %v31_v2  ;;  %v33_v14 = vld [vmem:[%s4341_s2 + $0x10] sm:$0xff]  ;;  %v2724_v16 = vpack.c.bf16 %v50_v13, %v49_v11  ;;  %v310_v59 = vunpack.c.0.s8 %v309_v44  ;;  %vm1189_vm9 = vcmask 662528  }
   0x4   :  { %v2752_v8 = vpack.c.bf16 %v80_v6, %v79_v5  ;;  %v63_v9 = vld [vmem:[%s4341_s2 + $0x100] sm:$0xff]  ;;  %v64_v10 = vld [vmem:[%s4341_s2 + $0x108] sm:$0xff]  ;;  %2721 = vmatprep.subr.bf16.mxu0 %v2720_v3  ;;  %v34_v15 = vld [vmem:[%s4341_s2 + $0x18] sm:$0xff]  ;;  %vm1581_vm11 = vcmask 211968   ;;  %vm1591_vm12 = vcmask 205824   ;;  %vm2080_vm13 = vcmask 656384  }
   0x5   :  { %v2754_v12 = vpack.c.bf16 %v64_v10, %v63_v9  ;;  %2723 = vmatpush3.bf16.msra.mxu0 %v2722_v7  ;;  %v2726_v17 = vpack.c.bf16 %v34_v15, %v33_v14  ;;  %v81_v18 = vld [vmem:[%s4341_s2 + $0x190] sm:$0xff]  ;;  %v82_v19 = vld [vmem:[%s4341_s2 + $0x198] sm:$0xff]  ;;  %v51_v23 = vld [vmem:[%s4341_s2 + $0xa0] sm:$0xff]  ;;  %v3356_v10 = vsub.s32 %v310_v59, %v3326_v60 }
   0x6   :  { %2753 = vmatprep.subr.bf16.mxu1 %v2752_v8  ;;  %v65_v20 = vld [vmem:[%s4341_s2 + $0x110] sm:$0xff]  ;;  %v2756_v21 = vpack.c.bf16 %v82_v19, %v81_v18  ;;  %v66_v22 = vld [vmem:[%s4341_s2 + $0x118] sm:$0xff]  ;;  %v52_v24 = vld [vmem:[%s4341_s2 + $0xa8] sm:$0xff]  ;;  %2725 = vmatprep.subr.bf16.mxu0 %v2724_v16 }
   0x7   :  { %2755 = vmatpush3.bf16.msra.mxu1 %v2754_v12  ;;  %v2758_v25 = vpack.c.bf16 %v66_v22, %v65_v20  ;;  %v2728_v26 = vpack.c.bf16 %v52_v24, %v51_v23  ;;  %v35_v27 = vld [vmem:[%s4341_s2 + $0x20] sm:$0xff]  ;;  %v36_v28 = vld [vmem:[%s4341_s2 + $0x28] sm:$0xff]  ;;  %v53_v35 = vld [vmem:[%s4341_s2 + $0xb0] sm:$0xff] }
   0x8   :  { %v83_v29 = vld [vmem:[%s4341_s2 + $0x1a0] sm:$0xff]  ;;  %2757 = vmatprep.subr.bf16.mxu1 %v2756_v21  ;;  %v84_v30 = vld [vmem:[%s4341_s2 + $0x1a8] sm:$0xff]  ;;  %v2730_v33 = vpack.c.bf16 %v36_v28, %v35_v27  ;;  %v54_v36 = vld [vmem:[%s4341_s2 + $0xb8] sm:$0xff] }
   0x9   :  { %v67_v31 = vld [vmem:[%s4341_s2 + $0x120] sm:$0xff]  ;;  %v68_v32 = vld [vmem:[%s4341_s2 + $0x128] sm:$0xff]  ;;  %2727 = vmatpush3.bf16.msra.mxu0 %v2726_v17  ;;  %v2760_v34 = vpack.c.bf16 %v84_v30, %v83_v29  ;;  %v37_v37 = vld [vmem:[%s4341_s2 + $0x30] sm:$0xff]  ;;  %v2732_v39 = vpack.c.bf16 %v54_v36, %v53_v35 }
   0xa   :  { %2729 = vmatprep.subr.bf16.mxu0 %v2728_v26  ;;  %v2762_v38 = vpack.c.bf16 %v68_v32, %v67_v31  ;;  %v38_v40 = vld [vmem:[%s4341_s2 + $0x38] sm:$0xff]  ;;  %v85_v41 = vld [vmem:[%s4341_s2 + $0x1b0] sm:$0xff]  ;;  %v55_v49 = vld [vmem:[%s4341_s2 + $0xc0] sm:$0xff] }
   0xb   :  { %2759 = vmatpush3.bf16.msra.mxu1 %v2758_v25  ;;  %v86_v42 = vld [vmem:[%s4341_s2 + $0x1b8] sm:$0xff]  ;;  %v69_v47 = vld [vmem:[%s4341_s2 + $0x130] sm:$0xff]  ;;  %v56_v50 = vld [vmem:[%s4341_s2 + $0xc8] sm:$0xff]  ;;  %v2734_v51 = vpack.c.bf16 %v38_v40, %v37_v37 }
   0xc   :  { %2761 = vmatprep.subr.bf16.mxu1 %v2760_v34  ;;  %v2764_v46 = vpack.c.bf16 %v86_v42, %v85_v41  ;;  %v70_v48 = vld [vmem:[%s4341_s2 + $0x138] sm:$0xff]  ;;  %v87_v52 = vld [vmem:[%s4341_s2 + $0x1c0] sm:$0xff]  ;;  %v88_v53 = vld [vmem:[%s4341_s2 + $0x1c8] sm:$0xff]  ;;  %v2736_v55 = vpack.c.bf16 %v56_v50, %v55_v49 }
   0xd   :  { %2731 = vmatpush3.bf16.msra.mxu0 %v2730_v33  ;;  %v2766_v54 = vpack.c.bf16 %v70_v48, %v69_v47  ;;  %v39_v56 = vld [vmem:[%s4341_s2 + $0x40] sm:$0xff]  ;;  %v40_v57 = vld [vmem:[%s4341_s2 + $0x48] sm:$0xff]  ;;  %v2768_v61 = vpack.c.bf16 %v88_v53, %v87_v52  ;;  %v57_v63 = vld [vmem:[%s4341_s2 + $0xd0] sm:$0xff] }
   0xe   :  { %2733 = vmatprep.subr.bf16.mxu0 %v2732_v39  ;;  %v71_v58 = vld [vmem:[%s4341_s2 + $0x140] sm:$0xff]  ;;  %v72_v62 = vld [vmem:[%s4341_s2 + $0x148] sm:$0xff]  ;;  %v58_v0 = vld [vmem:[%s4341_s2 + $0xd8] sm:$0xff]  ;;  %v2738_v3 = vpack.c.bf16 %v40_v57, %v39_v56 }
   0xf   :  { %2763 = vmatpush3.bf16.msra.mxu1 %v2762_v38  ;;  %v89_v1 = vld [vmem:[%s4341_s2 + $0x1d0] sm:$0xff]  ;;  %v90_v2 = vld [vmem:[%s4341_s2 + $0x1d8] sm:$0xff]  ;;  %v2770_v5 = vpack.c.bf16 %v72_v62, %v71_v58  ;;  %v2740_v6 = vpack.c.bf16 %v58_v0, %v57_v63  ;;  %v59_v12 = vld [vmem:[%s4341_s2 + $0xe0] sm:$0xff] }
  0x10   :  { %2765 = vmatprep.subr.bf16.mxu1 %v2764_v46  ;;  %v41_v4 = vld [vmem:[%s4341_s2 + $0x50] sm:$0xff]  ;;  %v42_v7 = vld [vmem:[%s4341_s2 + $0x58] sm:$0xff]  ;;  %v2772_v11 = vpack.c.bf16 %v90_v2, %v89_v1  ;;  %v60_v13 = vld [vmem:[%s4341_s2 + $0xe8] sm:$0xff] }
  0x11   :  { %2735 = vmatpush3.bf16.msra.mxu0 %v2734_v51  ;;  %v73_v8 = vld [vmem:[%s4341_s2 + $0x150] sm:$0xff]  ;;  %v74_v9 = vld [vmem:[%s4341_s2 + $0x158] sm:$0xff]  ;;  %v91_v14 = vld [vmem:[%s4341_s2 + $0x1e0] sm:$0xff]  ;;  %v2742_v16 = vpack.c.bf16 %v42_v7, %v41_v4  ;;  %v2744_v19 = vpack.c.bf16 %v60_v13, %v59_v12 }
  0x12   :  { %2737 = vmatprep.subr.bf16.mxu0 %v2736_v55  ;;  %v92_v15 = vld [vmem:[%s4341_s2 + $0x1e8] sm:$0xff]  ;;  %v2774_v17 = vpack.c.bf16 %v74_v9, %v73_v8  ;;  %v26_v18 = vld [vmem:[%s4342_s0] sm:$0xff]  ;;  %v61_v27 = vld [vmem:[%s4341_s2 + $0xf0] sm:$0xff] }
  0x13   :  { %2767 = vmatpush3.bf16.msra.mxu1 %v2766_v54  ;;  %v43_v20 = vld [vmem:[%s4341_s2 + $0x60] sm:$0xff]  ;;  %v44_v21 = vld [vmem:[%s4341_s2 + $0x68] sm:$0xff]  ;;  %v314_v23 = vrot.slane %v26_v18, %v3356_v10  ;;  %v307_v24 = vcombine.high %v26_v18, %v26_v18  ;;  %v2776_v25 = vpack.c.bf16 %v92_v15, %v91_v14  ;;  %v62_v28 = vld [vmem:[%s4341_s2 + $0xf8] sm:$0xff] }
  0x14   :  { %2769 = vmatprep.subr.bf16.mxu1 %v2768_v61  ;;  %v75_v22 = vld [vmem:[%s4341_s2 + $0x160] sm:$0xff]  ;;  %v76_v26 = vld [vmem:[%s4341_s2 + $0x168] sm:$0xff]  ;;  %v93_v29 = vld [vmem:[%s4341_s2 + $0x1f0] sm:$0xff]  ;;  %v2746_v33 = vpack.c.bf16 %v44_v21, %v43_v20  ;;  %v2748_v35 = vpack.c.bf16 %v62_v28, %v61_v27 }
  0x15   :  { %2739 = vmatpush3.bf16.msra.mxu0 %v2738_v3  ;;  %v94_v30 = vld [vmem:[%s4341_s2 + $0x1f8] sm:$0xff]  ;;  %v322_v31 = vcombine.high %v314_v23, %v314_v23  ;;  %v321_v32 = vrot.slane %v307_v24, %v3356_v10  ;;  %v2778_v34 = vpack.c.bf16 %v76_v26, %v75_v22  ;;  %v45_v36 = vld [vmem:[%s4341_s2 + $0x70] sm:$0xff]  ;;  %v111_v42 = vld [vmem:[%s4341_s2 + $0x280] sm:$0xff] }
  0x16   :  { %2741 = vmatprep.subr.bf16.mxu0 %v2740_v6  ;;  %v46_v37 = vld [vmem:[%s4341_s2 + $0x78] sm:$0xff]  ;;  %v77_v38 = vld [vmem:[%s4341_s2 + $0x170] sm:$0xff]  ;;  %v2780_v40 = vpack.c.bf16 %v94_v30, %v93_v29  ;;  %v112_v43 = vld [vmem:[%s4341_s2 + $0x288] sm:$0xff] }
  0x17   :  { %2771 = vmatpush3.bf16.msra.mxu1 %v2770_v5  ;;  %v323_v39 = vcombine.high %v321_v32, %v321_v32  ;;  %469 = vmatprep.mubr.f32.mxu0 %v322_v31  ;;  %v78_v41 = vld [vmem:[%s4341_s2 + $0x178] sm:$0xff]  ;;  %v143_v44 = vld [vmem:[%s4341_s2 + $0x380] sm:$0xff]  ;;  %v144_v45 = vld [vmem:[%s4341_s2 + $0x388] sm:$0xff]  ;;  %v2750_v46 = vpack.c.bf16 %v46_v37, %v45_v36  ;;  %v2784_v48 = vpack.c.bf16 %v112_v43, %v111_v42 }
  0x18   :  { %2773 = vmatprep.subr.bf16.mxu1 %v2772_v11  ;;  %v2782_v47 = vpack.c.bf16 %v78_v41, %v77_v38  ;;  %v95_v49 = vld [vmem:[%s4341_s2 + $0x200] sm:$0xff]  ;;  %v96_v50 = vld [vmem:[%s4341_s2 + $0x208] sm:$0xff]  ;;  %v2816_v52 = vpack.c.bf16 %v144_v45, %v143_v44  ;;  %v113_v54 = vld [vmem:[%s4341_s2 + $0x290] sm:$0xff] }
  0x19   :  { %2743 = vmatpush3.bf16.msra.mxu0 %v2742_v16  ;;  %539 = vmatprep.mubr.f32.mxu1 %v323_v39  ;;  %v127_v51 = vld [vmem:[%s4341_s2 + $0x300] sm:$0xff]  ;;  %v128_v53 = vld [vmem:[%s4341_s2 + $0x308] sm:$0xff]  ;;  %v114_v55 = vld [vmem:[%s4341_s2 + $0x298] sm:$0xff]  ;;  %v2786_v58 = vpack.c.bf16 %v96_v50, %v95_v49 }
  0x1a   :  { %2745 = vmatprep.subr.bf16.mxu0 %v2744_v19  ;;  %v145_v56 = vld [vmem:[%s4341_s2 + $0x390] sm:$0xff]  ;;  %v146_v57 = vld [vmem:[%s4341_s2 + $0x398] sm:$0xff]  ;;  %v2818_v59 = vpack.c.bf16 %v128_v53, %v127_v51  ;;  %v2788_v61 = vpack.c.bf16 %v114_v55, %v113_v54  ;;  %v115_v3 = vld [vmem:[%s4341_s2 + $0x2a0] sm:$0xff] }
  0x1b   :  { %2775 = vmatpush3.bf16.msra.mxu1 %v2774_v17  ;;  %v97_v62 = vld [vmem:[%s4341_s2 + $0x210] sm:$0xff]  ;;  %v98_v63 = vld [vmem:[%s4341_s2 + $0x218] sm:$0xff]  ;;  %v2820_v1 = vpack.c.bf16 %v146_v57, %v145_v56  ;;  %v116_v4 = vld [vmem:[%s4341_s2 + $0x2a8] sm:$0xff] }
  0x1c   :  { %2777 = vmatprep.subr.bf16.mxu1 %v2776_v25  ;;  %v129_v0 = vld [vmem:[%s4341_s2 + $0x310] sm:$0xff]  ;;  %v130_v2 = vld [vmem:[%s4341_s2 + $0x318] sm:$0xff]  ;;  %v147_v5 = vld [vmem:[%s4341_s2 + $0x3a0] sm:$0xff]  ;;  %v2790_v7 = vpack.c.bf16 %v98_v63, %v97_v62  ;;  %v2792_v9 = vpack.c.bf16 %v116_v4, %v115_v3 }
  0x1d   :  { %2747 = vmatpush3.bf16.msra.mxu0 %v2746_v33  ;;  %v148_v6 = vld [vmem:[%s4341_s2 + $0x3a8] sm:$0xff]  ;;  %v2822_v8 = vpack.c.bf16 %v130_v2, %v129_v0  ;;  %v99_v11 = vld [vmem:[%s4341_s2 + $0x220] sm:$0xff]  ;;  %v117_v16 = vld [vmem:[%s4341_s2 + $0x2b0] sm:$0xff] }
  0x1e   :  { %2749 = vmatprep.subr.bf16.mxu0 %v2748_v35  ;;  %v100_v12 = vld [vmem:[%s4341_s2 + $0x228] sm:$0xff]  ;;  %v131_v13 = vld [vmem:[%s4341_s2 + $0x320] sm:$0xff]  ;;  %v2824_v14 = vpack.c.bf16 %v148_v6, %v147_v5  ;;  %v118_v17 = vld [vmem:[%s4341_s2 + $0x2b8] sm:$0xff] }
  0x1f   :  { %2779 = vmatpush3.bf16.msra.mxu1 %v2778_v34  ;;  %v132_v15 = vld [vmem:[%s4341_s2 + $0x328] sm:$0xff]  ;;  %v149_v18 = vld [vmem:[%s4341_s2 + $0x3b0] sm:$0xff]  ;;  %v150_v19 = vld [vmem:[%s4341_s2 + $0x3b8] sm:$0xff]  ;;  %v2794_v20 = vpack.c.bf16 %v100_v12, %v99_v11 }
  0x20   :  { %2781 = vmatprep.subr.bf16.mxu1 %v2780_v40  ;;  %v101_v21 = vld [vmem:[%s4341_s2 + $0x230] sm:$0xff]  ;;  %v2826_v22 = vpack.c.bf16 %v132_v15, %v131_v13  ;;  %v102_v24 = vld [vmem:[%s4341_s2 + $0x238] sm:$0xff]  ;;  %v2828_v27 = vpack.c.bf16 %v150_v19, %v149_v18  ;;  %v119_v28 = vld [vmem:[%s4341_s2 + $0x2c0] sm:$0xff] }
  0x21   :  { %2751 = vmatpush3.bf16.msra.mxu0 %v2750_v46  ;;  %v133_v25 = vld [vmem:[%s4341_s2 + $0x330] sm:$0xff]  ;;  %v134_v26 = vld [vmem:[%s4341_s2 + $0x338] sm:$0xff]  ;;  %v120_v29 = vld [vmem:[%s4341_s2 + $0x2c8] sm:$0xff]  ;;  %v2798_v35 = vpack.c.bf16 %v102_v24, %v101_v21 }
  0x22   :  { %2785 = vmatprep.subr.bf16.mxu0 %v2784_v48  ;;  %v27_v30 = vld [vmem:[%s4342_s0 + $0x8] sm:$0xff]  ;;  %v151_v31 = vld [vmem:[%s4341_s2 + $0x3c0] sm:$0xff]  ;;  %v2830_v36 = vpack.c.bf16 %v134_v26, %v133_v25  ;;  %v2800_v37 = vpack.c.bf16 %v120_v29, %v119_v28  ;;  %v121_v45 = vld [vmem:[%s4341_s2 + $0x2d0] sm:$0xff] }
  0x23   :  { %2783 = vmatpush3.bf16.msra.mxu1 %v2782_v47  ;;  %v3523_v33 = vrot.slane %v27_v30, %v3356_v10  ;;  %v324_v34 = vcombine.high %v27_v30, %v27_v30  ;;  %v103_v38 = vld [vmem:[%s4341_s2 + $0x240] sm:$0xff]  ;;  %v104_v39 = vld [vmem:[%s4341_s2 + $0x248] sm:$0xff]  ;;  %v122_v46 = vld [vmem:[%s4341_s2 + $0x2d8] sm:$0xff] }
  0x24   :  { %2817 = vmatprep.subr.bf16.mxu1 %v2816_v52  ;;  %470 = vmatmul.mubr.f32.vlgmr.msra.gmra.mrb[0].mxu0 %v314_v23  ;;  %v2796_v23 = vpack.c.bf16 %v118_v17, %v117_v16  ;;  %v135_v40 = vld [vmem:[%s4341_s2 + $0x340] sm:$0xff]  ;;  %v136_v44 = vld [vmem:[%s4341_s2 + $0x348] sm:$0xff]  ;;  %v153_v47 = vld [vmem:[%s4341_s2 + $0x3d0] sm:$0xff]  ;;  %v2802_v50 = vpack.c.bf16 %v104_v39, %v103_v38  ;;  %v2804_v52 = vpack.c.bf16 %v122_v46, %v121_v45 }
  0x25   :  { %2787 = vmatpush3.bf16.msra.mxu0 %v2786_v58  ;;  %v339_v41 = vcombine.high %v3523_v33, %v3523_v33  ;;  %v3537_v42 = vrot.slane %v324_v34, %v3356_v10  ;;  %v154_v48 = vld [vmem:[%s4341_s2 + $0x3d8] sm:$0xff]  ;;  %v2834_v51 = vpack.c.bf16 %v136_v44, %v135_v40  ;;  %v105_v53 = vld [vmem:[%s4341_s2 + $0x250] sm:$0xff]  ;;  %v123_v58 = vld [vmem:[%s4341_s2 + $0x2e0] sm:$0xff] }
  0x26   :  { %540 = vmatmul.mubr.f32.vlgmr.msra.gmra.mrb[0].mxu1 %v321_v32  ;;  %2789 = vmatprep.subr.bf16.mxu0 %v2788_v61  ;;  %v152_v32 = vld [vmem:[%s4341_s2 + $0x3c8] sm:$0xff]  ;;  %v106_v54 = vld [vmem:[%s4341_s2 + $0x258] sm:$0xff]  ;;  %v137_v55 = vld [vmem:[%s4341_s2 + $0x350] sm:$0xff]  ;;  %v2836_v56 = vpack.c.bf16 %v154_v48, %v153_v47 }
  0x27   :  { %2819 = vmatpush3.bf16.msra.mxu1 %v2818_v59  ;;  %v2832_v43 = vpack.c.bf16 %v152_v32, %v151_v31  ;;  %609 = vmatprep.mubr.f32.mxu0 %v339_v41  ;;  %v340_v49 = vcombine.high %v3537_v42, %v3537_v42  ;;  %v138_v57 = vld [vmem:[%s4341_s2 + $0x358] sm:$0xff]  ;;  %v124_v59 = vld [vmem:[%s4341_s2 + $0x2e8] sm:$0xff]  ;;  %v155_v61 = vld [vmem:[%s4341_s2 + $0x3e0] sm:$0xff]  ;;  %v2806_v63 = vpack.c.bf16 %v106_v54, %v105_v53 }
  0x28   :  { %2821 = vmatprep.subr.bf16.mxu1 %v2820_v1  ;;  %v156_v62 = vld [vmem:[%s4341_s2 + $0x3e8] sm:$0xff]  ;;  %v2838_v0 = vpack.c.bf16 %v138_v57, %v137_v55  ;;  %v2808_v1 = vpack.c.bf16 %v124_v59, %v123_v58  ;;  %v107_v2 = vld [vmem:[%s4341_s2 + $0x260] sm:$0xff]  ;;  %v158_v11 = vld [vmem:[%s4341_s2 + $0x3f8] sm:$0xff] }
  0x29   :  { %2791 = vmatpush3.bf16.msra.mxu0 %v2790_v7  ;;  %679 = vmatprep.mubr.f32.mxu1 %v340_v49  ;;  %v108_v3 = vld [vmem:[%s4341_s2 + $0x268] sm:$0xff]  ;;  %v139_v4 = vld [vmem:[%s4341_s2 + $0x360] sm:$0xff]  ;;  %v2840_v5 = vpack.c.bf16 %v156_v62, %v155_v61  ;;  %v125_v7 = vld [vmem:[%s4341_s2 + $0x2f0] sm:$0xff] }
  0x2a   :  { %2793 = vmatprep.subr.bf16.mxu0 %v2792_v9  ;;  %v140_v6 = vld [vmem:[%s4341_s2 + $0x368] sm:$0xff]  ;;  %v157_v9 = vld [vmem:[%s4341_s2 + $0x3f0] sm:$0xff]  ;;  %v2810_v12 = vpack.c.bf16 %v108_v3, %v107_v2  ;;  %v110_v16 = vld [vmem:[%s4341_s2 + $0x278] sm:$0xff] }
  0x2b   :  { %2823 = vmatpush3.bf16.msra.mxu1 %v2822_v8  ;;  %v126_v8 = vld [vmem:[%s4341_s2 + $0x2f8] sm:$0xff]  ;;  %v2842_v13 = vpack.c.bf16 %v140_v6, %v139_v4  ;;  %v109_v15 = vld [vmem:[%s4341_s2 + $0x270] sm:$0xff]  ;;  %v2844_v18 = vpack.c.bf16 %v158_v11, %v157_v9  ;;  %v176_v21 = vld [vmem:[%s4341_s2 + $0x488] sm:$0xff] }
  0x2c   :  { %2825 = vmatprep.subr.bf16.mxu1 %v2824_v14  ;;  %v2812_v14 = vpack.c.bf16 %v126_v8, %v125_v7  ;;  %v141_v17 = vld [vmem:[%s4341_s2 + $0x370] sm:$0xff]  ;;  %v142_v19 = vld [vmem:[%s4341_s2 + $0x378] sm:$0xff]  ;;  %v2814_v24 = vpack.c.bf16 %v110_v16, %v109_v15  ;;  %v159_v25 = vld [vmem:[%s4341_s2 + $0x400] sm:$0xff] }
  0x2d   :  { %2795 = vmatpush3.bf16.msra.mxu0 %v2794_v20  ;;  %v175_v20 = vld [vmem:[%s4341_s2 + $0x480] sm:$0xff]  ;;  %v2846_v26 = vpack.c.bf16 %v142_v19, %v141_v17  ;;  %v160_v28 = vld [vmem:[%s4341_s2 + $0x408] sm:$0xff]  ;;  %v177_v32 = vld [vmem:[%s4341_s2 + $0x490] sm:$0xff] }
  0x2e   :  { %2797 = vmatprep.subr.bf16.mxu0 %v2796_v23  ;;  %v208_v23 = vld [vmem:[%s4341_s2 + $0x588] sm:$0xff]  ;;  %v191_v29 = vld [vmem:[%s4341_s2 + $0x500] sm:$0xff]  ;;  %v178_v34 = vld [vmem:[%s4341_s2 + $0x498] sm:$0xff] }
  0x2f   :  { %2827 = vmatpush3.bf16.msra.mxu1 %v2826_v22  ;;  %v207_v22 = vld [vmem:[%s4341_s2 + $0x580] sm:$0xff]  ;;  %v192_v30 = vld [vmem:[%s4341_s2 + $0x508] sm:$0xff]  ;;  %v28_v39 = vld [vmem:[%s4342_s0 + $0x10] sm:$0xff]  ;;  %v2852_v40 = vpack.c.bf16 %v178_v34, %v177_v32 }
  0x30   :  { %2829 = vmatprep.subr.bf16.mxu1 %v2828_v27  ;;  %v2848_v27 = vpack.c.bf16 %v176_v21, %v175_v20  ;;  %v2880_v31 = vpack.c.bf16 %v208_v23, %v207_v22  ;;  %v2882_v38 = vpack.c.bf16 %v192_v30, %v191_v29  ;;  %v161_v41 = vld [vmem:[%s4341_s2 + $0x410] sm:$0xff]  ;;  %v3665_v45 = vrot.slane %v28_v39, %v3356_v10  ;;  %v194_v48 = vld [vmem:[%s4341_s2 + $0x518] sm:$0xff]  ;;  %v179_v49 = vld [vmem:[%s4341_s2 + $0x4a0] sm:$0xff] }
  0x31   :  { %2799 = vmatpush3.bf16.msra.mxu0 %v2798_v35  ;;  %v209_v35 = vld [vmem:[%s4341_s2 + $0x590] sm:$0xff]  ;;  %v341_v46 = vcombine.high %v28_v39, %v28_v39  ;;  %v163_v57 = vld [vmem:[%s4341_s2 + $0x420] sm:$0xff]  ;;  %v164_v58 = vld [vmem:[%s4341_s2 + $0x428] sm:$0xff] }
  0x32   :  { %2801 = vmatprep.subr.bf16.mxu0 %v2800_v37  ;;  %v2850_v37 = vpack.c.bf16 %v160_v28, %v159_v25  ;;  %v193_v44 = vld [vmem:[%s4341_s2 + $0x510] sm:$0xff]  ;;  %v356_v53 = vcombine.high %v3665_v45, %v3665_v45  ;;  %v195_v59 = vld [vmem:[%s4341_s2 + $0x520] sm:$0xff]  ;;  %v196_v62 = vld [vmem:[%s4341_s2 + $0x528] sm:$0xff]  ;;  %v2858_v3 = vpack.c.bf16 %v164_v58, %v163_v57 }
  0x33   :  { %2831 = vmatpush3.bf16.msra.mxu1 %v2830_v36  ;;  %v210_v36 = vld [vmem:[%s4341_s2 + $0x598] sm:$0xff]  ;;  %v3686_v54 = vrot.slane %v341_v46, %v3356_v10  ;;  %v2890_v4 = vpack.c.bf16 %v196_v62, %v195_v59  ;;  %v165_v6 = vld [vmem:[%s4341_s2 + $0x430] sm:$0xff]  ;;  %v216_v15 = vld [vmem:[%s4341_s2 + $0x5c8] sm:$0xff] }
  0x34   :  { %2833 = vmatprep.subr.bf16.mxu1 %v2832_v43  ;;  %v162_v43 = vld [vmem:[%s4341_s2 + $0x418] sm:$0xff]  ;;  %v2884_v47 = vpack.c.bf16 %v210_v36, %v209_v35  ;;  %v197_v8 = vld [vmem:[%s4341_s2 + $0x530] sm:$0xff]  ;;  %v167_v19 = vld [vmem:[%s4341_s2 + $0x440] sm:$0xff] }
  0x35   :  { %2803 = vmatpush3.bf16.msra.mxu0 %v2802_v50  ;;  %v180_v50 = vld [vmem:[%s4341_s2 + $0x4a8] sm:$0xff]  ;;  %v2854_v55 = vpack.c.bf16 %v162_v43, %v161_v41  ;;  %v214_v2 = vld [vmem:[%s4341_s2 + $0x5b8] sm:$0xff]  ;;  %v199_v21 = vld [vmem:[%s4341_s2 + $0x540] sm:$0xff] }
  0x36   :  { %2805 = vmatprep.subr.bf16.mxu0 %v2804_v52  ;;  %v212_v52 = vld [vmem:[%s4341_s2 + $0x5a8] sm:$0xff]  ;;  %v166_v7 = vld [vmem:[%s4341_s2 + $0x438] sm:$0xff]  ;;  %v201_v34 = vld [vmem:[%s4341_s2 + $0x550] sm:$0xff] }
  0x37   :  { %2835 = vmatpush3.bf16.msra.mxu1 %v2834_v51  ;;  %v211_v51 = vld [vmem:[%s4341_s2 + $0x5a0] sm:$0xff]  ;;  %v198_v11 = vld [vmem:[%s4341_s2 + $0x538] sm:$0xff]  ;;  %v2862_v16 = vpack.c.bf16 %v166_v7, %v165_v6  ;;  %v168_v20 = vld [vmem:[%s4341_s2 + $0x448] sm:$0xff] }
  0x38   :  { %2837 = vmatprep.subr.bf16.mxu1 %v2836_v56  ;;  %v2856_v56 = vpack.c.bf16 %v180_v50, %v179_v49  ;;  %v2888_v61 = vpack.c.bf16 %v212_v52, %v211_v51  ;;  %v2894_v17 = vpack.c.bf16 %v198_v11, %v197_v8  ;;  %v200_v23 = vld [vmem:[%s4341_s2 + $0x548] sm:$0xff]  ;;  %v186_v25 = vld [vmem:[%s4341_s2 + $0x4d8] sm:$0xff]  ;;  %v2866_v28 = vpack.c.bf16 %v168_v20, %v167_v19  ;;  %v219_v39 = vld [vmem:[%s4341_s2 + $0x5e0] sm:$0xff] }
  0x39   :  { %2807 = vmatpush3.bf16.msra.mxu0 %v2806_v63  ;;  %v181_v63 = vld [vmem:[%s4341_s2 + $0x4b0] sm:$0xff]  ;;  %v2898_v29 = vpack.c.bf16 %v200_v23, %v199_v21  ;;  %v170_v32 = vld [vmem:[%s4341_s2 + $0x458] sm:$0xff]  ;;  %v171_v46 = vld [vmem:[%s4341_s2 + $0x460] sm:$0xff] }
  0x3a   :  { %2809 = vmatprep.subr.bf16.mxu0 %v2808_v1  ;;  %v213_v1 = vld [vmem:[%s4341_s2 + $0x5b0] sm:$0xff]  ;;  %v202_v36 = vld [vmem:[%s4341_s2 + $0x558] sm:$0xff]  ;;  %v204_v50 = vld [vmem:[%s4341_s2 + $0x568] sm:$0xff] }
  0x3b   :  { %2839 = vmatpush3.bf16.msra.mxu1 %v2838_v0  ;;  %v182_v0 = vld [vmem:[%s4341_s2 + $0x4b8] sm:$0xff]  ;;  %v2892_v9 = vpack.c.bf16 %v214_v2, %v213_v1  ;;  %v2902_v43 = vpack.c.bf16 %v202_v36, %v201_v34  ;;  %v189_v51 = vld [vmem:[%s4341_s2 + $0x4f0] sm:$0xff]  ;;  %v240_v1 = vld [vmem:[%s4341_s2 + $0x688] sm:$0xff] }
  0x3c   :  { %2841 = vmatprep.subr.bf16.mxu1 %v2840_v5  ;;  %v2860_v5 = vpack.c.bf16 %v182_v0, %v181_v63  ;;  %v190_v52 = vld [vmem:[%s4341_s2 + $0x4f8] sm:$0xff]  ;;  %v173_v59 = vld [vmem:[%s4341_s2 + $0x470] sm:$0xff]  ;;  %v239_v0 = vld [vmem:[%s4341_s2 + $0x680] sm:$0xff] }
  0x3d   :  { %2811 = vmatpush3.bf16.msra.mxu0 %v2810_v12  ;;  %v183_v12 = vld [vmem:[%s4341_s2 + $0x4c0] sm:$0xff]  ;;  %v2876_v58 = vpack.c.bf16 %v190_v52, %v189_v51  ;;  %v206_v63 = vld [vmem:[%s4341_s2 + $0x578] sm:$0xff]  ;;  %v2912_v7 = vpack.c.bf16 %v240_v1, %v239_v0  ;;  %v225_v23 = vld [vmem:[%s4341_s2 + $0x610] sm:$0xff] }
  0x3e   :  { %2813 = vmatprep.subr.bf16.mxu0 %v2812_v14  ;;  %v215_v14 = vld [vmem:[%s4341_s2 + $0x5c0] sm:$0xff]  ;;  %v261_v51 = vld [vmem:[%s4341_s2 + $0x730] sm:$0xff]  ;;  %v264_v1 = vld [vmem:[%s4341_s2 + $0x748] sm:$0xff] }
  0x3f   :  { %2843 = vmatpush3.bf16.msra.mxu1 %v2842_v13  ;;  %v184_v13 = vld [vmem:[%s4341_s2 + $0x4c8] sm:$0xff]  ;;  %v2896_v22 = vpack.c.bf16 %v216_v15, %v215_v14  ;;  %v271_v2 = vld [vmem:[%s4341_s2 + $0x780] sm:$0xff]  ;;  %v241_v14 = vld [vmem:[%s4341_s2 + $0x690] sm:$0xff] }
  0x40   :  { %2845 = vmatprep.subr.bf16.mxu1 %v2844_v18  ;;  %v2864_v18 = vpack.c.bf16 %v184_v13, %v183_v12  ;;  %v223_v8 = vld [vmem:[%s4341_s2 + $0x600] sm:$0xff]  ;;  %v256_v13 = vld [vmem:[%s4341_s2 + $0x708] sm:$0xff]  ;;  %v242_v15 = vld [vmem:[%s4341_s2 + $0x698] sm:$0xff] }
  0x41   :  { %2815 = vmatpush3.bf16.msra.mxu0 %v2814_v24  ;;  %v185_v24 = vld [vmem:[%s4341_s2 + $0x4d0] sm:$0xff]  ;;  %v255_v11 = vld [vmem:[%s4341_s2 + $0x700] sm:$0xff]  ;;  %vm4057_vm3 = vmpackc.low %vm401_vm1, %vm3167_vm2 }
  0x42   :  { %2849 = vmatprep.subr.bf16.mxu0 %v2848_v27  ;;  %v218_v27 = vld [vmem:[%s4341_s2 + $0x5d8] sm:$0xff]  ;;  %v2868_v30 = vpack.c.bf16 %v186_v25, %v185_v24  ;;  %v2946_v21 = vpack.c.bf16 %v256_v13, %v255_v11  ;;  %v257_v25 = vld [vmem:[%s4341_s2 + $0x710] sm:$0xff]  ;;  %vm2991_vm7 = vmpackc.low %vm1055_vm6, %vm3167_vm2 }
  0x43   :  { %2847 = vmatpush3.bf16.msra.mxu1 %v2846_v26  ;;  %v217_v26 = vld [vmem:[%s4341_s2 + $0x5d0] sm:$0xff]  ;;  %v226_v24 = vld [vmem:[%s4341_s2 + $0x618] sm:$0xff]  ;;  %vm4143_vm10 = vmpackc.low %vm1189_vm9, %vm1189_vm9 }
  0x44   :  { %2881 = vmatprep.subr.bf16.mxu1 %v2880_v31  ;;  %610 = vmatmul.mubr.f32.vlgmr.msra.gmra.mrb[2].mxu0 %v3523_v33  ;;  %v2886_v33 = vpack.c.bf16 %v194_v48, %v193_v44  ;;  %v169_v31 = vld [vmem:[%s4341_s2 + $0x450] sm:$0xff]  ;;  %v2900_v35 = vpack.c.bf16 %v218_v27, %v217_v26  ;;  %v203_v48 = vld [vmem:[%s4341_s2 + $0x560] sm:$0xff]  ;;  %v258_v26 = vld [vmem:[%s4341_s2 + $0x718] sm:$0xff]  ;;  %v2918_v34 = vpack.c.bf16 %v226_v24, %v225_v23 }
  0x45   :  { %2851 = vmatpush3.bf16.msra.mxu0 %v2850_v37  ;;  %749 = vmatprep.mubr.f32.mxu0 %v356_v53  ;;  %v187_v37 = vld [vmem:[%s4341_s2 + $0x4e0] sm:$0xff]  ;;  %v2870_v41 = vpack.c.bf16 %v170_v32, %v169_v31  ;;  %v221_v53 = vld [vmem:[%s4341_s2 + $0x5f0] sm:$0xff]  ;;  %v2906_v57 = vpack.c.bf16 %v204_v50, %v203_v48  ;;  %v276_v31 = vld [vmem:[%s4341_s2 + $0x7a8] sm:$0xff] }
  0x46   :  { %680 = vmatmul.mubr.f32.vlgmr.msra.gmra.mrb[2].mxu1 %v3537_v42  ;;  %2853 = vmatprep.subr.bf16.mxu0 %v2852_v40  ;;  %v357_v42 = vcombine.high %v3686_v54, %v3686_v54  ;;  %v220_v40 = vld [vmem:[%s4341_s2 + $0x5e8] sm:$0xff]  ;;  %v243_v27 = vld [vmem:[%s4341_s2 + $0x6a0] sm:$0xff]  ;;  %v230_v50 = vld [vmem:[%s4341_s2 + $0x638] sm:$0xff] }
  0x47   :  { %2883 = vmatpush3.bf16.msra.mxu1 %v2882_v38  ;;  %v188_v38 = vld [vmem:[%s4341_s2 + $0x4e8] sm:$0xff]  ;;  %v2904_v49 = vpack.c.bf16 %v220_v40, %v219_v39  ;;  %v245_v40 = vld [vmem:[%s4341_s2 + $0x6b0] sm:$0xff]  ;;  %v234_v11 = vld [vmem:[%s4341_s2 + $0x658] sm:$0xff] }
  0x48   :  { %2885 = vmatprep.subr.bf16.mxu1 %v2884_v47  ;;  %819 = vmatprep.mubr.f32.mxu1 %v357_v42  ;;  %v2872_v44 = vpack.c.bf16 %v188_v38, %v187_v37  ;;  %v172_v47 = vld [vmem:[%s4341_s2 + $0x468] sm:$0xff]  ;;  %v174_v42 = vld [vmem:[%s4341_s2 + $0x478] sm:$0xff]  ;;  %v259_v38 = vld [vmem:[%s4341_s2 + $0x720] sm:$0xff] }
  0x49   :  { %2855 = vmatpush3.bf16.msra.mxu0 %v2854_v55  ;;  %v222_v55 = vld [vmem:[%s4341_s2 + $0x5f8] sm:$0xff]  ;;  %v228_v37 = vld [vmem:[%s4341_s2 + $0x628] sm:$0xff]  ;;  %v235_v24 = vld [vmem:[%s4341_s2 + $0x660] sm:$0xff] }
  0x4a   :  { %2857 = vmatprep.subr.bf16.mxu0 %v2856_v56  ;;  %v29_v56 = vld [vmem:[%s4342_s0 + $0x18] sm:$0xff]  ;;  %v2908_v62 = vpack.c.bf16 %v222_v55, %v221_v53  ;;  %v247_v55 = vld [vmem:[%s4341_s2 + $0x6c0] sm:$0xff] }
  0x4b   :  { %2887 = vmatpush3.bf16.msra.mxu1 %v2886_v33  ;;  %v2874_v33 = vpack.c.bf16 %v172_v47, %v171_v46  ;;  %v262_v53 = vld [vmem:[%s4341_s2 + $0x738] sm:$0xff] }
  0x4c   :  { %2889 = vmatprep.subr.bf16.mxu1 %v2888_v61  ;;  %v205_v61 = vld [vmem:[%s4341_s2 + $0x570] sm:$0xff] }
  0x4d   :  { %2859 = vmatpush3.bf16.msra.mxu0 %v2858_v3  ;;  %v272_v3 = vld [vmem:[%s4341_s2 + $0x788] sm:$0xff]  ;;  %v2910_v6 = vpack.c.bf16 %v206_v63, %v205_v61  ;;  %v231_v61 = vld [vmem:[%s4341_s2 + $0x640] sm:$0xff] }
  0x4e   :  { %2861 = vmatprep.subr.bf16.mxu0 %v2860_v5  ;;  %v2878_v5 = vpack.c.bf16 %v174_v42, %v173_v59  ;;  %v2944_v12 = vpack.c.bf16 %v272_v3, %v271_v2  ;;  %v2958_v59 = vpack.c.bf16 %v262_v53, %v261_v51  ;;  %v263_v63 = vld [vmem:[%s4341_s2 + $0x740] sm:$0xff]  ;;  %v249_v2 = vld [vmem:[%s4341_s2 + $0x6d0] sm:$0xff]  ;;  %v250_v3 = vld [vmem:[%s4341_s2 + $0x6d8] sm:$0xff] }
  0x4f   :  { %2891 = vmatpush3.bf16.msra.mxu1 %v2890_v4  ;;  %v358_v4 = vcombine.high %v29_v56, %v29_v56  ;;  %v292_v51 = vld [vmem:[%s4341_s2 + $0x828] sm:$0xff] }
  0x50   :  { %2893 = vmatprep.subr.bf16.mxu1 %v2892_v9  ;;  %v224_v9 = vld [vmem:[%s4341_s2 + $0x608] sm:$0xff] }
  0x51   :  { %2863 = vmatpush3.bf16.msra.mxu0 %v2862_v16  ;;  %v3857_v16 = vrot.slane %v29_v56, %v3356_v10  ;;  %v3866_v19 = vrot.slane %v358_v4, %v3356_v10  ;;  %v2914_v20 = vpack.c.bf16 %v224_v9, %v223_v8  ;;  %v279_v56 = vld [vmem:[%s4341_s2 + $0x7c0] sm:$0xff]  ;;  %v281_v4 = vld [vmem:[%s4341_s2 + $0x7d0] sm:$0xff]  ;;  %v2932_v8 = vpack.c.bf16 %v250_v3, %v249_v2 }
  0x52   :  { %2865 = vmatprep.subr.bf16.mxu0 %v2864_v18  ;;  %v274_v18 = vld [vmem:[%s4341_s2 + $0x798] sm:$0xff]  ;;  %v233_v9 = vld [vmem:[%s4341_s2 + $0x650] sm:$0xff] }
  0x53   :  { %2895 = vmatpush3.bf16.msra.mxu1 %v2894_v17  ;;  %v273_v17 = vld [vmem:[%s4341_s2 + $0x790] sm:$0xff]  ;;  %v374_v32 = vcombine.high %v3866_v19, %v3866_v19 }
  0x54   :  { %2897 = vmatprep.subr.bf16.mxu1 %v2896_v22  ;;  %v2916_v22 = vpack.c.bf16 %v242_v15, %v241_v14  ;;  %v2948_v10 = vpack.c.bf16 %v274_v18, %v273_v17  ;;  %v266_v14 = vld [vmem:[%s4341_s2 + $0x758] sm:$0xff]  ;;  %v251_v15 = vld [vmem:[%s4341_s2 + $0x6e0] sm:$0xff]  ;;  %v252_v17 = vld [vmem:[%s4341_s2 + $0x6e8] sm:$0xff] }
  0x55   :  { %2867 = vmatpush3.bf16.msra.mxu0 %v2866_v28  ;;  %v244_v28 = vld [vmem:[%s4341_s2 + $0x6a8] sm:$0xff]  ;;  %v283_v18 = vld [vmem:[%s4341_s2 + $0x7e0] sm:$0xff]  ;;  %v2936_v23 = vpack.c.bf16 %v252_v17, %v251_v15 }
  0x56   :  { %2869 = vmatprep.subr.bf16.mxu0 %v2868_v30  ;;  %v275_v30 = vld [vmem:[%s4341_s2 + $0x7a0] sm:$0xff]  ;;  %v2920_v36 = vpack.c.bf16 %v244_v28, %v243_v27  ;;  %v268_v27 = vld [vmem:[%s4341_s2 + $0x768] sm:$0xff]  ;;  %v253_v28 = vld [vmem:[%s4341_s2 + $0x6f0] sm:$0xff] }
  0x57   :  { %2899 = vmatpush3.bf16.msra.mxu1 %v2898_v29  ;;  %v373_v29 = vcombine.high %v3857_v16, %v3857_v16  ;;  %v2952_v39 = vpack.c.bf16 %v276_v31, %v275_v30  ;;  %v285_v30 = vld [vmem:[%s4341_s2 + $0x7f0] sm:$0xff]  ;;  %v286_v31 = vld [vmem:[%s4341_s2 + $0x7f8] sm:$0xff] }
  0x58   :  { %2901 = vmatprep.subr.bf16.mxu1 %v2900_v35  ;;  %v2950_v35 = vpack.c.bf16 %v258_v26, %v257_v25  ;;  %v236_v25 = vld [vmem:[%s4341_s2 + $0x668] sm:$0xff] }
  0x59   :  { %2871 = vmatpush3.bf16.msra.mxu0 %v2870_v41  ;;  %v246_v41 = vld [vmem:[%s4341_s2 + $0x6b8] sm:$0xff] }
  0x5a   :  { %2873 = vmatprep.subr.bf16.mxu0 %v2872_v44  ;;  %v278_v44 = vld [vmem:[%s4341_s2 + $0x7b8] sm:$0xff]  ;;  %v2924_v48 = vpack.c.bf16 %v246_v41, %v245_v40  ;;  %v287_v41 = vld [vmem:[%s4341_s2 + $0x800] sm:$0xff] }
  0x5b   :  { %2903 = vmatpush3.bf16.msra.mxu1 %v2902_v43  ;;  %v277_v43 = vld [vmem:[%s4341_s2 + $0x7b0] sm:$0xff] }
  0x5c   :  { %2905 = vmatprep.subr.bf16.mxu1 %v2904_v49  ;;  %v229_v49 = vld [vmem:[%s4341_s2 + $0x630] sm:$0xff]  ;;  %v2956_v52 = vpack.c.bf16 %v278_v44, %v277_v43  ;;  %v288_v43 = vld [vmem:[%s4341_s2 + $0x808] sm:$0xff] }
  0x5d   :  { %2875 = vmatpush3.bf16.msra.mxu0 %v2874_v33  ;;  %v248_v33 = vld [vmem:[%s4341_s2 + $0x6c8] sm:$0xff]  ;;  %v2977_v44 = vpack.c.bf16 %v288_v43, %v287_v41  ;;  %v1180_v43 = vld [vmem:[%s4345_s5 + $0x10] sm:$0xff] }
  0x5e   :  { %2877 = vmatprep.subr.bf16.mxu0 %v2876_v58  ;;  %v2926_v58 = vpack.c.bf16 %v230_v50, %v229_v49  ;;  %v2928_v42 = vpack.c.bf16 %v248_v33, %v247_v55  ;;  %v291_v50 = vld [vmem:[%s4341_s2 + $0x820] sm:$0xff]  ;;  %v1179_v41 = vld [vmem:[%s4345_s5 + $0x8] sm:$0xff]  ;;  %v1879_v33 = vld [vmem:[%s4347_s6 + $0x50] sm:$0x1] }
  0x5f   :  { %2907 = vmatpush3.bf16.msra.mxu1 %v2906_v57  ;;  %v280_v57 = vld [vmem:[%s4341_s2 + $0x7c8] sm:$0xff]  ;;  %v2983_v53 = vpack.c.bf16 %v292_v51, %v291_v50  ;;  %v1184_v51 = vld [vmem:[%s4345_s5 + $0x30] sm:$0xff] }
  0x60   :  { %2909 = vmatprep.subr.bf16.mxu1 %v2908_v62  ;;  %v232_v62 = vld [vmem:[%s4341_s2 + $0x648] sm:$0xff]  ;;  %v2960_v0 = vpack.c.bf16 %v280_v57, %v279_v56  ;;  %v2091_v56 = vld.sshfl [vmem:[%s4342_s0 + $0x20] sm:$0x3 pattern:$0x76325410] }
  0x61   :  { %2879 = vmatpush3.bf16.msra.mxu0 %v2878_v5  ;;  %v282_v5 = vld [vmem:[%s4341_s2 + $0x7d8] sm:$0xff] }
  0x62   :  { %2913 = vmatprep.subr.bf16.mxu0 %v2912_v7  ;;  %v2962_v7 = vpack.c.bf16 %v264_v1, %v263_v63  ;;  %v2964_v13 = vpack.c.bf16 %v282_v5, %v281_v4 }
  0x63   :  { %2911 = vmatpush3.bf16.msra.mxu1 %v2910_v6  ;;  %v2930_v6 = vpack.c.bf16 %v232_v62, %v231_v61 }
  0x64   :  { %2945 = vmatprep.subr.bf16.mxu1 %v2944_v12  ;;  %750 = vmatmul.mubr.f32.vlgmr.msra.gmra.mrb[4].mxu0 %v3665_v45  ;;  %v227_v45 = vld [vmem:[%s4341_s2 + $0x620] sm:$0xff]  ;;  %v265_v12 = vld [vmem:[%s4341_s2 + $0x750] sm:$0xff] }
  0x65   :  { %2915 = vmatpush3.bf16.msra.mxu0 %v2914_v20  ;;  %889 = vmatprep.mubr.f32.mxu0 %v373_v29  ;;  %v2922_v46 = vpack.c.bf16 %v228_v37, %v227_v45  ;;  %v284_v20 = vld [vmem:[%s4341_s2 + $0x7e8] sm:$0xff]  ;;  %v254_v29 = vld [vmem:[%s4341_s2 + $0x6f8] sm:$0xff]  ;;  %v2972_v37 = vpack.c.bf16 %v286_v31, %v285_v30 }
  0x66   :  { %820 = vmatmul.mubr.f32.vlgmr.msra.gmra.mrb[4].mxu1 %v3686_v54  ;;  %2917 = vmatprep.subr.bf16.mxu0 %v2916_v22  ;;  %v260_v54 = vld [vmem:[%s4341_s2 + $0x728] sm:$0xff]  ;;  %v2966_v22 = vpack.c.bf16 %v266_v14, %v265_v12  ;;  %v2968_v26 = vpack.c.bf16 %v284_v20, %v283_v18  ;;  %v238_v45 = vld [vmem:[%s4341_s2 + $0x678] sm:$0xff] }
  0x67   :  { %2947 = vmatpush3.bf16.msra.mxu1 %v2946_v21  ;;  %959 = vmatprep.mubr.f32.mxu1 %v374_v32  ;;  %v2954_v47 = vpack.c.bf16 %v260_v54, %v259_v38  ;;  %v2934_v21 = vpack.c.bf16 %v234_v11, %v233_v9  ;;  %v2938_v32 = vpack.c.bf16 %v236_v25, %v235_v24  ;;  %v269_v38 = vld [vmem:[%s4341_s2 + $0x770] sm:$0xff] }
  0x68   :  { %2949 = vmatprep.subr.bf16.mxu1 %v2948_v10  ;;  %v267_v10 = vld [vmem:[%s4341_s2 + $0x760] sm:$0xff] }
  0x69   :  { %2919 = vmatpush3.bf16.msra.mxu0 %v2918_v34  ;;  %v2970_v34 = vpack.c.bf16 %v268_v27, %v267_v10 }
  0x6a   :  { %2921 = vmatprep.subr.bf16.mxu0 %v2920_v36  ;;  %v237_v36 = vld [vmem:[%s4341_s2 + $0x670] sm:$0xff] }
  0x6b   :  { %2951 = vmatpush3.bf16.msra.mxu1 %v2950_v35  ;;  %v2940_v35 = vpack.c.bf16 %v254_v29, %v253_v28  ;;  %v2942_v54 = vpack.c.bf16 %v238_v45, %v237_v36 }
  0x6c   :  { %2953 = vmatprep.subr.bf16.mxu1 %v2952_v39  ;;  %v270_v39 = vld [vmem:[%s4341_s2 + $0x778] sm:$0xff] }
  0x6d   :  { %2923 = vmatpush3.bf16.msra.mxu0 %v2922_v46  ;;  %v2974_v40 = vpack.c.bf16 %v270_v39, %v269_v38  ;;  %v3164_v46 = vmov 0.0|0.0   ;;  %v1049_v38 = vld [vmem:[%s4344_s4] sm:$0xff]  ;;  %v1050_v39 = vld [vmem:[%s4344_s4 + $0x8] sm:$0x1] }
  0x6e   :  { %2925 = vmatprep.subr.bf16.mxu0 %v2924_v48  ;;  %v290_v48 = vld [vmem:[%s4341_s2 + $0x818] sm:$0xff] }
  0x6f   :  { %2955 = vmatpush3.bf16.msra.mxu1 %v2954_v47  ;;  %v289_v47 = vld [vmem:[%s4341_s2 + $0x810] sm:$0xff] }
  0x70   :  { %2957 = vmatprep.subr.bf16.mxu1 %v2956_v52  ;;  %v2980_v49 = vpack.c.bf16 %v290_v48, %v289_v47  ;;  %v3166_v52 = vmov 0.0   ;;  %v1182_v48 = vld [vmem:[%s4345_s5 + $0x20] sm:$0xff] }
  0x71   :  { %2927 = vmatpush3.bf16.msra.mxu0 %v2926_v58  ;;  %v2090_v58 = vld [vmem:[%s4343_s3] ss:$0 sm:$0xff] }
  0x72   :  { %2929 = vmatprep.subr.bf16.mxu0 %v2928_v42 }
  0x73   :  { %2959 = vmatpush3.bf16.msra.mxu1 %v2958_v59 }
  0x74   :  { %2961 = vmatprep.subr.bf16.mxu1 %v2960_v0 }
  0x75   :  { %2931 = vmatpush3.bf16.msra.mxu0 %v2930_v6 }
  0x76   :  { %2933 = vmatprep.subr.bf16.mxu0 %v2932_v8 }
  0x77   :  { %2963 = vmatpush3.bf16.msra.mxu1 %v2962_v7 }
  0x78   :  { %2965 = vmatprep.subr.bf16.mxu1 %v2964_v13 }
  0x79   :  { %2935 = vmatpush3.bf16.msra.mxu0 %v2934_v21 }
  0x7a   :  { %2937 = vmatprep.subr.bf16.mxu0 %v2936_v23 }
  0x7b   :  { %2967 = vmatpush3.bf16.msra.mxu1 %v2966_v22 }
  0x7c   :  { %2969 = vmatprep.subr.bf16.mxu1 %v2968_v26 }
  0x7d   :  { %2939 = vmatpush3.bf16.msra.mxu0 %v2938_v32 }
  0x7e   :  { %2941 = vmatprep.subr.bf16.mxu0 %v2940_v35 }
  0x7f   :  { %2971 = vmatpush3.bf16.msra.mxu1 %v2970_v34 }
  0x80   :  { %2973 = vmatprep.subr.bf16.mxu1 %v2972_v37 }
  0x81   :  { %2943 = vmatpush3.bf16.msra.mxu0 %v2942_v54  ;;  %v2990_v54 = vpack.c.bf16 %v1050_v39, %v1049_v38 }
  0x82   :  { %2976 = vmatprep.subr.bf16.mxu0 %v3164_v46 }
  0x83   :  { %2975 = vmatpush3.bf16.msra.mxu1 %v2974_v40  ;;  %v1178_v40 = vld [vmem:[%s4345_s5] sm:$0xff] }
  0x84   :  { %2989 = vmatprep.subr.bf16.mxu1 %v3164_v46  ;;  %890 = vmatmul.mubr.f32.vlgmr.msra.gmra.mrb[6].mxu0 %v3857_v16  ;;  %v293_v16 = vld [vmem:[%s4341_s2 + $0x830] sm:$0xff] }
  0x85   :  { %2978 = vmatpush3.bf16.msra.mxu0 %v2977_v44  ;;  %2542 = vmatprep.mubr.msk.f32.mxu0 %vm3165_vm0, %v3166_v52  ;;  %v2993_v44 = vpack.c.bf16 %v1179_v41, %v1178_v40 }
  0x86   :  { %960 = vmatmul.mubr.f32.vlgmr.msra.gmra.mrb[6].mxu1 %v3866_v19  ;;  %2979 = vmatprep.subr.bf16.mxu0 %v3164_v46  ;;  %v294_v19 = vld [vmem:[%s4341_s2 + $0x838] sm:$0x3] }
  0x87   :  { %2549 = vmatprep.mubr.msk.f32.mxu1 %vm3165_vm0, %v3166_v52  ;;  %v2986_v55 = vpack.c.bf16 %v294_v19, %v293_v16  ;;  %2992 = vmatpush3.bf16.msk.msra.mxu1 %vm2991_vm7, %v2990_v54  ;;  %v1185_v52 = vld [vmem:[%s4345_s5 + $0x38] sm:$0xff] }
  0x88   :  { %2994 = vmatprep.subr.bf16.mxu1 %v2993_v44 }
  0x89   :  { %2981 = vmatpush3.bf16.msra.mxu0 %v2980_v49  ;;  %v1183_v49 = vld [vmem:[%s4345_s5 + $0x28] sm:$0xff] }
  0x8a   :  { %2982 = vmatprep.subr.bf16.mxu0 %v3164_v46  ;;  %v3001_v50 = vpack.c.bf16 %v1183_v49, %v1182_v48 }
  0x8d   :  { %2984 = vmatpush3.bf16.msra.mxu0 %v2983_v53  ;;  %v3005_v53 = vpack.c.bf16 %v1185_v52, %v1184_v51 }
  0x8e   :  { %2985 = vmatprep.subr.bf16.mxu0 %v3164_v46  ;;  %v1181_v46 = vld [vmem:[%s4345_s5 + $0x18] sm:$0xff] }
  0x8f   :  { %v2997_v47 = vpack.c.bf16 %v1181_v46, %v1180_v43 }
  0x91   :  { %2988 = vmatpush3.bf16.msk.msra.mxu0 %vm4057_vm3, %v2986_v55 }
  0x92   :  { %3014 = vmatprep.subr.bf16.mxu0 %v2993_v44 }
  0x94   :  { %2543 = vmatmul.mubr.msk.f32.vlgmr.msra.gmra.mrb[8].mxu0 %vm398_vm4, %v2091_v56 }
  0x95   :  { %3016 = vmatpush3.bf16.msra.mxu0 %v2993_v44 }
  0x96   :  { %3018 = vmatprep.subr.bf16.mxu0 %v2997_v47 }
  0x99   :  { %3020 = vmatpush3.bf16.msra.mxu0 %v2997_v47 }
  0x9a   :  { %3022 = vmatprep.subr.bf16.mxu0 %v3001_v50 }
  0x9d   :  { %3024 = vmatpush3.bf16.msra.mxu0 %v3001_v50 }
  0x9e   :  { %3026 = vmatprep.subr.bf16.mxu0 %v3005_v53 }
  0xa1   :  { %3028 = vmatpush3.bf16.msra.mxu0 %v3005_v53 }
  0xf7   :  { %v2174_v57 = vpop.f32.mrb[0].mxu0 }
  0xf8   :  { %v2175_v59 = vpop.f32.mrb[1].mxu0 }
  0xf9   :  { %v2209_v42 = vpop.f32.mrb[0].mxu1  ;;  %v2176_v61 = vadd.f32 %v2175_v59, %v2174_v57  ;;  %v1186_v57 = vld [vmem:[%s4345_s5 + $0x40] sm:$0xff] }
  0xfa   :  { %v2210_v62 = vpop.f32.mrb[1].mxu1 }
  0xfb   :  { %v2211_v63 = vadd.f32 %v2210_v62, %v2209_v42  ;;  %v472_v0 = vadd.f32 %v2176_v61, %v2090_v58  ;;  %v1187_v58 = vld [vmem:[%s4345_s5 + $0x48] sm:$0xff]  ;;  %v1188_v42 = vld [vmem:[%s4345_s5 + $0x50] sm:$0x1]  ;;  %v3168_v61 = vmov 1966171168  }
  0xfc   :  { %v3009_v59 = vpack.c.bf16 %v1187_v58, %v1186_v57  ;;  %v1139_v62 = vunpack.c.l.s4 %v3168_v61 }
  0xfd   :  { %v542_v1 = vadd.f32 %v2211_v63, %v472_v0 }
  0xfe   :  { %3030 = vmatprep.subr.bf16.mxu0 %v3009_v59  ;;  %v1140_v63 = vunpack.c.0.s8 %v1139_v62 }
  0xff   :  { %3032 = vmatpush3.bf16.msra.mxu0 %v3009_v59 }
 0x100   :  { %2600 = vmatprep.subr.msk.mxu0 %vm1055_vm6, %v1188_v42  ;;  %v1143_v0 = vsub.s32 %v1140_v63, %v3326_v60 }
 0x103   :  { %2601 = vmatpush3.msk.msra.mxu0 %vm1055_vm6, %v1188_v42 }
 0x117   :  { %v2244_v2 = vpop.f32.mrb[2].mxu0 }
 0x118   :  { %v2245_v3 = vpop.f32.mrb[3].mxu0 }
 0x119   :  { %v2279_v4 = vpop.f32.mrb[2].mxu1  ;;  %v2246_v5 = vadd.f32 %v2245_v3, %v2244_v2  ;;  %v1162_v3 = vsub.s32 0, %v3326_v60  ;;  %v1132_v60 = vld [vmem:[%s4346_s1 + $0x18] sm:$0x3] }
 0x11a   :  { %v2280_v6 = vpop.f32.mrb[3].mxu1 }
 0x11b   :  { %v2281_v7 = vadd.f32 %v2280_v6, %v2279_v4  ;;  %v612_v8 = vadd.f32 %v2246_v5, %v542_v1 }
 0x11d   :  { %v682_v9 = vadd.f32 %v2281_v7, %v612_v8  ;;  %v1129_v7 = vld [vmem:[%s4346_s1] sm:$0xff]  ;;  %v1130_v8 = vld [vmem:[%s4346_s1 + $0x8] sm:$0xff] }
 0x137   :  { %v2314_v11 = vpop.f32.mrb[4].mxu0 }
 0x138   :  { %v2315_v12 = vpop.f32.mrb[5].mxu0 }
 0x139   :  { %v2349_v13 = vpop.f32.mrb[4].mxu1  ;;  %v2316_v14 = vadd.f32 %v2315_v12, %v2314_v11  ;;  %v1131_v12 = vld [vmem:[%s4346_s1 + $0x10] sm:$0xff] }
 0x13a   :  { %v2350_v15 = vpop.f32.mrb[5].mxu1 }
 0x13b   :  { %v2351_v17 = vadd.f32 %v2350_v15, %v2349_v13  ;;  %v752_v18 = vadd.f32 %v2316_v14, %v682_v9  ;;  %v1133_v13 = vld [vmem:[%s4346_s1 + $0x20] sm:$0xff]  ;;  %v1134_v14 = vld [vmem:[%s4346_s1 + $0x28] sm:$0xff] }
 0x13d   :  { %v822_v20 = vadd.f32 %v2351_v17, %v752_v18 }
 0x157   :  { %v2384_v21 = vpop.f32.mrb[6].mxu0 }
 0x158   :  { %v2385_v22 = vpop.f32.mrb[7].mxu0 }
 0x159   :  { %v2419_v23 = vpop.f32.mrb[6].mxu1  ;;  %v2386_v24 = vadd.f32 %v2385_v22, %v2384_v21  ;;  %v1136_v21 = vld [vmem:[%s4346_s1 + $0x38] sm:$0x3] }
 0x15a   :  { %v2420_v25 = vpop.f32.mrb[7].mxu1 }
 0x15b   :  { %v2421_v10 = vadd.f32 %v2420_v25, %v2419_v23  ;;  %v892_v26 = vadd.f32 %v2386_v24, %v822_v20  ;;  %v1135_v20 = vld [vmem:[%s4346_s1 + $0x30] sm:$0xff] }
 0x15d   :  { %v962_v27 = vadd.f32 %v2421_v10, %v892_v26 }
 0x167   :  { %v1031_v28 = vpop.f32.mrb[8].mxu0 }
 0x168   :  { %v1032_v29 = vadd.f32 %v1031_v28, %v962_v27  ;;  %v2544_v30 = vpop.f32.mrb[9].mxu0 }
 0x16a   :  { %v1035_v31 = vmax.f32 %v1032_v29, 0.0 }
 0x16c   :  { %v1037_v32 = vsel %vm1036_vm5, %v1035_v31, -inf }
 0x16d   :  { %1038 = vmax.xlane.f32.xlu0 %v1037_v32 }
 0x1fa   :  { %v1039_v34 = vpop.xlane.xlu0 %1038 }
 0x1fb   :  { %v1040_v35 = vsub.f32 %v1035_v31, %v1039_v34 }
 0x1fd   :  { %v1041_v36 = vmul.f32 1.442695, %v1040_v35 }
 0x1ff   :  { %3127 = vpow2.f32 %v1041_v36 }
 0x209   :  { %v3128_v45 = vpop.eup %3127 }
 0x20a   :  { %v1043_v37 = vsel %vm1036_vm5, %v3128_v45, 0.0 }
 0x20b   :  { %1044 = vadd.xlane.f32.xlu0 %v1043_v37 }
 0x298   :  { %v1045_v16 = vpop.xlane.xlu0 %1044 }
 0x299   :  { %3129 = vrcp.f32 %v1045_v16 }
 0x2a3   :  { %v3130_v19 = vpop.eup %3129 }
 0x2a4   :  { %v1047_v55 = vmul.f32 %v3130_v19, %v3128_v45 }
 0x2a6   :  { %v1048_v56 = vadd.f32 2.0, %v1047_v55 }
 0x2a8   :  { %2550 = vmatmul.mubr.msk.f32.vlgmr.msra.gmra.mrb[8].mxu1 %vm1051_vm8, %v1048_v56 }
 0x2a9   :  { %2996 = vmatpush3.bf16.msra.mxu1 %v2993_v44 }
 0x2aa   :  { %2998 = vmatprep.subr.bf16.mxu1 %v2997_v47 }
 0x2ad   :  { %3000 = vmatpush3.bf16.msra.mxu1 %v2997_v47 }
 0x2ae   :  { %3002 = vmatprep.subr.bf16.mxu1 %v3001_v50 }
 0x2b1   :  { %3004 = vmatpush3.bf16.msra.mxu1 %v3001_v50 }
 0x2b2   :  { %3006 = vmatprep.subr.bf16.mxu1 %v3005_v53 }
 0x2b5   :  { %3008 = vmatpush3.bf16.msra.mxu1 %v3005_v53 }
 0x2b6   :  { %3010 = vmatprep.subr.bf16.mxu1 %v3009_v59 }
 0x2b9   :  { %3012 = vmatpush3.bf16.msra.mxu1 %v3009_v59 }
 0x2ba   :  { %2572 = vmatprep.subr.msk.mxu1 %vm1055_vm6, %v1188_v42 }
 0x2bd   :  { %2573 = vmatpush3.msk.msra.mxu1 %vm1055_vm6, %v1188_v42 }
 0x37b   :  { %v1125_v1 = vpop.f32.mrb[8].mxu1 }
 0x37c   :  { %v1144_v2 = vrot.slane %v1125_v1, %v1143_v0  ;;  %v2551_v4 = vpop.f32.mrb[9].mxu1 }
 0x37e   :  { %v1145_v5 = vcombine.high %v1144_v2, %v1144_v2  ;;  %v1152_v6 = vrot.slane %v1144_v2, %v1143_v0 }
 0x380   :  { %v1159_v9 = vrot.slane %v1145_v5, %v1143_v0  ;;  %v1163_v11 = vrot.slane %v1152_v6, %v1162_v3 }
 0x382   :  { %v1167_v15 = vrot.slane %v1159_v9, %v1162_v3  ;;  %v1170_v17 = vmul.f32 %v1163_v11, %v1129_v7  ;;  %v1171_v18 = vmul.f32 %v1163_v11, %v1130_v8  ;;  %v1172_v22 = vmul.f32 %v1163_v11, %v1131_v12 }
 0x383   :  { %v1173_v23 = vmul.f32 %v1163_v11, %v1132_v60 }
 0x384   :  { %2574 = vmatprep.mubr.msk.f32.mxu1 %vm1189_vm9, %v1170_v17  ;;  %v1174_v24 = vmul.f32 %v1167_v15, %v1133_v13  ;;  %v3033_v25 = vpack.c.bf16 %v1171_v18, %v1170_v17  ;;  %v1175_v26 = vmul.f32 %v1167_v15, %v1134_v14  ;;  %v1176_v27 = vmul.f32 %v1167_v15, %v1135_v20 }
 0x385   :  { %2575 = vmatmul.mubr.msk.f32.vlgmr.msra.gmra.mrb[10].mxu1 %vm1189_vm9, %v1171_v18  ;;  %v1177_v28 = vmul.f32 %v1167_v15, %v1136_v21  ;;  %v3039_v30 = vpack.c.bf16 %v1173_v23, %v1172_v22 }
 0x386   :  { %2577 = vmatprep.mubr.msk.f32.mxu1 %vm1189_vm9, %v1172_v22  ;;  %2602 = vmatprep.mubr.msk.f32.mxu0 %vm1189_vm9, %v1174_v24  ;;  %v4150_v29 = vpack.c.bf16 %v1175_v26, %v1174_v24 }
 0x387   :  { %3035 = vmatprep.subr.msk.bf16.mxu1 %vm4143_vm10, %v3033_v25  ;;  %2603 = vmatmul.mubr.msk.f32.vlgmr.msra.gmra.mrb[10].mxu0 %vm1189_vm9, %v1175_v26  ;;  %v4163_v31 = vpack.c.bf16 %v1177_v28, %v1176_v27 }
 0x388   :  { %3038 = vmatpush3.bf16.xpose.msk.msra.mxu1 %vm4143_vm10, %v3033_v25  ;;  %2605 = vmatprep.mubr.msk.f32.mxu0 %vm1189_vm9, %v1176_v27 }
 0x389   :  { %3041 = vmatprep.subr.msk.bf16.mxu1 %vm4143_vm10, %v3039_v30  ;;  %3047 = vmatprep.subr.msk.bf16.mxu0 %vm4143_vm10, %v4150_v29 }
 0x38a   :  { %2578 = vmatmul.mubr.msk.f32.gmra.mrb[12].mxu1 %vm1189_vm9, %v1173_v23  ;;  %3050 = vmatpush3.bf16.xpose.msk.msra.mxu0 %vm4143_vm10, %v4150_v29 }
 0x38b   :  { %3053 = vmatprep.subr.msk.bf16.mxu0 %vm4143_vm10, %v4163_v31  ;;  %2606 = vmatmul.mubr.msk.f32.gmra.mrb[12].mxu0 %vm1189_vm9, %v1177_v28 }
 0x390   :  { %3044 = vmatpush3.bf16.xpose.msk.msra.mxu1 %vm4143_vm10, %v3039_v30 }
 0x391   :  { %3058 = vmatprep.subr.bf16.mxu1 %v3033_v25 }
 0x392   :  { %3056 = vmatpush3.bf16.xpose.msk.msra.mxu0 %vm4143_vm10, %v4163_v31 }
 0x458   :  { %v2576_v32 = vpop.f32.mrb[10].mxu1 }
 0x459   :  { %v1271_v34 = vpop.f32.mrb[11].mxu1 }
 0x45a   :  { %v2604_v35 = vpop.f32.mrb[10].mxu0  ;;  %2616 = vmatprep.mubr.msk.f32.mxu1 %vm1189_vm9, %v1271_v34 }
 0x45b   :  { %v1368_v36 = vpop.f32.mrb[11].mxu0  ;;  %2617 = vmatmul.mubr.msk.f32.vlgmr.msra.gmra.mrb[14].mxu1 %vm1189_vm9, %v2576_v32 }
 0x45c   :  { %3060 = vmatpush3.bf16.msra.mxu1 %v3033_v25  ;;  %2630 = vmatprep.mubr.msk.f32.mxu0 %vm1189_vm9, %v1368_v36  ;;  %v1869_v36 = vld [vmem:[%s4347_s6] sm:$0xff] }
 0x45d   :  { %v2579_v45 = vpop.f32.mrb[12].mxu1  ;;  %3063 = vmatprep.subr.msk.bf16.mxu1 %vm4057_vm3, %v3039_v30  ;;  %2631 = vmatmul.mubr.msk.f32.vlgmr.msra.gmra.mrb[14].mxu0 %vm1189_vm9, %v2604_v35 }
 0x45e   :  { %v1281_v37 = vpop.f32.mrb[13].mxu1  ;;  %v2607_v38 = vpop.f32.mrb[12].mxu0 }
 0x45f   :  { %2619 = vmatprep.mubr.msk.f32.mxu1 %vm1189_vm9, %v1281_v37  ;;  %v1378_v39 = vpop.f32.mrb[13].mxu0  ;;  %v1871_v37 = vld [vmem:[%s4347_s6 + $0x10] sm:$0xff] }
 0x460   :  { %2620 = vmatmul.mubr.msk.f32.gmra.mrb[16].mxu1 %vm1189_vm9, %v2579_v45  ;;  %2633 = vmatprep.mubr.msk.f32.mxu0 %vm1189_vm9, %v1378_v39  ;;  %v1870_v45 = vld [vmem:[%s4347_s6 + $0x8] sm:$0xff]  ;;  %v1872_v39 = vld [vmem:[%s4347_s6 + $0x18] sm:$0xff] }
 0x461   :  { %3066 = vmatpush3.bf16.msk.msra.mxu1 %vm4057_vm3, %v3039_v30  ;;  %2634 = vmatmul.mubr.msk.f32.gmra.mrb[16].mxu0 %vm1189_vm9, %v2607_v38  ;;  %v4240_v38 = vpack.c.bf16 %v1870_v45, %v1869_v36 }
 0x462   :  { %3068 = vmatprep.subr.bf16.mxu1 %v4150_v29 }
 0x463   :  { %3078 = vmatprep.subr.bf16.mxu0 %v4240_v38 }
 0x464   :  { %3080 = vmatpush3.bf16.msra.mxu0 %v4240_v38 }
 0x52e   :  { %v2618_v54 = vpop.f32.mrb[14].mxu1 }
 0x52f   :  { %v1465_v40 = vpop.f32.mrb[15].mxu1  ;;  %v1585_v49 = vsel %vm1581_vm11, %v2618_v54, -inf }
 0x530   :  { %v2632_v41 = vpop.f32.mrb[14].mxu0  ;;  %v1582_v43 = vsel %vm1581_vm11, %v1465_v40, -inf }
 0x531   :  { %v1562_v44 = vpop.f32.mrb[15].mxu0  ;;  %1583 = vmax.xlane.f32.xlu1 %v1582_v43  ;;  %v1598_v16 = vsel %vm1581_vm11, %v2632_v41, -inf }
 0x532   :  { %v1595_v53 = vsel %vm1581_vm11, %v1562_v44, -inf }
 0x533   :  { %v2621_v46 = vpop.f32.mrb[16].mxu1 }
 0x534   :  { %v1475_v47 = vpop.f32.mrb[17].mxu1  ;;  %v2635_v48 = vpop.f32.mrb[16].mxu0  ;;  %v1592_v52 = vsel %vm1591_vm12, %v2621_v46, -inf }
 0x535   :  { %v1572_v50 = vpop.f32.mrb[17].mxu0  ;;  %1586 = vmax.xlane.f32.xlu1 %v1585_v49  ;;  %v1588_v51 = vsel %vm1581_vm11, %v1475_v47, -inf  ;;  %v1604_v55 = vsel %vm1591_vm12, %v2635_v48, -inf  ;;  %v1878_v49 = vld [vmem:[%s4347_s6 + $0x48] sm:$0xff] }
 0x536   :  { %1589 = vmax.xlane.f32.xlu0 %v1588_v51  ;;  %v1601_v19 = vsel %vm1581_vm11, %v1572_v50, -inf }
 0x539   :  { %1593 = vmax.xlane.f32.xlu1 %v1592_v52 }
 0x53a   :  { %1596 = vmax.xlane.f32.xlu0 %v1595_v53 }
 0x53d   :  { %1599 = vmax.xlane.f32.xlu1 %v1598_v16 }
 0x53e   :  { %1602 = vmax.xlane.f32.xlu0 %v1601_v19 }
 0x541   :  { %1605 = vmax.xlane.f32.xlu1 %v1604_v55 }
 0x5be   :  { %v1584_v56 = vpop.xlane.xlu1 %1583 }
 0x5bf   :  { %v1607_v57 = vsub.f32 %v1465_v40, %v1584_v56  ;;  %v1873_v40 = vld [vmem:[%s4347_s6 + $0x20] sm:$0xff] }
 0x5c1   :  { %v1615_v58 = vmul.f32 1.442695, %v1607_v57 }
 0x5c2   :  { %v1587_v59 = vpop.xlane.xlu1 %1586 }
 0x5c3   :  { %3131 = vpow2.f32 %v1615_v58  ;;  %v1608_v42 = vsub.f32 %v2618_v54, %v1587_v59  ;;  %v1590_v61 = vpop.xlane.xlu0 %1589  ;;  %v4245_v54 = vpack.c.bf16 %v1872_v39, %v1871_v37 }
 0x5c4   :  { %v1609_v62 = vsub.f32 %v1475_v47, %v1590_v61 }
 0x5c5   :  { %v1617_v63 = vmul.f32 1.442695, %v1608_v42  ;;  %3082 = vmatprep.subr.bf16.mxu0 %v4245_v54 }
 0x5c6   :  { %v1619_v0 = vmul.f32 1.442695, %v1609_v62  ;;  %v1594_v1 = vpop.xlane.xlu1 %1593  ;;  %3084 = vmatpush3.bf16.msra.mxu0 %v4245_v54 }
 0x5c7   :  { %3133 = vpow2.f32 %v1617_v63  ;;  %v1610_v2 = vsub.f32 %v2621_v46, %v1594_v1  ;;  %v1597_v3 = vpop.xlane.xlu0 %1596  ;;  %v1876_v46 = vld [vmem:[%s4347_s6 + $0x38] sm:$0xff] }
 0x5c8   :  { %3135 = vpow2.f32 %v1619_v0  ;;  %v1611_v4 = vsub.f32 %v1562_v44, %v1597_v3  ;;  %v1875_v44 = vld [vmem:[%s4347_s6 + $0x30] sm:$0xff] }
 0x5c9   :  { %v1621_v5 = vmul.f32 1.442695, %v1610_v2  ;;  %v3089_v47 = vpack.c.bf16 %v1876_v46, %v1875_v44 }
 0x5ca   :  { %v1623_v6 = vmul.f32 1.442695, %v1611_v4  ;;  %v1600_v7 = vpop.xlane.xlu1 %1599 }
 0x5cb   :  { %3137 = vpow2.f32 %v1621_v5  ;;  %v1612_v8 = vsub.f32 %v2632_v41, %v1600_v7  ;;  %v1603_v9 = vpop.xlane.xlu0 %1602  ;;  %v1874_v41 = vld [vmem:[%s4347_s6 + $0x28] sm:$0xff] }
 0x5cc   :  { %3139 = vpow2.f32 %v1623_v6  ;;  %v1613_v11 = vsub.f32 %v1572_v50, %v1603_v9  ;;  %v3085_v43 = vpack.c.bf16 %v1874_v41, %v1873_v40 }
 0x5cd   :  { %v4199_v12 = vpop.eup %3131  ;;  %v1625_v60 = vmul.f32 1.442695, %v1612_v8 }
 0x5ce   :  { %v1627_v13 = vmul.f32 1.442695, %v1613_v11  ;;  %v1606_v14 = vpop.xlane.xlu1 %1605  ;;  %v1631_v15 = vsel %vm1581_vm11, %v4199_v12, 0.0  ;;  %3086 = vmatprep.subr.bf16.mxu0 %v3085_v43 }
 0x5cf   :  { %3141 = vpow2.f32 %v1625_v60  ;;  %v1614_v17 = vsub.f32 %v2635_v48, %v1606_v14  ;;  %1632 = vadd.xlane.f32.xlu0 %v1631_v15  ;;  %v1877_v48 = vld [vmem:[%s4347_s6 + $0x40] sm:$0xff]  ;;  %3088 = vmatpush3.bf16.msra.mxu0 %v3085_v43 }
 0x5d0   :  { %3143 = vpow2.f32 %v1627_v13  ;;  %3090 = vmatprep.subr.bf16.mxu0 %v3089_v47  ;;  %v3093_v50 = vpack.c.bf16 %v1878_v49, %v1877_v48 }
 0x5d1   :  { %v4203_v18 = vpop.eup %3133  ;;  %v1629_v20 = vmul.f32 1.442695, %v1614_v17 }
 0x5d2   :  { %v4205_v21 = vpop.eup %3135  ;;  %v1634_v22 = vsel %vm1581_vm11, %v4203_v18, 0.0 }
 0x5d3   :  { %3145 = vpow2.f32 %v1629_v20  ;;  %1635 = vadd.xlane.f32.xlu1 %v1634_v22  ;;  %v1637_v23 = vsel %vm1581_vm11, %v4205_v21, 0.0  ;;  %3092 = vmatpush3.bf16.msra.mxu0 %v3089_v47 }
 0x5d4   :  { %1638 = vadd.xlane.f32.xlu0 %v1637_v23  ;;  %3094 = vmatprep.subr.bf16.mxu0 %v3093_v50 }
 0x5d5   :  { %v4211_v24 = vpop.eup %3137 }
 0x5d6   :  { %v4213_v25 = vpop.eup %3139  ;;  %v1640_v10 = vsel %vm1591_vm12, %v4211_v24, 0.0 }
 0x5d7   :  { %1641 = vadd.xlane.f32.xlu1 %v1640_v10  ;;  %v1643_v26 = vsel %vm1581_vm11, %v4213_v25, 0.0  ;;  %3096 = vmatpush3.bf16.msra.mxu0 %v3093_v50 }
 0x5d8   :  { %1644 = vadd.xlane.f32.xlu0 %v1643_v26  ;;  %2684 = vmatprep.subr.msk.mxu0 %vm1055_vm6, %v1879_v33 }
 0x5d9   :  { %v4219_v27 = vpop.eup %3141 }
 0x5da   :  { %v4221_v28 = vpop.eup %3143  ;;  %v1646_v30 = vsel %vm1581_vm11, %v4219_v27, 0.0 }
 0x5db   :  { %1647 = vadd.xlane.f32.xlu1 %v1646_v30  ;;  %v1649_v32 = vsel %vm1581_vm11, %v4221_v28, 0.0  ;;  %2685 = vmatpush3.msk.msra.mxu0 %vm1055_vm6, %v1879_v33 }
 0x5dc   :  { %1650 = vadd.xlane.f32.xlu0 %v1649_v32 }
 0x5dd   :  { %v4227_v34 = vpop.eup %3145 }
 0x5de   :  { %v1652_v35 = vsel %vm1591_vm12, %v4227_v34, 0.0 }
 0x5df   :  { %1653 = vadd.xlane.f32.xlu1 %v1652_v35 }
 0x65c   :  { %v1633_v51 = vpop.xlane.xlu0 %1632 }
 0x65d   :  { %3147 = vrcp.f32 %v1633_v51 }
 0x660   :  { %v1636_v52 = vpop.xlane.xlu1 %1635 }
 0x661   :  { %3149 = vrcp.f32 %v1636_v52  ;;  %v1639_v53 = vpop.xlane.xlu0 %1638 }
 0x662   :  { %3151 = vrcp.f32 %v1639_v53 }
 0x664   :  { %v1642_v16 = vpop.xlane.xlu1 %1641 }
 0x665   :  { %3153 = vrcp.f32 %v1642_v16  ;;  %v1645_v19 = vpop.xlane.xlu0 %1644 }
 0x666   :  { %3155 = vrcp.f32 %v1645_v19 }
 0x667   :  { %v3148_v55 = vpop.eup %3147 }
 0x668   :  { %v1648_v56 = vpop.xlane.xlu1 %1647  ;;  %v1663_v57 = vmul.f32 %v3148_v55, %v4199_v12 }
 0x669   :  { %3157 = vrcp.f32 %v1648_v56  ;;  %v1651_v58 = vpop.xlane.xlu0 %1650 }
 0x66a   :  { %3159 = vrcp.f32 %v1651_v58  ;;  %2644 = vmatprep.mubr.msk.f32.mxu1 %vm1581_vm11, %v1663_v57 }
 0x66b   :  { %v3150_v59 = vpop.eup %3149 }
 0x66c   :  { %v3152_v42 = vpop.eup %3151  ;;  %v1664_v61 = vmul.f32 %v3150_v59, %v4203_v18  ;;  %v1654_v62 = vpop.xlane.xlu1 %1653 }
 0x66d   :  { %3161 = vrcp.f32 %v1654_v62  ;;  %v1665_v63 = vmul.f32 %v3152_v42, %v4205_v21 }
 0x66e   :  { %2645 = vmatmul.mubr.msk.f32.vlgmr.msra.gmra.mrb[18].mxu1 %vm1581_vm11, %v1664_v61 }
 0x66f   :  { %v3154_v0 = vpop.eup %3153  ;;  %3070 = vmatpush3.bf16.msra.mxu1 %v4150_v29  ;;  %2647 = vmatprep.mubr.msk.f32.mxu1 %vm1581_vm11, %v1665_v63 }
 0x670   :  { %v3156_v1 = vpop.eup %3155  ;;  %3073 = vmatprep.subr.msk.bf16.mxu1 %vm4057_vm3, %v4163_v31  ;;  %v1666_v2 = vmul.f32 %v3154_v0, %v4211_v24 }
 0x671   :  { %v1667_v3 = vmul.f32 %v3156_v1, %v4213_v25 }
 0x672   :  { %2648 = vmatmul.mubr.msk.f32.gmra.mrb[20].mxu1 %vm1581_vm11, %v1666_v2 }
 0x673   :  { %v3158_v4 = vpop.eup %3157  ;;  %3076 = vmatpush3.bf16.msk.msra.mxu1 %vm4057_vm3, %v4163_v31  ;;  %2658 = vmatprep.mubr.msk.f32.mxu1 %vm1581_vm11, %v1667_v3 }
 0x674   :  { %v3160_v29 = vpop.eup %3159  ;;  %v1668_v5 = vmul.f32 %v3158_v4, %v4219_v27  ;;  %3098 = vmatprep.subr.bf16.mxu1 %v4240_v38 }
 0x675   :  { %v1669_v6 = vmul.f32 %v3160_v29, %v4221_v28 }
 0x676   :  { %2659 = vmatmul.mubr.msk.f32.vlgmr.msra.gmra.mrb[22].mxu1 %vm1581_vm11, %v1668_v5 }
 0x677   :  { %v3162_v7 = vpop.eup %3161  ;;  %2661 = vmatprep.mubr.msk.f32.mxu1 %vm1581_vm11, %v1669_v6  ;;  %3100 = vmatpush3.bf16.msra.mxu1 %v4240_v38 }
 0x678   :  { %v1670_v8 = vmul.f32 %v3162_v7, %v4227_v34  ;;  %3102 = vmatprep.subr.bf16.mxu1 %v4245_v54 }
 0x67a   :  { %2662 = vmatmul.mubr.msk.f32.gmra.mrb[24].mxu1 %vm1581_vm11, %v1670_v8 }
 0x67b   :  { %3104 = vmatpush3.bf16.msra.mxu1 %v4245_v54 }
 0x67c   :  { %3106 = vmatprep.subr.bf16.mxu1 %v3085_v43 }
 0x67f   :  { %3108 = vmatpush3.bf16.msra.mxu1 %v3085_v43 }
 0x680   :  { %3110 = vmatprep.subr.bf16.mxu1 %v3089_v47 }
 0x683   :  { %3112 = vmatpush3.bf16.msra.mxu1 %v3089_v47 }
 0x684   :  { %3114 = vmatprep.subr.bf16.mxu1 %v3093_v50 }
 0x687   :  { %3116 = vmatpush3.bf16.msra.mxu1 %v3093_v50 }
 0x688   :  { %2712 = vmatprep.subr.msk.mxu1 %vm1055_vm6, %v1879_v33 }
 0x68b   :  { %2713 = vmatpush3.msk.msra.mxu1 %vm1055_vm6, %v1879_v33 }
 0x741   :  { %v2646_v31 = vpop.f32.mrb[18].mxu1 }
 0x742   :  { %v1751_v9 = vpop.f32.mrb[19].mxu1 }
 0x743   :  { %2686 = vmatprep.mubr.msk.f32.mxu0 %vm1189_vm9, %v1751_v9 }
 0x744   :  { %2687 = vmatmul.mubr.msk.f32.vlgmr.msra.gmra.mrb[18].mxu0 %vm1189_vm9, %v2646_v31 }
 0x745   :  { %v2649_v11 = vpop.f32.mrb[20].mxu1 }
 0x746   :  { %v1761_v12 = vpop.f32.mrb[21].mxu1 }
 0x747   :  { %2689 = vmatprep.mubr.msk.f32.mxu0 %vm1189_vm9, %v1761_v12 }
 0x748   :  { %2690 = vmatmul.mubr.msk.f32.gmra.mrb[20].mxu0 %vm1189_vm9, %v2649_v11 }
 0x749   :  { %v2660_v60 = vpop.f32.mrb[22].mxu1 }
 0x74a   :  { %v1850_v13 = vpop.f32.mrb[23].mxu1 }
 0x74b   :  { %2714 = vmatprep.mubr.msk.f32.mxu1 %vm1189_vm9, %v1850_v13 }
 0x74c   :  { %2715 = vmatmul.mubr.msk.f32.vlgmr.msra.gmra.mrb[26].mxu1 %vm1189_vm9, %v2660_v60 }
 0x74d   :  { %v2663_v14 = vpop.f32.mrb[24].mxu1 }
 0x74e   :  { %v1860_v15 = vpop.f32.mrb[25].mxu1 }
 0x74f   :  { %2717 = vmatprep.mubr.msk.f32.mxu1 %vm1189_vm9, %v1860_v15 }
 0x750   :  { %2718 = vmatmul.mubr.msk.f32.gmra.mrb[28].mxu1 %vm1189_vm9, %v2663_v14 }
 0x817   :  { %v2688_v17 = vpop.f32.mrb[18].mxu0 }
 0x818   :  { %2078 = vst.msk [vmem:[%s4348_s7 + $0x8] sm:$0xff] %vm1189_vm9, %v2688_v17  ;;  %v1961_v18 = vpop.f32.mrb[19].mxu0 }
 0x819   :  { %2077 = vst.msk [vmem:[%s4348_s7] sm:$0xff] %vm1189_vm9, %v1961_v18 }
 0x81b   :  { %v2691_v20 = vpop.f32.mrb[20].mxu0 }
 0x81c   :  { %2081 = vst.msk [vmem:[%s4348_s7 + $0x18] sm:$0x3] %vm2080_vm13, %v2691_v20  ;;  %v1971_v21 = vpop.f32.mrb[21].mxu0 }
 0x81d   :  { %2079 = vst.msk [vmem:[%s4348_s7 + $0x10] sm:$0xff] %vm1189_vm9, %v1971_v21 }
 0x81f   :  { %v2716_v22 = vpop.f32.mrb[26].mxu1 }
 0x820   :  { %2083 = vst.msk [vmem:[%s4348_s7 + $0x28] sm:$0xff] %vm1189_vm9, %v2716_v22  ;;  %v2058_v23 = vpop.f32.mrb[27].mxu1 }
 0x821   :  { %2082 = vst.msk [vmem:[%s4348_s7 + $0x20] sm:$0xff] %vm1189_vm9, %v2058_v23 }
 0x823   :  { %v2719_v24 = vpop.f32.mrb[28].mxu1 }
 0x824   :  { %2085 = vst.msk [vmem:[%s4348_s7 + $0x38] sm:$0x3] %vm2080_vm13, %v2719_v24  ;;  %v2068_v25 = vpop.f32.mrb[29].mxu1 }
 0x825   :  { %2084 = vst.msk [vmem:[%s4348_s7 + $0x30] sm:$0xff] %vm1189_vm9, %v2068_v25 }

// kernel: forward.5
= control target key start
LH: loop header
LB: loop body
LE: loop exit
PB: predicated region body
PF: predicated region fallthrough
CT: control target
= control target key end

     0   :  { %12 = vsyncpa [#allocation4], 0  ;;  %s16449_s24 = smov 0   ;;  %s16451_s25 = smov 0   ;;  %s18598_s0 = inlined_call_operand.vmem [shape: f32[2,6400], index: 0, kind: input, shape index: {}]   ;;  %s18599_s1 = inlined_call_operand.vmem [shape: bf16[6400,800], index: 1, kind: input, shape index: {}]   ;;  %s18600_s2 = inlined_call_operand.vmem [shape: f32[1,800], index: 2, kind: input, shape index: {}]   ;;  %s18601_s3 = inlined_call_operand.vmem [shape: f32[800,100], index: 3, kind: input, shape index: {}]   ;;  %s18602_s4 = inlined_call_operand.vmem [shape: f32[1,100], index: 4, kind: input, shape index: {}]   ;;  %s18603_s5 = inlined_call_operand.vmem [shape: f32[100,128], index: 5, kind: input, shape index: {}]   ;;  %s18604_s6 = inlined_call_operand.vmem [shape: f32[1,128], index: 6, kind: input, shape index: {}]   ;;  %s18605_s7 = inlined_call_operand.hbm [shape: f32[2,128], index: 7, kind: output, shape index: {}]  }
   0x1   :  { %s16453_s26 = smov 0  }
   0x2 LB: > { %s12163_s27 = sadd.s32 4294967295, %s16398_s26   ;;  %s27_s28 = sadd.s32 1, %s16394_s25  ;;  %s16398_s26 = sphi %s16453_s26, %s18_s26   ;;  %s16394_s25 = sphi %s16451_s25, %s18608_s25   ;;  %s16390_s24 = sphi %s16449_s24, %s18607_s24  }
   0x3   : > { %p28_p0 = scmp.ge.s32.totalorder %s27_s28, 2  ;;  %p12166_p1 = scmp.ge.s32.totalorder %s16398_s26, 1 }
   0x4   : > { %p269_p2 = scmp.lt.s32.totalorder %s16398_s26, 3 }
   0x5   : > { %s18610_s28 = smov (%p28_p0, %s27_s28), 0 }
   0x6   : > { %p270_p3 = pnand %p12166_p1, %p269_p2 }
   0x7   : > { %s306_s29 = smul.u32 (!%p270_p3), 25, %s16390_s24  ;;  %p12169_p6 = scmp.ne.s32.totalorder (!%p270_p3), %s16390_s24, 0 }
   0x8   : > { %273 = sbr.rel (%p270_p3) target bundleno = 2162 (0x872), region = 48 }
   0x9   : > { %s316_s30 = smul.u32 (!%p270_p3), 400, %s16390_s24  ;;  %p309_p4 = scmp.lt.s32.totalorder (!%p270_p3), %s306_s29, 49 }
   0xb   : > { %p317_p5 = scmp.lt.s32.totalorder (!%p270_p3), %s316_s30, 799 }
   0xf   : > { %s18612_s29 = smov (!%p309_p4, %s306_s29), 49  ;;  %s18614_s30 = smov (!%p317_p5, %s316_s30), 799 }
  0x10   : > { %s12167_s8 = sshll.u32 %s18612_s29, 1  ;;  %s14300_s12 = smul.u32 28, %s18614_s30  ;;  %vm329_vm0 = vcmask (!%p12169_p6), 1041408   ;;  %vm330_vm1 = vcmask (!%p12169_p6), 1043458   ;;  %vm332_vm2 = vcmask (!%p12169_p6), 259076   ;;  %v16400_v0 = vmov (!%p12169_p6), 0.0  }
  0x11   : > { %s16475_s11 = scalar_lea.vmem %s18598_s0, %s12167_s8  ;;  %327 = sbr.rel (%p12169_p6) target bundleno = 24 (0x18), region = 52  ;;  %328 = vst [vmem:[#allocation2] sm:$0xff] (!%p12169_p6), %v16400_v0  ;;  %vm331_vm3 = vmor (!%p12169_p6), %vm330_vm1, %vm329_vm0 }
  0x12   : > { %s16480_s15 = scalar_lea.vmem %s18599_s1, %s14300_s12  ;;  %vm333_vm4 = vmor (!%p12169_p6), %vm332_vm2, %vm331_vm3 }
  0x13   : > { %334 = vst.msk [vmem:[#allocation2 + $0x8] sm:$0x3f] (!%p12169_p6), %vm333_vm4, %v16400_v0 }
  0x18 PF: > { %v14340_v1 = vld [vmem:[%s16480_s15 + $0x4] ss:$28 sps:$4 sm:$0xff]   ;;  %v14346_v5 = vld [vmem:[%s16480_s15 + $0x3c] ss:$28 sps:$4 sm:$0xff]   ;;  %v14352_v9 = vld [vmem:[%s16480_s15 + $0x74] ss:$28 sps:$4 sm:$0xff]   ;;  %v355_v39 = vlaneseq }
  0x19   : > { %v14342_v2 = vld [vmem:[%s16480_s15 + $0xa84] ss:$28 sps:$4 sm:$0xff]   ;;  %9310 = vmatprep.subr.bf16.mxu1 %v14340_v1  ;;  %v14348_v6 = vld [vmem:[%s16480_s15 + $0xabc] ss:$28 sps:$4 sm:$0xff]   ;;  %v14354_v10 = vld [vmem:[%s16480_s15 + $0xaf4] ss:$28 sps:$4 sm:$0xff]  }
  0x1a   : > { %v14344_v3 = vld [vmem:[%s16480_s15] ss:$28 sps:$4 sm:$0xff]   ;;  %9433 = vmatprep.subr.bf16.mxu0 %v14342_v2  ;;  %v14350_v7 = vld [vmem:[%s16480_s15 + $0x38] ss:$28 sps:$4 sm:$0xff]   ;;  %v14356_v11 = vld [vmem:[%s16480_s15 + $0x70] ss:$28 sps:$4 sm:$0xff]  }
  0x1b   : > { %v14345_v4 = vld [vmem:[%s16480_s15 + $0xa80] ss:$28 sps:$4 sm:$0xff]   ;;  %9311 = vmatpush1.bf16.msra.mxu1 %v14344_v3  ;;  %v14351_v8 = vld [vmem:[%s16480_s15 + $0xab8] ss:$28 sps:$4 sm:$0xff]   ;;  %v14357_v12 = vld [vmem:[%s16480_s15 + $0xaf0] ss:$28 sps:$4 sm:$0xff]  }
  0x1c   : > { %9434 = vmatpush1.bf16.msra.mxu0 %v14345_v4  ;;  %9312 = vmatprep.subr.bf16.mxu1 %v14346_v5  ;;  %v14358_v13 = vld [vmem:[%s16480_s15 + $0xac] ss:$28 sps:$4 sm:$0xff]   ;;  %v14364_v17 = vld [vmem:[%s16480_s15 + $0xe4] ss:$28 sps:$4 sm:$0xff]   ;;  %v14370_v21 = vld [vmem:[%s16480_s15 + $0x11c] ss:$28 sps:$4 sm:$0xff]  }
  0x1d   : > { %9435 = vmatprep.subr.bf16.mxu0 %v14348_v6  ;;  %v14360_v14 = vld [vmem:[%s16480_s15 + $0xb2c] ss:$28 sps:$4 sm:$0xff]   ;;  %v14366_v18 = vld [vmem:[%s16480_s15 + $0xb64] ss:$28 sps:$4 sm:$0xff]   ;;  %v14372_v22 = vld [vmem:[%s16480_s15 + $0xb9c] ss:$28 sps:$4 sm:$0xff]  }
  0x1e   : > { %v14362_v15 = vld [vmem:[%s16480_s15 + $0xa8] ss:$28 sps:$4 sm:$0xff]   ;;  %v14368_v19 = vld [vmem:[%s16480_s15 + $0xe0] ss:$28 sps:$4 sm:$0xff]   ;;  %v14374_v23 = vld [vmem:[%s16480_s15 + $0x118] ss:$28 sps:$4 sm:$0xff]  }
  0x1f   : > { %9313 = vmatpush1.bf16.msra.mxu1 %v14350_v7  ;;  %v14363_v16 = vld [vmem:[%s16480_s15 + $0xb28] ss:$28 sps:$4 sm:$0xff]   ;;  %v14369_v20 = vld [vmem:[%s16480_s15 + $0xb60] ss:$28 sps:$4 sm:$0xff]   ;;  %v14375_v24 = vld [vmem:[%s16480_s15 + $0xb98] ss:$28 sps:$4 sm:$0xff]  }
  0x20   : > { %9436 = vmatpush1.bf16.msra.mxu0 %v14351_v8  ;;  %9314 = vmatprep.subr.bf16.mxu1 %v14352_v9  ;;  %v14376_v25 = vld [vmem:[%s16480_s15 + $0x154] ss:$28 sps:$4 sm:$0xff]   ;;  %v14382_v29 = vld [vmem:[%s16480_s15 + $0x18c] ss:$28 sps:$4 sm:$0xff]   ;;  %v14388_v33 = vld [vmem:[%s16480_s15 + $0x1c4] ss:$28 sps:$4 sm:$0xff]  }
  0x21   : > { %9437 = vmatprep.subr.bf16.mxu0 %v14354_v10  ;;  %v14378_v26 = vld [vmem:[%s16480_s15 + $0xbd4] ss:$28 sps:$4 sm:$0xff]   ;;  %v14384_v30 = vld [vmem:[%s16480_s15 + $0xc0c] ss:$28 sps:$4 sm:$0xff]   ;;  %v14390_v34 = vld [vmem:[%s16480_s15 + $0xc44] ss:$28 sps:$4 sm:$0xff]  }
  0x22   : > { %v14380_v27 = vld [vmem:[%s16480_s15 + $0x150] ss:$28 sps:$4 sm:$0xff]   ;;  %v14386_v31 = vld [vmem:[%s16480_s15 + $0x188] ss:$28 sps:$4 sm:$0xff]   ;;  %v14392_v35 = vld [vmem:[%s16480_s15 + $0x1c0] ss:$28 sps:$4 sm:$0xff]  }
  0x23   : > { %9315 = vmatpush1.bf16.msra.mxu1 %v14356_v11  ;;  %v14381_v28 = vld [vmem:[%s16480_s15 + $0xbd0] ss:$28 sps:$4 sm:$0xff]   ;;  %v14387_v32 = vld [vmem:[%s16480_s15 + $0xc08] ss:$28 sps:$4 sm:$0xff]   ;;  %v14393_v36 = vld [vmem:[%s16480_s15 + $0xc40] ss:$28 sps:$4 sm:$0xff]  }
  0x24   : > { %9438 = vmatpush1.bf16.msra.mxu0 %v14357_v12  ;;  %9316 = vmatprep.subr.bf16.mxu1 %v14358_v13  ;;  %v16401_v37 = vmov 1983009808   ;;  %v14394_v40 = vld [vmem:[%s16480_s15 + $0x1fc] ss:$28 sps:$4 sm:$0xff]   ;;  %v16522_v44 = vshrl.u32 %v355_v39, 7  ;;  %v337_v53 = vld [vmem:[%s16475_s11] sm:$0xff] }
  0x25   : > { %9439 = vmatprep.subr.bf16.mxu0 %v14360_v14  ;;  %v353_v38 = vunpack.c.l.s4 %v16401_v37  ;;  %v14396_v41 = vld [vmem:[%s16480_s15 + $0xc7c] ss:$28 sps:$4 sm:$0xff]   ;;  %v14400_v46 = vld [vmem:[%s16480_s15 + $0x234] ss:$28 sps:$4 sm:$0xff]   ;;  %v14406_v51 = vld [vmem:[%s16480_s15 + $0x26c] ss:$28 sps:$4 sm:$0xff]   ;;  %v351_v10 = vcombine.high %v337_v53, %v337_v53 }
  0x26   : > { %v14398_v42 = vld [vmem:[%s16480_s15 + $0x1f8] ss:$28 sps:$4 sm:$0xff]   ;;  %v14404_v48 = vld [vmem:[%s16480_s15 + $0x230] ss:$28 sps:$4 sm:$0xff]   ;;  %v14410_v54 = vld [vmem:[%s16480_s15 + $0x268] ss:$28 sps:$4 sm:$0xff]  }
  0x27   : > { %9317 = vmatpush1.bf16.msra.mxu1 %v14362_v15  ;;  %v354_v43 = vunpack.c.0.s8 %v353_v38  ;;  %v14399_v45 = vld [vmem:[%s16480_s15 + $0xc78] ss:$28 sps:$4 sm:$0xff]   ;;  %v14405_v49 = vld [vmem:[%s16480_s15 + $0xcb0] ss:$28 sps:$4 sm:$0xff]   ;;  %v14411_v56 = vld [vmem:[%s16480_s15 + $0xce8] ss:$28 sps:$4 sm:$0xff]  }
  0x28   : > { %9440 = vmatpush1.bf16.msra.mxu0 %v14363_v16  ;;  %9318 = vmatprep.subr.bf16.mxu1 %v14364_v17  ;;  %v14402_v47 = vld [vmem:[%s16480_s15 + $0xcb4] ss:$28 sps:$4 sm:$0xff]   ;;  %v14408_v52 = vld [vmem:[%s16480_s15 + $0xcec] ss:$28 sps:$4 sm:$0xff]   ;;  %v14412_v58 = vld [vmem:[%s16480_s15 + $0x2a4] ss:$28 sps:$4 sm:$0xff]  }
  0x29   : > { %9441 = vmatprep.subr.bf16.mxu0 %v14366_v18  ;;  %v16530_v50 = vsub.s32 %v354_v43, %v16522_v44  ;;  %v16539_v57 = vld [vmem:[%s16475_s11 + $0x8] sm:$0xff]  ;;  %v14414_v59 = vld [vmem:[%s16480_s15 + $0xd24] ss:$28 sps:$4 sm:$0xff]   ;;  %v14418_v2 = vld [vmem:[%s16480_s15 + $0x2dc] ss:$28 sps:$4 sm:$0xff]   ;;  %vm16404_vm5 = vmmov 0  }
  0x2a   : > { %v368_v61 = vcombine.high %v16539_v57, %v16539_v57  ;;  %v14416_v0 = vld [vmem:[%s16480_s15 + $0x2a0] ss:$28 sps:$4 sm:$0xff]   ;;  %v14422_v6 = vld [vmem:[%s16480_s15 + $0x2d8] ss:$28 sps:$4 sm:$0xff]   ;;  %v14428_v11 = vld [vmem:[%s16480_s15 + $0x310] ss:$28 sps:$4 sm:$0xff]  }
  0x2b   : > { %9319 = vmatpush1.bf16.msra.mxu1 %v14368_v19  ;;  %v358_v55 = vrot.slane %v337_v53, %v16530_v50  ;;  %v14417_v1 = vld [vmem:[%s16480_s15 + $0xd20] ss:$28 sps:$4 sm:$0xff]   ;;  %v14423_v7 = vld [vmem:[%s16480_s15 + $0xd58] ss:$28 sps:$4 sm:$0xff]   ;;  %v14429_v12 = vld [vmem:[%s16480_s15 + $0xd90] ss:$28 sps:$4 sm:$0xff]   ;;  %v16565_v15 = vrot.slane %v351_v10, %v16530_v50 }
  0x2c   : > { %9442 = vmatpush1.bf16.msra.mxu0 %v14369_v20  ;;  %9320 = vmatprep.subr.bf16.mxu1 %v14370_v21  ;;  %v382_v63 = vrot.slane %v368_v61, %v16530_v50  ;;  %v14420_v3 = vld [vmem:[%s16480_s15 + $0xd5c] ss:$28 sps:$4 sm:$0xff]   ;;  %v14424_v8 = vld [vmem:[%s16480_s15 + $0x314] ss:$28 sps:$4 sm:$0xff]   ;;  %v14430_v13 = vld [vmem:[%s16480_s15 + $0x34c] ss:$28 sps:$4 sm:$0xff]  }
  0x2d   : > { %9443 = vmatprep.subr.bf16.mxu0 %v14372_v22  ;;  %v366_v60 = vcombine.high %v358_v55, %v358_v55  ;;  %v14426_v9 = vld [vmem:[%s16480_s15 + $0xd94] ss:$28 sps:$4 sm:$0xff]   ;;  %v14432_v14 = vld [vmem:[%s16480_s15 + $0xdcc] ss:$28 sps:$4 sm:$0xff]   ;;  %v14438_v18 = vld [vmem:[%s16480_s15 + $0x384] ss:$28 sps:$4 sm:$0xff]   ;;  %v367_v20 = vcombine.high %v16565_v15, %v16565_v15  ;;  %v16573_v21 = vpack.c.bf16 %v358_v55, %v358_v55 }
  0x2e   : > { %v384_v4 = vcombine.high %v382_v63, %v382_v63  ;;  %v14434_v16 = vld [vmem:[%s16480_s15 + $0x348] ss:$28 sps:$4 sm:$0xff]   ;;  %v16575_v22 = vpack.c.bf16 %v382_v63, %v382_v63  ;;  %v14472_v43 = vld [vmem:[%s16480_s15 + $0xf1c] ss:$28 sps:$4 sm:$0xff]   ;;  %v14500_v10 = vld [vmem:[%s16480_s15 + $0x1030] ss:$28 sps:$4 sm:$0xff]  }
  0x2f   : > { %9321 = vmatpush1.bf16.msra.mxu1 %v14374_v23  ;;  %v16545_v62 = vpack.c.bf16 %v366_v60, %v366_v60  ;;  %v14435_v17 = vld [vmem:[%s16480_s15 + $0xdc8] ss:$28 sps:$4 sm:$0xff]   ;;  %v14436_v23 = vld [vmem:[%s16480_s15 + $0x380] ss:$28 sps:$4 sm:$0xff]   ;;  %vm11474_vm6 = vcmask 1041408   ;;  %vm11475_vm7 = vcmask 1043458  }
  0x30   : > { %9444 = vmatpush1.bf16.msra.mxu0 %v14375_v24  ;;  %9322 = vmatprep.subr.bf16.mxu1 %v14376_v25  ;;  %v16553_v5 = vpack.c.bf16 %v384_v4, %v384_v4  ;;  %v14442_v19 = vld [vmem:[%s16480_s15 + $0xe04] ss:$28 sps:$4 sm:$0xff]   ;;  %v14445_v25 = vld [vmem:[%s16480_s15 + $0x3bc] ss:$28 sps:$4 sm:$0xff]   ;;  %v14481_v53 = vld [vmem:[%s16480_s15 + $0x50c] ss:$28 sps:$4 sm:$0xff]  }
  0x31   : > { %9445 = vmatprep.subr.bf16.mxu0 %v14378_v26  ;;  %9342 = vmatprep.mubr.bf16.mxu1 %v16545_v62  ;;  %v14440_v24 = vld [vmem:[%s16480_s15 + $0xe00] ss:$28 sps:$4 sm:$0xff]   ;;  %v14458_v37 = vld [vmem:[%s16480_s15 + $0xea8] ss:$28 sps:$4 sm:$0xff]   ;;  %v14491_v4 = vld [vmem:[%s16480_s15 + $0x578] ss:$28 sps:$4 sm:$0xff]  }
  0x32   : > { %9465 = vmatprep.mubr.bf16.mxu0 %v16553_v5  ;;  %v14448_v26 = vld [vmem:[%s16480_s15 + $0xe3c] ss:$28 sps:$4 sm:$0xff]   ;;  %v14463_v38 = vld [vmem:[%s16480_s15 + $0x464] ss:$28 sps:$4 sm:$0xff]   ;;  %v14484_v55 = vld [vmem:[%s16480_s15 + $0xf8c] ss:$28 sps:$4 sm:$0xff]  }
  0x33   : > { %9323 = vmatpush1.bf16.msra.mxu1 %v14380_v27  ;;  %v16581_v27 = vpack.c.bf16 %v367_v20, %v367_v20  ;;  %v14466_v39 = vld [vmem:[%s16480_s15 + $0xee4] ss:$28 sps:$4 sm:$0xff]   ;;  %v14517_v20 = vld [vmem:[%s16480_s15 + $0x65c] ss:$28 sps:$4 sm:$0xff]   ;;  %vm11476_vm8 = vmor %vm11475_vm7, %vm11474_vm6  ;;  %vm11477_vm9 = vcmask 259076   ;;  %p13571_p7 = scmp.ne.s32.totalorder %s16390_s24, 1 }
  0x34   : > { %9446 = vmatpush1.bf16.msra.mxu0 %v14381_v28  ;;  %9324 = vmatprep.subr.bf16.mxu1 %v14382_v29  ;;  %v14443_v28 = vld [vmem:[%s16480_s15 + $0x3b8] ss:$28 sps:$4 sm:$0xff]   ;;  %v14487_v60 = vld [vmem:[%s16480_s15 + $0x544] ss:$28 sps:$4 sm:$0xff]   ;;  %vm11478_vm10 = vmor %vm11477_vm9, %vm11476_vm8  ;;  %vm16406_vm11 = vmmov (!%p13571_p7), 0   ;;  %vm11703_vm12 = vcmask (!%p13571_p7), 261120  }
  0x35   : > { %9447 = vmatprep.subr.bf16.mxu0 %v14384_v30  ;;  %v14446_v29 = vld [vmem:[%s16480_s15 + $0xe38] ss:$28 sps:$4 sm:$0xff]   ;;  %v14490_v63 = vld [vmem:[%s16480_s15 + $0xfc4] ss:$28 sps:$4 sm:$0xff]   ;;  %vm12011_vm13 = vcmask (!%p13571_p7), 1043456   ;;  %vm12007_vm14 = vcmask (!%p13571_p7), 818176  }
  0x36   : > { %v14451_v30 = vld [vmem:[%s16480_s15 + $0x3f4] ss:$28 sps:$4 sm:$0xff]  }
  0x37   : > { %9325 = vmatpush1.bf16.msra.mxu1 %v14386_v31  ;;  %v14454_v31 = vld [vmem:[%s16480_s15 + $0xe74] ss:$28 sps:$4 sm:$0xff]  }
  0x38   : > { %9448 = vmatpush1.bf16.msra.mxu0 %v14387_v32  ;;  %9326 = vmatprep.subr.bf16.mxu1 %v14388_v33  ;;  %v14449_v32 = vld [vmem:[%s16480_s15 + $0x3f0] ss:$28 sps:$4 sm:$0xff]  }
  0x39   : > { %9449 = vmatprep.subr.bf16.mxu0 %v14390_v34  ;;  %v14452_v33 = vld [vmem:[%s16480_s15 + $0xe70] ss:$28 sps:$4 sm:$0xff]  }
  0x3a   : > { %v14457_v34 = vld [vmem:[%s16480_s15 + $0x42c] ss:$28 sps:$4 sm:$0xff]  }
  0x3b   : > { %9327 = vmatpush1.bf16.msra.mxu1 %v14392_v35  ;;  %v14460_v35 = vld [vmem:[%s16480_s15 + $0xeac] ss:$28 sps:$4 sm:$0xff]  }
  0x3c   : > { %9450 = vmatpush1.bf16.msra.mxu0 %v14393_v36  ;;  %9328 = vmatprep.subr.bf16.mxu1 %v14394_v40  ;;  %v14455_v36 = vld [vmem:[%s16480_s15 + $0x428] ss:$28 sps:$4 sm:$0xff]   ;;  %v14461_v40 = vld [vmem:[%s16480_s15 + $0x460] ss:$28 sps:$4 sm:$0xff]  }
  0x3d   : > { %9451 = vmatprep.subr.bf16.mxu0 %v14396_v41  ;;  %v14464_v41 = vld [vmem:[%s16480_s15 + $0xee0] ss:$28 sps:$4 sm:$0xff]  }
  0x3f   : > { %9329 = vmatpush1.bf16.msra.mxu1 %v14398_v42  ;;  %v14469_v42 = vld [vmem:[%s16480_s15 + $0x49c] ss:$28 sps:$4 sm:$0xff]  }
  0x40   : > { %9452 = vmatpush1.bf16.msra.mxu0 %v14399_v45  ;;  %9330 = vmatprep.subr.bf16.mxu1 %v14400_v46  ;;  %v14467_v45 = vld [vmem:[%s16480_s15 + $0x498] ss:$28 sps:$4 sm:$0xff]  }
  0x41   : > { %9453 = vmatprep.subr.bf16.mxu0 %v14402_v47  ;;  %v14470_v46 = vld [vmem:[%s16480_s15 + $0xf18] ss:$28 sps:$4 sm:$0xff]  }
  0x42   : > { %v14475_v47 = vld [vmem:[%s16480_s15 + $0x4d4] ss:$28 sps:$4 sm:$0xff]  }
  0x43   : > { %9331 = vmatpush1.bf16.msra.mxu1 %v14404_v48  ;;  %v14478_v48 = vld [vmem:[%s16480_s15 + $0xf54] ss:$28 sps:$4 sm:$0xff]  }
  0x44   : > { %9454 = vmatpush1.bf16.msra.mxu0 %v14405_v49  ;;  %9332 = vmatprep.subr.bf16.mxu1 %v14406_v51  ;;  %v14473_v49 = vld [vmem:[%s16480_s15 + $0x4d0] ss:$28 sps:$4 sm:$0xff]  }
  0x45   : > { %9455 = vmatprep.subr.bf16.mxu0 %v14408_v52  ;;  %v16608_v51 = vld [vmem:[%s16475_s11 + $0x10] sm:$0xff] }
  0x46   : > { %v14476_v52 = vld [vmem:[%s16480_s15 + $0xf50] ss:$28 sps:$4 sm:$0xff]  }
  0x47   : > { %9333 = vmatpush1.bf16.msra.mxu1 %v14410_v54  ;;  %v16614_v54 = vrot.slane %v16608_v51, %v16530_v50 }
  0x48   : > { %9456 = vmatpush1.bf16.msra.mxu0 %v14411_v56  ;;  %9334 = vmatprep.subr.bf16.mxu1 %v14412_v58  ;;  %v14479_v58 = vld [vmem:[%s16480_s15 + $0x508] ss:$28 sps:$4 sm:$0xff]  }
  0x49   : > { %9457 = vmatprep.subr.bf16.mxu0 %v14414_v59  ;;  %v400_v56 = vcombine.high %v16614_v54, %v16614_v54  ;;  %v14482_v59 = vld [vmem:[%s16480_s15 + $0xf88] ss:$28 sps:$4 sm:$0xff]  }
  0x4b   : > { %9335 = vmatpush1.bf16.msra.mxu1 %v14416_v0  ;;  %v16622_v61 = vpack.c.bf16 %v400_v56, %v400_v56  ;;  %v14485_v0 = vld [vmem:[%s16480_s15 + $0x540] ss:$28 sps:$4 sm:$0xff]   ;;  %v14554_v56 = vld [vmem:[%s16480_s15 + $0x7ac] ss:$28 sps:$4 sm:$0xff]  }
  0x4c   : > { %9458 = vmatpush1.bf16.msra.mxu0 %v14417_v1  ;;  %9336 = vmatprep.subr.bf16.mxu1 %v14418_v2  ;;  %v14488_v1 = vld [vmem:[%s16480_s15 + $0xfc0] ss:$28 sps:$4 sm:$0xff]  }
  0x4d   : > { %9459 = vmatprep.subr.bf16.mxu0 %v14420_v3  ;;  %v14493_v2 = vld [vmem:[%s16480_s15 + $0x57c] ss:$28 sps:$4 sm:$0xff]  }
  0x4e   : > { %v14496_v3 = vld [vmem:[%s16480_s15 + $0xffc] ss:$28 sps:$4 sm:$0xff]  }
  0x4f   : > { %9337 = vmatpush1.bf16.msra.mxu1 %v14422_v6  ;;  %v14494_v6 = vld [vmem:[%s16480_s15 + $0xff8] ss:$28 sps:$4 sm:$0xff]  }
  0x50   : > { %9460 = vmatpush1.bf16.msra.mxu0 %v14423_v7  ;;  %9338 = vmatprep.subr.bf16.mxu1 %v14424_v8  ;;  %v14499_v7 = vld [vmem:[%s16480_s15 + $0x5b4] ss:$28 sps:$4 sm:$0xff]  }
  0x51   : > { %9461 = vmatprep.subr.bf16.mxu0 %v14426_v9  ;;  %v14502_v8 = vld [vmem:[%s16480_s15 + $0x1034] ss:$28 sps:$4 sm:$0xff]  }
  0x52   : > { %v14497_v9 = vld [vmem:[%s16480_s15 + $0x5b0] ss:$28 sps:$4 sm:$0xff]  }
  0x53   : > { %9339 = vmatpush1.bf16.msra.mxu1 %v14428_v11  ;;  %v14505_v11 = vld [vmem:[%s16480_s15 + $0x5ec] ss:$28 sps:$4 sm:$0xff]  }
  0x54   : > { %9462 = vmatpush1.bf16.msra.mxu0 %v14429_v12  ;;  %9340 = vmatprep.subr.bf16.mxu1 %v14430_v13  ;;  %v14508_v12 = vld [vmem:[%s16480_s15 + $0x106c] ss:$28 sps:$4 sm:$0xff]  }
  0x55   : > { %9463 = vmatprep.subr.bf16.mxu0 %v14432_v14  ;;  %v14503_v13 = vld [vmem:[%s16480_s15 + $0x5e8] ss:$28 sps:$4 sm:$0xff]  }
  0x56   : > { %v14506_v14 = vld [vmem:[%s16480_s15 + $0x1068] ss:$28 sps:$4 sm:$0xff]  }
  0x57   : > { %9341 = vmatpush1.bf16.msra.mxu1 %v14434_v16  ;;  %v14511_v16 = vld [vmem:[%s16480_s15 + $0x624] ss:$28 sps:$4 sm:$0xff]  }
  0x58   : > { %9464 = vmatpush1.bf16.msra.mxu0 %v14435_v17  ;;  %9351 = vmatprep.subr.bf16.mxu1 %v14438_v18  ;;  %v14514_v17 = vld [vmem:[%s16480_s15 + $0x10a4] ss:$28 sps:$4 sm:$0xff]  }
  0x59   : > { %9474 = vmatprep.subr.bf16.mxu0 %v14442_v19  ;;  %v14509_v18 = vld [vmem:[%s16480_s15 + $0x620] ss:$28 sps:$4 sm:$0xff]  }
  0x5a   : > { %9343 = vmatmul.mubr.bf16.vlgmr.msra.gmra.mrb[0].mxu1 %v16573_v21  ;;  %v14512_v19 = vld [vmem:[%s16480_s15 + $0x10a0] ss:$28 sps:$4 sm:$0xff]  }
  0x5b   : > { %9466 = vmatmul.mubr.bf16.vlgmr.msra.gmra.mrb[0].mxu0 %v16575_v22  ;;  %9352 = vmatpush1.bf16.msra.mxu1 %v14436_v23  ;;  %v14520_v23 = vld [vmem:[%s16480_s15 + $0x10dc] ss:$28 sps:$4 sm:$0xff]  }
  0x5c   : > { %9475 = vmatpush1.bf16.msra.mxu0 %v14440_v24  ;;  %9353 = vmatprep.subr.bf16.mxu1 %v14445_v25  ;;  %v14515_v24 = vld [vmem:[%s16480_s15 + $0x658] ss:$28 sps:$4 sm:$0xff]  }
  0x5d   : > { %9476 = vmatprep.subr.bf16.mxu0 %v14448_v26  ;;  %9383 = vmatprep.mubr.bf16.mxu1 %v16581_v27  ;;  %v14518_v25 = vld [vmem:[%s16480_s15 + $0x10d8] ss:$28 sps:$4 sm:$0xff]  }
  0x5e   : > { %9506 = vmatprep.mubr.bf16.mxu0 %v16622_v61  ;;  %v14523_v26 = vld [vmem:[%s16480_s15 + $0x694] ss:$28 sps:$4 sm:$0xff]  }
  0x5f   : > { %9354 = vmatpush1.bf16.msra.mxu1 %v14443_v28  ;;  %v14526_v28 = vld [vmem:[%s16480_s15 + $0x1114] ss:$28 sps:$4 sm:$0xff]  }
  0x60   : > { %9477 = vmatpush1.bf16.msra.mxu0 %v14446_v29  ;;  %9355 = vmatprep.subr.bf16.mxu1 %v14451_v30  ;;  %v385_v29 = vcombine.high %v16608_v51, %v16608_v51  ;;  %v14521_v30 = vld [vmem:[%s16480_s15 + $0x690] ss:$28 sps:$4 sm:$0xff]   ;;  %v14543_v51 = vld [vmem:[%s16480_s15 + $0x11b8] ss:$28 sps:$4 sm:$0xff]  }
  0x61   : > { %9478 = vmatprep.subr.bf16.mxu0 %v14454_v31  ;;  %v14524_v31 = vld [vmem:[%s16480_s15 + $0x1110] ss:$28 sps:$4 sm:$0xff]  }
  0x63   : > { %9356 = vmatpush1.bf16.msra.mxu1 %v14449_v32  ;;  %v14529_v32 = vld [vmem:[%s16480_s15 + $0x6cc] ss:$28 sps:$4 sm:$0xff]  }
  0x64   : > { %9479 = vmatpush1.bf16.msra.mxu0 %v14452_v33  ;;  %9357 = vmatprep.subr.bf16.mxu1 %v14457_v34  ;;  %v14532_v33 = vld [vmem:[%s16480_s15 + $0x114c] ss:$28 sps:$4 sm:$0xff]   ;;  %v16658_v34 = vrot.slane %v16539_v57, %v16530_v50 }
  0x65   : > { %9480 = vmatprep.subr.bf16.mxu0 %v14460_v35  ;;  %v16661_v35 = vrot.slane %v385_v29, %v16530_v50  ;;  %v14599_v29 = vld [vmem:[%s16480_s15 + $0x13b4] ss:$28 sps:$4 sm:$0xff]  }
  0x67   : > { %9358 = vmatpush1.bf16.msra.mxu1 %v14455_v36  ;;  %v14527_v36 = vld [vmem:[%s16480_s15 + $0x6c8] ss:$28 sps:$4 sm:$0xff]   ;;  %v401_v57 = vcombine.high %v16661_v35, %v16661_v35 }
  0x68   : > { %9481 = vmatpush1.bf16.msra.mxu0 %v14458_v37  ;;  %9359 = vmatprep.subr.bf16.mxu1 %v14463_v38  ;;  %v14530_v37 = vld [vmem:[%s16480_s15 + $0x1148] ss:$28 sps:$4 sm:$0xff]  }
  0x69   : > { %9482 = vmatprep.subr.bf16.mxu0 %v14466_v39  ;;  %v14536_v38 = vld [vmem:[%s16480_s15 + $0x704] ss:$28 sps:$4 sm:$0xff]  }
  0x6a   : > { %v14539_v39 = vld [vmem:[%s16480_s15 + $0x1184] ss:$28 sps:$4 sm:$0xff]  }
  0x6b   : > { %9360 = vmatpush1.bf16.msra.mxu1 %v14461_v40  ;;  %v383_v40 = vcombine.high %v16658_v34, %v16658_v34 }
  0x6c   : > { %9483 = vmatpush1.bf16.msra.mxu0 %v14464_v41  ;;  %9361 = vmatprep.subr.bf16.mxu1 %v14469_v42  ;;  %v14534_v41 = vld [vmem:[%s16480_s15 + $0x700] ss:$28 sps:$4 sm:$0xff]   ;;  %v16674_v42 = vpack.c.bf16 %v16565_v15, %v16565_v15  ;;  %v14540_v15 = vld [vmem:[%s16480_s15 + $0x738] ss:$28 sps:$4 sm:$0xff]  }
  0x6d   : > { %9484 = vmatprep.subr.bf16.mxu0 %v14472_v43  ;;  %v16678_v43 = vpack.c.bf16 %v16614_v54, %v16614_v54  ;;  %v14546_v54 = vld [vmem:[%s16480_s15 + $0x770] ss:$28 sps:$4 sm:$0xff]  }
  0x6f   : > { %9362 = vmatpush1.bf16.msra.mxu1 %v14467_v45  ;;  %v14537_v45 = vld [vmem:[%s16480_s15 + $0x1180] ss:$28 sps:$4 sm:$0xff]  }
  0x70   : > { %9485 = vmatpush1.bf16.msra.mxu0 %v14470_v46  ;;  %9363 = vmatprep.subr.bf16.mxu1 %v14475_v47  ;;  %v14542_v46 = vld [vmem:[%s16480_s15 + $0x73c] ss:$28 sps:$4 sm:$0xff]  }
  0x71   : > { %9486 = vmatprep.subr.bf16.mxu0 %v14478_v48  ;;  %v14545_v47 = vld [vmem:[%s16480_s15 + $0x11bc] ss:$28 sps:$4 sm:$0xff]   ;;  %v16683_v48 = vpack.c.bf16 %v383_v40, %v383_v40 }
  0x72   : > { %v14606_v40 = vld [vmem:[%s16480_s15 + $0x9a0] ss:$28 sps:$4 sm:$0xff]  }
  0x73   : > { %9364 = vmatpush1.bf16.msra.mxu1 %v14473_v49  ;;  %v16685_v49 = vpack.c.bf16 %v401_v57, %v401_v57  ;;  %v14609_v57 = vld [vmem:[%s16480_s15 + $0x1420] ss:$28 sps:$4 sm:$0xff]  }
  0x74   : > { %9487 = vmatpush1.bf16.msra.mxu0 %v14476_v52  ;;  %9365 = vmatprep.subr.bf16.mxu1 %v14481_v53  ;;  %v14548_v52 = vld [vmem:[%s16480_s15 + $0x774] ss:$28 sps:$4 sm:$0xff]  }
  0x75   : > { %9488 = vmatprep.subr.bf16.mxu0 %v14484_v55  ;;  %v14551_v53 = vld [vmem:[%s16480_s15 + $0x11f4] ss:$28 sps:$4 sm:$0xff]  }
  0x76   : > { %v14549_v55 = vld [vmem:[%s16480_s15 + $0x11f0] ss:$28 sps:$4 sm:$0xff]  }
  0x77   : > { %9366 = vmatpush1.bf16.msra.mxu1 %v14479_v58  ;;  %v14557_v58 = vld [vmem:[%s16480_s15 + $0x122c] ss:$28 sps:$4 sm:$0xff]  }
  0x78   : > { %9489 = vmatpush1.bf16.msra.mxu0 %v14482_v59  ;;  %9367 = vmatprep.subr.bf16.mxu1 %v14487_v60  ;;  %v14552_v59 = vld [vmem:[%s16480_s15 + $0x7a8] ss:$28 sps:$4 sm:$0xff]  }
  0x79   : > { %9490 = vmatprep.subr.bf16.mxu0 %v14490_v63  ;;  %v14555_v60 = vld [vmem:[%s16480_s15 + $0x1228] ss:$28 sps:$4 sm:$0xff]  }
  0x7a   : > { %v14560_v63 = vld [vmem:[%s16480_s15 + $0x7e4] ss:$28 sps:$4 sm:$0xff]  }
  0x7b   : > { %9368 = vmatpush1.bf16.msra.mxu1 %v14485_v0  ;;  %v14563_v0 = vld [vmem:[%s16480_s15 + $0x1264] ss:$28 sps:$4 sm:$0xff]  }
  0x7c   : > { %9491 = vmatpush1.bf16.msra.mxu0 %v14488_v1  ;;  %9369 = vmatprep.subr.bf16.mxu1 %v14493_v2  ;;  %v14558_v1 = vld [vmem:[%s16480_s15 + $0x7e0] ss:$28 sps:$4 sm:$0xff]  }
  0x7d   : > { %9492 = vmatprep.subr.bf16.mxu0 %v14496_v3  ;;  %v14561_v2 = vld [vmem:[%s16480_s15 + $0x1260] ss:$28 sps:$4 sm:$0xff]  }
  0x7e   : > { %v14566_v3 = vld [vmem:[%s16480_s15 + $0x81c] ss:$28 sps:$4 sm:$0xff]  }
  0x7f   : > { %9370 = vmatpush1.bf16.msra.mxu1 %v14491_v4  ;;  %v14569_v4 = vld [vmem:[%s16480_s15 + $0x129c] ss:$28 sps:$4 sm:$0xff]  }
  0x80   : > { %9493 = vmatpush1.bf16.msra.mxu0 %v14494_v6  ;;  %9371 = vmatprep.subr.bf16.mxu1 %v14499_v7  ;;  %v14564_v6 = vld [vmem:[%s16480_s15 + $0x818] ss:$28 sps:$4 sm:$0xff]  }
  0x81   : > { %9494 = vmatprep.subr.bf16.mxu0 %v14502_v8  ;;  %v14567_v7 = vld [vmem:[%s16480_s15 + $0x1298] ss:$28 sps:$4 sm:$0xff]  }
  0x82   : > { %v14572_v8 = vld [vmem:[%s16480_s15 + $0x854] ss:$28 sps:$4 sm:$0xff]  }
  0x83   : > { %9372 = vmatpush1.bf16.msra.mxu1 %v14497_v9  ;;  %v14575_v9 = vld [vmem:[%s16480_s15 + $0x12d4] ss:$28 sps:$4 sm:$0xff]  }
  0x84   : > { %9495 = vmatpush1.bf16.msra.mxu0 %v14500_v10  ;;  %9373 = vmatprep.subr.bf16.mxu1 %v14505_v11  ;;  %v14570_v10 = vld [vmem:[%s16480_s15 + $0x850] ss:$28 sps:$4 sm:$0xff]  }
  0x85   : > { %9496 = vmatprep.subr.bf16.mxu0 %v14508_v12  ;;  %v14573_v11 = vld [vmem:[%s16480_s15 + $0x12d0] ss:$28 sps:$4 sm:$0xff]  }
  0x86   : > { %v14578_v12 = vld [vmem:[%s16480_s15 + $0x88c] ss:$28 sps:$4 sm:$0xff]  }
  0x87   : > { %9374 = vmatpush1.bf16.msra.mxu1 %v14503_v13  ;;  %v14581_v13 = vld [vmem:[%s16480_s15 + $0x130c] ss:$28 sps:$4 sm:$0xff]  }
  0x88   : > { %9497 = vmatpush1.bf16.msra.mxu0 %v14506_v14  ;;  %9375 = vmatprep.subr.bf16.mxu1 %v14511_v16  ;;  %v14576_v14 = vld [vmem:[%s16480_s15 + $0x888] ss:$28 sps:$4 sm:$0xff]  }
  0x89   : > { %9498 = vmatprep.subr.bf16.mxu0 %v14514_v17  ;;  %v14579_v16 = vld [vmem:[%s16480_s15 + $0x1308] ss:$28 sps:$4 sm:$0xff]  }
  0x8a   : > { %v14584_v17 = vld [vmem:[%s16480_s15 + $0x8c4] ss:$28 sps:$4 sm:$0xff]  }
  0x8b   : > { %9376 = vmatpush1.bf16.msra.mxu1 %v14509_v18  ;;  %v14587_v18 = vld [vmem:[%s16480_s15 + $0x1344] ss:$28 sps:$4 sm:$0xff]  }
  0x8c   : > { %9499 = vmatpush1.bf16.msra.mxu0 %v14512_v19  ;;  %9377 = vmatprep.subr.bf16.mxu1 %v14517_v20  ;;  %v14582_v19 = vld [vmem:[%s16480_s15 + $0x8c0] ss:$28 sps:$4 sm:$0xff]  }
  0x8d   : > { %9500 = vmatprep.subr.bf16.mxu0 %v14520_v23  ;;  %v14585_v20 = vld [vmem:[%s16480_s15 + $0x1340] ss:$28 sps:$4 sm:$0xff]  }
  0x8e   : > { %v14590_v23 = vld [vmem:[%s16480_s15 + $0x8fc] ss:$28 sps:$4 sm:$0xff]  }
  0x8f   : > { %9378 = vmatpush1.bf16.msra.mxu1 %v14515_v24  ;;  %v14593_v24 = vld [vmem:[%s16480_s15 + $0x137c] ss:$28 sps:$4 sm:$0xff]  }
  0x90   : > { %9501 = vmatpush1.bf16.msra.mxu0 %v14518_v25  ;;  %9379 = vmatprep.subr.bf16.mxu1 %v14523_v26  ;;  %v14588_v25 = vld [vmem:[%s16480_s15 + $0x8f8] ss:$28 sps:$4 sm:$0xff]  }
  0x91   : > { %9502 = vmatprep.subr.bf16.mxu0 %v14526_v28  ;;  %v14591_v26 = vld [vmem:[%s16480_s15 + $0x1378] ss:$28 sps:$4 sm:$0xff]  }
  0x92   : > { %v14596_v28 = vld [vmem:[%s16480_s15 + $0x934] ss:$28 sps:$4 sm:$0xff]  }
  0x93   : > { %9380 = vmatpush1.bf16.msra.mxu1 %v14521_v30  ;;  %v14594_v30 = vld [vmem:[%s16480_s15 + $0x930] ss:$28 sps:$4 sm:$0xff]  }
  0x94   : > { %9503 = vmatpush1.bf16.msra.mxu0 %v14524_v31  ;;  %9381 = vmatprep.subr.bf16.mxu1 %v14529_v32  ;;  %v14597_v31 = vld [vmem:[%s16480_s15 + $0x13b0] ss:$28 sps:$4 sm:$0xff]  }
  0x95   : > { %9504 = vmatprep.subr.bf16.mxu0 %v14532_v33  ;;  %v14602_v32 = vld [vmem:[%s16480_s15 + $0x96c] ss:$28 sps:$4 sm:$0xff]  }
  0x96   : > { %v14605_v33 = vld [vmem:[%s16480_s15 + $0x13ec] ss:$28 sps:$4 sm:$0xff]  }
  0x97   : > { %9382 = vmatpush1.bf16.msra.mxu1 %v14527_v36  ;;  %v14600_v36 = vld [vmem:[%s16480_s15 + $0x968] ss:$28 sps:$4 sm:$0xff]  }
  0x98   : > { %9505 = vmatpush1.bf16.msra.mxu0 %v14530_v37  ;;  %9392 = vmatprep.subr.bf16.mxu1 %v14536_v38  ;;  %v14603_v37 = vld [vmem:[%s16480_s15 + $0x13e8] ss:$28 sps:$4 sm:$0xff]  }
  0x99   : > { %9515 = vmatprep.subr.bf16.mxu0 %v14539_v39  ;;  %v14608_v38 = vld [vmem:[%s16480_s15 + $0x9a4] ss:$28 sps:$4 sm:$0xff]  }
  0x9a   : > { %9384 = vmatmul.mubr.bf16.vlgmr.msra.gmra.mrb[0].mxu1 %v16674_v42  ;;  %v14611_v39 = vld [vmem:[%s16480_s15 + $0x1424] ss:$28 sps:$4 sm:$0xff]  }
  0x9b   : > { %9507 = vmatmul.mubr.bf16.vlgmr.msra.gmra.mrb[0].mxu0 %v16678_v43  ;;  %9393 = vmatpush1.bf16.msra.mxu1 %v14534_v41  ;;  %v14614_v41 = vld [vmem:[%s16480_s15 + $0x9dc] ss:$28 sps:$4 sm:$0xff]  }
  0x9c   : > { %9516 = vmatpush1.bf16.msra.mxu0 %v14537_v45  ;;  %9394 = vmatprep.subr.bf16.mxu1 %v14542_v46  ;;  %v14617_v45 = vld [vmem:[%s16480_s15 + $0x145c] ss:$28 sps:$4 sm:$0xff]  }
  0x9d   : > { %9517 = vmatprep.subr.bf16.mxu0 %v14545_v47  ;;  %9424 = vmatprep.mubr.bf16.mxu1 %v16683_v48  ;;  %v14612_v46 = vld [vmem:[%s16480_s15 + $0x9d8] ss:$28 sps:$4 sm:$0xff]  }
  0x9e   : > { %9547 = vmatprep.mubr.bf16.mxu0 %v16685_v49  ;;  %v14615_v47 = vld [vmem:[%s16480_s15 + $0x1458] ss:$28 sps:$4 sm:$0xff]  }
  0x9f   : > { %9395 = vmatpush1.bf16.msra.mxu1 %v14540_v15  ;;  %v14620_v15 = vld [vmem:[%s16480_s15 + $0xa14] ss:$28 sps:$4 sm:$0xff]  }
  0xa0   : > { %9518 = vmatpush1.bf16.msra.mxu0 %v14543_v51  ;;  %9396 = vmatprep.subr.bf16.mxu1 %v14548_v52  ;;  %v14623_v51 = vld [vmem:[%s16480_s15 + $0x1494] ss:$28 sps:$4 sm:$0xff]  }
  0xa1   : > { %9519 = vmatprep.subr.bf16.mxu0 %v14551_v53  ;;  %v14618_v52 = vld [vmem:[%s16480_s15 + $0xa10] ss:$28 sps:$4 sm:$0xff]  }
  0xa2   : > { %v14621_v53 = vld [vmem:[%s16480_s15 + $0x1490] ss:$28 sps:$4 sm:$0xff]  }
  0xa3   : > { %9397 = vmatpush1.bf16.msra.mxu1 %v14546_v54  ;;  %v16746_v54 = vld [vmem:[%s16475_s11 + $0x18] sm:$0xff] }
  0xa4   : > { %9520 = vmatpush1.bf16.msra.mxu0 %v14549_v55  ;;  %9398 = vmatprep.subr.bf16.mxu1 %v14554_v56  ;;  %v14626_v55 = vld [vmem:[%s16480_s15 + $0xa4c] ss:$28 sps:$4 sm:$0xff]  }
  0xa5   : > { %9521 = vmatprep.subr.bf16.mxu0 %v14557_v58  ;;  %v14629_v56 = vld [vmem:[%s16480_s15 + $0x14cc] ss:$28 sps:$4 sm:$0xff]   ;;  %v16752_v58 = vrot.slane %v16746_v54, %v16530_v50 }
  0xa7   : > { %9399 = vmatpush1.bf16.msra.mxu1 %v14552_v59  ;;  %v14624_v59 = vld [vmem:[%s16480_s15 + $0xa48] ss:$28 sps:$4 sm:$0xff]  }
  0xa8   : > { %9522 = vmatpush1.bf16.msra.mxu0 %v14555_v60  ;;  %9400 = vmatprep.subr.bf16.mxu1 %v14560_v63  ;;  %v14627_v60 = vld [vmem:[%s16480_s15 + $0x14c8] ss:$28 sps:$4 sm:$0xff]  }
  0xa9   : > { %9523 = vmatprep.subr.bf16.mxu0 %v14563_v0  ;;  %v14633_v63 = vld [vmem:[%s16480_s15 + $0x1504] ss:$28 sps:$4 sm:$0xff]   ;;  %v14636_v0 = vld [vmem:[%s16480_s15 + $0xc] ss:$28 sps:$4 sm:$0xff]  }
  0xab   : > { %9401 = vmatpush1.bf16.msra.mxu1 %v14558_v1  ;;  %v417_v1 = vcombine.high %v16752_v58, %v16752_v58 }
  0xac   : > { %9524 = vmatpush1.bf16.msra.mxu0 %v14561_v2  ;;  %9402 = vmatprep.subr.bf16.mxu1 %v14566_v3  ;;  %v16762_v2 = vpack.c.bf16 %v16658_v34, %v16658_v34  ;;  %v14631_v3 = vld [vmem:[%s16480_s15 + $0x1500] ss:$28 sps:$4 sm:$0xff]   ;;  %v14637_v34 = vld [vmem:[%s16480_s15 + $0x1538] ss:$28 sps:$4 sm:$0xff]  }
  0xad   : > { %9525 = vmatprep.subr.bf16.mxu0 %v14569_v4  ;;  %v14634_v4 = vld [vmem:[%s16480_s15 + $0x8] ss:$28 sps:$4 sm:$0xff]  }
  0xaf   : > { %9403 = vmatpush1.bf16.msra.mxu1 %v14564_v6  ;;  %v16768_v6 = vpack.c.bf16 %v16661_v35, %v16661_v35  ;;  %v14645_v35 = vld [vmem:[%s16480_s15 + $0x1574] ss:$28 sps:$4 sm:$0xff]  }
  0xb0   : > { %9526 = vmatpush1.bf16.msra.mxu0 %v14567_v7  ;;  %9404 = vmatprep.subr.bf16.mxu1 %v14572_v8  ;;  %v14639_v7 = vld [vmem:[%s16480_s15 + $0x153c] ss:$28 sps:$4 sm:$0xff]   ;;  %v14642_v8 = vld [vmem:[%s16480_s15 + $0x44] ss:$28 sps:$4 sm:$0xff]  }
  0xb1   : > { %9527 = vmatprep.subr.bf16.mxu0 %v14575_v9  ;;  %v16772_v9 = vpack.c.bf16 %v417_v1, %v417_v1  ;;  %v14705_v1 = vld [vmem:[%s16480_s15 + $0x17a4] ss:$28 sps:$4 sm:$0xff]  }
  0xb3   : > { %9405 = vmatpush1.bf16.msra.mxu1 %v14570_v10  ;;  %v14640_v10 = vld [vmem:[%s16480_s15 + $0x40] ss:$28 sps:$4 sm:$0xff]  }
  0xb4   : > { %9528 = vmatpush1.bf16.msra.mxu0 %v14573_v11  ;;  %9406 = vmatprep.subr.bf16.mxu1 %v14578_v12  ;;  %v14648_v11 = vld [vmem:[%s16480_s15 + $0x7c] ss:$28 sps:$4 sm:$0xff]   ;;  %v14643_v12 = vld [vmem:[%s16480_s15 + $0x1570] ss:$28 sps:$4 sm:$0xff]  }
  0xb5   : > { %9529 = vmatprep.subr.bf16.mxu0 %v14581_v13  ;;  %v14646_v13 = vld [vmem:[%s16480_s15 + $0x78] ss:$28 sps:$4 sm:$0xff]  }
  0xb7   : > { %9407 = vmatpush1.bf16.msra.mxu1 %v14576_v14  ;;  %v14651_v14 = vld [vmem:[%s16480_s15 + $0x15ac] ss:$28 sps:$4 sm:$0xff]  }
  0xb8   : > { %9530 = vmatpush1.bf16.msra.mxu0 %v14579_v16  ;;  %9408 = vmatprep.subr.bf16.mxu1 %v14584_v17  ;;  %v14654_v16 = vld [vmem:[%s16480_s15 + $0xb4] ss:$28 sps:$4 sm:$0xff]   ;;  %v14649_v17 = vld [vmem:[%s16480_s15 + $0x15a8] ss:$28 sps:$4 sm:$0xff]  }
  0xb9   : > { %9531 = vmatprep.subr.bf16.mxu0 %v14587_v18  ;;  %v14652_v18 = vld [vmem:[%s16480_s15 + $0xb0] ss:$28 sps:$4 sm:$0xff]  }
  0xbb   : > { %9409 = vmatpush1.bf16.msra.mxu1 %v14582_v19  ;;  %v14657_v19 = vld [vmem:[%s16480_s15 + $0x15e4] ss:$28 sps:$4 sm:$0xff]  }
  0xbc   : > { %9532 = vmatpush1.bf16.msra.mxu0 %v14585_v20  ;;  %9410 = vmatprep.subr.bf16.mxu1 %v14590_v23  ;;  %v14660_v20 = vld [vmem:[%s16480_s15 + $0xec] ss:$28 sps:$4 sm:$0xff]   ;;  %v14655_v23 = vld [vmem:[%s16480_s15 + $0x15e0] ss:$28 sps:$4 sm:$0xff]  }
  0xbd   : > { %9533 = vmatprep.subr.bf16.mxu0 %v14593_v24  ;;  %v14658_v24 = vld [vmem:[%s16480_s15 + $0xe8] ss:$28 sps:$4 sm:$0xff]  }
  0xbf   : > { %9411 = vmatpush1.bf16.msra.mxu1 %v14588_v25  ;;  %v14663_v25 = vld [vmem:[%s16480_s15 + $0x161c] ss:$28 sps:$4 sm:$0xff]  }
  0xc0   : > { %9534 = vmatpush1.bf16.msra.mxu0 %v14591_v26  ;;  %9412 = vmatprep.subr.bf16.mxu1 %v14596_v28  ;;  %v14666_v26 = vld [vmem:[%s16480_s15 + $0x124] ss:$28 sps:$4 sm:$0xff]   ;;  %v14661_v28 = vld [vmem:[%s16480_s15 + $0x1618] ss:$28 sps:$4 sm:$0xff]  }
  0xc1   : > { %9535 = vmatprep.subr.bf16.mxu0 %v14599_v29  ;;  %v14664_v29 = vld [vmem:[%s16480_s15 + $0x120] ss:$28 sps:$4 sm:$0xff]  }
  0xc3   : > { %9413 = vmatpush1.bf16.msra.mxu1 %v14594_v30  ;;  %v14669_v30 = vld [vmem:[%s16480_s15 + $0x1654] ss:$28 sps:$4 sm:$0xff]  }
  0xc4   : > { %9536 = vmatpush1.bf16.msra.mxu0 %v14597_v31  ;;  %9414 = vmatprep.subr.bf16.mxu1 %v14602_v32  ;;  %v14672_v31 = vld [vmem:[%s16480_s15 + $0x15c] ss:$28 sps:$4 sm:$0xff]   ;;  %v14667_v32 = vld [vmem:[%s16480_s15 + $0x1650] ss:$28 sps:$4 sm:$0xff]  }
  0xc5   : > { %9537 = vmatprep.subr.bf16.mxu0 %v14605_v33  ;;  %v14670_v33 = vld [vmem:[%s16480_s15 + $0x158] ss:$28 sps:$4 sm:$0xff]  }
  0xc7   : > { %9415 = vmatpush1.bf16.msra.mxu1 %v14600_v36  ;;  %v14675_v36 = vld [vmem:[%s16480_s15 + $0x168c] ss:$28 sps:$4 sm:$0xff]  }
  0xc8   : > { %9538 = vmatpush1.bf16.msra.mxu0 %v14603_v37  ;;  %9416 = vmatprep.subr.bf16.mxu1 %v14608_v38  ;;  %v14678_v37 = vld [vmem:[%s16480_s15 + $0x194] ss:$28 sps:$4 sm:$0xff]   ;;  %v14673_v38 = vld [vmem:[%s16480_s15 + $0x1688] ss:$28 sps:$4 sm:$0xff]  }
  0xc9   : > { %9539 = vmatprep.subr.bf16.mxu0 %v14611_v39  ;;  %v14676_v39 = vld [vmem:[%s16480_s15 + $0x190] ss:$28 sps:$4 sm:$0xff]  }
  0xcb   : > { %9417 = vmatpush1.bf16.msra.mxu1 %v14606_v40  ;;  %v14681_v40 = vld [vmem:[%s16480_s15 + $0x16c4] ss:$28 sps:$4 sm:$0xff]  }
  0xcc   : > { %9540 = vmatpush1.bf16.msra.mxu0 %v14609_v57  ;;  %9418 = vmatprep.subr.bf16.mxu1 %v14614_v41  ;;  %v14684_v57 = vld [vmem:[%s16480_s15 + $0x1cc] ss:$28 sps:$4 sm:$0xff]   ;;  %v14679_v41 = vld [vmem:[%s16480_s15 + $0x16c0] ss:$28 sps:$4 sm:$0xff]  }
  0xcd   : > { %9541 = vmatprep.subr.bf16.mxu0 %v14617_v45  ;;  %v14682_v45 = vld [vmem:[%s16480_s15 + $0x1c8] ss:$28 sps:$4 sm:$0xff]  }
  0xcf   : > { %9419 = vmatpush1.bf16.msra.mxu1 %v14612_v46  ;;  %v14687_v46 = vld [vmem:[%s16480_s15 + $0x16fc] ss:$28 sps:$4 sm:$0xff]  }
  0xd0   : > { %9542 = vmatpush1.bf16.msra.mxu0 %v14615_v47  ;;  %9420 = vmatprep.subr.bf16.mxu1 %v14620_v15  ;;  %v14690_v47 = vld [vmem:[%s16480_s15 + $0x204] ss:$28 sps:$4 sm:$0xff]   ;;  %v14685_v15 = vld [vmem:[%s16480_s15 + $0x16f8] ss:$28 sps:$4 sm:$0xff]  }
  0xd1   : > { %9543 = vmatprep.subr.bf16.mxu0 %v14623_v51  ;;  %v14688_v51 = vld [vmem:[%s16480_s15 + $0x200] ss:$28 sps:$4 sm:$0xff]  }
  0xd3   : > { %9421 = vmatpush1.bf16.msra.mxu1 %v14618_v52  ;;  %v14693_v52 = vld [vmem:[%s16480_s15 + $0x1734] ss:$28 sps:$4 sm:$0xff]  }
  0xd4   : > { %9544 = vmatpush1.bf16.msra.mxu0 %v14621_v53  ;;  %9422 = vmatprep.subr.bf16.mxu1 %v14626_v55  ;;  %v14696_v53 = vld [vmem:[%s16480_s15 + $0x23c] ss:$28 sps:$4 sm:$0xff]   ;;  %v14691_v55 = vld [vmem:[%s16480_s15 + $0x1730] ss:$28 sps:$4 sm:$0xff]  }
  0xd5   : > { %9545 = vmatprep.subr.bf16.mxu0 %v14629_v56  ;;  %v14694_v56 = vld [vmem:[%s16480_s15 + $0x238] ss:$28 sps:$4 sm:$0xff]  }
  0xd7   : > { %9423 = vmatpush1.bf16.msra.mxu1 %v14624_v59  ;;  %v14699_v59 = vld [vmem:[%s16480_s15 + $0x176c] ss:$28 sps:$4 sm:$0xff]  }
  0xd8   : > { %9546 = vmatpush1.bf16.msra.mxu0 %v14627_v60  ;;  %9843 = vmatprep.subr.bf16.mxu1 %v14636_v0  ;;  %v14702_v60 = vld [vmem:[%s16480_s15 + $0x274] ss:$28 sps:$4 sm:$0xff]  }
  0xd9   : > { %9556 = vmatprep.subr.bf16.mxu0 %v14633_v63  ;;  %v14697_v63 = vld [vmem:[%s16480_s15 + $0x1768] ss:$28 sps:$4 sm:$0xff]   ;;  %v14700_v0 = vld [vmem:[%s16480_s15 + $0x270] ss:$28 sps:$4 sm:$0xff]  }
  0xda   : > { %9425 = vmatmul.mubr.bf16.vlgmr.msra.gmra.mrb[0].mxu1 %v16762_v2 }
  0xdb   : > { %9548 = vmatmul.mubr.bf16.vlgmr.msra.gmra.mrb[0].mxu0 %v16768_v6  ;;  %9844 = vmatpush1.bf16.msra.mxu1 %v14634_v4  ;;  %v14703_v4 = vld [vmem:[%s16480_s15 + $0x17a0] ss:$28 sps:$4 sm:$0xff]  }
  0xdc   : > { %9557 = vmatpush1.bf16.msra.mxu0 %v14631_v3  ;;  %9845 = vmatprep.subr.bf16.mxu1 %v14642_v8  ;;  %v14708_v3 = vld [vmem:[%s16480_s15 + $0x2ac] ss:$28 sps:$4 sm:$0xff]   ;;  %v14711_v8 = vld [vmem:[%s16480_s15 + $0x17dc] ss:$28 sps:$4 sm:$0xff]  }
  0xdd   : > { %9558 = vmatprep.subr.bf16.mxu0 %v14639_v7  ;;  %9588 = vmatprep.mubr.bf16.mxu0 %v16772_v9  ;;  %v14706_v7 = vld [vmem:[%s16480_s15 + $0x2a8] ss:$28 sps:$4 sm:$0xff]  }
  0xde   : > { %9875 = vmatprep.mubr.bf16.mxu1 %v16545_v62 }
  0xdf   : > { %9846 = vmatpush1.bf16.msra.mxu1 %v14640_v10  ;;  %v14709_v10 = vld [vmem:[%s16480_s15 + $0x17d8] ss:$28 sps:$4 sm:$0xff]  }
  0xe0   : > { %9559 = vmatpush1.bf16.msra.mxu0 %v14637_v34  ;;  %9847 = vmatprep.subr.bf16.mxu1 %v14648_v11  ;;  %v14714_v34 = vld [vmem:[%s16480_s15 + $0x2e4] ss:$28 sps:$4 sm:$0xff]   ;;  %v14717_v11 = vld [vmem:[%s16480_s15 + $0x1814] ss:$28 sps:$4 sm:$0xff]  }
  0xe1   : > { %9560 = vmatprep.subr.bf16.mxu0 %v14645_v35  ;;  %v14712_v35 = vld [vmem:[%s16480_s15 + $0x2e0] ss:$28 sps:$4 sm:$0xff]  }
  0xe3   : > { %9848 = vmatpush1.bf16.msra.mxu1 %v14646_v13  ;;  %v402_v13 = vcombine.high %v16746_v54, %v16746_v54  ;;  %v14729_v54 = vld [vmem:[%s16480_s15 + $0x1884] ss:$28 sps:$4 sm:$0xff]  }
  0xe4   : > { %9561 = vmatpush1.bf16.msra.mxu0 %v14643_v12  ;;  %9849 = vmatprep.subr.bf16.mxu1 %v14654_v16  ;;  %v14720_v12 = vld [vmem:[%s16480_s15 + $0x31c] ss:$28 sps:$4 sm:$0xff]  }
  0xe5   : > { %9562 = vmatprep.subr.bf16.mxu0 %v14651_v14  ;;  %v14715_v14 = vld [vmem:[%s16480_s15 + $0x1810] ss:$28 sps:$4 sm:$0xff]   ;;  %v14718_v16 = vld [vmem:[%s16480_s15 + $0x318] ss:$28 sps:$4 sm:$0xff]  }
  0xe7   : > { %9850 = vmatpush1.bf16.msra.mxu1 %v14652_v18  ;;  %v14726_v18 = vld [vmem:[%s16480_s15 + $0x354] ss:$28 sps:$4 sm:$0xff]  }
  0xe8   : > { %9563 = vmatpush1.bf16.msra.mxu0 %v14649_v17  ;;  %9851 = vmatprep.subr.bf16.mxu1 %v14660_v20  ;;  %v14723_v17 = vld [vmem:[%s16480_s15 + $0x184c] ss:$28 sps:$4 sm:$0xff]  }
  0xe9   : > { %9564 = vmatprep.subr.bf16.mxu0 %v14657_v19  ;;  %v16837_v19 = vrot.slane %v402_v13, %v16530_v50  ;;  %v14721_v20 = vld [vmem:[%s16480_s15 + $0x1848] ss:$28 sps:$4 sm:$0xff]   ;;  %v14781_v13 = vld [vmem:[%s16480_s15 + $0x1a78] ss:$28 sps:$4 sm:$0xff]  }
  0xeb   : > { %9852 = vmatpush1.bf16.msra.mxu1 %v14658_v24  ;;  %v14732_v24 = vld [vmem:[%s16480_s15 + $0x38c] ss:$28 sps:$4 sm:$0xff]  }
  0xec   : > { %9565 = vmatpush1.bf16.msra.mxu0 %v14655_v23  ;;  %9853 = vmatprep.subr.bf16.mxu1 %v14666_v26  ;;  %v14724_v23 = vld [vmem:[%s16480_s15 + $0x350] ss:$28 sps:$4 sm:$0xff]   ;;  %v14727_v26 = vld [vmem:[%s16480_s15 + $0x1880] ss:$28 sps:$4 sm:$0xff]  }
  0xed   : > { %9566 = vmatprep.subr.bf16.mxu0 %v14663_v25  ;;  %v418_v25 = vcombine.high %v16837_v19, %v16837_v19 }
  0xef   : > { %9854 = vmatpush1.bf16.msra.mxu1 %v14664_v29  ;;  %v14730_v29 = vld [vmem:[%s16480_s15 + $0x388] ss:$28 sps:$4 sm:$0xff]  }
  0xf0   : > { %9567 = vmatpush1.bf16.msra.mxu0 %v14661_v28  ;;  %9855 = vmatprep.subr.bf16.mxu1 %v14672_v31  ;;  %v16848_v28 = vpack.c.bf16 %v16752_v58, %v16752_v58  ;;  %v14738_v31 = vld [vmem:[%s16480_s15 + $0x3c4] ss:$28 sps:$4 sm:$0xff]  }
  0xf1   : > { %9568 = vmatprep.subr.bf16.mxu0 %v14669_v30  ;;  %v14735_v30 = vld [vmem:[%s16480_s15 + $0x18bc] ss:$28 sps:$4 sm:$0xff]  }
  0xf2   : > { %v14736_v58 = vld [vmem:[%s16480_s15 + $0x3c0] ss:$28 sps:$4 sm:$0xff]  }
  0xf3   : > { %9856 = vmatpush1.bf16.msra.mxu1 %v14670_v33  ;;  %v14733_v33 = vld [vmem:[%s16480_s15 + $0x18b8] ss:$28 sps:$4 sm:$0xff]  }
  0xf4   : > { %9569 = vmatpush1.bf16.msra.mxu0 %v14667_v32  ;;  %9857 = vmatprep.subr.bf16.mxu1 %v14678_v37  ;;  %v16853_v32 = vpack.c.bf16 %v418_v25, %v418_v25  ;;  %v14744_v37 = vld [vmem:[%s16480_s15 + $0x3fc] ss:$28 sps:$4 sm:$0xff]   ;;  %v14796_v25 = vld [vmem:[%s16480_s15 + $0x5f0] ss:$28 sps:$4 sm:$0xff]  }
  0xf5   : > { %9570 = vmatprep.subr.bf16.mxu0 %v14675_v36  ;;  %v14741_v36 = vld [vmem:[%s16480_s15 + $0x18f4] ss:$28 sps:$4 sm:$0xff]  }
  0xf7   : > { %9858 = vmatpush1.bf16.msra.mxu1 %v14676_v39  ;;  %v14742_v39 = vld [vmem:[%s16480_s15 + $0x3f8] ss:$28 sps:$4 sm:$0xff]  }
  0xf8   : > { %9571 = vmatpush1.bf16.msra.mxu0 %v14673_v38  ;;  %9859 = vmatprep.subr.bf16.mxu1 %v14684_v57  ;;  %v14739_v38 = vld [vmem:[%s16480_s15 + $0x18f0] ss:$28 sps:$4 sm:$0xff]  }
  0xf9   : > { %9572 = vmatprep.subr.bf16.mxu0 %v14681_v40  ;;  %v14747_v40 = vld [vmem:[%s16480_s15 + $0x192c] ss:$28 sps:$4 sm:$0xff]   ;;  %v14750_v57 = vld [vmem:[%s16480_s15 + $0x434] ss:$28 sps:$4 sm:$0xff]  }
  0xfb   : > { %9860 = vmatpush1.bf16.msra.mxu1 %v14682_v45  ;;  %v14748_v45 = vld [vmem:[%s16480_s15 + $0x430] ss:$28 sps:$4 sm:$0xff]  }
  0xfc   : > { %9573 = vmatpush1.bf16.msra.mxu0 %v14679_v41  ;;  %9861 = vmatprep.subr.bf16.mxu1 %v14690_v47  ;;  %v14745_v41 = vld [vmem:[%s16480_s15 + $0x1928] ss:$28 sps:$4 sm:$0xff]  }
  0xfd   : > { %9574 = vmatprep.subr.bf16.mxu0 %v14687_v46  ;;  %v14753_v46 = vld [vmem:[%s16480_s15 + $0x1964] ss:$28 sps:$4 sm:$0xff]   ;;  %v14756_v47 = vld [vmem:[%s16480_s15 + $0x46c] ss:$28 sps:$4 sm:$0xff]  }
  0xff   : > { %9862 = vmatpush1.bf16.msra.mxu1 %v14688_v51  ;;  %v14754_v51 = vld [vmem:[%s16480_s15 + $0x468] ss:$28 sps:$4 sm:$0xff]  }
 0x100   : > { %9575 = vmatpush1.bf16.msra.mxu0 %v14685_v15  ;;  %9863 = vmatprep.subr.bf16.mxu1 %v14696_v53  ;;  %v14751_v15 = vld [vmem:[%s16480_s15 + $0x1960] ss:$28 sps:$4 sm:$0xff]  }
 0x101   : > { %9576 = vmatprep.subr.bf16.mxu0 %v14693_v52  ;;  %v14759_v52 = vld [vmem:[%s16480_s15 + $0x199c] ss:$28 sps:$4 sm:$0xff]   ;;  %v14762_v53 = vld [vmem:[%s16480_s15 + $0x4a4] ss:$28 sps:$4 sm:$0xff]  }
 0x103   : > { %9864 = vmatpush1.bf16.msra.mxu1 %v14694_v56  ;;  %v14760_v56 = vld [vmem:[%s16480_s15 + $0x4a0] ss:$28 sps:$4 sm:$0xff]  }
 0x104   : > { %9577 = vmatpush1.bf16.msra.mxu0 %v14691_v55  ;;  %9865 = vmatprep.subr.bf16.mxu1 %v14702_v60  ;;  %v14757_v55 = vld [vmem:[%s16480_s15 + $0x1998] ss:$28 sps:$4 sm:$0xff]  }
 0x105   : > { %9578 = vmatprep.subr.bf16.mxu0 %v14699_v59  ;;  %v14765_v59 = vld [vmem:[%s16480_s15 + $0x19d4] ss:$28 sps:$4 sm:$0xff]   ;;  %v14768_v60 = vld [vmem:[%s16480_s15 + $0x4dc] ss:$28 sps:$4 sm:$0xff]  }
 0x107   : > { %9866 = vmatpush1.bf16.msra.mxu1 %v14700_v0  ;;  %v14766_v0 = vld [vmem:[%s16480_s15 + $0x4d8] ss:$28 sps:$4 sm:$0xff]  }
 0x108   : > { %9579 = vmatpush1.bf16.msra.mxu0 %v14697_v63  ;;  %9867 = vmatprep.subr.bf16.mxu1 %v14708_v3  ;;  %v14763_v63 = vld [vmem:[%s16480_s15 + $0x19d0] ss:$28 sps:$4 sm:$0xff]  }
 0x109   : > { %9580 = vmatprep.subr.bf16.mxu0 %v14705_v1  ;;  %v14771_v1 = vld [vmem:[%s16480_s15 + $0x1a0c] ss:$28 sps:$4 sm:$0xff]   ;;  %v14774_v3 = vld [vmem:[%s16480_s15 + $0x514] ss:$28 sps:$4 sm:$0xff]  }
 0x10b   : > { %9868 = vmatpush1.bf16.msra.mxu1 %v14706_v7  ;;  %v14772_v7 = vld [vmem:[%s16480_s15 + $0x510] ss:$28 sps:$4 sm:$0xff]  }
 0x10c   : > { %9581 = vmatpush1.bf16.msra.mxu0 %v14703_v4  ;;  %9869 = vmatprep.subr.bf16.mxu1 %v14714_v34  ;;  %v14769_v4 = vld [vmem:[%s16480_s15 + $0x1a08] ss:$28 sps:$4 sm:$0xff]  }
 0x10d   : > { %9582 = vmatprep.subr.bf16.mxu0 %v14711_v8  ;;  %v14777_v8 = vld [vmem:[%s16480_s15 + $0x1a44] ss:$28 sps:$4 sm:$0xff]   ;;  %v14780_v34 = vld [vmem:[%s16480_s15 + $0x54c] ss:$28 sps:$4 sm:$0xff]  }
 0x10f   : > { %9870 = vmatpush1.bf16.msra.mxu1 %v14712_v35  ;;  %v14778_v35 = vld [vmem:[%s16480_s15 + $0x548] ss:$28 sps:$4 sm:$0xff]  }
 0x110   : > { %9583 = vmatpush1.bf16.msra.mxu0 %v14709_v10  ;;  %9871 = vmatprep.subr.bf16.mxu1 %v14720_v12  ;;  %v14775_v10 = vld [vmem:[%s16480_s15 + $0x1a40] ss:$28 sps:$4 sm:$0xff]  }
 0x111   : > { %9584 = vmatprep.subr.bf16.mxu0 %v14717_v11  ;;  %v14783_v11 = vld [vmem:[%s16480_s15 + $0x1a7c] ss:$28 sps:$4 sm:$0xff]   ;;  %v14786_v12 = vld [vmem:[%s16480_s15 + $0x584] ss:$28 sps:$4 sm:$0xff]  }
 0x113   : > { %9872 = vmatpush1.bf16.msra.mxu1 %v14718_v16  ;;  %v14789_v16 = vld [vmem:[%s16480_s15 + $0x1ab4] ss:$28 sps:$4 sm:$0xff]  }
 0x114   : > { %9585 = vmatpush1.bf16.msra.mxu0 %v14715_v14  ;;  %9873 = vmatprep.subr.bf16.mxu1 %v14726_v18  ;;  %v14784_v14 = vld [vmem:[%s16480_s15 + $0x580] ss:$28 sps:$4 sm:$0xff]   ;;  %v14787_v18 = vld [vmem:[%s16480_s15 + $0x1ab0] ss:$28 sps:$4 sm:$0xff]  }
 0x115   : > { %9586 = vmatprep.subr.bf16.mxu0 %v14723_v17  ;;  %v14792_v17 = vld [vmem:[%s16480_s15 + $0x5bc] ss:$28 sps:$4 sm:$0xff]  }
 0x117   : > { %9874 = vmatpush1.bf16.msra.mxu1 %v14724_v23  ;;  %v14795_v23 = vld [vmem:[%s16480_s15 + $0x1aec] ss:$28 sps:$4 sm:$0xff]  }
 0x118   : > { %9587 = vmatpush1.bf16.msra.mxu0 %v14721_v20  ;;  %9884 = vmatprep.subr.bf16.mxu1 %v14732_v24  ;;  %v14790_v20 = vld [vmem:[%s16480_s15 + $0x5b8] ss:$28 sps:$4 sm:$0xff]   ;;  %v14793_v24 = vld [vmem:[%s16480_s15 + $0x1ae8] ss:$28 sps:$4 sm:$0xff]  }
 0x119   : > { %9597 = vmatprep.subr.bf16.mxu0 %v14729_v54  ;;  %v14798_v54 = vld [vmem:[%s16480_s15 + $0x5f4] ss:$28 sps:$4 sm:$0xff]  }
 0x11a   : > { %9876 = vmatmul.mubr.bf16.vlgmr.msra.gmra.mrb[4].mxu1 %v16573_v21 }
 0x11b   : > { %9589 = vmatmul.mubr.bf16.vlgmr.msra.gmra.mrb[0].mxu0 %v16848_v28  ;;  %9885 = vmatpush1.bf16.msra.mxu1 %v14730_v29  ;;  %v14804_v29 = vld [vmem:[%s16480_s15 + $0x62c] ss:$28 sps:$4 sm:$0xff]  }
 0x11c   : > { %9598 = vmatpush1.bf16.msra.mxu0 %v14727_v26  ;;  %9886 = vmatprep.subr.bf16.mxu1 %v14738_v31  ;;  %v14801_v26 = vld [vmem:[%s16480_s15 + $0x1b24] ss:$28 sps:$4 sm:$0xff]  }
 0x11d   : > { %9599 = vmatprep.subr.bf16.mxu0 %v14735_v30  ;;  %9629 = vmatprep.mubr.bf16.mxu0 %v16853_v32  ;;  %v14799_v30 = vld [vmem:[%s16480_s15 + $0x1b20] ss:$28 sps:$4 sm:$0xff]   ;;  %v14802_v31 = vld [vmem:[%s16480_s15 + $0x628] ss:$28 sps:$4 sm:$0xff]  }
 0x11e   : > { %9916 = vmatprep.mubr.bf16.mxu1 %v16581_v27 }
 0x11f   : > { %9887 = vmatpush1.bf16.msra.mxu1 %v14736_v58  ;;  %v14810_v58 = vld [vmem:[%s16480_s15 + $0x664] ss:$28 sps:$4 sm:$0xff]  }
 0x120   : > { %9600 = vmatpush1.bf16.msra.mxu0 %v14733_v33  ;;  %9888 = vmatprep.subr.bf16.mxu1 %v14744_v37  ;;  %v14807_v33 = vld [vmem:[%s16480_s15 + $0x1b5c] ss:$28 sps:$4 sm:$0xff]  }
 0x121   : > { %9601 = vmatprep.subr.bf16.mxu0 %v14741_v36  ;;  %v14805_v36 = vld [vmem:[%s16480_s15 + $0x1b58] ss:$28 sps:$4 sm:$0xff]   ;;  %v14808_v37 = vld [vmem:[%s16480_s15 + $0x660] ss:$28 sps:$4 sm:$0xff]  }
 0x123   : > { %9889 = vmatpush1.bf16.msra.mxu1 %v14742_v39  ;;  %v14816_v39 = vld [vmem:[%s16480_s15 + $0x69c] ss:$28 sps:$4 sm:$0xff]  }
 0x124   : > { %9602 = vmatpush1.bf16.msra.mxu0 %v14739_v38  ;;  %9890 = vmatprep.subr.bf16.mxu1 %v14750_v57  ;;  %v14813_v38 = vld [vmem:[%s16480_s15 + $0x1b94] ss:$28 sps:$4 sm:$0xff]  }
 0x125   : > { %9603 = vmatprep.subr.bf16.mxu0 %v14747_v40  ;;  %v16912_v40 = vld [vmem:[%s16475_s11 + $0x20] sm:$0xff]  ;;  %v14811_v57 = vld [vmem:[%s16480_s15 + $0x1b90] ss:$28 sps:$4 sm:$0xff]  }
 0x127   : > { %9891 = vmatpush1.bf16.msra.mxu1 %v14748_v45  ;;  %v14819_v45 = vld [vmem:[%s16480_s15 + $0x1bcc] ss:$28 sps:$4 sm:$0xff]  }
 0x128   : > { %9604 = vmatpush1.bf16.msra.mxu0 %v14745_v41  ;;  %9892 = vmatprep.subr.bf16.mxu1 %v14756_v47  ;;  %v14814_v41 = vld [vmem:[%s16480_s15 + $0x698] ss:$28 sps:$4 sm:$0xff]   ;;  %v16920_v47 = vrot.slane %v16912_v40, %v16530_v50 }
 0x129   : > { %9605 = vmatprep.subr.bf16.mxu0 %v14753_v46  ;;  %v14822_v46 = vld [vmem:[%s16480_s15 + $0x6d4] ss:$28 sps:$4 sm:$0xff]  }
 0x12b   : > { %9893 = vmatpush1.bf16.msra.mxu1 %v14754_v51  ;;  %v14820_v51 = vld [vmem:[%s16480_s15 + $0x6d0] ss:$28 sps:$4 sm:$0xff]  }
 0x12c   : > { %9606 = vmatpush1.bf16.msra.mxu0 %v14751_v15  ;;  %9894 = vmatprep.subr.bf16.mxu1 %v14762_v53  ;;  %v14817_v15 = vld [vmem:[%s16480_s15 + $0x1bc8] ss:$28 sps:$4 sm:$0xff]  }
 0x12d   : > { %9607 = vmatprep.subr.bf16.mxu0 %v14759_v52  ;;  %v14826_v52 = vld [vmem:[%s16480_s15 + $0x1c04] ss:$28 sps:$4 sm:$0xff]   ;;  %v14829_v53 = vld [vmem:[%s16480_s15 + $0x70c] ss:$28 sps:$4 sm:$0xff]  }
 0x12f   : > { %9895 = vmatpush1.bf16.msra.mxu1 %v14760_v56  ;;  %v16930_v56 = vpack.c.bf16 %v16837_v19, %v16837_v19  ;;  %v14830_v19 = vld [vmem:[%s16480_s15 + $0x1c38] ss:$28 sps:$4 sm:$0xff]  }
 0x130   : > { %9608 = vmatpush1.bf16.msra.mxu0 %v14757_v55  ;;  %9896 = vmatprep.subr.bf16.mxu1 %v14768_v60  ;;  %v434_v55 = vcombine.high %v16920_v47, %v16920_v47  ;;  %v14827_v60 = vld [vmem:[%s16480_s15 + $0x708] ss:$28 sps:$4 sm:$0xff]  }
 0x131   : > { %9609 = vmatprep.subr.bf16.mxu0 %v14765_v59  ;;  %v14824_v59 = vld [vmem:[%s16480_s15 + $0x1c00] ss:$28 sps:$4 sm:$0xff]  }
 0x133   : > { %9897 = vmatpush1.bf16.msra.mxu1 %v14766_v0  ;;  %v14835_v0 = vld [vmem:[%s16480_s15 + $0x744] ss:$28 sps:$4 sm:$0xff]  }
 0x134   : > { %9610 = vmatpush1.bf16.msra.mxu0 %v14763_v63  ;;  %9898 = vmatprep.subr.bf16.mxu1 %v14774_v3  ;;  %v14832_v63 = vld [vmem:[%s16480_s15 + $0x1c3c] ss:$28 sps:$4 sm:$0xff]  }
 0x135   : > { %9611 = vmatprep.subr.bf16.mxu0 %v14771_v1  ;;  %v16936_v1 = vpack.c.bf16 %v434_v55, %v434_v55  ;;  %v14833_v3 = vld [vmem:[%s16480_s15 + $0x740] ss:$28 sps:$4 sm:$0xff]   ;;  %v14892_v55 = vld [vmem:[%s16480_s15 + $0x1e6c] ss:$28 sps:$4 sm:$0xff]  }
 0x137   : > { %9899 = vmatpush1.bf16.msra.mxu1 %v14772_v7  ;;  %v14841_v7 = vld [vmem:[%s16480_s15 + $0x77c] ss:$28 sps:$4 sm:$0xff]  }
 0x138   : > { %9612 = vmatpush1.bf16.msra.mxu0 %v14769_v4  ;;  %9900 = vmatprep.subr.bf16.mxu1 %v14780_v34  ;;  %v14838_v4 = vld [vmem:[%s16480_s15 + $0x1c74] ss:$28 sps:$4 sm:$0xff]  }
 0x139   : > { %9613 = vmatprep.subr.bf16.mxu0 %v14777_v8  ;;  %v14836_v8 = vld [vmem:[%s16480_s15 + $0x1c70] ss:$28 sps:$4 sm:$0xff]   ;;  %v14839_v34 = vld [vmem:[%s16480_s15 + $0x778] ss:$28 sps:$4 sm:$0xff]  }
 0x13b   : > { %9901 = vmatpush1.bf16.msra.mxu1 %v14778_v35  ;;  %v14847_v35 = vld [vmem:[%s16480_s15 + $0x7b4] ss:$28 sps:$4 sm:$0xff]  }
 0x13c   : > { %9614 = vmatpush1.bf16.msra.mxu0 %v14775_v10  ;;  %9902 = vmatprep.subr.bf16.mxu1 %v14786_v12  ;;  %v14844_v10 = vld [vmem:[%s16480_s15 + $0x1cac] ss:$28 sps:$4 sm:$0xff]  }
 0x13d   : > { %9615 = vmatprep.subr.bf16.mxu0 %v14783_v11  ;;  %v14842_v11 = vld [vmem:[%s16480_s15 + $0x1ca8] ss:$28 sps:$4 sm:$0xff]   ;;  %v14845_v12 = vld [vmem:[%s16480_s15 + $0x7b0] ss:$28 sps:$4 sm:$0xff]  }
 0x13f   : > { %9903 = vmatpush1.bf16.msra.mxu1 %v14784_v14  ;;  %v14853_v14 = vld [vmem:[%s16480_s15 + $0x7ec] ss:$28 sps:$4 sm:$0xff]  }
 0x140   : > { %9616 = vmatpush1.bf16.msra.mxu0 %v14781_v13  ;;  %9904 = vmatprep.subr.bf16.mxu1 %v14792_v17  ;;  %v14850_v13 = vld [vmem:[%s16480_s15 + $0x1ce4] ss:$28 sps:$4 sm:$0xff]  }
 0x141   : > { %9617 = vmatprep.subr.bf16.mxu0 %v14789_v16  ;;  %v14848_v16 = vld [vmem:[%s16480_s15 + $0x1ce0] ss:$28 sps:$4 sm:$0xff]   ;;  %v14851_v17 = vld [vmem:[%s16480_s15 + $0x7e8] ss:$28 sps:$4 sm:$0xff]  }
 0x143   : > { %9905 = vmatpush1.bf16.msra.mxu1 %v14790_v20  ;;  %v14859_v20 = vld [vmem:[%s16480_s15 + $0x824] ss:$28 sps:$4 sm:$0xff]  }
 0x144   : > { %9618 = vmatpush1.bf16.msra.mxu0 %v14787_v18  ;;  %9906 = vmatprep.subr.bf16.mxu1 %v14798_v54  ;;  %v14856_v18 = vld [vmem:[%s16480_s15 + $0x1d1c] ss:$28 sps:$4 sm:$0xff]  }
 0x145   : > { %9619 = vmatprep.subr.bf16.mxu0 %v14795_v23  ;;  %v14854_v23 = vld [vmem:[%s16480_s15 + $0x1d18] ss:$28 sps:$4 sm:$0xff]   ;;  %v14857_v54 = vld [vmem:[%s16480_s15 + $0x820] ss:$28 sps:$4 sm:$0xff]  }
 0x147   : > { %9907 = vmatpush1.bf16.msra.mxu1 %v14796_v25  ;;  %v14865_v25 = vld [vmem:[%s16480_s15 + $0x85c] ss:$28 sps:$4 sm:$0xff]  }
 0x148   : > { %9620 = vmatpush1.bf16.msra.mxu0 %v14793_v24  ;;  %9908 = vmatprep.subr.bf16.mxu1 %v14804_v29  ;;  %v14862_v24 = vld [vmem:[%s16480_s15 + $0x1d54] ss:$28 sps:$4 sm:$0xff]  }
 0x149   : > { %9621 = vmatprep.subr.bf16.mxu0 %v14801_v26  ;;  %v14860_v26 = vld [vmem:[%s16480_s15 + $0x1d50] ss:$28 sps:$4 sm:$0xff]   ;;  %v14863_v29 = vld [vmem:[%s16480_s15 + $0x858] ss:$28 sps:$4 sm:$0xff]  }
 0x14b   : > { %9909 = vmatpush1.bf16.msra.mxu1 %v14802_v31  ;;  %v14871_v31 = vld [vmem:[%s16480_s15 + $0x894] ss:$28 sps:$4 sm:$0xff]  }
 0x14c   : > { %9622 = vmatpush1.bf16.msra.mxu0 %v14799_v30  ;;  %9910 = vmatprep.subr.bf16.mxu1 %v14810_v58  ;;  %v14868_v30 = vld [vmem:[%s16480_s15 + $0x1d8c] ss:$28 sps:$4 sm:$0xff]  }
 0x14d   : > { %9623 = vmatprep.subr.bf16.mxu0 %v14807_v33  ;;  %v14866_v33 = vld [vmem:[%s16480_s15 + $0x1d88] ss:$28 sps:$4 sm:$0xff]   ;;  %v14869_v58 = vld [vmem:[%s16480_s15 + $0x890] ss:$28 sps:$4 sm:$0xff]  }
 0x14f   : > { %9911 = vmatpush1.bf16.msra.mxu1 %v14808_v37  ;;  %v14877_v37 = vld [vmem:[%s16480_s15 + $0x8cc] ss:$28 sps:$4 sm:$0xff]  }
 0x150   : > { %9624 = vmatpush1.bf16.msra.mxu0 %v14805_v36  ;;  %9912 = vmatprep.subr.bf16.mxu1 %v14816_v39  ;;  %v14874_v36 = vld [vmem:[%s16480_s15 + $0x1dc4] ss:$28 sps:$4 sm:$0xff]  }
 0x151   : > { %9625 = vmatprep.subr.bf16.mxu0 %v14813_v38  ;;  %v14872_v38 = vld [vmem:[%s16480_s15 + $0x1dc0] ss:$28 sps:$4 sm:$0xff]   ;;  %v14875_v39 = vld [vmem:[%s16480_s15 + $0x8c8] ss:$28 sps:$4 sm:$0xff]  }
 0x153   : > { %9913 = vmatpush1.bf16.msra.mxu1 %v14814_v41  ;;  %v14883_v41 = vld [vmem:[%s16480_s15 + $0x904] ss:$28 sps:$4 sm:$0xff]  }
 0x154   : > { %9626 = vmatpush1.bf16.msra.mxu0 %v14811_v57  ;;  %9914 = vmatprep.subr.bf16.mxu1 %v14822_v46  ;;  %v14880_v57 = vld [vmem:[%s16480_s15 + $0x1dfc] ss:$28 sps:$4 sm:$0xff]  }
 0x155   : > { %9627 = vmatprep.subr.bf16.mxu0 %v14819_v45  ;;  %v14878_v45 = vld [vmem:[%s16480_s15 + $0x1df8] ss:$28 sps:$4 sm:$0xff]   ;;  %v14881_v46 = vld [vmem:[%s16480_s15 + $0x900] ss:$28 sps:$4 sm:$0xff]  }
 0x157   : > { %9915 = vmatpush1.bf16.msra.mxu1 %v14820_v51  ;;  %v14889_v51 = vld [vmem:[%s16480_s15 + $0x93c] ss:$28 sps:$4 sm:$0xff]  }
 0x158   : > { %9628 = vmatpush1.bf16.msra.mxu0 %v14817_v15  ;;  %9925 = vmatprep.subr.bf16.mxu1 %v14829_v53  ;;  %v14886_v15 = vld [vmem:[%s16480_s15 + $0x1e34] ss:$28 sps:$4 sm:$0xff]  }
 0x159   : > { %9638 = vmatprep.subr.bf16.mxu0 %v14826_v52  ;;  %v14884_v52 = vld [vmem:[%s16480_s15 + $0x1e30] ss:$28 sps:$4 sm:$0xff]   ;;  %v14887_v53 = vld [vmem:[%s16480_s15 + $0x938] ss:$28 sps:$4 sm:$0xff]  }
 0x15a   : > { %9917 = vmatmul.mubr.bf16.vlgmr.msra.gmra.mrb[4].mxu1 %v16674_v42 }
 0x15b   : > { %9630 = vmatmul.mubr.bf16.vlgmr.msra.gmra.mrb[0].mxu0 %v16930_v56  ;;  %9926 = vmatpush1.bf16.msra.mxu1 %v14827_v60  ;;  %v14890_v60 = vld [vmem:[%s16480_s15 + $0x1e68] ss:$28 sps:$4 sm:$0xff]  }
 0x15c   : > { %9639 = vmatpush1.bf16.msra.mxu0 %v14824_v59  ;;  %9927 = vmatprep.subr.bf16.mxu1 %v14835_v0  ;;  %v14895_v59 = vld [vmem:[%s16480_s15 + $0x974] ss:$28 sps:$4 sm:$0xff]   ;;  %v14898_v0 = vld [vmem:[%s16480_s15 + $0x1ea4] ss:$28 sps:$4 sm:$0xff]  }
 0x15d   : > { %9640 = vmatprep.subr.bf16.mxu0 %v14832_v63  ;;  %9670 = vmatprep.mubr.bf16.mxu0 %v16936_v1  ;;  %v14893_v63 = vld [vmem:[%s16480_s15 + $0x970] ss:$28 sps:$4 sm:$0xff]  }
 0x15e   : > { %9957 = vmatprep.mubr.bf16.mxu1 %v16683_v48 }
 0x15f   : > { %9928 = vmatpush1.bf16.msra.mxu1 %v14833_v3  ;;  %v14896_v3 = vld [vmem:[%s16480_s15 + $0x1ea0] ss:$28 sps:$4 sm:$0xff]  }
 0x160   : > { %9641 = vmatpush1.bf16.msra.mxu0 %v14830_v19  ;;  %9929 = vmatprep.subr.bf16.mxu1 %v14841_v7  ;;  %v14901_v19 = vld [vmem:[%s16480_s15 + $0x9ac] ss:$28 sps:$4 sm:$0xff]   ;;  %v14904_v7 = vld [vmem:[%s16480_s15 + $0x1edc] ss:$28 sps:$4 sm:$0xff]  }
 0x161   : > { %9642 = vmatprep.subr.bf16.mxu0 %v14838_v4  ;;  %v14899_v4 = vld [vmem:[%s16480_s15 + $0x9a8] ss:$28 sps:$4 sm:$0xff]  }
 0x163   : > { %9930 = vmatpush1.bf16.msra.mxu1 %v14839_v34  ;;  %v14902_v34 = vld [vmem:[%s16480_s15 + $0x1ed8] ss:$28 sps:$4 sm:$0xff]  }
 0x164   : > { %9643 = vmatpush1.bf16.msra.mxu0 %v14836_v8  ;;  %9931 = vmatprep.subr.bf16.mxu1 %v14847_v35  ;;  %v14907_v8 = vld [vmem:[%s16480_s15 + $0x9e4] ss:$28 sps:$4 sm:$0xff]   ;;  %v14910_v35 = vld [vmem:[%s16480_s15 + $0x1f14] ss:$28 sps:$4 sm:$0xff]  }
 0x165   : > { %9644 = vmatprep.subr.bf16.mxu0 %v14844_v10  ;;  %v14905_v10 = vld [vmem:[%s16480_s15 + $0x9e0] ss:$28 sps:$4 sm:$0xff]  }
 0x167   : > { %9932 = vmatpush1.bf16.msra.mxu1 %v14845_v12  ;;  %v419_v12 = vcombine.high %v16912_v40, %v16912_v40  ;;  %v14914_v40 = vld [vmem:[%s16480_s15 + $0x1f48] ss:$28 sps:$4 sm:$0xff]  }
 0x168   : > { %9645 = vmatpush1.bf16.msra.mxu0 %v14842_v11  ;;  %9933 = vmatprep.subr.bf16.mxu1 %v14853_v14  ;;  %v14913_v11 = vld [vmem:[%s16480_s15 + $0xa1c] ss:$28 sps:$4 sm:$0xff]  }
 0x169   : > { %9646 = vmatprep.subr.bf16.mxu0 %v14850_v13  ;;  %v14908_v13 = vld [vmem:[%s16480_s15 + $0x1f10] ss:$28 sps:$4 sm:$0xff]   ;;  %v14911_v14 = vld [vmem:[%s16480_s15 + $0xa18] ss:$28 sps:$4 sm:$0xff]  }
 0x16b   : > { %9934 = vmatpush1.bf16.msra.mxu1 %v14851_v17  ;;  %v14919_v17 = vld [vmem:[%s16480_s15 + $0xa54] ss:$28 sps:$4 sm:$0xff]  }
 0x16c   : > { %9647 = vmatpush1.bf16.msra.mxu0 %v14848_v16  ;;  %9935 = vmatprep.subr.bf16.mxu1 %v14859_v20  ;;  %v14916_v16 = vld [vmem:[%s16480_s15 + $0x1f4c] ss:$28 sps:$4 sm:$0xff]  }
 0x16d   : > { %9648 = vmatprep.subr.bf16.mxu0 %v14856_v18  ;;  %v17001_v18 = vrot.slane %v419_v12, %v16530_v50  ;;  %v14917_v20 = vld [vmem:[%s16480_s15 + $0xa50] ss:$28 sps:$4 sm:$0xff]   ;;  %v14962_v12 = vld [vmem:[%s16480_s15 + $0x2108] ss:$28 sps:$4 sm:$0xff]  }
 0x16f   : > { %9936 = vmatpush1.bf16.msra.mxu1 %v14857_v54  ;;  %v14925_v54 = vld [vmem:[%s16480_s15 + $0xa8c] ss:$28 sps:$4 sm:$0xff]  }
 0x170   : > { %9649 = vmatpush1.bf16.msra.mxu0 %v14854_v23  ;;  %9937 = vmatprep.subr.bf16.mxu1 %v14865_v25  ;;  %v14922_v23 = vld [vmem:[%s16480_s15 + $0x1f84] ss:$28 sps:$4 sm:$0xff]   ;;  %v17011_v25 = vpack.c.bf16 %v16920_v47, %v16920_v47  ;;  %v14926_v47 = vld [vmem:[%s16480_s15 + $0x1fb8] ss:$28 sps:$4 sm:$0xff]  }
 0x171   : > { %9650 = vmatprep.subr.bf16.mxu0 %v14862_v24  ;;  %v435_v24 = vcombine.high %v17001_v18, %v17001_v18 }
 0x173   : > { %9938 = vmatpush1.bf16.msra.mxu1 %v14863_v29  ;;  %v14923_v29 = vld [vmem:[%s16480_s15 + $0xa88] ss:$28 sps:$4 sm:$0xff]  }
 0x174   : > { %9651 = vmatpush1.bf16.msra.mxu0 %v14860_v26  ;;  %9939 = vmatprep.subr.bf16.mxu1 %v14871_v31  ;;  %v14920_v26 = vld [vmem:[%s16480_s15 + $0x1f80] ss:$28 sps:$4 sm:$0xff]  }
 0x175   : > { %9652 = vmatprep.subr.bf16.mxu0 %v14868_v30  ;;  %v14928_v30 = vld [vmem:[%s16480_s15 + $0x1fbc] ss:$28 sps:$4 sm:$0xff]   ;;  %v14931_v31 = vld [vmem:[%s16480_s15 + $0xac4] ss:$28 sps:$4 sm:$0xff]  }
 0x177   : > { %9940 = vmatpush1.bf16.msra.mxu1 %v14869_v58  ;;  %v14929_v58 = vld [vmem:[%s16480_s15 + $0xac0] ss:$28 sps:$4 sm:$0xff]  }
 0x178   : > { %9653 = vmatpush1.bf16.msra.mxu0 %v14866_v33  ;;  %9941 = vmatprep.subr.bf16.mxu1 %v14877_v37  ;;  %v17017_v33 = vpack.c.bf16 %v435_v24, %v435_v24  ;;  %v14937_v37 = vld [vmem:[%s16480_s15 + $0xafc] ss:$28 sps:$4 sm:$0xff]  }
 0x179   : > { %9654 = vmatprep.subr.bf16.mxu0 %v14874_v36  ;;  %v14934_v36 = vld [vmem:[%s16480_s15 + $0x1ff4] ss:$28 sps:$4 sm:$0xff]   ;;  %v14977_v24 = vld [vmem:[%s16480_s15 + $0xc80] ss:$28 sps:$4 sm:$0xff]  }
 0x17b   : > { %9942 = vmatpush1.bf16.msra.mxu1 %v14875_v39  ;;  %v14935_v39 = vld [vmem:[%s16480_s15 + $0xaf8] ss:$28 sps:$4 sm:$0xff]  }
 0x17c   : > { %9655 = vmatpush1.bf16.msra.mxu0 %v14872_v38  ;;  %9943 = vmatprep.subr.bf16.mxu1 %v14883_v41  ;;  %v14932_v38 = vld [vmem:[%s16480_s15 + $0x1ff0] ss:$28 sps:$4 sm:$0xff]  }
 0x17d   : > { %9656 = vmatprep.subr.bf16.mxu0 %v14880_v57  ;;  %v14940_v57 = vld [vmem:[%s16480_s15 + $0x202c] ss:$28 sps:$4 sm:$0xff]   ;;  %v14943_v41 = vld [vmem:[%s16480_s15 + $0xb34] ss:$28 sps:$4 sm:$0xff]  }
 0x17f   : > { %9944 = vmatpush1.bf16.msra.mxu1 %v14881_v46  ;;  %v14941_v46 = vld [vmem:[%s16480_s15 + $0xb30] ss:$28 sps:$4 sm:$0xff]  }
 0x180   : > { %9657 = vmatpush1.bf16.msra.mxu0 %v14878_v45  ;;  %9945 = vmatprep.subr.bf16.mxu1 %v14889_v51  ;;  %v14938_v45 = vld [vmem:[%s16480_s15 + $0x2028] ss:$28 sps:$4 sm:$0xff]  }
 0x181   : > { %9658 = vmatprep.subr.bf16.mxu0 %v14886_v15  ;;  %v14946_v15 = vld [vmem:[%s16480_s15 + $0x2064] ss:$28 sps:$4 sm:$0xff]   ;;  %v14949_v51 = vld [vmem:[%s16480_s15 + $0xb6c] ss:$28 sps:$4 sm:$0xff]  }
 0x183   : > { %9946 = vmatpush1.bf16.msra.mxu1 %v14887_v53  ;;  %v14947_v53 = vld [vmem:[%s16480_s15 + $0xb68] ss:$28 sps:$4 sm:$0xff]  }
 0x184   : > { %9659 = vmatpush1.bf16.msra.mxu0 %v14884_v52  ;;  %9947 = vmatprep.subr.bf16.mxu1 %v14895_v59  ;;  %v14944_v52 = vld [vmem:[%s16480_s15 + $0x2060] ss:$28 sps:$4 sm:$0xff]  }
 0x185   : > { %9660 = vmatprep.subr.bf16.mxu0 %v14892_v55  ;;  %v14952_v55 = vld [vmem:[%s16480_s15 + $0x209c] ss:$28 sps:$4 sm:$0xff]   ;;  %v14955_v59 = vld [vmem:[%s16480_s15 + $0xba4] ss:$28 sps:$4 sm:$0xff]  }
 0x187   : > { %9948 = vmatpush1.bf16.msra.mxu1 %v14893_v63  ;;  %v14953_v63 = vld [vmem:[%s16480_s15 + $0xba0] ss:$28 sps:$4 sm:$0xff]  }
 0x188   : > { %9661 = vmatpush1.bf16.msra.mxu0 %v14890_v60  ;;  %9949 = vmatprep.subr.bf16.mxu1 %v14901_v19  ;;  %v14950_v60 = vld [vmem:[%s16480_s15 + $0x2098] ss:$28 sps:$4 sm:$0xff]  }
 0x189   : > { %9662 = vmatprep.subr.bf16.mxu0 %v14898_v0  ;;  %v14958_v0 = vld [vmem:[%s16480_s15 + $0x20d4] ss:$28 sps:$4 sm:$0xff]   ;;  %v14961_v19 = vld [vmem:[%s16480_s15 + $0xbdc] ss:$28 sps:$4 sm:$0xff]  }
 0x18b   : > { %9950 = vmatpush1.bf16.msra.mxu1 %v14899_v4 }
 0x18c   : > { %9663 = vmatpush1.bf16.msra.mxu0 %v14896_v3  ;;  %9951 = vmatprep.subr.bf16.mxu1 %v14907_v8  ;;  %v14956_v8 = vld [vmem:[%s16480_s15 + $0x20d0] ss:$28 sps:$4 sm:$0xff]  }
 0x18d   : > { %9664 = vmatprep.subr.bf16.mxu0 %v14904_v7 }
 0x18f   : > { %9952 = vmatpush1.bf16.msra.mxu1 %v14905_v10 }
 0x190   : > { %9665 = vmatpush1.bf16.msra.mxu0 %v14902_v34  ;;  %9953 = vmatprep.subr.bf16.mxu1 %v14913_v11  ;;  %v14959_v34 = vld [vmem:[%s16480_s15 + $0xbd8] ss:$28 sps:$4 sm:$0xff]  }
 0x191   : > { %9666 = vmatprep.subr.bf16.mxu0 %v14910_v35  ;;  %v14964_v35 = vld [vmem:[%s16480_s15 + $0x210c] ss:$28 sps:$4 sm:$0xff]   ;;  %v14967_v11 = vld [vmem:[%s16480_s15 + $0xc14] ss:$28 sps:$4 sm:$0xff]  }
 0x193   : > { %9954 = vmatpush1.bf16.msra.mxu1 %v14911_v14  ;;  %v14970_v14 = vld [vmem:[%s16480_s15 + $0x2144] ss:$28 sps:$4 sm:$0xff]  }
 0x194   : > { %9667 = vmatpush1.bf16.msra.mxu0 %v14908_v13  ;;  %9955 = vmatprep.subr.bf16.mxu1 %v14919_v17  ;;  %v14965_v13 = vld [vmem:[%s16480_s15 + $0xc10] ss:$28 sps:$4 sm:$0xff]   ;;  %v14968_v17 = vld [vmem:[%s16480_s15 + $0x2140] ss:$28 sps:$4 sm:$0xff]  }
 0x195   : > { %9668 = vmatprep.subr.bf16.mxu0 %v14916_v16  ;;  %v14973_v16 = vld [vmem:[%s16480_s15 + $0xc4c] ss:$28 sps:$4 sm:$0xff]  }
 0x197   : > { %9956 = vmatpush1.bf16.msra.mxu1 %v14917_v20  ;;  %v14976_v20 = vld [vmem:[%s16480_s15 + $0x217c] ss:$28 sps:$4 sm:$0xff]  }
 0x198   : > { %9669 = vmatpush1.bf16.msra.mxu0 %v14914_v40  ;;  %9966 = vmatprep.subr.bf16.mxu1 %v14925_v54  ;;  %v14971_v40 = vld [vmem:[%s16480_s15 + $0xc48] ss:$28 sps:$4 sm:$0xff]   ;;  %v14974_v54 = vld [vmem:[%s16480_s15 + $0x2178] ss:$28 sps:$4 sm:$0xff]  }
 0x199   : > { %9679 = vmatprep.subr.bf16.mxu0 %v14922_v23  ;;  %v14979_v23 = vld [vmem:[%s16480_s15 + $0xc84] ss:$28 sps:$4 sm:$0xff]  }
 0x19a   : > { %9958 = vmatmul.mubr.bf16.vlgmr.msra.gmra.mrb[4].mxu1 %v16762_v2 }
 0x19b   : > { %9671 = vmatmul.mubr.bf16.vlgmr.msra.gmra.mrb[0].mxu0 %v17011_v25  ;;  %9967 = vmatpush1.bf16.msra.mxu1 %v14923_v29  ;;  %v14985_v29 = vld [vmem:[%s16480_s15 + $0xcbc] ss:$28 sps:$4 sm:$0xff]  }
 0x19c   : > { %9680 = vmatpush1.bf16.msra.mxu0 %v14920_v26  ;;  %9968 = vmatprep.subr.bf16.mxu1 %v14931_v31  ;;  %v14982_v26 = vld [vmem:[%s16480_s15 + $0x21b4] ss:$28 sps:$4 sm:$0xff]  }
 0x19d   : > { %9681 = vmatprep.subr.bf16.mxu0 %v14928_v30  ;;  %9711 = vmatprep.mubr.bf16.mxu0 %v17017_v33  ;;  %v14980_v30 = vld [vmem:[%s16480_s15 + $0x21b0] ss:$28 sps:$4 sm:$0xff]   ;;  %v14983_v31 = vld [vmem:[%s16480_s15 + $0xcb8] ss:$28 sps:$4 sm:$0xff]  }
 0x19e   : > { %9998 = vmatprep.mubr.bf16.mxu1 %v16553_v5 }
 0x19f   : > { %9969 = vmatpush1.bf16.msra.mxu1 %v14929_v58  ;;  %v14991_v58 = vld [vmem:[%s16480_s15 + $0xcf4] ss:$28 sps:$4 sm:$0xff]  }
 0x1a0   : > { %9682 = vmatpush1.bf16.msra.mxu0 %v14926_v47  ;;  %9970 = vmatprep.subr.bf16.mxu1 %v14937_v37  ;;  %v14988_v47 = vld [vmem:[%s16480_s15 + $0x21ec] ss:$28 sps:$4 sm:$0xff]  }
 0x1a1   : > { %9683 = vmatprep.subr.bf16.mxu0 %v14934_v36  ;;  %v14986_v36 = vld [vmem:[%s16480_s15 + $0x21e8] ss:$28 sps:$4 sm:$0xff]   ;;  %v14989_v37 = vld [vmem:[%s16480_s15 + $0xcf0] ss:$28 sps:$4 sm:$0xff]  }
 0x1a3   : > { %9971 = vmatpush1.bf16.msra.mxu1 %v14935_v39  ;;  %v14997_v39 = vld [vmem:[%s16480_s15 + $0xd2c] ss:$28 sps:$4 sm:$0xff]  }
 0x1a4   : > { %9684 = vmatpush1.bf16.msra.mxu0 %v14932_v38  ;;  %9972 = vmatprep.subr.bf16.mxu1 %v14943_v41  ;;  %v14994_v38 = vld [vmem:[%s16480_s15 + $0x2224] ss:$28 sps:$4 sm:$0xff]  }
 0x1a5   : > { %9685 = vmatprep.subr.bf16.mxu0 %v14940_v57  ;;  %v14992_v57 = vld [vmem:[%s16480_s15 + $0x2220] ss:$28 sps:$4 sm:$0xff]   ;;  %v14995_v41 = vld [vmem:[%s16480_s15 + $0xd28] ss:$28 sps:$4 sm:$0xff]  }
 0x1a7   : > { %9973 = vmatpush1.bf16.msra.mxu1 %v14941_v46  ;;  %v15003_v46 = vld [vmem:[%s16480_s15 + $0xd64] ss:$28 sps:$4 sm:$0xff]  }
 0x1a8   : > { %9686 = vmatpush1.bf16.msra.mxu0 %v14938_v45  ;;  %9974 = vmatprep.subr.bf16.mxu1 %v14949_v51  ;;  %v15000_v45 = vld [vmem:[%s16480_s15 + $0x225c] ss:$28 sps:$4 sm:$0xff]  }
 0x1a9   : > { %9687 = vmatprep.subr.bf16.mxu0 %v14946_v15  ;;  %v14998_v15 = vld [vmem:[%s16480_s15 + $0x2258] ss:$28 sps:$4 sm:$0xff]   ;;  %v15001_v51 = vld [vmem:[%s16480_s15 + $0xd60] ss:$28 sps:$4 sm:$0xff]  }
 0x1ab   : > { %9975 = vmatpush1.bf16.msra.mxu1 %v14947_v53  ;;  %v15009_v53 = vld [vmem:[%s16480_s15 + $0xd9c] ss:$28 sps:$4 sm:$0xff]  }
 0x1ac   : > { %9688 = vmatpush1.bf16.msra.mxu0 %v14944_v52  ;;  %9976 = vmatprep.subr.bf16.mxu1 %v14955_v59  ;;  %v15006_v52 = vld [vmem:[%s16480_s15 + $0x2294] ss:$28 sps:$4 sm:$0xff]  }
 0x1ad   : > { %9689 = vmatprep.subr.bf16.mxu0 %v14952_v55  ;;  %v17043_v3 = vpop.f32.mrb[0].mxu1  ;;  %v17080_v55 = vld [vmem:[%s16475_s11 + $0x28] sm:$0xff] }
 0x1ae   : > { %v17045_v4 = vpop.f32.mrb[1].mxu1  ;;  %v15004_v59 = vld [vmem:[%s16480_s15 + $0x2290] ss:$28 sps:$4 sm:$0xff]  }
 0x1af   : > { %v9430_v7 = vpop.f32.mrb[2].mxu1  ;;  %9977 = vmatpush1.bf16.msra.mxu1 %v14953_v63  ;;  %v15012_v63 = vld [vmem:[%s16480_s15 + $0x22cc] ss:$28 sps:$4 sm:$0xff]  }
 0x1b0   : > { %9690 = vmatpush1.bf16.msra.mxu0 %v14950_v60  ;;  %v9431_v10 = vpop.f32.mrb[3].mxu1  ;;  %9978 = vmatprep.subr.bf16.mxu1 %v14961_v19  ;;  %v15007_v60 = vld [vmem:[%s16480_s15 + $0xd98] ss:$28 sps:$4 sm:$0xff]   ;;  %v17088_v19 = vrot.slane %v17080_v55, %v16530_v50  ;;  %v15010_v7 = vld [vmem:[%s16480_s15 + $0x22c8] ss:$28 sps:$4 sm:$0xff]  }
 0x1b1   : > { %9691 = vmatprep.subr.bf16.mxu0 %v14958_v0  ;;  %v15015_v0 = vld [vmem:[%s16480_s15 + $0xdd4] ss:$28 sps:$4 sm:$0xff]   ;;  %v15022_v10 = vld [vmem:[%s16480_s15 + $0xe0c] ss:$28 sps:$4 sm:$0xff]  }
 0x1b3   : > { %9979 = vmatpush1.bf16.msra.mxu1 %v14959_v34  ;;  %v15019_v34 = vld [vmem:[%s16480_s15 + $0x2304] ss:$28 sps:$4 sm:$0xff]  }
 0x1b4   : > { %9692 = vmatpush1.bf16.msra.mxu0 %v14956_v8  ;;  %9980 = vmatprep.subr.bf16.mxu1 %v14967_v11  ;;  %v15013_v8 = vld [vmem:[%s16480_s15 + $0xdd0] ss:$28 sps:$4 sm:$0xff]   ;;  %v17098_v11 = vpack.c.bf16 %v17001_v18, %v17001_v18  ;;  %v15023_v18 = vld [vmem:[%s16480_s15 + $0x2338] ss:$28 sps:$4 sm:$0xff]  }
 0x1b5   : > { %9693 = vmatprep.subr.bf16.mxu0 %v14964_v35  ;;  %v451_v35 = vcombine.high %v17088_v19, %v17088_v19 }
 0x1b7   : > { %9981 = vmatpush1.bf16.msra.mxu1 %v14965_v13  ;;  %v15020_v13 = vld [vmem:[%s16480_s15 + $0xe08] ss:$28 sps:$4 sm:$0xff]  }
 0x1b8   : > { %9694 = vmatpush1.bf16.msra.mxu0 %v14962_v12  ;;  %9982 = vmatprep.subr.bf16.mxu1 %v14973_v16  ;;  %v15017_v12 = vld [vmem:[%s16480_s15 + $0x2300] ss:$28 sps:$4 sm:$0xff]  }
 0x1b9   : > { %9695 = vmatprep.subr.bf16.mxu0 %v14970_v14  ;;  %v15025_v14 = vld [vmem:[%s16480_s15 + $0x233c] ss:$28 sps:$4 sm:$0xff]   ;;  %v15028_v16 = vld [vmem:[%s16480_s15 + $0xe44] ss:$28 sps:$4 sm:$0xff]  }
 0x1bb   : > { %9983 = vmatpush1.bf16.msra.mxu1 %v14971_v40  ;;  %v15026_v40 = vld [vmem:[%s16480_s15 + $0xe40] ss:$28 sps:$4 sm:$0xff]  }
 0x1bc   : > { %9696 = vmatpush1.bf16.msra.mxu0 %v14968_v17  ;;  %9984 = vmatprep.subr.bf16.mxu1 %v14979_v23  ;;  %v17104_v17 = vpack.c.bf16 %v451_v35, %v451_v35  ;;  %v15034_v23 = vld [vmem:[%s16480_s15 + $0xe7c] ss:$28 sps:$4 sm:$0xff]  }
 0x1bd   : > { %9697 = vmatprep.subr.bf16.mxu0 %v14976_v20  ;;  %v15031_v20 = vld [vmem:[%s16480_s15 + $0x2374] ss:$28 sps:$4 sm:$0xff]  }
 0x1be   : > { %v15071_v35 = vld [vmem:[%s16480_s15 + $0x24f8] ss:$28 sps:$4 sm:$0xff]  }
 0x1bf   : > { %9985 = vmatpush1.bf16.msra.mxu1 %v14977_v24  ;;  %v15032_v24 = vld [vmem:[%s16480_s15 + $0xe78] ss:$28 sps:$4 sm:$0xff]  }
 0x1c0   : > { %9698 = vmatpush1.bf16.msra.mxu0 %v14974_v54  ;;  %9986 = vmatprep.subr.bf16.mxu1 %v14985_v29  ;;  %v15029_v54 = vld [vmem:[%s16480_s15 + $0x2370] ss:$28 sps:$4 sm:$0xff]  }
 0x1c1   : > { %9699 = vmatprep.subr.bf16.mxu0 %v14982_v26  ;;  %v15037_v26 = vld [vmem:[%s16480_s15 + $0x23ac] ss:$28 sps:$4 sm:$0xff]   ;;  %v15040_v29 = vld [vmem:[%s16480_s15 + $0xeb4] ss:$28 sps:$4 sm:$0xff]  }
 0x1c3   : > { %9987 = vmatpush1.bf16.msra.mxu1 %v14983_v31  ;;  %v15038_v31 = vld [vmem:[%s16480_s15 + $0xeb0] ss:$28 sps:$4 sm:$0xff]  }
 0x1c4   : > { %9700 = vmatpush1.bf16.msra.mxu0 %v14980_v30  ;;  %9988 = vmatprep.subr.bf16.mxu1 %v14991_v58  ;;  %v15035_v30 = vld [vmem:[%s16480_s15 + $0x23a8] ss:$28 sps:$4 sm:$0xff]  }
 0x1c5   : > { %9701 = vmatprep.subr.bf16.mxu0 %v14988_v47  ;;  %v15043_v47 = vld [vmem:[%s16480_s15 + $0x23e4] ss:$28 sps:$4 sm:$0xff]   ;;  %v15046_v58 = vld [vmem:[%s16480_s15 + $0xeec] ss:$28 sps:$4 sm:$0xff]  }
 0x1c7   : > { %9989 = vmatpush1.bf16.msra.mxu1 %v14989_v37  ;;  %v15044_v37 = vld [vmem:[%s16480_s15 + $0xee8] ss:$28 sps:$4 sm:$0xff]  }
 0x1c8   : > { %9702 = vmatpush1.bf16.msra.mxu0 %v14986_v36  ;;  %9990 = vmatprep.subr.bf16.mxu1 %v14997_v39  ;;  %v15041_v36 = vld [vmem:[%s16480_s15 + $0x23e0] ss:$28 sps:$4 sm:$0xff]  }
 0x1c9   : > { %9703 = vmatprep.subr.bf16.mxu0 %v14994_v38  ;;  %v15049_v38 = vld [vmem:[%s16480_s15 + $0x241c] ss:$28 sps:$4 sm:$0xff]   ;;  %v15052_v39 = vld [vmem:[%s16480_s15 + $0xf24] ss:$28 sps:$4 sm:$0xff]  }
 0x1cb   : > { %9991 = vmatpush1.bf16.msra.mxu1 %v14995_v41  ;;  %v15050_v41 = vld [vmem:[%s16480_s15 + $0xf20] ss:$28 sps:$4 sm:$0xff]  }
 0x1cc   : > { %9704 = vmatpush1.bf16.msra.mxu0 %v14992_v57  ;;  %9992 = vmatprep.subr.bf16.mxu1 %v15003_v46  ;;  %v15047_v57 = vld [vmem:[%s16480_s15 + $0x2418] ss:$28 sps:$4 sm:$0xff]  }
 0x1cd   : > { %9705 = vmatprep.subr.bf16.mxu0 %v15000_v45  ;;  %v15055_v45 = vld [vmem:[%s16480_s15 + $0x2454] ss:$28 sps:$4 sm:$0xff]   ;;  %v15058_v46 = vld [vmem:[%s16480_s15 + $0xf5c] ss:$28 sps:$4 sm:$0xff]  }
 0x1cf   : > { %9993 = vmatpush1.bf16.msra.mxu1 %v15001_v51  ;;  %v15056_v51 = vld [vmem:[%s16480_s15 + $0xf58] ss:$28 sps:$4 sm:$0xff]  }
 0x1d0   : > { %9706 = vmatpush1.bf16.msra.mxu0 %v14998_v15  ;;  %9994 = vmatprep.subr.bf16.mxu1 %v15009_v53  ;;  %v15053_v15 = vld [vmem:[%s16480_s15 + $0x2450] ss:$28 sps:$4 sm:$0xff]  }
 0x1d1   : > { %9707 = vmatprep.subr.bf16.mxu0 %v15006_v52  ;;  %v15061_v52 = vld [vmem:[%s16480_s15 + $0x248c] ss:$28 sps:$4 sm:$0xff]   ;;  %v15064_v53 = vld [vmem:[%s16480_s15 + $0xf94] ss:$28 sps:$4 sm:$0xff]  }
 0x1d3   : > { %9995 = vmatpush1.bf16.msra.mxu1 %v15007_v60  ;;  %v15062_v60 = vld [vmem:[%s16480_s15 + $0xf90] ss:$28 sps:$4 sm:$0xff]  }
 0x1d4   : > { %9708 = vmatpush1.bf16.msra.mxu0 %v15004_v59  ;;  %9996 = vmatprep.subr.bf16.mxu1 %v15015_v0  ;;  %v15059_v59 = vld [vmem:[%s16480_s15 + $0x2488] ss:$28 sps:$4 sm:$0xff]  }
 0x1d5   : > { %9709 = vmatprep.subr.bf16.mxu0 %v15012_v63  ;;  %v15067_v63 = vld [vmem:[%s16480_s15 + $0x24c4] ss:$28 sps:$4 sm:$0xff]   ;;  %v15070_v0 = vld [vmem:[%s16480_s15 + $0xfcc] ss:$28 sps:$4 sm:$0xff]  }
 0x1d7   : > { %9997 = vmatpush1.bf16.msra.mxu1 %v15013_v8  ;;  %v15068_v8 = vld [vmem:[%s16480_s15 + $0xfc8] ss:$28 sps:$4 sm:$0xff]  }
 0x1d8   : > { %9710 = vmatpush1.bf16.msra.mxu0 %v15010_v7  ;;  %10007 = vmatprep.subr.bf16.mxu1 %v15022_v10  ;;  %v15065_v7 = vld [vmem:[%s16480_s15 + $0x24c0] ss:$28 sps:$4 sm:$0xff]  }
 0x1d9   : > { %9720 = vmatprep.subr.bf16.mxu0 %v15019_v34  ;;  %v15073_v34 = vld [vmem:[%s16480_s15 + $0x24fc] ss:$28 sps:$4 sm:$0xff]   ;;  %v15076_v10 = vld [vmem:[%s16480_s15 + $0x1004] ss:$28 sps:$4 sm:$0xff]  }
 0x1da   : > { %9999 = vmatmul.mubr.bf16.vlgmr.msra.gmra.mrb[4].mxu1 %v16575_v22 }
 0x1db   : > { %9712 = vmatmul.mubr.bf16.vlgmr.msra.gmra.mrb[0].mxu0 %v17098_v11  ;;  %10008 = vmatpush1.bf16.msra.mxu1 %v15020_v13  ;;  %v15079_v13 = vld [vmem:[%s16480_s15 + $0x2534] ss:$28 sps:$4 sm:$0xff]  }
 0x1dc   : > { %9721 = vmatpush1.bf16.msra.mxu0 %v15017_v12  ;;  %10009 = vmatprep.subr.bf16.mxu1 %v15028_v16  ;;  %v15074_v12 = vld [vmem:[%s16480_s15 + $0x1000] ss:$28 sps:$4 sm:$0xff]   ;;  %v15077_v16 = vld [vmem:[%s16480_s15 + $0x2530] ss:$28 sps:$4 sm:$0xff]  }
 0x1dd   : > { %9722 = vmatprep.subr.bf16.mxu0 %v15025_v14  ;;  %9752 = vmatprep.mubr.bf16.mxu0 %v17104_v17  ;;  %v15082_v14 = vld [vmem:[%s16480_s15 + $0x103c] ss:$28 sps:$4 sm:$0xff]  }
 0x1de   : > { %10039 = vmatprep.mubr.bf16.mxu1 %v16622_v61 }
 0x1df   : > { %10010 = vmatpush1.bf16.msra.mxu1 %v15026_v40  ;;  %v15085_v40 = vld [vmem:[%s16480_s15 + $0x256c] ss:$28 sps:$4 sm:$0xff]  }
 0x1e0   : > { %9723 = vmatpush1.bf16.msra.mxu0 %v15023_v18  ;;  %10011 = vmatprep.subr.bf16.mxu1 %v15034_v23  ;;  %v15080_v18 = vld [vmem:[%s16480_s15 + $0x1038] ss:$28 sps:$4 sm:$0xff]   ;;  %v15083_v23 = vld [vmem:[%s16480_s15 + $0x2568] ss:$28 sps:$4 sm:$0xff]  }
 0x1e1   : > { %9724 = vmatprep.subr.bf16.mxu0 %v15031_v20  ;;  %v15088_v20 = vld [vmem:[%s16480_s15 + $0x1074] ss:$28 sps:$4 sm:$0xff]  }
 0x1e3   : > { %10012 = vmatpush1.bf16.msra.mxu1 %v15032_v24  ;;  %v15091_v24 = vld [vmem:[%s16480_s15 + $0x25a4] ss:$28 sps:$4 sm:$0xff]  }
 0x1e4   : > { %9725 = vmatpush1.bf16.msra.mxu0 %v15029_v54  ;;  %10013 = vmatprep.subr.bf16.mxu1 %v15040_v29  ;;  %v15086_v54 = vld [vmem:[%s16480_s15 + $0x1070] ss:$28 sps:$4 sm:$0xff]   ;;  %v15089_v29 = vld [vmem:[%s16480_s15 + $0x25a0] ss:$28 sps:$4 sm:$0xff]  }
 0x1e5   : > { %9726 = vmatprep.subr.bf16.mxu0 %v15037_v26  ;;  %v15094_v26 = vld [vmem:[%s16480_s15 + $0x10ac] ss:$28 sps:$4 sm:$0xff]  }
 0x1e7   : > { %10014 = vmatpush1.bf16.msra.mxu1 %v15038_v31  ;;  %v15097_v31 = vld [vmem:[%s16480_s15 + $0x25dc] ss:$28 sps:$4 sm:$0xff]  }
 0x1e8   : > { %9727 = vmatpush1.bf16.msra.mxu0 %v15035_v30  ;;  %10015 = vmatprep.subr.bf16.mxu1 %v15046_v58  ;;  %v15092_v30 = vld [vmem:[%s16480_s15 + $0x10a8] ss:$28 sps:$4 sm:$0xff]   ;;  %v15095_v58 = vld [vmem:[%s16480_s15 + $0x25d8] ss:$28 sps:$4 sm:$0xff]  }
 0x1e9   : > { %9728 = vmatprep.subr.bf16.mxu0 %v15043_v47  ;;  %v15100_v47 = vld [vmem:[%s16480_s15 + $0x10e4] ss:$28 sps:$4 sm:$0xff]  }
 0x1eb   : > { %10016 = vmatpush1.bf16.msra.mxu1 %v15044_v37  ;;  %v15103_v37 = vld [vmem:[%s16480_s15 + $0x2614] ss:$28 sps:$4 sm:$0xff]  }
 0x1ec   : > { %9729 = vmatpush1.bf16.msra.mxu0 %v15041_v36  ;;  %10017 = vmatprep.subr.bf16.mxu1 %v15052_v39  ;;  %v15098_v36 = vld [vmem:[%s16480_s15 + $0x10e0] ss:$28 sps:$4 sm:$0xff]   ;;  %v436_v39 = vcombine.high %v17080_v55, %v17080_v55  ;;  %v15107_v55 = vld [vmem:[%s16480_s15 + $0x2648] ss:$28 sps:$4 sm:$0xff]  }
 0x1ed   : > { %9730 = vmatprep.subr.bf16.mxu0 %v15049_v38  ;;  %v15106_v38 = vld [vmem:[%s16480_s15 + $0x111c] ss:$28 sps:$4 sm:$0xff]  }
 0x1ef   : > { %10018 = vmatpush1.bf16.msra.mxu1 %v15050_v41  ;;  %v15104_v41 = vld [vmem:[%s16480_s15 + $0x1118] ss:$28 sps:$4 sm:$0xff]  }
 0x1f0   : > { %9731 = vmatpush1.bf16.msra.mxu0 %v15047_v57  ;;  %10019 = vmatprep.subr.bf16.mxu1 %v15058_v46  ;;  %v15101_v57 = vld [vmem:[%s16480_s15 + $0x2610] ss:$28 sps:$4 sm:$0xff]  }
 0x1f1   : > { %9732 = vmatprep.subr.bf16.mxu0 %v15055_v45  ;;  %v15109_v45 = vld [vmem:[%s16480_s15 + $0x264c] ss:$28 sps:$4 sm:$0xff]   ;;  %v15112_v46 = vld [vmem:[%s16480_s15 + $0x1154] ss:$28 sps:$4 sm:$0xff]  }
 0x1f3   : > { %10020 = vmatpush1.bf16.msra.mxu1 %v15056_v51  ;;  %v15110_v51 = vld [vmem:[%s16480_s15 + $0x1150] ss:$28 sps:$4 sm:$0xff]  }
 0x1f4   : > { %9733 = vmatpush1.bf16.msra.mxu0 %v15053_v15  ;;  %10021 = vmatprep.subr.bf16.mxu1 %v15064_v53  ;;  %v17169_v15 = vrot.slane %v436_v39, %v16530_v50  ;;  %v15118_v53 = vld [vmem:[%s16480_s15 + $0x118c] ss:$28 sps:$4 sm:$0xff]  }
 0x1f5   : > { %9734 = vmatprep.subr.bf16.mxu0 %v15061_v52  ;;  %v15115_v52 = vld [vmem:[%s16480_s15 + $0x2684] ss:$28 sps:$4 sm:$0xff]   ;;  %v15157_v39 = vld [vmem:[%s16480_s15 + $0x280c] ss:$28 sps:$4 sm:$0xff]  }
 0x1f7   : > { %10022 = vmatpush1.bf16.msra.mxu1 %v15062_v60  ;;  %v17179_v60 = vpack.c.bf16 %v17088_v19, %v17088_v19  ;;  %v15119_v19 = vld [vmem:[%s16480_s15 + $0x26b8] ss:$28 sps:$4 sm:$0xff]  }
 0x1f8   : > { %9735 = vmatpush1.bf16.msra.mxu0 %v15059_v59  ;;  %10023 = vmatprep.subr.bf16.mxu1 %v15070_v0  ;;  %v452_v59 = vcombine.high %v17169_v15, %v17169_v15  ;;  %v15116_v0 = vld [vmem:[%s16480_s15 + $0x1188] ss:$28 sps:$4 sm:$0xff]  }
 0x1f9   : > { %9736 = vmatprep.subr.bf16.mxu0 %v15067_v63  ;;  %v15113_v63 = vld [vmem:[%s16480_s15 + $0x2680] ss:$28 sps:$4 sm:$0xff]  }
 0x1fb   : > { %10024 = vmatpush1.bf16.msra.mxu1 %v15068_v8  ;;  %v15124_v8 = vld [vmem:[%s16480_s15 + $0x11c4] ss:$28 sps:$4 sm:$0xff]  }
 0x1fc   : > { %9737 = vmatpush1.bf16.msra.mxu0 %v15065_v7  ;;  %10025 = vmatprep.subr.bf16.mxu1 %v15076_v10  ;;  %v15121_v7 = vld [vmem:[%s16480_s15 + $0x26bc] ss:$28 sps:$4 sm:$0xff]  }
 0x1fd   : > { %9738 = vmatprep.subr.bf16.mxu0 %v15073_v34  ;;  %v17185_v34 = vpack.c.bf16 %v452_v59, %v452_v59  ;;  %v15122_v10 = vld [vmem:[%s16480_s15 + $0x11c0] ss:$28 sps:$4 sm:$0xff]  }
 0x1fe   : > { %v15172_v59 = vld [vmem:[%s16480_s15 + $0x1384] ss:$28 sps:$4 sm:$0xff]  }
 0x1ff   : > { %10026 = vmatpush1.bf16.msra.mxu1 %v15074_v12  ;;  %v15130_v12 = vld [vmem:[%s16480_s15 + $0x11fc] ss:$28 sps:$4 sm:$0xff]  }
 0x200   : > { %9739 = vmatpush1.bf16.msra.mxu0 %v15071_v35  ;;  %10027 = vmatprep.subr.bf16.mxu1 %v15082_v14  ;;  %v15127_v35 = vld [vmem:[%s16480_s15 + $0x26f4] ss:$28 sps:$4 sm:$0xff]  }
 0x201   : > { %9740 = vmatprep.subr.bf16.mxu0 %v15079_v13  ;;  %v15125_v13 = vld [vmem:[%s16480_s15 + $0x26f0] ss:$28 sps:$4 sm:$0xff]   ;;  %v15128_v14 = vld [vmem:[%s16480_s15 + $0x11f8] ss:$28 sps:$4 sm:$0xff]  }
 0x203   : > { %10028 = vmatpush1.bf16.msra.mxu1 %v15080_v18  ;;  %v15136_v18 = vld [vmem:[%s16480_s15 + $0x1234] ss:$28 sps:$4 sm:$0xff]  }
 0x204   : > { %9741 = vmatpush1.bf16.msra.mxu0 %v15077_v16  ;;  %10029 = vmatprep.subr.bf16.mxu1 %v15088_v20  ;;  %v15133_v16 = vld [vmem:[%s16480_s15 + $0x272c] ss:$28 sps:$4 sm:$0xff]  }
 0x205   : > { %9742 = vmatprep.subr.bf16.mxu0 %v15085_v40  ;;  %v15131_v40 = vld [vmem:[%s16480_s15 + $0x2728] ss:$28 sps:$4 sm:$0xff]   ;;  %v15134_v20 = vld [vmem:[%s16480_s15 + $0x1230] ss:$28 sps:$4 sm:$0xff]  }
 0x207   : > { %10030 = vmatpush1.bf16.msra.mxu1 %v15086_v54  ;;  %v15142_v54 = vld [vmem:[%s16480_s15 + $0x126c] ss:$28 sps:$4 sm:$0xff]  }
 0x208   : > { %9743 = vmatpush1.bf16.msra.mxu0 %v15083_v23  ;;  %10031 = vmatprep.subr.bf16.mxu1 %v15094_v26  ;;  %v15139_v23 = vld [vmem:[%s16480_s15 + $0x2764] ss:$28 sps:$4 sm:$0xff]  }
 0x209   : > { %9744 = vmatprep.subr.bf16.mxu0 %v15091_v24  ;;  %v15137_v24 = vld [vmem:[%s16480_s15 + $0x2760] ss:$28 sps:$4 sm:$0xff]   ;;  %v15140_v26 = vld [vmem:[%s16480_s15 + $0x1268] ss:$28 sps:$4 sm:$0xff]  }
 0x20b   : > { %10032 = vmatpush1.bf16.msra.mxu1 %v15092_v30  ;;  %v15148_v30 = vld [vmem:[%s16480_s15 + $0x12a4] ss:$28 sps:$4 sm:$0xff]  }
 0x20c   : > { %9745 = vmatpush1.bf16.msra.mxu0 %v15089_v29  ;;  %10033 = vmatprep.subr.bf16.mxu1 %v15100_v47  ;;  %v15145_v29 = vld [vmem:[%s16480_s15 + $0x279c] ss:$28 sps:$4 sm:$0xff]  }
 0x20d   : > { %9746 = vmatprep.subr.bf16.mxu0 %v15097_v31  ;;  %v15143_v31 = vld [vmem:[%s16480_s15 + $0x2798] ss:$28 sps:$4 sm:$0xff]   ;;  %v15146_v47 = vld [vmem:[%s16480_s15 + $0x12a0] ss:$28 sps:$4 sm:$0xff]  }
 0x20f   : > { %10034 = vmatpush1.bf16.msra.mxu1 %v15098_v36  ;;  %v15154_v36 = vld [vmem:[%s16480_s15 + $0x12dc] ss:$28 sps:$4 sm:$0xff]  }
 0x210   : > { %9747 = vmatpush1.bf16.msra.mxu0 %v15095_v58  ;;  %10035 = vmatprep.subr.bf16.mxu1 %v15106_v38  ;;  %v15151_v58 = vld [vmem:[%s16480_s15 + $0x27d4] ss:$28 sps:$4 sm:$0xff]  }
 0x211   : > { %9748 = vmatprep.subr.bf16.mxu0 %v15103_v37  ;;  %v15149_v37 = vld [vmem:[%s16480_s15 + $0x27d0] ss:$28 sps:$4 sm:$0xff]   ;;  %v15152_v38 = vld [vmem:[%s16480_s15 + $0x12d8] ss:$28 sps:$4 sm:$0xff]  }
 0x213   : > { %10036 = vmatpush1.bf16.msra.mxu1 %v15104_v41  ;;  %v15155_v41 = vld [vmem:[%s16480_s15 + $0x2808] ss:$28 sps:$4 sm:$0xff]  }
 0x214   : > { %9749 = vmatpush1.bf16.msra.mxu0 %v15101_v57  ;;  %10037 = vmatprep.subr.bf16.mxu1 %v15112_v46  ;;  %v15160_v57 = vld [vmem:[%s16480_s15 + $0x1314] ss:$28 sps:$4 sm:$0xff]   ;;  %v15163_v46 = vld [vmem:[%s16480_s15 + $0x2844] ss:$28 sps:$4 sm:$0xff]  }
 0x215   : > { %9750 = vmatprep.subr.bf16.mxu0 %v15109_v45  ;;  %v15158_v45 = vld [vmem:[%s16480_s15 + $0x1310] ss:$28 sps:$4 sm:$0xff]  }
 0x217   : > { %10038 = vmatpush1.bf16.msra.mxu1 %v15110_v51  ;;  %v15161_v51 = vld [vmem:[%s16480_s15 + $0x2840] ss:$28 sps:$4 sm:$0xff]  }
 0x218   : > { %9751 = vmatpush1.bf16.msra.mxu0 %v15107_v55  ;;  %10048 = vmatprep.subr.bf16.mxu1 %v15118_v53  ;;  %v15166_v55 = vld [vmem:[%s16480_s15 + $0x134c] ss:$28 sps:$4 sm:$0xff]   ;;  %v15169_v53 = vld [vmem:[%s16480_s15 + $0x287c] ss:$28 sps:$4 sm:$0xff]  }
 0x219   : > { %9761 = vmatprep.subr.bf16.mxu0 %v15115_v52  ;;  %v15164_v52 = vld [vmem:[%s16480_s15 + $0x1348] ss:$28 sps:$4 sm:$0xff]  }
 0x21a   : > { %10040 = vmatmul.mubr.bf16.vlgmr.msra.gmra.mrb[4].mxu1 %v16678_v43 }
 0x21b   : > { %9753 = vmatmul.mubr.bf16.vlgmr.msra.gmra.mrb[0].mxu0 %v17179_v60  ;;  %10049 = vmatpush1.bf16.msra.mxu1 %v15116_v0  ;;  %v15170_v0 = vld [vmem:[%s16480_s15 + $0x1380] ss:$28 sps:$4 sm:$0xff]  }
 0x21c   : > { %9762 = vmatpush1.bf16.msra.mxu0 %v15113_v63  ;;  %10050 = vmatprep.subr.bf16.mxu1 %v15124_v8  ;;  %v15167_v63 = vld [vmem:[%s16480_s15 + $0x2878] ss:$28 sps:$4 sm:$0xff]  }
 0x21d   : > { %9763 = vmatprep.subr.bf16.mxu0 %v15121_v7  ;;  %9793 = vmatprep.mubr.bf16.mxu0 %v17185_v34  ;;  %v15175_v7 = vld [vmem:[%s16480_s15 + $0x28b4] ss:$28 sps:$4 sm:$0xff]   ;;  %v15178_v8 = vld [vmem:[%s16480_s15 + $0x13bc] ss:$28 sps:$4 sm:$0xff]  }
 0x21e   : > { %10080 = vmatprep.mubr.bf16.mxu1 %v16685_v49 }
 0x21f   : > { %10051 = vmatpush1.bf16.msra.mxu1 %v15122_v10  ;;  %v15176_v10 = vld [vmem:[%s16480_s15 + $0x13b8] ss:$28 sps:$4 sm:$0xff]  }
 0x220   : > { %9764 = vmatpush1.bf16.msra.mxu0 %v15119_v19  ;;  %10052 = vmatprep.subr.bf16.mxu1 %v15130_v12  ;;  %v15173_v19 = vld [vmem:[%s16480_s15 + $0x28b0] ss:$28 sps:$4 sm:$0xff]  }
 0x221   : > { %9765 = vmatprep.subr.bf16.mxu0 %v15127_v35  ;;  %v15181_v35 = vld [vmem:[%s16480_s15 + $0x28ec] ss:$28 sps:$4 sm:$0xff]   ;;  %v15184_v12 = vld [vmem:[%s16480_s15 + $0x13f4] ss:$28 sps:$4 sm:$0xff]  }
 0x223   : > { %10053 = vmatpush1.bf16.msra.mxu1 %v15128_v14  ;;  %v15182_v14 = vld [vmem:[%s16480_s15 + $0x13f0] ss:$28 sps:$4 sm:$0xff]  }
 0x224   : > { %9766 = vmatpush1.bf16.msra.mxu0 %v15125_v13  ;;  %10054 = vmatprep.subr.bf16.mxu1 %v15136_v18  ;;  %v15179_v13 = vld [vmem:[%s16480_s15 + $0x28e8] ss:$28 sps:$4 sm:$0xff]  }
 0x225   : > { %9767 = vmatprep.subr.bf16.mxu0 %v15133_v16  ;;  %v15187_v16 = vld [vmem:[%s16480_s15 + $0x2924] ss:$28 sps:$4 sm:$0xff]   ;;  %v15190_v18 = vld [vmem:[%s16480_s15 + $0x142c] ss:$28 sps:$4 sm:$0xff]  }
 0x227   : > { %10055 = vmatpush1.bf16.msra.mxu1 %v15134_v20  ;;  %v15188_v20 = vld [vmem:[%s16480_s15 + $0x1428] ss:$28 sps:$4 sm:$0xff]  }
 0x228   : > { %9768 = vmatpush1.bf16.msra.mxu0 %v15131_v40  ;;  %10056 = vmatprep.subr.bf16.mxu1 %v15142_v54  ;;  %v15185_v40 = vld [vmem:[%s16480_s15 + $0x2920] ss:$28 sps:$4 sm:$0xff]  }
 0x229   : > { %9769 = vmatprep.subr.bf16.mxu0 %v15139_v23  ;;  %v15193_v23 = vld [vmem:[%s16480_s15 + $0x295c] ss:$28 sps:$4 sm:$0xff]   ;;  %v15196_v54 = vld [vmem:[%s16480_s15 + $0x1464] ss:$28 sps:$4 sm:$0xff]  }
 0x22b   : > { %10057 = vmatpush1.bf16.msra.mxu1 %v15140_v26  ;;  %v15194_v26 = vld [vmem:[%s16480_s15 + $0x1460] ss:$28 sps:$4 sm:$0xff]  }
 0x22c   : > { %9770 = vmatpush1.bf16.msra.mxu0 %v15137_v24  ;;  %10058 = vmatprep.subr.bf16.mxu1 %v15148_v30  ;;  %v15191_v24 = vld [vmem:[%s16480_s15 + $0x2958] ss:$28 sps:$4 sm:$0xff]  }
 0x22d   : > { %9771 = vmatprep.subr.bf16.mxu0 %v15145_v29  ;;  %v15199_v29 = vld [vmem:[%s16480_s15 + $0x2994] ss:$28 sps:$4 sm:$0xff]   ;;  %v15202_v30 = vld [vmem:[%s16480_s15 + $0x149c] ss:$28 sps:$4 sm:$0xff]  }
 0x22f   : > { %10059 = vmatpush1.bf16.msra.mxu1 %v15146_v47  ;;  %v15200_v47 = vld [vmem:[%s16480_s15 + $0x1498] ss:$28 sps:$4 sm:$0xff]  }
 0x230   : > { %9772 = vmatpush1.bf16.msra.mxu0 %v15143_v31  ;;  %10060 = vmatprep.subr.bf16.mxu1 %v15154_v36  ;;  %v15197_v31 = vld [vmem:[%s16480_s15 + $0x2990] ss:$28 sps:$4 sm:$0xff]  }
 0x231   : > { %9773 = vmatprep.subr.bf16.mxu0 %v15151_v58  ;;  %v15205_v58 = vld [vmem:[%s16480_s15 + $0x29cc] ss:$28 sps:$4 sm:$0xff]   ;;  %v15208_v36 = vld [vmem:[%s16480_s15 + $0x14d4] ss:$28 sps:$4 sm:$0xff]  }
 0x233   : > { %10061 = vmatpush1.bf16.msra.mxu1 %v15152_v38  ;;  %v15206_v38 = vld [vmem:[%s16480_s15 + $0x14d0] ss:$28 sps:$4 sm:$0xff]  }
 0x234   : > { %9774 = vmatpush1.bf16.msra.mxu0 %v15149_v37  ;;  %10062 = vmatprep.subr.bf16.mxu1 %v15160_v57  ;;  %v15203_v37 = vld [vmem:[%s16480_s15 + $0x29c8] ss:$28 sps:$4 sm:$0xff]  }
 0x235   : > { %9775 = vmatprep.subr.bf16.mxu0 %v15157_v39  ;;  %v15212_v39 = vld [vmem:[%s16480_s15 + $0x2a04] ss:$28 sps:$4 sm:$0xff]   ;;  %v15215_v57 = vld [vmem:[%s16480_s15 + $0x150c] ss:$28 sps:$4 sm:$0xff]  }
 0x237   : > { %10063 = vmatpush1.bf16.msra.mxu1 %v15158_v45  ;;  %v15210_v45 = vld [vmem:[%s16480_s15 + $0x2a00] ss:$28 sps:$4 sm:$0xff]  }
 0x238   : > { %9776 = vmatpush1.bf16.msra.mxu0 %v15155_v41  ;;  %10064 = vmatprep.subr.bf16.mxu1 %v15166_v55  ;;  %v17253_v41 = vpack.c.bf16 %v17169_v15, %v17169_v15  ;;  %v15218_v55 = vld [vmem:[%s16480_s15 + $0x2a3c] ss:$28 sps:$4 sm:$0xff]  }
 0x239   : > { %9777 = vmatprep.subr.bf16.mxu0 %v15163_v46  ;;  %v15213_v46 = vld [vmem:[%s16480_s15 + $0x1508] ss:$28 sps:$4 sm:$0xff]   ;;  %v15216_v15 = vld [vmem:[%s16480_s15 + $0x2a38] ss:$28 sps:$4 sm:$0xff]  }
 0x23b   : > { %10065 = vmatpush1.bf16.msra.mxu1 %v15164_v52  ;;  %v15219_v52 = vld [vmem:[%s16480_s15 + $0x1540] ss:$28 sps:$4 sm:$0xff]  }
 0x23c   : > { %9778 = vmatpush1.bf16.msra.mxu0 %v15161_v51  ;;  %10066 = vmatprep.subr.bf16.mxu1 %v15172_v59  ;;  %v15221_v51 = vld [vmem:[%s16480_s15 + $0x1544] ss:$28 sps:$4 sm:$0xff]   ;;  %v15227_v59 = vld [vmem:[%s16480_s15 + $0x157c] ss:$28 sps:$4 sm:$0xff]  }
 0x23d   : > { %9779 = vmatprep.subr.bf16.mxu0 %v15169_v53  ;;  %v15224_v53 = vld [vmem:[%s16480_s15 + $0x2a74] ss:$28 sps:$4 sm:$0xff]  }
 0x23f   : > { %10067 = vmatpush1.bf16.msra.mxu1 %v15170_v0  ;;  %v15222_v0 = vld [vmem:[%s16480_s15 + $0x2a70] ss:$28 sps:$4 sm:$0xff]  }
 0x240   : > { %9780 = vmatpush1.bf16.msra.mxu0 %v15167_v63  ;;  %10068 = vmatprep.subr.bf16.mxu1 %v15178_v8  ;;  %v16402_v63 = vmov 0   ;;  %v15230_v8 = vld [vmem:[%s16480_s15 + $0x2aac] ss:$28 sps:$4 sm:$0xff]  }
 0x241   : > { %9781 = vmatprep.subr.bf16.mxu0 %v15175_v7  ;;  %v15225_v7 = vld [vmem:[%s16480_s15 + $0x1578] ss:$28 sps:$4 sm:$0xff]  }
 0x243   : > { %10069 = vmatpush1.bf16.msra.mxu1 %v15176_v10  ;;  %v15228_v10 = vld [vmem:[%s16480_s15 + $0x2aa8] ss:$28 sps:$4 sm:$0xff]  }
 0x244   : > { %9782 = vmatpush1.bf16.msra.mxu0 %v15173_v19  ;;  %10070 = vmatprep.subr.bf16.mxu1 %v15184_v12  ;;  %v15233_v19 = vld [vmem:[%s16480_s15 + $0x15b4] ss:$28 sps:$4 sm:$0xff]   ;;  %v15236_v12 = vld [vmem:[%s16480_s15 + $0x2ae4] ss:$28 sps:$4 sm:$0xff]  }
 0x245   : > { %9783 = vmatprep.subr.bf16.mxu0 %v15181_v35  ;;  %v15231_v35 = vld [vmem:[%s16480_s15 + $0x15b0] ss:$28 sps:$4 sm:$0xff]  }
 0x247   : > { %10071 = vmatpush1.bf16.msra.mxu1 %v15182_v14  ;;  %v15234_v14 = vld [vmem:[%s16480_s15 + $0x2ae0] ss:$28 sps:$4 sm:$0xff]  }
 0x248   : > { %9784 = vmatpush1.bf16.msra.mxu0 %v15179_v13  ;;  %10072 = vmatprep.subr.bf16.mxu1 %v15190_v18  ;;  %v15239_v13 = vld [vmem:[%s16480_s15 + $0x15ec] ss:$28 sps:$4 sm:$0xff]   ;;  %v15242_v18 = vld [vmem:[%s16480_s15 + $0x2b1c] ss:$28 sps:$4 sm:$0xff]  }
 0x249   : > { %9785 = vmatprep.subr.bf16.mxu0 %v15187_v16  ;;  %v15237_v16 = vld [vmem:[%s16480_s15 + $0x15e8] ss:$28 sps:$4 sm:$0xff]  }
 0x24b   : > { %10073 = vmatpush1.bf16.msra.mxu1 %v15188_v20  ;;  %v15240_v20 = vld [vmem:[%s16480_s15 + $0x2b18] ss:$28 sps:$4 sm:$0xff]  }
 0x24c   : > { %9786 = vmatpush1.bf16.msra.mxu0 %v15185_v40  ;;  %10074 = vmatprep.subr.bf16.mxu1 %v15196_v54  ;;  %v15245_v40 = vld [vmem:[%s16480_s15 + $0x1624] ss:$28 sps:$4 sm:$0xff]   ;;  %v15248_v54 = vld [vmem:[%s16480_s15 + $0x2b54] ss:$28 sps:$4 sm:$0xff]  }
 0x24d   : > { %9787 = vmatprep.subr.bf16.mxu0 %v15193_v23  ;;  %v15243_v23 = vld [vmem:[%s16480_s15 + $0x1620] ss:$28 sps:$4 sm:$0xff]  }
 0x24f   : > { %10075 = vmatpush1.bf16.msra.mxu1 %v15194_v26  ;;  %v15246_v26 = vld [vmem:[%s16480_s15 + $0x2b50] ss:$28 sps:$4 sm:$0xff]  }
 0x250   : > { %9788 = vmatpush1.bf16.msra.mxu0 %v15191_v24  ;;  %10076 = vmatprep.subr.bf16.mxu1 %v15202_v30  ;;  %v15251_v24 = vld [vmem:[%s16480_s15 + $0x165c] ss:$28 sps:$4 sm:$0xff]   ;;  %v15254_v30 = vld [vmem:[%s16480_s15 + $0x2b8c] ss:$28 sps:$4 sm:$0xff]  }
 0x251   : > { %9789 = vmatprep.subr.bf16.mxu0 %v15199_v29  ;;  %v15249_v29 = vld [vmem:[%s16480_s15 + $0x1658] ss:$28 sps:$4 sm:$0xff]  }
 0x253   : > { %10077 = vmatpush1.bf16.msra.mxu1 %v15200_v47  ;;  %v15252_v47 = vld [vmem:[%s16480_s15 + $0x2b88] ss:$28 sps:$4 sm:$0xff]  }
 0x254   : > { %9790 = vmatpush1.bf16.msra.mxu0 %v15197_v31  ;;  %10078 = vmatprep.subr.bf16.mxu1 %v15208_v36  ;;  %v15257_v31 = vld [vmem:[%s16480_s15 + $0x1694] ss:$28 sps:$4 sm:$0xff]  }
 0x255   : > { %9791 = vmatprep.subr.bf16.mxu0 %v15205_v58  ;;  %v15255_v58 = vld [vmem:[%s16480_s15 + $0x1690] ss:$28 sps:$4 sm:$0xff]  }
 0x256   : > { %v12170_v36 = vld.sshfl [vmem:[%s16475_s11 + $0x30] sm:$0x3 pattern:$0x76325410] }
 0x257   : > { %10079 = vmatpush1.bf16.msra.mxu1 %v15206_v38  ;;  %v15263_v38 = vld [vmem:[%s16480_s15 + $0x14] ss:$28 sps:$4 sm:$0xff]  }
 0x258   : > { %9792 = vmatpush1.bf16.msra.mxu0 %v15203_v37  ;;  %10089 = vmatprep.subr.bf16.mxu1 %v15215_v57  ;;  %v15260_v37 = vld [vmem:[%s16480_s15 + $0x16cc] ss:$28 sps:$4 sm:$0xff]  }
 0x259   : > { %9802 = vmatprep.subr.bf16.mxu0 %v15212_v39  ;;  %v17292_v39 = vpack.c.bf16 %v12170_v36, %v12170_v36  ;;  %v15258_v57 = vld [vmem:[%s16480_s15 + $0x16c8] ss:$28 sps:$4 sm:$0xff]   ;;  %v15311_v36 = vld [vmem:[%s16480_s15 + $0x1d4] ss:$28 sps:$4 sm:$0xff]  }
 0x25a   : > { %10081 = vmatmul.mubr.bf16.vlgmr.msra.gmra.mrb[4].mxu1 %v16768_v6 }
 0x25b   : > { %9794 = vmatmul.mubr.bf16.vlgmr.msra.gmra.mrb[0].mxu0 %v17253_v41  ;;  %10090 = vmatpush1.bf16.msra.mxu1 %v15213_v46  ;;  %v15266_v46 = vld [vmem:[%s16480_s15 + $0x1704] ss:$28 sps:$4 sm:$0xff]  }
 0x25c   : > { %9803 = vmatpush1.bf16.msra.mxu0 %v15210_v45  ;;  %10091 = vmatprep.subr.bf16.mxu1 %v15221_v51  ;;  %v15261_v45 = vld [vmem:[%s16480_s15 + $0x10] ss:$28 sps:$4 sm:$0xff]   ;;  %v15264_v51 = vld [vmem:[%s16480_s15 + $0x1700] ss:$28 sps:$4 sm:$0xff]  }
 0x25d   : > { %9804 = vmatprep.subr.bf16.mxu0 %v15218_v55  ;;  %9834 = vmatprep.mubr.bf16.mxu0 %v16402_v63  ;;  %v15269_v55 = vld [vmem:[%s16480_s15 + $0x4c] ss:$28 sps:$4 sm:$0xff]  }
 0x25e   : > { %10121 = vmatprep.mubr.bf16.mxu1 %v16772_v9 }
 0x25f   : > { %10092 = vmatpush1.bf16.msra.mxu1 %v15219_v52  ;;  %v15272_v52 = vld [vmem:[%s16480_s15 + $0x173c] ss:$28 sps:$4 sm:$0xff]  }
 0x260   : > { %9805 = vmatpush1.bf16.msra.mxu0 %v15216_v15  ;;  %10093 = vmatprep.subr.bf16.mxu1 %v15227_v59  ;;  %v15267_v15 = vld [vmem:[%s16480_s15 + $0x48] ss:$28 sps:$4 sm:$0xff]   ;;  %v15270_v59 = vld [vmem:[%s16480_s15 + $0x1738] ss:$28 sps:$4 sm:$0xff]  }
 0x261   : > { %9806 = vmatprep.subr.bf16.mxu0 %v15224_v53  ;;  %v15275_v53 = vld [vmem:[%s16480_s15 + $0x84] ss:$28 sps:$4 sm:$0xff]  }
 0x263   : > { %10094 = vmatpush1.bf16.msra.mxu1 %v15225_v7  ;;  %v15278_v7 = vld [vmem:[%s16480_s15 + $0x1774] ss:$28 sps:$4 sm:$0xff]  }
 0x264   : > { %9807 = vmatpush1.bf16.msra.mxu0 %v15222_v0  ;;  %10095 = vmatprep.subr.bf16.mxu1 %v15233_v19  ;;  %v15273_v0 = vld [vmem:[%s16480_s15 + $0x80] ss:$28 sps:$4 sm:$0xff]   ;;  %v15276_v19 = vld [vmem:[%s16480_s15 + $0x1770] ss:$28 sps:$4 sm:$0xff]  }
 0x265   : > { %9808 = vmatprep.subr.bf16.mxu0 %v15230_v8  ;;  %v15281_v8 = vld [vmem:[%s16480_s15 + $0xbc] ss:$28 sps:$4 sm:$0xff]  }
 0x267   : > { %10096 = vmatpush1.bf16.msra.mxu1 %v15231_v35  ;;  %v15284_v35 = vld [vmem:[%s16480_s15 + $0x17ac] ss:$28 sps:$4 sm:$0xff]  }
 0x268   : > { %9809 = vmatpush1.bf16.msra.mxu0 %v15228_v10  ;;  %10097 = vmatprep.subr.bf16.mxu1 %v15239_v13  ;;  %v15279_v10 = vld [vmem:[%s16480_s15 + $0xb8] ss:$28 sps:$4 sm:$0xff]   ;;  %v15282_v13 = vld [vmem:[%s16480_s15 + $0x17a8] ss:$28 sps:$4 sm:$0xff]  }
 0x269   : > { %9810 = vmatprep.subr.bf16.mxu0 %v15236_v12  ;;  %v15287_v12 = vld [vmem:[%s16480_s15 + $0xf4] ss:$28 sps:$4 sm:$0xff]  }
 0x26b   : > { %10098 = vmatpush1.bf16.msra.mxu1 %v15237_v16  ;;  %v15290_v16 = vld [vmem:[%s16480_s15 + $0x17e4] ss:$28 sps:$4 sm:$0xff]  }
 0x26c   : > { %9811 = vmatpush1.bf16.msra.mxu0 %v15234_v14  ;;  %10099 = vmatprep.subr.bf16.mxu1 %v15245_v40  ;;  %v15285_v14 = vld [vmem:[%s16480_s15 + $0xf0] ss:$28 sps:$4 sm:$0xff]   ;;  %v15288_v40 = vld [vmem:[%s16480_s15 + $0x17e0] ss:$28 sps:$4 sm:$0xff]  }
 0x26d   : > { %9812 = vmatprep.subr.bf16.mxu0 %v15242_v18  ;;  %v15293_v18 = vld [vmem:[%s16480_s15 + $0x12c] ss:$28 sps:$4 sm:$0xff]  }
 0x26f   : > { %10100 = vmatpush1.bf16.msra.mxu1 %v15243_v23  ;;  %v15296_v23 = vld [vmem:[%s16480_s15 + $0x181c] ss:$28 sps:$4 sm:$0xff]  }
 0x270   : > { %9813 = vmatpush1.bf16.msra.mxu0 %v15240_v20  ;;  %10101 = vmatprep.subr.bf16.mxu1 %v15251_v24  ;;  %v15291_v20 = vld [vmem:[%s16480_s15 + $0x128] ss:$28 sps:$4 sm:$0xff]   ;;  %v15294_v24 = vld [vmem:[%s16480_s15 + $0x1818] ss:$28 sps:$4 sm:$0xff]  }
 0x271   : > { %9814 = vmatprep.subr.bf16.mxu0 %v15248_v54  ;;  %v15299_v54 = vld [vmem:[%s16480_s15 + $0x164] ss:$28 sps:$4 sm:$0xff]  }
 0x273   : > { %10102 = vmatpush1.bf16.msra.mxu1 %v15249_v29  ;;  %v15302_v29 = vld [vmem:[%s16480_s15 + $0x1854] ss:$28 sps:$4 sm:$0xff]  }
 0x274   : > { %9815 = vmatpush1.bf16.msra.mxu0 %v15246_v26  ;;  %10103 = vmatprep.subr.bf16.mxu1 %v15257_v31  ;;  %v15297_v26 = vld [vmem:[%s16480_s15 + $0x160] ss:$28 sps:$4 sm:$0xff]   ;;  %v15300_v31 = vld [vmem:[%s16480_s15 + $0x1850] ss:$28 sps:$4 sm:$0xff]  }
 0x275   : > { %9816 = vmatprep.subr.bf16.mxu0 %v15254_v30  ;;  %v15305_v30 = vld [vmem:[%s16480_s15 + $0x19c] ss:$28 sps:$4 sm:$0xff]  }
 0x277   : > { %10104 = vmatpush1.bf16.msra.mxu1 %v15255_v58  ;;  %v15308_v58 = vld [vmem:[%s16480_s15 + $0x188c] ss:$28 sps:$4 sm:$0xff]  }
 0x278   : > { %9817 = vmatpush1.bf16.msra.mxu0 %v15252_v47  ;;  %10105 = vmatprep.subr.bf16.mxu1 %v15260_v37  ;;  %v15303_v47 = vld [vmem:[%s16480_s15 + $0x198] ss:$28 sps:$4 sm:$0xff]   ;;  %v15306_v37 = vld [vmem:[%s16480_s15 + $0x1888] ss:$28 sps:$4 sm:$0xff]  }
 0x279   : > { %10376 = vmatprep.subr.bf16.mxu0 %v15263_v38  ;;  %v15309_v38 = vld [vmem:[%s16480_s15 + $0x1d0] ss:$28 sps:$4 sm:$0xff]  }
 0x27b   : > { %9835 = vmatmul.mubr.bf16.vlgmr.msra.gmra.mrb[0].mxu0 %v17292_v39  ;;  %10106 = vmatpush1.bf16.msra.mxu1 %v15258_v57  ;;  %v15314_v57 = vld [vmem:[%s16480_s15 + $0x18c4] ss:$28 sps:$4 sm:$0xff]  }
 0x27c   : > { %10377 = vmatpush1.bf16.msra.mxu0 %v15261_v45  ;;  %10107 = vmatprep.subr.bf16.mxu1 %v15266_v46  ;;  %v15317_v45 = vld [vmem:[%s16480_s15 + $0x20c] ss:$28 sps:$4 sm:$0xff]   ;;  %v15312_v46 = vld [vmem:[%s16480_s15 + $0x18c0] ss:$28 sps:$4 sm:$0xff]  }
 0x27d   : > { %10378 = vmatprep.subr.bf16.mxu0 %v15269_v55  ;;  %10408 = vmatprep.mubr.bf16.mxu0 %v16545_v62  ;;  %v15315_v55 = vld [vmem:[%s16480_s15 + $0x208] ss:$28 sps:$4 sm:$0xff]  }
 0x27f   : > { %10108 = vmatpush1.bf16.msra.mxu1 %v15264_v51  ;;  %v15320_v51 = vld [vmem:[%s16480_s15 + $0x18fc] ss:$28 sps:$4 sm:$0xff]  }
 0x280   : > { %10379 = vmatpush1.bf16.msra.mxu0 %v15267_v15  ;;  %10109 = vmatprep.subr.bf16.mxu1 %v15272_v52  ;;  %v15323_v15 = vld [vmem:[%s16480_s15 + $0x244] ss:$28 sps:$4 sm:$0xff]   ;;  %v15318_v52 = vld [vmem:[%s16480_s15 + $0x18f8] ss:$28 sps:$4 sm:$0xff]  }
 0x281   : > { %10380 = vmatprep.subr.bf16.mxu0 %v15275_v53  ;;  %v15321_v53 = vld [vmem:[%s16480_s15 + $0x240] ss:$28 sps:$4 sm:$0xff]  }
 0x283   : > { %10110 = vmatpush1.bf16.msra.mxu1 %v15270_v59  ;;  %v15326_v59 = vld [vmem:[%s16480_s15 + $0x1934] ss:$28 sps:$4 sm:$0xff]  }
 0x284   : > { %10381 = vmatpush1.bf16.msra.mxu0 %v15273_v0  ;;  %10111 = vmatprep.subr.bf16.mxu1 %v15278_v7  ;;  %v15329_v0 = vld [vmem:[%s16480_s15 + $0x27c] ss:$28 sps:$4 sm:$0xff]   ;;  %v15324_v7 = vld [vmem:[%s16480_s15 + $0x1930] ss:$28 sps:$4 sm:$0xff]  }
 0x285   : > { %10382 = vmatprep.subr.bf16.mxu0 %v15281_v8  ;;  %v15327_v8 = vld [vmem:[%s16480_s15 + $0x278] ss:$28 sps:$4 sm:$0xff]  }
 0x287   : > { %10112 = vmatpush1.bf16.msra.mxu1 %v15276_v19  ;;  %v15332_v19 = vld [vmem:[%s16480_s15 + $0x196c] ss:$28 sps:$4 sm:$0xff]  }
 0x288   : > { %10383 = vmatpush1.bf16.msra.mxu0 %v15279_v10  ;;  %10113 = vmatprep.subr.bf16.mxu1 %v15284_v35  ;;  %v15335_v10 = vld [vmem:[%s16480_s15 + $0x2b4] ss:$28 sps:$4 sm:$0xff]   ;;  %v15330_v35 = vld [vmem:[%s16480_s15 + $0x1968] ss:$28 sps:$4 sm:$0xff]  }
 0x289   : > { %10384 = vmatprep.subr.bf16.mxu0 %v15287_v12  ;;  %v15333_v12 = vld [vmem:[%s16480_s15 + $0x2b0] ss:$28 sps:$4 sm:$0xff]  }
 0x28b   : > { %10114 = vmatpush1.bf16.msra.mxu1 %v15282_v13  ;;  %v15338_v13 = vld [vmem:[%s16480_s15 + $0x19a4] ss:$28 sps:$4 sm:$0xff]  }
 0x28c   : > { %10385 = vmatpush1.bf16.msra.mxu0 %v15285_v14  ;;  %10115 = vmatprep.subr.bf16.mxu1 %v15290_v16  ;;  %v15341_v14 = vld [vmem:[%s16480_s15 + $0x2ec] ss:$28 sps:$4 sm:$0xff]   ;;  %v15336_v16 = vld [vmem:[%s16480_s15 + $0x19a0] ss:$28 sps:$4 sm:$0xff]  }
 0x28d   : > { %10386 = vmatprep.subr.bf16.mxu0 %v15293_v18  ;;  %v15339_v18 = vld [vmem:[%s16480_s15 + $0x2e8] ss:$28 sps:$4 sm:$0xff]  }
 0x28f   : > { %10116 = vmatpush1.bf16.msra.mxu1 %v15288_v40  ;;  %v15344_v40 = vld [vmem:[%s16480_s15 + $0x19dc] ss:$28 sps:$4 sm:$0xff]  }
 0x290   : > { %10387 = vmatpush1.bf16.msra.mxu0 %v15291_v20  ;;  %10117 = vmatprep.subr.bf16.mxu1 %v15296_v23  ;;  %v15347_v20 = vld [vmem:[%s16480_s15 + $0x324] ss:$28 sps:$4 sm:$0xff]   ;;  %v15342_v23 = vld [vmem:[%s16480_s15 + $0x19d8] ss:$28 sps:$4 sm:$0xff]  }
 0x291   : > { %10388 = vmatprep.subr.bf16.mxu0 %v15299_v54  ;;  %v15345_v54 = vld [vmem:[%s16480_s15 + $0x320] ss:$28 sps:$4 sm:$0xff]  }
 0x293   : > { %10118 = vmatpush1.bf16.msra.mxu1 %v15294_v24  ;;  %v15350_v24 = vld [vmem:[%s16480_s15 + $0x1a14] ss:$28 sps:$4 sm:$0xff]  }
 0x294   : > { %10389 = vmatpush1.bf16.msra.mxu0 %v15297_v26  ;;  %10119 = vmatprep.subr.bf16.mxu1 %v15302_v29  ;;  %v15353_v26 = vld [vmem:[%s16480_s15 + $0x35c] ss:$28 sps:$4 sm:$0xff]   ;;  %v15348_v29 = vld [vmem:[%s16480_s15 + $0x1a10] ss:$28 sps:$4 sm:$0xff]  }
 0x295   : > { %10390 = vmatprep.subr.bf16.mxu0 %v15305_v30  ;;  %v15351_v30 = vld [vmem:[%s16480_s15 + $0x358] ss:$28 sps:$4 sm:$0xff]  }
 0x297   : > { %10120 = vmatpush1.bf16.msra.mxu1 %v15300_v31  ;;  %v15356_v31 = vld [vmem:[%s16480_s15 + $0x1a4c] ss:$28 sps:$4 sm:$0xff]  }
 0x298   : > { %10391 = vmatpush1.bf16.msra.mxu0 %v15303_v47  ;;  %10130 = vmatprep.subr.bf16.mxu1 %v15308_v58  ;;  %v15359_v47 = vld [vmem:[%s16480_s15 + $0x394] ss:$28 sps:$4 sm:$0xff]   ;;  %v15354_v58 = vld [vmem:[%s16480_s15 + $0x1a48] ss:$28 sps:$4 sm:$0xff]  }
 0x299   : > { %10392 = vmatprep.subr.bf16.mxu0 %v15311_v36  ;;  %v15357_v36 = vld [vmem:[%s16480_s15 + $0x390] ss:$28 sps:$4 sm:$0xff]  }
 0x29a   : > { %10122 = vmatmul.mubr.bf16.vlgmr.msra.gmra.mrb[4].mxu1 %v16848_v28 }
 0x29b   : > { %10131 = vmatpush1.bf16.msra.mxu1 %v15306_v37  ;;  %10162 = vmatprep.mubr.bf16.mxu1 %v16853_v32  ;;  %v15362_v37 = vld [vmem:[%s16480_s15 + $0x1a84] ss:$28 sps:$4 sm:$0xff]  }
 0x29c   : > { %10393 = vmatpush1.bf16.msra.mxu0 %v15309_v38  ;;  %10132 = vmatprep.subr.bf16.mxu1 %v15314_v57  ;;  %v15365_v38 = vld [vmem:[%s16480_s15 + $0x3cc] ss:$28 sps:$4 sm:$0xff]   ;;  %v15360_v57 = vld [vmem:[%s16480_s15 + $0x1a80] ss:$28 sps:$4 sm:$0xff]  }
 0x29d   : > { %10394 = vmatprep.subr.bf16.mxu0 %v15317_v45  ;;  %v15363_v45 = vld [vmem:[%s16480_s15 + $0x3c8] ss:$28 sps:$4 sm:$0xff]  }
 0x29f   : > { %10133 = vmatpush1.bf16.msra.mxu1 %v15312_v46  ;;  %v15368_v46 = vld [vmem:[%s16480_s15 + $0x1abc] ss:$28 sps:$4 sm:$0xff]  }
 0x2a0   : > { %10395 = vmatpush1.bf16.msra.mxu0 %v15315_v55  ;;  %10134 = vmatprep.subr.bf16.mxu1 %v15320_v51  ;;  %v15371_v55 = vld [vmem:[%s16480_s15 + $0x404] ss:$28 sps:$4 sm:$0xff]   ;;  %v15366_v51 = vld [vmem:[%s16480_s15 + $0x1ab8] ss:$28 sps:$4 sm:$0xff]  }
 0x2a1   : > { %10396 = vmatprep.subr.bf16.mxu0 %v15323_v15  ;;  %v15369_v15 = vld [vmem:[%s16480_s15 + $0x400] ss:$28 sps:$4 sm:$0xff]  }
 0x2a3   : > { %10135 = vmatpush1.bf16.msra.mxu1 %v15318_v52  ;;  %v15374_v52 = vld [vmem:[%s16480_s15 + $0x1af4] ss:$28 sps:$4 sm:$0xff]  }
 0x2a4   : > { %10397 = vmatpush1.bf16.msra.mxu0 %v15321_v53  ;;  %10136 = vmatprep.subr.bf16.mxu1 %v15326_v59  ;;  %v15377_v53 = vld [vmem:[%s16480_s15 + $0x43c] ss:$28 sps:$4 sm:$0xff]   ;;  %v15372_v59 = vld [vmem:[%s16480_s15 + $0x1af0] ss:$28 sps:$4 sm:$0xff]  }
 0x2a5   : > { %10398 = vmatprep.subr.bf16.mxu0 %v15329_v0  ;;  %v15375_v0 = vld [vmem:[%s16480_s15 + $0x438] ss:$28 sps:$4 sm:$0xff]  }
 0x2a7   : > { %10137 = vmatpush1.bf16.msra.mxu1 %v15324_v7  ;;  %v15380_v7 = vld [vmem:[%s16480_s15 + $0x1b2c] ss:$28 sps:$4 sm:$0xff]  }
 0x2a8   : > { %10399 = vmatpush1.bf16.msra.mxu0 %v15327_v8  ;;  %10138 = vmatprep.subr.bf16.mxu1 %v15332_v19  ;;  %v15383_v8 = vld [vmem:[%s16480_s15 + $0x474] ss:$28 sps:$4 sm:$0xff]   ;;  %v15378_v19 = vld [vmem:[%s16480_s15 + $0x1b28] ss:$28 sps:$4 sm:$0xff]  }
 0x2a9   : > { %10400 = vmatprep.subr.bf16.mxu0 %v15335_v10  ;;  %v15381_v10 = vld [vmem:[%s16480_s15 + $0x470] ss:$28 sps:$4 sm:$0xff]  }
 0x2ab   : > { %10139 = vmatpush1.bf16.msra.mxu1 %v15330_v35  ;;  %v15386_v35 = vld [vmem:[%s16480_s15 + $0x1b64] ss:$28 sps:$4 sm:$0xff]  }
 0x2ac   : > { %10401 = vmatpush1.bf16.msra.mxu0 %v15333_v12  ;;  %10140 = vmatprep.subr.bf16.mxu1 %v15338_v13  ;;  %v15389_v12 = vld [vmem:[%s16480_s15 + $0x4ac] ss:$28 sps:$4 sm:$0xff]   ;;  %v15384_v13 = vld [vmem:[%s16480_s15 + $0x1b60] ss:$28 sps:$4 sm:$0xff]  }
 0x2ad   : > { %10402 = vmatprep.subr.bf16.mxu0 %v15341_v14  ;;  %v15387_v14 = vld [vmem:[%s16480_s15 + $0x4a8] ss:$28 sps:$4 sm:$0xff]  }
 0x2af   : > { %10141 = vmatpush1.bf16.msra.mxu1 %v15336_v16  ;;  %v15392_v16 = vld [vmem:[%s16480_s15 + $0x1b9c] ss:$28 sps:$4 sm:$0xff]  }
 0x2b0   : > { %10403 = vmatpush1.bf16.msra.mxu0 %v15339_v18  ;;  %10142 = vmatprep.subr.bf16.mxu1 %v15344_v40  ;;  %v15395_v18 = vld [vmem:[%s16480_s15 + $0x4e4] ss:$28 sps:$4 sm:$0xff]   ;;  %v15390_v40 = vld [vmem:[%s16480_s15 + $0x1b98] ss:$28 sps:$4 sm:$0xff]  }
 0x2b1   : > { %10404 = vmatprep.subr.bf16.mxu0 %v15347_v20  ;;  %v15393_v20 = vld [vmem:[%s16480_s15 + $0x4e0] ss:$28 sps:$4 sm:$0xff]  }
 0x2b3   : > { %10143 = vmatpush1.bf16.msra.mxu1 %v15342_v23  ;;  %v15398_v23 = vld [vmem:[%s16480_s15 + $0x1bd4] ss:$28 sps:$4 sm:$0xff]  }
 0x2b4   : > { %10405 = vmatpush1.bf16.msra.mxu0 %v15345_v54  ;;  %10144 = vmatprep.subr.bf16.mxu1 %v15350_v24  ;;  %v15401_v54 = vld [vmem:[%s16480_s15 + $0x51c] ss:$28 sps:$4 sm:$0xff]   ;;  %v15396_v24 = vld [vmem:[%s16480_s15 + $0x1bd0] ss:$28 sps:$4 sm:$0xff]  }
 0x2b5   : > { %10406 = vmatprep.subr.bf16.mxu0 %v15353_v26  ;;  %v15399_v26 = vld [vmem:[%s16480_s15 + $0x518] ss:$28 sps:$4 sm:$0xff]  }
 0x2b7   : > { %10145 = vmatpush1.bf16.msra.mxu1 %v15348_v29  ;;  %v15404_v29 = vld [vmem:[%s16480_s15 + $0x1c0c] ss:$28 sps:$4 sm:$0xff]  }
 0x2b8   : > { %10407 = vmatpush1.bf16.msra.mxu0 %v15351_v30  ;;  %10146 = vmatprep.subr.bf16.mxu1 %v15356_v31  ;;  %v15407_v30 = vld [vmem:[%s16480_s15 + $0x554] ss:$28 sps:$4 sm:$0xff]   ;;  %v15402_v31 = vld [vmem:[%s16480_s15 + $0x1c08] ss:$28 sps:$4 sm:$0xff]  }
 0x2b9   : > { %10417 = vmatprep.subr.bf16.mxu0 %v15359_v47  ;;  %v15405_v47 = vld [vmem:[%s16480_s15 + $0x550] ss:$28 sps:$4 sm:$0xff]  }
 0x2bb   : > { %10409 = vmatmul.mubr.bf16.vlgmr.msra.gmra.mrb[4].mxu0 %v16573_v21  ;;  %10147 = vmatpush1.bf16.msra.mxu1 %v15354_v58  ;;  %v15410_v58 = vld [vmem:[%s16480_s15 + $0x1c44] ss:$28 sps:$4 sm:$0xff]  }
 0x2bc   : > { %10418 = vmatpush1.bf16.msra.mxu0 %v15357_v36  ;;  %10148 = vmatprep.subr.bf16.mxu1 %v15362_v37  ;;  %v15413_v36 = vld [vmem:[%s16480_s15 + $0x58c] ss:$28 sps:$4 sm:$0xff]   ;;  %v15408_v37 = vld [vmem:[%s16480_s15 + $0x1c40] ss:$28 sps:$4 sm:$0xff]  }
 0x2bd   : > { %10419 = vmatprep.subr.bf16.mxu0 %v15365_v38  ;;  %10449 = vmatprep.mubr.bf16.mxu0 %v16581_v27  ;;  %v15411_v38 = vld [vmem:[%s16480_s15 + $0x588] ss:$28 sps:$4 sm:$0xff]  }
 0x2bf   : > { %10149 = vmatpush1.bf16.msra.mxu1 %v15360_v57  ;;  %v15416_v57 = vld [vmem:[%s16480_s15 + $0x1c7c] ss:$28 sps:$4 sm:$0xff]  }
 0x2c0   : > { %10420 = vmatpush1.bf16.msra.mxu0 %v15363_v45  ;;  %10150 = vmatprep.subr.bf16.mxu1 %v15368_v46  ;;  %v15419_v45 = vld [vmem:[%s16480_s15 + $0x5c4] ss:$28 sps:$4 sm:$0xff]   ;;  %v15414_v46 = vld [vmem:[%s16480_s15 + $0x1c78] ss:$28 sps:$4 sm:$0xff]  }
 0x2c1   : > { %10421 = vmatprep.subr.bf16.mxu0 %v15371_v55  ;;  %v15417_v55 = vld [vmem:[%s16480_s15 + $0x5c0] ss:$28 sps:$4 sm:$0xff]  }
 0x2c3   : > { %10151 = vmatpush1.bf16.msra.mxu1 %v15366_v51  ;;  %v15422_v51 = vld [vmem:[%s16480_s15 + $0x1cb4] ss:$28 sps:$4 sm:$0xff]  }
 0x2c4   : > { %10422 = vmatpush1.bf16.msra.mxu0 %v15369_v15  ;;  %10152 = vmatprep.subr.bf16.mxu1 %v15374_v52  ;;  %v15425_v15 = vld [vmem:[%s16480_s15 + $0x5fc] ss:$28 sps:$4 sm:$0xff]   ;;  %v15420_v52 = vld [vmem:[%s16480_s15 + $0x1cb0] ss:$28 sps:$4 sm:$0xff]  }
 0x2c5   : > { %10423 = vmatprep.subr.bf16.mxu0 %v15377_v53  ;;  %v15423_v53 = vld [vmem:[%s16480_s15 + $0x5f8] ss:$28 sps:$4 sm:$0xff]  }
 0x2c7   : > { %10153 = vmatpush1.bf16.msra.mxu1 %v15372_v59  ;;  %v15428_v59 = vld [vmem:[%s16480_s15 + $0x1cec] ss:$28 sps:$4 sm:$0xff]  }
 0x2c8   : > { %10424 = vmatpush1.bf16.msra.mxu0 %v15375_v0  ;;  %10154 = vmatprep.subr.bf16.mxu1 %v15380_v7  ;;  %v15431_v0 = vld [vmem:[%s16480_s15 + $0x634] ss:$28 sps:$4 sm:$0xff]   ;;  %v15426_v7 = vld [vmem:[%s16480_s15 + $0x1ce8] ss:$28 sps:$4 sm:$0xff]  }
 0x2c9   : > { %10425 = vmatprep.subr.bf16.mxu0 %v15383_v8  ;;  %v15429_v8 = vld [vmem:[%s16480_s15 + $0x630] ss:$28 sps:$4 sm:$0xff]  }
 0x2cb   : > { %10155 = vmatpush1.bf16.msra.mxu1 %v15378_v19  ;;  %v15434_v19 = vld [vmem:[%s16480_s15 + $0x1d24] ss:$28 sps:$4 sm:$0xff]  }
 0x2cc   : > { %10426 = vmatpush1.bf16.msra.mxu0 %v15381_v10  ;;  %10156 = vmatprep.subr.bf16.mxu1 %v15386_v35  ;;  %v15437_v10 = vld [vmem:[%s16480_s15 + $0x66c] ss:$28 sps:$4 sm:$0xff]   ;;  %v15432_v35 = vld [vmem:[%s16480_s15 + $0x1d20] ss:$28 sps:$4 sm:$0xff]  }
 0x2cd   : > { %10427 = vmatprep.subr.bf16.mxu0 %v15389_v12  ;;  %v15435_v12 = vld [vmem:[%s16480_s15 + $0x668] ss:$28 sps:$4 sm:$0xff]  }
 0x2cf   : > { %10157 = vmatpush1.bf16.msra.mxu1 %v15384_v13  ;;  %v15440_v13 = vld [vmem:[%s16480_s15 + $0x1d5c] ss:$28 sps:$4 sm:$0xff]  }
 0x2d0   : > { %10428 = vmatpush1.bf16.msra.mxu0 %v15387_v14  ;;  %10158 = vmatprep.subr.bf16.mxu1 %v15392_v16  ;;  %v15443_v14 = vld [vmem:[%s16480_s15 + $0x6a4] ss:$28 sps:$4 sm:$0xff]   ;;  %v15438_v16 = vld [vmem:[%s16480_s15 + $0x1d58] ss:$28 sps:$4 sm:$0xff]  }
 0x2d1   : > { %10429 = vmatprep.subr.bf16.mxu0 %v15395_v18  ;;  %v15441_v18 = vld [vmem:[%s16480_s15 + $0x6a0] ss:$28 sps:$4 sm:$0xff]  }
 0x2d3   : > { %10159 = vmatpush1.bf16.msra.mxu1 %v15390_v40  ;;  %v15446_v40 = vld [vmem:[%s16480_s15 + $0x1d94] ss:$28 sps:$4 sm:$0xff]  }
 0x2d4   : > { %10430 = vmatpush1.bf16.msra.mxu0 %v15393_v20  ;;  %10160 = vmatprep.subr.bf16.mxu1 %v15398_v23  ;;  %v15449_v20 = vld [vmem:[%s16480_s15 + $0x6dc] ss:$28 sps:$4 sm:$0xff]   ;;  %v15444_v23 = vld [vmem:[%s16480_s15 + $0x1d90] ss:$28 sps:$4 sm:$0xff]  }
 0x2d5   : > { %10431 = vmatprep.subr.bf16.mxu0 %v15401_v54  ;;  %v15447_v54 = vld [vmem:[%s16480_s15 + $0x6d8] ss:$28 sps:$4 sm:$0xff]  }
 0x2d7   : > { %10161 = vmatpush1.bf16.msra.mxu1 %v15396_v24  ;;  %v15452_v24 = vld [vmem:[%s16480_s15 + $0x1dcc] ss:$28 sps:$4 sm:$0xff]  }
 0x2d8   : > { %10432 = vmatpush1.bf16.msra.mxu0 %v15399_v26  ;;  %10171 = vmatprep.subr.bf16.mxu1 %v15404_v29  ;;  %v15455_v26 = vld [vmem:[%s16480_s15 + $0x714] ss:$28 sps:$4 sm:$0xff]   ;;  %v15450_v29 = vld [vmem:[%s16480_s15 + $0x1dc8] ss:$28 sps:$4 sm:$0xff]  }
 0x2d9   : > { %10433 = vmatprep.subr.bf16.mxu0 %v15407_v30  ;;  %v15453_v30 = vld [vmem:[%s16480_s15 + $0x710] ss:$28 sps:$4 sm:$0xff]  }
 0x2da   : > { %10163 = vmatmul.mubr.bf16.vlgmr.msra.gmra.mrb[4].mxu1 %v16930_v56 }
 0x2db   : > { %10172 = vmatpush1.bf16.msra.mxu1 %v15402_v31  ;;  %10203 = vmatprep.mubr.bf16.mxu1 %v16936_v1  ;;  %v15458_v31 = vld [vmem:[%s16480_s15 + $0x1e04] ss:$28 sps:$4 sm:$0xff]  }
 0x2dc   : > { %10434 = vmatpush1.bf16.msra.mxu0 %v15405_v47  ;;  %10173 = vmatprep.subr.bf16.mxu1 %v15410_v58  ;;  %v15461_v47 = vld [vmem:[%s16480_s15 + $0x74c] ss:$28 sps:$4 sm:$0xff]   ;;  %v15456_v58 = vld [vmem:[%s16480_s15 + $0x1e00] ss:$28 sps:$4 sm:$0xff]  }
 0x2dd   : > { %10435 = vmatprep.subr.bf16.mxu0 %v15413_v36  ;;  %v15459_v36 = vld [vmem:[%s16480_s15 + $0x748] ss:$28 sps:$4 sm:$0xff]  }
 0x2df   : > { %10174 = vmatpush1.bf16.msra.mxu1 %v15408_v37  ;;  %v15464_v37 = vld [vmem:[%s16480_s15 + $0x1e3c] ss:$28 sps:$4 sm:$0xff]  }
 0x2e0   : > { %10436 = vmatpush1.bf16.msra.mxu0 %v15411_v38  ;;  %10175 = vmatprep.subr.bf16.mxu1 %v15416_v57  ;;  %v15467_v38 = vld [vmem:[%s16480_s15 + $0x784] ss:$28 sps:$4 sm:$0xff]   ;;  %v15462_v57 = vld [vmem:[%s16480_s15 + $0x1e38] ss:$28 sps:$4 sm:$0xff]  }
 0x2e1   : > { %10437 = vmatprep.subr.bf16.mxu0 %v15419_v45  ;;  %v15465_v45 = vld [vmem:[%s16480_s15 + $0x780] ss:$28 sps:$4 sm:$0xff]  }
 0x2e3   : > { %10176 = vmatpush1.bf16.msra.mxu1 %v15414_v46  ;;  %v15470_v46 = vld [vmem:[%s16480_s15 + $0x1e74] ss:$28 sps:$4 sm:$0xff]  }
 0x2e4   : > { %10438 = vmatpush1.bf16.msra.mxu0 %v15417_v55  ;;  %10177 = vmatprep.subr.bf16.mxu1 %v15422_v51  ;;  %v15473_v55 = vld [vmem:[%s16480_s15 + $0x7bc] ss:$28 sps:$4 sm:$0xff]   ;;  %v15468_v51 = vld [vmem:[%s16480_s15 + $0x1e70] ss:$28 sps:$4 sm:$0xff]  }
 0x2e5   : > { %10439 = vmatprep.subr.bf16.mxu0 %v15425_v15  ;;  %v15471_v15 = vld [vmem:[%s16480_s15 + $0x7b8] ss:$28 sps:$4 sm:$0xff]  }
 0x2e7   : > { %10178 = vmatpush1.bf16.msra.mxu1 %v15420_v52  ;;  %v15476_v52 = vld [vmem:[%s16480_s15 + $0x1eac] ss:$28 sps:$4 sm:$0xff]  }
 0x2e8   : > { %10440 = vmatpush1.bf16.msra.mxu0 %v15423_v53  ;;  %10179 = vmatprep.subr.bf16.mxu1 %v15428_v59  ;;  %v15479_v53 = vld [vmem:[%s16480_s15 + $0x7f4] ss:$28 sps:$4 sm:$0xff]   ;;  %v15474_v59 = vld [vmem:[%s16480_s15 + $0x1ea8] ss:$28 sps:$4 sm:$0xff]  }
 0x2e9   : > { %10441 = vmatprep.subr.bf16.mxu0 %v15431_v0  ;;  %v15477_v0 = vld [vmem:[%s16480_s15 + $0x7f0] ss:$28 sps:$4 sm:$0xff]  }
 0x2eb   : > { %10180 = vmatpush1.bf16.msra.mxu1 %v15426_v7  ;;  %v15482_v7 = vld [vmem:[%s16480_s15 + $0x1ee4] ss:$28 sps:$4 sm:$0xff]  }
 0x2ec   : > { %10442 = vmatpush1.bf16.msra.mxu0 %v15429_v8  ;;  %10181 = vmatprep.subr.bf16.mxu1 %v15434_v19  ;;  %v15485_v8 = vld [vmem:[%s16480_s15 + $0x82c] ss:$28 sps:$4 sm:$0xff]   ;;  %v15480_v19 = vld [vmem:[%s16480_s15 + $0x1ee0] ss:$28 sps:$4 sm:$0xff]  }
 0x2ed   : > { %10443 = vmatprep.subr.bf16.mxu0 %v15437_v10  ;;  %v15483_v10 = vld [vmem:[%s16480_s15 + $0x828] ss:$28 sps:$4 sm:$0xff]  }
 0x2ef   : > { %10182 = vmatpush1.bf16.msra.mxu1 %v15432_v35  ;;  %v15488_v35 = vld [vmem:[%s16480_s15 + $0x1f1c] ss:$28 sps:$4 sm:$0xff]  }
 0x2f0   : > { %10444 = vmatpush1.bf16.msra.mxu0 %v15435_v12  ;;  %10183 = vmatprep.subr.bf16.mxu1 %v15440_v13  ;;  %v15491_v12 = vld [vmem:[%s16480_s15 + $0x864] ss:$28 sps:$4 sm:$0xff]   ;;  %v15486_v13 = vld [vmem:[%s16480_s15 + $0x1f18] ss:$28 sps:$4 sm:$0xff]  }
 0x2f1   : > { %10445 = vmatprep.subr.bf16.mxu0 %v15443_v14  ;;  %v15489_v14 = vld [vmem:[%s16480_s15 + $0x860] ss:$28 sps:$4 sm:$0xff]  }
 0x2f3   : > { %10184 = vmatpush1.bf16.msra.mxu1 %v15438_v16  ;;  %v15494_v16 = vld [vmem:[%s16480_s15 + $0x1f54] ss:$28 sps:$4 sm:$0xff]  }
 0x2f4   : > { %10446 = vmatpush1.bf16.msra.mxu0 %v15441_v18  ;;  %10185 = vmatprep.subr.bf16.mxu1 %v15446_v40  ;;  %v15497_v18 = vld [vmem:[%s16480_s15 + $0x89c] ss:$28 sps:$4 sm:$0xff]   ;;  %v15492_v40 = vld [vmem:[%s16480_s15 + $0x1f50] ss:$28 sps:$4 sm:$0xff]  }
 0x2f5   : > { %10447 = vmatprep.subr.bf16.mxu0 %v15449_v20  ;;  %v15495_v20 = vld [vmem:[%s16480_s15 + $0x898] ss:$28 sps:$4 sm:$0xff]  }
 0x2f7   : > { %10186 = vmatpush1.bf16.msra.mxu1 %v15444_v23  ;;  %v15500_v23 = vld [vmem:[%s16480_s15 + $0x1f8c] ss:$28 sps:$4 sm:$0xff]  }
 0x2f8   : > { %10448 = vmatpush1.bf16.msra.mxu0 %v15447_v54  ;;  %10187 = vmatprep.subr.bf16.mxu1 %v15452_v24  ;;  %v15503_v54 = vld [vmem:[%s16480_s15 + $0x8d4] ss:$28 sps:$4 sm:$0xff]   ;;  %v15498_v24 = vld [vmem:[%s16480_s15 + $0x1f88] ss:$28 sps:$4 sm:$0xff]  }
 0x2f9   : > { %10458 = vmatprep.subr.bf16.mxu0 %v15455_v26  ;;  %v15501_v26 = vld [vmem:[%s16480_s15 + $0x8d0] ss:$28 sps:$4 sm:$0xff]  }
 0x2fb   : > { %10450 = vmatmul.mubr.bf16.vlgmr.msra.gmra.mrb[4].mxu0 %v16674_v42  ;;  %10188 = vmatpush1.bf16.msra.mxu1 %v15450_v29  ;;  %v15506_v29 = vld [vmem:[%s16480_s15 + $0x1fc4] ss:$28 sps:$4 sm:$0xff]  }
 0x2fc   : > { %10459 = vmatpush1.bf16.msra.mxu0 %v15453_v30  ;;  %10189 = vmatprep.subr.bf16.mxu1 %v15458_v31  ;;  %v15509_v30 = vld [vmem:[%s16480_s15 + $0x90c] ss:$28 sps:$4 sm:$0xff]   ;;  %v15504_v31 = vld [vmem:[%s16480_s15 + $0x1fc0] ss:$28 sps:$4 sm:$0xff]  }
 0x2fd   : > { %10460 = vmatprep.subr.bf16.mxu0 %v15461_v47  ;;  %10490 = vmatprep.mubr.bf16.mxu0 %v16683_v48  ;;  %v15507_v47 = vld [vmem:[%s16480_s15 + $0x908] ss:$28 sps:$4 sm:$0xff]  }
 0x2ff   : > { %10190 = vmatpush1.bf16.msra.mxu1 %v15456_v58  ;;  %v15512_v58 = vld [vmem:[%s16480_s15 + $0x1ffc] ss:$28 sps:$4 sm:$0xff]  }
 0x300   : > { %10461 = vmatpush1.bf16.msra.mxu0 %v15459_v36  ;;  %10191 = vmatprep.subr.bf16.mxu1 %v15464_v37  ;;  %v15515_v36 = vld [vmem:[%s16480_s15 + $0x944] ss:$28 sps:$4 sm:$0xff]   ;;  %v15510_v37 = vld [vmem:[%s16480_s15 + $0x1ff8] ss:$28 sps:$4 sm:$0xff]  }
 0x301   : > { %10462 = vmatprep.subr.bf16.mxu0 %v15467_v38  ;;  %v15513_v38 = vld [vmem:[%s16480_s15 + $0x940] ss:$28 sps:$4 sm:$0xff]  }
 0x303   : > { %10192 = vmatpush1.bf16.msra.mxu1 %v15462_v57  ;;  %v15518_v57 = vld [vmem:[%s16480_s15 + $0x2034] ss:$28 sps:$4 sm:$0xff]  }
 0x304   : > { %10463 = vmatpush1.bf16.msra.mxu0 %v15465_v45  ;;  %10193 = vmatprep.subr.bf16.mxu1 %v15470_v46  ;;  %v15521_v45 = vld [vmem:[%s16480_s15 + $0x97c] ss:$28 sps:$4 sm:$0xff]   ;;  %v15516_v46 = vld [vmem:[%s16480_s15 + $0x2030] ss:$28 sps:$4 sm:$0xff]  }
 0x305   : > { %10464 = vmatprep.subr.bf16.mxu0 %v15473_v55  ;;  %v15519_v55 = vld [vmem:[%s16480_s15 + $0x978] ss:$28 sps:$4 sm:$0xff]  }
 0x307   : > { %10194 = vmatpush1.bf16.msra.mxu1 %v15468_v51  ;;  %v15524_v51 = vld [vmem:[%s16480_s15 + $0x206c] ss:$28 sps:$4 sm:$0xff]  }
 0x308   : > { %10465 = vmatpush1.bf16.msra.mxu0 %v15471_v15  ;;  %10195 = vmatprep.subr.bf16.mxu1 %v15476_v52  ;;  %v15527_v15 = vld [vmem:[%s16480_s15 + $0x9b4] ss:$28 sps:$4 sm:$0xff]   ;;  %v15522_v52 = vld [vmem:[%s16480_s15 + $0x2068] ss:$28 sps:$4 sm:$0xff]  }
 0x309   : > { %10466 = vmatprep.subr.bf16.mxu0 %v15479_v53  ;;  %v15525_v53 = vld [vmem:[%s16480_s15 + $0x9b0] ss:$28 sps:$4 sm:$0xff]  }
 0x30b   : > { %10196 = vmatpush1.bf16.msra.mxu1 %v15474_v59  ;;  %v15530_v59 = vld [vmem:[%s16480_s15 + $0x20a4] ss:$28 sps:$4 sm:$0xff]  }
 0x30c   : > { %10467 = vmatpush1.bf16.msra.mxu0 %v15477_v0  ;;  %10197 = vmatprep.subr.bf16.mxu1 %v15482_v7  ;;  %v15533_v0 = vld [vmem:[%s16480_s15 + $0x9ec] ss:$28 sps:$4 sm:$0xff]   ;;  %v15528_v7 = vld [vmem:[%s16480_s15 + $0x20a0] ss:$28 sps:$4 sm:$0xff]  }
 0x30d   : > { %10468 = vmatprep.subr.bf16.mxu0 %v15485_v8  ;;  %v15531_v8 = vld [vmem:[%s16480_s15 + $0x9e8] ss:$28 sps:$4 sm:$0xff]  }
 0x30f   : > { %10198 = vmatpush1.bf16.msra.mxu1 %v15480_v19  ;;  %v15536_v19 = vld [vmem:[%s16480_s15 + $0x20dc] ss:$28 sps:$4 sm:$0xff]  }
 0x310   : > { %10469 = vmatpush1.bf16.msra.mxu0 %v15483_v10  ;;  %10199 = vmatprep.subr.bf16.mxu1 %v15488_v35  ;;  %v15539_v10 = vld [vmem:[%s16480_s15 + $0xa24] ss:$28 sps:$4 sm:$0xff]   ;;  %v15534_v35 = vld [vmem:[%s16480_s15 + $0x20d8] ss:$28 sps:$4 sm:$0xff]  }
 0x311   : > { %10470 = vmatprep.subr.bf16.mxu0 %v15491_v12  ;;  %v15537_v12 = vld [vmem:[%s16480_s15 + $0xa20] ss:$28 sps:$4 sm:$0xff]  }
 0x313   : > { %10200 = vmatpush1.bf16.msra.mxu1 %v15486_v13  ;;  %v15542_v13 = vld [vmem:[%s16480_s15 + $0x2114] ss:$28 sps:$4 sm:$0xff]  }
 0x314   : > { %10471 = vmatpush1.bf16.msra.mxu0 %v15489_v14  ;;  %10201 = vmatprep.subr.bf16.mxu1 %v15494_v16  ;;  %v15545_v14 = vld [vmem:[%s16480_s15 + $0xa5c] ss:$28 sps:$4 sm:$0xff]   ;;  %v15540_v16 = vld [vmem:[%s16480_s15 + $0x2110] ss:$28 sps:$4 sm:$0xff]  }
 0x315   : > { %10472 = vmatprep.subr.bf16.mxu0 %v15497_v18  ;;  %v15543_v18 = vld [vmem:[%s16480_s15 + $0xa58] ss:$28 sps:$4 sm:$0xff]  }
 0x317   : > { %10202 = vmatpush1.bf16.msra.mxu1 %v15492_v40  ;;  %v15548_v40 = vld [vmem:[%s16480_s15 + $0x214c] ss:$28 sps:$4 sm:$0xff]  }
 0x318   : > { %10473 = vmatpush1.bf16.msra.mxu0 %v15495_v20  ;;  %10212 = vmatprep.subr.bf16.mxu1 %v15500_v23  ;;  %v15551_v20 = vld [vmem:[%s16480_s15 + $0xa94] ss:$28 sps:$4 sm:$0xff]   ;;  %v15546_v23 = vld [vmem:[%s16480_s15 + $0x2148] ss:$28 sps:$4 sm:$0xff]  }
 0x319   : > { %10474 = vmatprep.subr.bf16.mxu0 %v15503_v54  ;;  %v15549_v54 = vld [vmem:[%s16480_s15 + $0xa90] ss:$28 sps:$4 sm:$0xff]  }
 0x31a   : > { %10204 = vmatmul.mubr.bf16.vlgmr.msra.gmra.mrb[4].mxu1 %v17011_v25 }
 0x31b   : > { %10213 = vmatpush1.bf16.msra.mxu1 %v15498_v24  ;;  %10244 = vmatprep.mubr.bf16.mxu1 %v17017_v33  ;;  %v15554_v24 = vld [vmem:[%s16480_s15 + $0x2184] ss:$28 sps:$4 sm:$0xff]  }
 0x31c   : > { %10475 = vmatpush1.bf16.msra.mxu0 %v15501_v26  ;;  %10214 = vmatprep.subr.bf16.mxu1 %v15506_v29  ;;  %v15557_v26 = vld [vmem:[%s16480_s15 + $0xacc] ss:$28 sps:$4 sm:$0xff]   ;;  %v15552_v29 = vld [vmem:[%s16480_s15 + $0x2180] ss:$28 sps:$4 sm:$0xff]  }
 0x31d   : > { %10476 = vmatprep.subr.bf16.mxu0 %v15509_v30  ;;  %v15555_v30 = vld [vmem:[%s16480_s15 + $0xac8] ss:$28 sps:$4 sm:$0xff]  }
 0x31f   : > { %10215 = vmatpush1.bf16.msra.mxu1 %v15504_v31  ;;  %v15560_v31 = vld [vmem:[%s16480_s15 + $0x21bc] ss:$28 sps:$4 sm:$0xff]  }
 0x320   : > { %10477 = vmatpush1.bf16.msra.mxu0 %v15507_v47  ;;  %10216 = vmatprep.subr.bf16.mxu1 %v15512_v58  ;;  %v15563_v47 = vld [vmem:[%s16480_s15 + $0xb04] ss:$28 sps:$4 sm:$0xff]   ;;  %v15558_v58 = vld [vmem:[%s16480_s15 + $0x21b8] ss:$28 sps:$4 sm:$0xff]  }
 0x321   : > { %10478 = vmatprep.subr.bf16.mxu0 %v15515_v36  ;;  %v15561_v36 = vld [vmem:[%s16480_s15 + $0xb00] ss:$28 sps:$4 sm:$0xff]  }
 0x323   : > { %10217 = vmatpush1.bf16.msra.mxu1 %v15510_v37  ;;  %v15566_v37 = vld [vmem:[%s16480_s15 + $0x21f4] ss:$28 sps:$4 sm:$0xff]  }
 0x324   : > { %10479 = vmatpush1.bf16.msra.mxu0 %v15513_v38  ;;  %10218 = vmatprep.subr.bf16.mxu1 %v15518_v57  ;;  %v15569_v38 = vld [vmem:[%s16480_s15 + $0xb3c] ss:$28 sps:$4 sm:$0xff]   ;;  %v15564_v57 = vld [vmem:[%s16480_s15 + $0x21f0] ss:$28 sps:$4 sm:$0xff]  }
 0x325   : > { %10480 = vmatprep.subr.bf16.mxu0 %v15521_v45  ;;  %v15567_v45 = vld [vmem:[%s16480_s15 + $0xb38] ss:$28 sps:$4 sm:$0xff]  }
 0x327   : > { %10219 = vmatpush1.bf16.msra.mxu1 %v15516_v46  ;;  %v15572_v46 = vld [vmem:[%s16480_s15 + $0x222c] ss:$28 sps:$4 sm:$0xff]  }
 0x328   : > { %10481 = vmatpush1.bf16.msra.mxu0 %v15519_v55  ;;  %10220 = vmatprep.subr.bf16.mxu1 %v15524_v51  ;;  %v15575_v55 = vld [vmem:[%s16480_s15 + $0xb74] ss:$28 sps:$4 sm:$0xff]   ;;  %v15570_v51 = vld [vmem:[%s16480_s15 + $0x2228] ss:$28 sps:$4 sm:$0xff]  }
 0x329   : > { %10482 = vmatprep.subr.bf16.mxu0 %v15527_v15  ;;  %v15573_v15 = vld [vmem:[%s16480_s15 + $0xb70] ss:$28 sps:$4 sm:$0xff]  }
 0x32b   : > { %10221 = vmatpush1.bf16.msra.mxu1 %v15522_v52  ;;  %v15578_v52 = vld [vmem:[%s16480_s15 + $0x2264] ss:$28 sps:$4 sm:$0xff]  }
 0x32c   : > { %10483 = vmatpush1.bf16.msra.mxu0 %v15525_v53  ;;  %10222 = vmatprep.subr.bf16.mxu1 %v15530_v59  ;;  %v15581_v53 = vld [vmem:[%s16480_s15 + $0xbac] ss:$28 sps:$4 sm:$0xff]   ;;  %v15576_v59 = vld [vmem:[%s16480_s15 + $0x2260] ss:$28 sps:$4 sm:$0xff]  }
 0x32d   : > { %10484 = vmatprep.subr.bf16.mxu0 %v15533_v0  ;;  %v15579_v0 = vld [vmem:[%s16480_s15 + $0xba8] ss:$28 sps:$4 sm:$0xff]  }
 0x32f   : > { %10223 = vmatpush1.bf16.msra.mxu1 %v15528_v7  ;;  %v15584_v7 = vld [vmem:[%s16480_s15 + $0x229c] ss:$28 sps:$4 sm:$0xff]  }
 0x330   : > { %10485 = vmatpush1.bf16.msra.mxu0 %v15531_v8  ;;  %10224 = vmatprep.subr.bf16.mxu1 %v15536_v19  ;;  %v15587_v8 = vld [vmem:[%s16480_s15 + $0xbe4] ss:$28 sps:$4 sm:$0xff]  }
 0x331   : > { %10486 = vmatprep.subr.bf16.mxu0 %v15539_v10 }
 0x333   : > { %10225 = vmatpush1.bf16.msra.mxu1 %v15534_v35 }
 0x334   : > { %10487 = vmatpush1.bf16.msra.mxu0 %v15537_v12  ;;  %10226 = vmatprep.subr.bf16.mxu1 %v15542_v13 }
 0x335   : > { %10488 = vmatprep.subr.bf16.mxu0 %v15545_v14  ;;  %v15582_v14 = vld [vmem:[%s16480_s15 + $0x2298] ss:$28 sps:$4 sm:$0xff]  }
 0x337   : > { %10227 = vmatpush1.bf16.msra.mxu1 %v15540_v16  ;;  %v15585_v16 = vld [vmem:[%s16480_s15 + $0xbe0] ss:$28 sps:$4 sm:$0xff]  }
 0x338   : > { %10489 = vmatpush1.bf16.msra.mxu0 %v15543_v18  ;;  %10228 = vmatprep.subr.bf16.mxu1 %v15548_v40  ;;  %v15593_v40 = vld [vmem:[%s16480_s15 + $0xc1c] ss:$28 sps:$4 sm:$0xff]  }
 0x339   : > { %10499 = vmatprep.subr.bf16.mxu0 %v15551_v20 }
 0x33b   : > { %10491 = vmatmul.mubr.bf16.vlgmr.msra.gmra.mrb[4].mxu0 %v16762_v2  ;;  %10229 = vmatpush1.bf16.msra.mxu1 %v15546_v23  ;;  %v15591_v23 = vld [vmem:[%s16480_s15 + $0xc18] ss:$28 sps:$4 sm:$0xff]  }
 0x33c   : > { %10500 = vmatpush1.bf16.msra.mxu0 %v15549_v54  ;;  %10230 = vmatprep.subr.bf16.mxu1 %v15554_v24  ;;  %v15596_v54 = vld [vmem:[%s16480_s15 + $0x230c] ss:$28 sps:$4 sm:$0xff]   ;;  %v15599_v24 = vld [vmem:[%s16480_s15 + $0xc54] ss:$28 sps:$4 sm:$0xff]  }
 0x33d   : > { %10501 = vmatprep.subr.bf16.mxu0 %v15557_v26  ;;  %10531 = vmatprep.mubr.bf16.mxu0 %v16553_v5  ;;  %v15594_v26 = vld [vmem:[%s16480_s15 + $0x2308] ss:$28 sps:$4 sm:$0xff]  }
 0x33f   : > { %10231 = vmatpush1.bf16.msra.mxu1 %v15552_v29  ;;  %v15597_v29 = vld [vmem:[%s16480_s15 + $0xc50] ss:$28 sps:$4 sm:$0xff]  }
 0x340   : > { %10502 = vmatpush1.bf16.msra.mxu0 %v15555_v30  ;;  %10232 = vmatprep.subr.bf16.mxu1 %v15560_v31  ;;  %v15602_v30 = vld [vmem:[%s16480_s15 + $0x2344] ss:$28 sps:$4 sm:$0xff]   ;;  %v15605_v31 = vld [vmem:[%s16480_s15 + $0xc8c] ss:$28 sps:$4 sm:$0xff]  }
 0x341   : > { %10503 = vmatprep.subr.bf16.mxu0 %v15563_v47  ;;  %v15600_v47 = vld [vmem:[%s16480_s15 + $0x2340] ss:$28 sps:$4 sm:$0xff]  }
 0x343   : > { %10233 = vmatpush1.bf16.msra.mxu1 %v15558_v58  ;;  %v15603_v58 = vld [vmem:[%s16480_s15 + $0xc88] ss:$28 sps:$4 sm:$0xff]  }
 0x344   : > { %10504 = vmatpush1.bf16.msra.mxu0 %v15561_v36  ;;  %10234 = vmatprep.subr.bf16.mxu1 %v15566_v37  ;;  %v15608_v36 = vld [vmem:[%s16480_s15 + $0x237c] ss:$28 sps:$4 sm:$0xff]   ;;  %v15611_v37 = vld [vmem:[%s16480_s15 + $0xcc4] ss:$28 sps:$4 sm:$0xff]  }
 0x345   : > { %10505 = vmatprep.subr.bf16.mxu0 %v15569_v38  ;;  %v15606_v38 = vld [vmem:[%s16480_s15 + $0x2378] ss:$28 sps:$4 sm:$0xff]  }
 0x347   : > { %10235 = vmatpush1.bf16.msra.mxu1 %v15564_v57  ;;  %v15609_v57 = vld [vmem:[%s16480_s15 + $0xcc0] ss:$28 sps:$4 sm:$0xff]  }
 0x348   : > { %10506 = vmatpush1.bf16.msra.mxu0 %v15567_v45  ;;  %10236 = vmatprep.subr.bf16.mxu1 %v15572_v46  ;;  %v15614_v45 = vld [vmem:[%s16480_s15 + $0x23b4] ss:$28 sps:$4 sm:$0xff]   ;;  %v15617_v46 = vld [vmem:[%s16480_s15 + $0xcfc] ss:$28 sps:$4 sm:$0xff]  }
 0x349   : > { %10507 = vmatprep.subr.bf16.mxu0 %v15575_v55  ;;  %v15612_v55 = vld [vmem:[%s16480_s15 + $0x23b0] ss:$28 sps:$4 sm:$0xff]  }
 0x34b   : > { %10237 = vmatpush1.bf16.msra.mxu1 %v15570_v51  ;;  %v15615_v51 = vld [vmem:[%s16480_s15 + $0xcf8] ss:$28 sps:$4 sm:$0xff]  }
 0x34c   : > { %10508 = vmatpush1.bf16.msra.mxu0 %v15573_v15  ;;  %10238 = vmatprep.subr.bf16.mxu1 %v15578_v52  ;;  %v15620_v15 = vld [vmem:[%s16480_s15 + $0x23ec] ss:$28 sps:$4 sm:$0xff]   ;;  %v15623_v52 = vld [vmem:[%s16480_s15 + $0xd34] ss:$28 sps:$4 sm:$0xff]  }
 0x34d   : > { %10509 = vmatprep.subr.bf16.mxu0 %v15581_v53  ;;  %v15618_v53 = vld [vmem:[%s16480_s15 + $0x23e8] ss:$28 sps:$4 sm:$0xff]  }
 0x34e   : > { %v9836_v19 = vpop.f32.mrb[0].mxu0 }
 0x34f   : > { %v17525_v10 = vadd.f32 %v9836_v19, %v17043_v3  ;;  %v9838_v35 = vpop.f32.mrb[1].mxu0  ;;  %10239 = vmatpush1.bf16.msra.mxu1 %v15576_v59  ;;  %v15590_v3 = vld [vmem:[%s16480_s15 + $0x22d4] ss:$28 sps:$4 sm:$0xff]   ;;  %v15627_v19 = vld [vmem:[%s16480_s15 + $0xd68] ss:$28 sps:$4 sm:$0xff]  }
 0x350   : > { %v17528_v12 = vadd.f32 %v9838_v35, %v17045_v4  ;;  %v9840_v13 = vpop.f32.mrb[2].mxu0  ;;  %10510 = vmatpush1.bf16.msra.mxu0 %v15579_v0  ;;  %10240 = vmatprep.subr.bf16.mxu1 %v15584_v7  ;;  %v15588_v4 = vld [vmem:[%s16480_s15 + $0x22d0] ss:$28 sps:$4 sm:$0xff]   ;;  %v15626_v0 = vld [vmem:[%s16480_s15 + $0x2424] ss:$28 sps:$4 sm:$0xff]  }
 0x351   : > { %v9841_v18 = vpop.f32.mrb[3].mxu0  ;;  %10511 = vmatprep.subr.bf16.mxu0 %v15587_v8  ;;  %v15621_v59 = vld [vmem:[%s16480_s15 + $0xd30] ss:$28 sps:$4 sm:$0xff]   ;;  %v15624_v8 = vld [vmem:[%s16480_s15 + $0x2420] ss:$28 sps:$4 sm:$0xff]  }
 0x352   : > { %v11436_v20 = vcombine.low %v17525_v10, %v17528_v12  ;;  %v15629_v7 = vld [vmem:[%s16480_s15 + $0xd6c] ss:$28 sps:$4 sm:$0xff]   ;;  %v15632_v35 = vld [vmem:[%s16480_s15 + $0x245c] ss:$28 sps:$4 sm:$0xff]   ;;  %v15635_v13 = vld [vmem:[%s16480_s15 + $0xda4] ss:$28 sps:$4 sm:$0xff]  }
 0x353   : > { %10241 = vmatpush1.bf16.msra.mxu1 %v15582_v14  ;;  %v15630_v14 = vld [vmem:[%s16480_s15 + $0x2458] ss:$28 sps:$4 sm:$0xff]   ;;  %v16114_v12 = vld [vmem:[%s16480_s15 + $0x2150] ss:$28 sps:$4 sm:$0xff]  }
 0x354   : > { %10512 = vmatpush1.bf16.msra.mxu0 %v15585_v16  ;;  %10242 = vmatprep.subr.bf16.mxu1 %v15590_v3  ;;  %v15633_v16 = vld [vmem:[%s16480_s15 + $0xda0] ss:$28 sps:$4 sm:$0xff]   ;;  %v15638_v18 = vld [vmem:[%s16480_s15 + $0x2494] ss:$28 sps:$4 sm:$0xff]  }
 0x355   : > { %10513 = vmatprep.subr.bf16.mxu0 %v15593_v40  ;;  %v15641_v3 = vld [vmem:[%s16480_s15 + $0xddc] ss:$28 sps:$4 sm:$0xff]   ;;  %v15636_v40 = vld [vmem:[%s16480_s15 + $0x2490] ss:$28 sps:$4 sm:$0xff]  }
 0x357   : > { %10243 = vmatpush1.bf16.msra.mxu1 %v15588_v4  ;;  %v15639_v4 = vld [vmem:[%s16480_s15 + $0xdd8] ss:$28 sps:$4 sm:$0xff]  }
 0x358   : > { %10514 = vmatpush1.bf16.msra.mxu0 %v15591_v23  ;;  %10253 = vmatprep.subr.bf16.mxu1 %v15596_v54  ;;  %v15644_v23 = vld [vmem:[%s16480_s15 + $0x24cc] ss:$28 sps:$4 sm:$0xff]   ;;  %v15647_v54 = vld [vmem:[%s16480_s15 + $0xe14] ss:$28 sps:$4 sm:$0xff]  }
 0x359   : > { %10515 = vmatprep.subr.bf16.mxu0 %v15599_v24  ;;  %v15642_v24 = vld [vmem:[%s16480_s15 + $0x24c8] ss:$28 sps:$4 sm:$0xff]  }
 0x35a   : > { %10245 = vmatmul.mubr.bf16.vlgmr.msra.gmra.mrb[4].mxu1 %v17098_v11 }
 0x35b   : > { %10254 = vmatpush1.bf16.msra.mxu1 %v15594_v26  ;;  %10285 = vmatprep.mubr.bf16.mxu1 %v17104_v17  ;;  %v15645_v26 = vld [vmem:[%s16480_s15 + $0xe10] ss:$28 sps:$4 sm:$0xff]  }
 0x35c   : > { %10516 = vmatpush1.bf16.msra.mxu0 %v15597_v29  ;;  %10255 = vmatprep.subr.bf16.mxu1 %v15602_v30  ;;  %v15650_v29 = vld [vmem:[%s16480_s15 + $0x2504] ss:$28 sps:$4 sm:$0xff]   ;;  %v15653_v30 = vld [vmem:[%s16480_s15 + $0xe4c] ss:$28 sps:$4 sm:$0xff]  }
 0x35d   : > { %10517 = vmatprep.subr.bf16.mxu0 %v15605_v31  ;;  %v15648_v31 = vld [vmem:[%s16480_s15 + $0x2500] ss:$28 sps:$4 sm:$0xff]  }
 0x35f   : > { %10256 = vmatpush1.bf16.msra.mxu1 %v15600_v47  ;;  %v15651_v47 = vld [vmem:[%s16480_s15 + $0xe48] ss:$28 sps:$4 sm:$0xff]  }
 0x360   : > { %10518 = vmatpush1.bf16.msra.mxu0 %v15603_v58  ;;  %10257 = vmatprep.subr.bf16.mxu1 %v15608_v36  ;;  %v15656_v58 = vld [vmem:[%s16480_s15 + $0x253c] ss:$28 sps:$4 sm:$0xff]   ;;  %v15659_v36 = vld [vmem:[%s16480_s15 + $0xe84] ss:$28 sps:$4 sm:$0xff]  }
 0x361   : > { %10519 = vmatprep.subr.bf16.mxu0 %v15611_v37  ;;  %v15654_v37 = vld [vmem:[%s16480_s15 + $0x2538] ss:$28 sps:$4 sm:$0xff]  }
 0x363   : > { %10258 = vmatpush1.bf16.msra.mxu1 %v15606_v38  ;;  %v15657_v38 = vld [vmem:[%s16480_s15 + $0xe80] ss:$28 sps:$4 sm:$0xff]  }
 0x364   : > { %10520 = vmatpush1.bf16.msra.mxu0 %v15609_v57  ;;  %10259 = vmatprep.subr.bf16.mxu1 %v15614_v45  ;;  %v15662_v57 = vld [vmem:[%s16480_s15 + $0x2574] ss:$28 sps:$4 sm:$0xff]   ;;  %v15665_v45 = vld [vmem:[%s16480_s15 + $0xebc] ss:$28 sps:$4 sm:$0xff]  }
 0x365   : > { %10521 = vmatprep.subr.bf16.mxu0 %v15617_v46  ;;  %v15660_v46 = vld [vmem:[%s16480_s15 + $0x2570] ss:$28 sps:$4 sm:$0xff]  }
 0x367   : > { %10260 = vmatpush1.bf16.msra.mxu1 %v15612_v55  ;;  %v15663_v55 = vld [vmem:[%s16480_s15 + $0xeb8] ss:$28 sps:$4 sm:$0xff]  }
 0x368   : > { %10522 = vmatpush1.bf16.msra.mxu0 %v15615_v51  ;;  %10261 = vmatprep.subr.bf16.mxu1 %v15620_v15  ;;  %v15668_v51 = vld [vmem:[%s16480_s15 + $0x25ac] ss:$28 sps:$4 sm:$0xff]   ;;  %v15671_v15 = vld [vmem:[%s16480_s15 + $0xef4] ss:$28 sps:$4 sm:$0xff]  }
 0x369   : > { %10523 = vmatprep.subr.bf16.mxu0 %v15623_v52  ;;  %v15666_v52 = vld [vmem:[%s16480_s15 + $0x25a8] ss:$28 sps:$4 sm:$0xff]  }
 0x36b   : > { %10262 = vmatpush1.bf16.msra.mxu1 %v15618_v53  ;;  %v15669_v53 = vld [vmem:[%s16480_s15 + $0xef0] ss:$28 sps:$4 sm:$0xff]  }
 0x36c   : > { %10524 = vmatpush1.bf16.msra.mxu0 %v15621_v59  ;;  %10263 = vmatprep.subr.bf16.mxu1 %v15626_v0  ;;  %v15674_v59 = vld [vmem:[%s16480_s15 + $0x25e4] ss:$28 sps:$4 sm:$0xff]   ;;  %v15677_v0 = vld [vmem:[%s16480_s15 + $0xf2c] ss:$28 sps:$4 sm:$0xff]  }
 0x36d   : > { %10525 = vmatprep.subr.bf16.mxu0 %v15629_v7  ;;  %v15672_v7 = vld [vmem:[%s16480_s15 + $0x25e0] ss:$28 sps:$4 sm:$0xff]  }
 0x36f   : > { %10264 = vmatpush1.bf16.msra.mxu1 %v15624_v8  ;;  %v15675_v8 = vld [vmem:[%s16480_s15 + $0xf28] ss:$28 sps:$4 sm:$0xff]  }
 0x370   : > { %10526 = vmatpush1.bf16.msra.mxu0 %v15627_v19  ;;  %10265 = vmatprep.subr.bf16.mxu1 %v15632_v35  ;;  %v15680_v19 = vld [vmem:[%s16480_s15 + $0x261c] ss:$28 sps:$4 sm:$0xff]   ;;  %v15683_v35 = vld [vmem:[%s16480_s15 + $0xf64] ss:$28 sps:$4 sm:$0xff]  }
 0x371   : > { %10527 = vmatprep.subr.bf16.mxu0 %v15635_v13  ;;  %v15678_v13 = vld [vmem:[%s16480_s15 + $0x2618] ss:$28 sps:$4 sm:$0xff]  }
 0x373   : > { %10266 = vmatpush1.bf16.msra.mxu1 %v15630_v14  ;;  %v15681_v14 = vld [vmem:[%s16480_s15 + $0xf60] ss:$28 sps:$4 sm:$0xff]  }
 0x374   : > { %10528 = vmatpush1.bf16.msra.mxu0 %v15633_v16  ;;  %10267 = vmatprep.subr.bf16.mxu1 %v15638_v18  ;;  %v15686_v16 = vld [vmem:[%s16480_s15 + $0x2654] ss:$28 sps:$4 sm:$0xff]   ;;  %v15689_v18 = vld [vmem:[%s16480_s15 + $0xf9c] ss:$28 sps:$4 sm:$0xff]  }
 0x375   : > { %10529 = vmatprep.subr.bf16.mxu0 %v15641_v3  ;;  %v15684_v3 = vld [vmem:[%s16480_s15 + $0x2650] ss:$28 sps:$4 sm:$0xff]  }
 0x377   : > { %10268 = vmatpush1.bf16.msra.mxu1 %v15636_v40  ;;  %v15687_v40 = vld [vmem:[%s16480_s15 + $0xf98] ss:$28 sps:$4 sm:$0xff]  }
 0x378   : > { %10530 = vmatpush1.bf16.msra.mxu0 %v15639_v4  ;;  %10269 = vmatprep.subr.bf16.mxu1 %v15644_v23  ;;  %v15692_v4 = vld [vmem:[%s16480_s15 + $0x268c] ss:$28 sps:$4 sm:$0xff]   ;;  %v15695_v23 = vld [vmem:[%s16480_s15 + $0xfd4] ss:$28 sps:$4 sm:$0xff]  }
 0x379   : > { %10540 = vmatprep.subr.bf16.mxu0 %v15647_v54  ;;  %v15690_v54 = vld [vmem:[%s16480_s15 + $0x2688] ss:$28 sps:$4 sm:$0xff]  }
 0x37b   : > { %10532 = vmatmul.mubr.bf16.vlgmr.msra.gmra.mrb[4].mxu0 %v16575_v22  ;;  %10270 = vmatpush1.bf16.msra.mxu1 %v15642_v24  ;;  %v15693_v24 = vld [vmem:[%s16480_s15 + $0xfd0] ss:$28 sps:$4 sm:$0xff]  }
 0x37c   : > { %10541 = vmatpush1.bf16.msra.mxu0 %v15645_v26  ;;  %10271 = vmatprep.subr.bf16.mxu1 %v15650_v29  ;;  %v15698_v26 = vld [vmem:[%s16480_s15 + $0x26c4] ss:$28 sps:$4 sm:$0xff]   ;;  %v15701_v29 = vld [vmem:[%s16480_s15 + $0x100c] ss:$28 sps:$4 sm:$0xff]  }
 0x37d   : > { %10542 = vmatprep.subr.bf16.mxu0 %v15653_v30  ;;  %10572 = vmatprep.mubr.bf16.mxu0 %v16622_v61  ;;  %v15696_v30 = vld [vmem:[%s16480_s15 + $0x26c0] ss:$28 sps:$4 sm:$0xff]  }
 0x37f   : > { %10272 = vmatpush1.bf16.msra.mxu1 %v15648_v31  ;;  %v15699_v31 = vld [vmem:[%s16480_s15 + $0x1008] ss:$28 sps:$4 sm:$0xff]  }
 0x380   : > { %10543 = vmatpush1.bf16.msra.mxu0 %v15651_v47  ;;  %10273 = vmatprep.subr.bf16.mxu1 %v15656_v58  ;;  %v15704_v47 = vld [vmem:[%s16480_s15 + $0x26fc] ss:$28 sps:$4 sm:$0xff]   ;;  %v15707_v58 = vld [vmem:[%s16480_s15 + $0x1044] ss:$28 sps:$4 sm:$0xff]  }
 0x381   : > { %10544 = vmatprep.subr.bf16.mxu0 %v15659_v36  ;;  %v15702_v36 = vld [vmem:[%s16480_s15 + $0x26f8] ss:$28 sps:$4 sm:$0xff]  }
 0x383   : > { %10274 = vmatpush1.bf16.msra.mxu1 %v15654_v37  ;;  %v15705_v37 = vld [vmem:[%s16480_s15 + $0x1040] ss:$28 sps:$4 sm:$0xff]  }
 0x384   : > { %10545 = vmatpush1.bf16.msra.mxu0 %v15657_v38  ;;  %10275 = vmatprep.subr.bf16.mxu1 %v15662_v57  ;;  %v15710_v38 = vld [vmem:[%s16480_s15 + $0x2734] ss:$28 sps:$4 sm:$0xff]   ;;  %v15713_v57 = vld [vmem:[%s16480_s15 + $0x107c] ss:$28 sps:$4 sm:$0xff]  }
 0x385   : > { %10546 = vmatprep.subr.bf16.mxu0 %v15665_v45  ;;  %v15708_v45 = vld [vmem:[%s16480_s15 + $0x2730] ss:$28 sps:$4 sm:$0xff]  }
 0x387   : > { %10276 = vmatpush1.bf16.msra.mxu1 %v15660_v46  ;;  %v15711_v46 = vld [vmem:[%s16480_s15 + $0x1078] ss:$28 sps:$4 sm:$0xff]  }
 0x388   : > { %10547 = vmatpush1.bf16.msra.mxu0 %v15663_v55  ;;  %10277 = vmatprep.subr.bf16.mxu1 %v15668_v51  ;;  %v15716_v55 = vld [vmem:[%s16480_s15 + $0x276c] ss:$28 sps:$4 sm:$0xff]   ;;  %v15719_v51 = vld [vmem:[%s16480_s15 + $0x10b4] ss:$28 sps:$4 sm:$0xff]  }
 0x389   : > { %10548 = vmatprep.subr.bf16.mxu0 %v15671_v15  ;;  %v15714_v15 = vld [vmem:[%s16480_s15 + $0x2768] ss:$28 sps:$4 sm:$0xff]  }
 0x38b   : > { %10278 = vmatpush1.bf16.msra.mxu1 %v15666_v52  ;;  %v15717_v52 = vld [vmem:[%s16480_s15 + $0x10b0] ss:$28 sps:$4 sm:$0xff]  }
 0x38c   : > { %10549 = vmatpush1.bf16.msra.mxu0 %v15669_v53  ;;  %10279 = vmatprep.subr.bf16.mxu1 %v15674_v59  ;;  %v15722_v53 = vld [vmem:[%s16480_s15 + $0x27a4] ss:$28 sps:$4 sm:$0xff]   ;;  %v15725_v59 = vld [vmem:[%s16480_s15 + $0x10ec] ss:$28 sps:$4 sm:$0xff]  }
 0x38d   : > { %10550 = vmatprep.subr.bf16.mxu0 %v15677_v0  ;;  %v15720_v0 = vld [vmem:[%s16480_s15 + $0x27a0] ss:$28 sps:$4 sm:$0xff]  }
 0x38f   : > { %10280 = vmatpush1.bf16.msra.mxu1 %v15672_v7  ;;  %v15723_v7 = vld [vmem:[%s16480_s15 + $0x10e8] ss:$28 sps:$4 sm:$0xff]  }
 0x390   : > { %10551 = vmatpush1.bf16.msra.mxu0 %v15675_v8  ;;  %10281 = vmatprep.subr.bf16.mxu1 %v15680_v19  ;;  %v15728_v8 = vld [vmem:[%s16480_s15 + $0x27dc] ss:$28 sps:$4 sm:$0xff]   ;;  %v15731_v19 = vld [vmem:[%s16480_s15 + $0x1124] ss:$28 sps:$4 sm:$0xff]  }
 0x391   : > { %10552 = vmatprep.subr.bf16.mxu0 %v15683_v35  ;;  %v15726_v35 = vld [vmem:[%s16480_s15 + $0x27d8] ss:$28 sps:$4 sm:$0xff]  }
 0x393   : > { %10282 = vmatpush1.bf16.msra.mxu1 %v15678_v13  ;;  %v15729_v13 = vld [vmem:[%s16480_s15 + $0x1120] ss:$28 sps:$4 sm:$0xff]  }
 0x394   : > { %10553 = vmatpush1.bf16.msra.mxu0 %v15681_v14  ;;  %10283 = vmatprep.subr.bf16.mxu1 %v15686_v16  ;;  %v15734_v14 = vld [vmem:[%s16480_s15 + $0x2814] ss:$28 sps:$4 sm:$0xff]   ;;  %v15737_v16 = vld [vmem:[%s16480_s15 + $0x115c] ss:$28 sps:$4 sm:$0xff]  }
 0x395   : > { %10554 = vmatprep.subr.bf16.mxu0 %v15689_v18  ;;  %v15732_v18 = vld [vmem:[%s16480_s15 + $0x2810] ss:$28 sps:$4 sm:$0xff]  }
 0x397   : > { %10284 = vmatpush1.bf16.msra.mxu1 %v15684_v3  ;;  %v15735_v3 = vld [vmem:[%s16480_s15 + $0x1158] ss:$28 sps:$4 sm:$0xff]  }
 0x398   : > { %10555 = vmatpush1.bf16.msra.mxu0 %v15687_v40  ;;  %10294 = vmatprep.subr.bf16.mxu1 %v15692_v4  ;;  %v15740_v40 = vld [vmem:[%s16480_s15 + $0x284c] ss:$28 sps:$4 sm:$0xff]   ;;  %v15743_v4 = vld [vmem:[%s16480_s15 + $0x1194] ss:$28 sps:$4 sm:$0xff]  }
 0x399   : > { %10556 = vmatprep.subr.bf16.mxu0 %v15695_v23  ;;  %v15738_v23 = vld [vmem:[%s16480_s15 + $0x2848] ss:$28 sps:$4 sm:$0xff]  }
 0x39a   : > { %10286 = vmatmul.mubr.bf16.vlgmr.msra.gmra.mrb[4].mxu1 %v17179_v60 }
 0x39b   : > { %10295 = vmatpush1.bf16.msra.mxu1 %v15690_v54  ;;  %10326 = vmatprep.mubr.bf16.mxu1 %v17185_v34  ;;  %v15741_v54 = vld [vmem:[%s16480_s15 + $0x1190] ss:$28 sps:$4 sm:$0xff]  }
 0x39c   : > { %10557 = vmatpush1.bf16.msra.mxu0 %v15693_v24  ;;  %10296 = vmatprep.subr.bf16.mxu1 %v15698_v26  ;;  %v15746_v24 = vld [vmem:[%s16480_s15 + $0x2884] ss:$28 sps:$4 sm:$0xff]   ;;  %v15749_v26 = vld [vmem:[%s16480_s15 + $0x11cc] ss:$28 sps:$4 sm:$0xff]  }
 0x39d   : > { %10558 = vmatprep.subr.bf16.mxu0 %v15701_v29  ;;  %v15744_v29 = vld [vmem:[%s16480_s15 + $0x2880] ss:$28 sps:$4 sm:$0xff]  }
 0x39f   : > { %10297 = vmatpush1.bf16.msra.mxu1 %v15696_v30  ;;  %v15747_v30 = vld [vmem:[%s16480_s15 + $0x11c8] ss:$28 sps:$4 sm:$0xff]  }
 0x3a0   : > { %10559 = vmatpush1.bf16.msra.mxu0 %v15699_v31  ;;  %10298 = vmatprep.subr.bf16.mxu1 %v15704_v47  ;;  %v15752_v31 = vld [vmem:[%s16480_s15 + $0x28bc] ss:$28 sps:$4 sm:$0xff]   ;;  %v15755_v47 = vld [vmem:[%s16480_s15 + $0x1204] ss:$28 sps:$4 sm:$0xff]  }
 0x3a1   : > { %10560 = vmatprep.subr.bf16.mxu0 %v15707_v58  ;;  %v15750_v58 = vld [vmem:[%s16480_s15 + $0x28b8] ss:$28 sps:$4 sm:$0xff]  }
 0x3a3   : > { %10299 = vmatpush1.bf16.msra.mxu1 %v15702_v36  ;;  %v15753_v36 = vld [vmem:[%s16480_s15 + $0x1200] ss:$28 sps:$4 sm:$0xff]  }
 0x3a4   : > { %10561 = vmatpush1.bf16.msra.mxu0 %v15705_v37  ;;  %10300 = vmatprep.subr.bf16.mxu1 %v15710_v38  ;;  %v15758_v37 = vld [vmem:[%s16480_s15 + $0x28f4] ss:$28 sps:$4 sm:$0xff]   ;;  %v15761_v38 = vld [vmem:[%s16480_s15 + $0x123c] ss:$28 sps:$4 sm:$0xff]  }
 0x3a5   : > { %10562 = vmatprep.subr.bf16.mxu0 %v15713_v57  ;;  %v15756_v57 = vld [vmem:[%s16480_s15 + $0x28f0] ss:$28 sps:$4 sm:$0xff]  }
 0x3a7   : > { %10301 = vmatpush1.bf16.msra.mxu1 %v15708_v45  ;;  %v15759_v45 = vld [vmem:[%s16480_s15 + $0x1238] ss:$28 sps:$4 sm:$0xff]  }
 0x3a8   : > { %10563 = vmatpush1.bf16.msra.mxu0 %v15711_v46  ;;  %10302 = vmatprep.subr.bf16.mxu1 %v15716_v55  ;;  %v15764_v46 = vld [vmem:[%s16480_s15 + $0x292c] ss:$28 sps:$4 sm:$0xff]   ;;  %v15767_v55 = vld [vmem:[%s16480_s15 + $0x1274] ss:$28 sps:$4 sm:$0xff]  }
 0x3a9   : > { %10564 = vmatprep.subr.bf16.mxu0 %v15719_v51  ;;  %v15762_v51 = vld [vmem:[%s16480_s15 + $0x2928] ss:$28 sps:$4 sm:$0xff]  }
 0x3ab   : > { %10303 = vmatpush1.bf16.msra.mxu1 %v15714_v15  ;;  %v15765_v15 = vld [vmem:[%s16480_s15 + $0x1270] ss:$28 sps:$4 sm:$0xff]  }
 0x3ac   : > { %10565 = vmatpush1.bf16.msra.mxu0 %v15717_v52  ;;  %10304 = vmatprep.subr.bf16.mxu1 %v15722_v53  ;;  %v15770_v52 = vld [vmem:[%s16480_s15 + $0x2964] ss:$28 sps:$4 sm:$0xff]   ;;  %v15773_v53 = vld [vmem:[%s16480_s15 + $0x12ac] ss:$28 sps:$4 sm:$0xff]  }
 0x3ad   : > { %10566 = vmatprep.subr.bf16.mxu0 %v15725_v59  ;;  %v15768_v59 = vld [vmem:[%s16480_s15 + $0x2960] ss:$28 sps:$4 sm:$0xff]  }
 0x3af   : > { %10305 = vmatpush1.bf16.msra.mxu1 %v15720_v0  ;;  %v15771_v0 = vld [vmem:[%s16480_s15 + $0x12a8] ss:$28 sps:$4 sm:$0xff]  }
 0x3b0   : > { %10567 = vmatpush1.bf16.msra.mxu0 %v15723_v7  ;;  %10306 = vmatprep.subr.bf16.mxu1 %v15728_v8  ;;  %v15776_v7 = vld [vmem:[%s16480_s15 + $0x299c] ss:$28 sps:$4 sm:$0xff]   ;;  %v15779_v8 = vld [vmem:[%s16480_s15 + $0x12e4] ss:$28 sps:$4 sm:$0xff]  }
 0x3b1   : > { %10568 = vmatprep.subr.bf16.mxu0 %v15731_v19  ;;  %v15774_v19 = vld [vmem:[%s16480_s15 + $0x2998] ss:$28 sps:$4 sm:$0xff]  }
 0x3b3   : > { %10307 = vmatpush1.bf16.msra.mxu1 %v15726_v35  ;;  %v15777_v35 = vld [vmem:[%s16480_s15 + $0x12e0] ss:$28 sps:$4 sm:$0xff]  }
 0x3b4   : > { %10569 = vmatpush1.bf16.msra.mxu0 %v15729_v13  ;;  %10308 = vmatprep.subr.bf16.mxu1 %v15734_v14  ;;  %v15782_v13 = vld [vmem:[%s16480_s15 + $0x29d4] ss:$28 sps:$4 sm:$0xff]   ;;  %v15785_v14 = vld [vmem:[%s16480_s15 + $0x131c] ss:$28 sps:$4 sm:$0xff]  }
 0x3b5   : > { %10570 = vmatprep.subr.bf16.mxu0 %v15737_v16  ;;  %v15780_v16 = vld [vmem:[%s16480_s15 + $0x29d0] ss:$28 sps:$4 sm:$0xff]  }
 0x3b7   : > { %10309 = vmatpush1.bf16.msra.mxu1 %v15732_v18  ;;  %v15783_v18 = vld [vmem:[%s16480_s15 + $0x1318] ss:$28 sps:$4 sm:$0xff]  }
 0x3b8   : > { %10571 = vmatpush1.bf16.msra.mxu0 %v15735_v3  ;;  %10310 = vmatprep.subr.bf16.mxu1 %v15740_v40  ;;  %v15788_v3 = vld [vmem:[%s16480_s15 + $0x2a0c] ss:$28 sps:$4 sm:$0xff]   ;;  %v15791_v40 = vld [vmem:[%s16480_s15 + $0x1354] ss:$28 sps:$4 sm:$0xff]  }
 0x3b9   : > { %10581 = vmatprep.subr.bf16.mxu0 %v15743_v4  ;;  %v15786_v4 = vld [vmem:[%s16480_s15 + $0x2a08] ss:$28 sps:$4 sm:$0xff]  }
 0x3bb   : > { %10573 = vmatmul.mubr.bf16.vlgmr.msra.gmra.mrb[4].mxu0 %v16678_v43  ;;  %10311 = vmatpush1.bf16.msra.mxu1 %v15738_v23  ;;  %v15789_v23 = vld [vmem:[%s16480_s15 + $0x1350] ss:$28 sps:$4 sm:$0xff]  }
 0x3bc   : > { %10582 = vmatpush1.bf16.msra.mxu0 %v15741_v54  ;;  %10312 = vmatprep.subr.bf16.mxu1 %v15746_v24  ;;  %v15794_v54 = vld [vmem:[%s16480_s15 + $0x2a44] ss:$28 sps:$4 sm:$0xff]   ;;  %v15797_v24 = vld [vmem:[%s16480_s15 + $0x138c] ss:$28 sps:$4 sm:$0xff]  }
 0x3bd   : > { %10583 = vmatprep.subr.bf16.mxu0 %v15749_v26  ;;  %10613 = vmatprep.mubr.bf16.mxu0 %v16685_v49  ;;  %v15792_v26 = vld [vmem:[%s16480_s15 + $0x2a40] ss:$28 sps:$4 sm:$0xff]  }
 0x3bf   : > { %10313 = vmatpush1.bf16.msra.mxu1 %v15744_v29  ;;  %v15795_v29 = vld [vmem:[%s16480_s15 + $0x1388] ss:$28 sps:$4 sm:$0xff]  }
 0x3c0   : > { %10584 = vmatpush1.bf16.msra.mxu0 %v15747_v30  ;;  %10314 = vmatprep.subr.bf16.mxu1 %v15752_v31  ;;  %v15800_v30 = vld [vmem:[%s16480_s15 + $0x2a7c] ss:$28 sps:$4 sm:$0xff]   ;;  %v15803_v31 = vld [vmem:[%s16480_s15 + $0x13c4] ss:$28 sps:$4 sm:$0xff]  }
 0x3c1   : > { %10585 = vmatprep.subr.bf16.mxu0 %v15755_v47  ;;  %v15798_v47 = vld [vmem:[%s16480_s15 + $0x2a78] ss:$28 sps:$4 sm:$0xff]  }
 0x3c3   : > { %10315 = vmatpush1.bf16.msra.mxu1 %v15750_v58  ;;  %v15801_v58 = vld [vmem:[%s16480_s15 + $0x13c0] ss:$28 sps:$4 sm:$0xff]  }
 0x3c4   : > { %10586 = vmatpush1.bf16.msra.mxu0 %v15753_v36  ;;  %10316 = vmatprep.subr.bf16.mxu1 %v15758_v37  ;;  %v15806_v36 = vld [vmem:[%s16480_s15 + $0x2ab4] ss:$28 sps:$4 sm:$0xff]   ;;  %v15809_v37 = vld [vmem:[%s16480_s15 + $0x13fc] ss:$28 sps:$4 sm:$0xff]  }
 0x3c5   : > { %10587 = vmatprep.subr.bf16.mxu0 %v15761_v38  ;;  %v15804_v38 = vld [vmem:[%s16480_s15 + $0x2ab0] ss:$28 sps:$4 sm:$0xff]  }
 0x3c7   : > { %10317 = vmatpush1.bf16.msra.mxu1 %v15756_v57  ;;  %v15807_v57 = vld [vmem:[%s16480_s15 + $0x13f8] ss:$28 sps:$4 sm:$0xff]  }
 0x3c8   : > { %10588 = vmatpush1.bf16.msra.mxu0 %v15759_v45  ;;  %10318 = vmatprep.subr.bf16.mxu1 %v15764_v46  ;;  %v15812_v45 = vld [vmem:[%s16480_s15 + $0x2aec] ss:$28 sps:$4 sm:$0xff]   ;;  %v15815_v46 = vld [vmem:[%s16480_s15 + $0x1434] ss:$28 sps:$4 sm:$0xff]  }
 0x3c9   : > { %10589 = vmatprep.subr.bf16.mxu0 %v15767_v55  ;;  %v15810_v55 = vld [vmem:[%s16480_s15 + $0x2ae8] ss:$28 sps:$4 sm:$0xff]  }
 0x3cb   : > { %10319 = vmatpush1.bf16.msra.mxu1 %v15762_v51  ;;  %v15813_v51 = vld [vmem:[%s16480_s15 + $0x1430] ss:$28 sps:$4 sm:$0xff]  }
 0x3cc   : > { %10590 = vmatpush1.bf16.msra.mxu0 %v15765_v15  ;;  %10320 = vmatprep.subr.bf16.mxu1 %v15770_v52  ;;  %v15818_v15 = vld [vmem:[%s16480_s15 + $0x2b24] ss:$28 sps:$4 sm:$0xff]   ;;  %v15821_v52 = vld [vmem:[%s16480_s15 + $0x146c] ss:$28 sps:$4 sm:$0xff]  }
 0x3cd   : > { %10591 = vmatprep.subr.bf16.mxu0 %v15773_v53  ;;  %v15816_v53 = vld [vmem:[%s16480_s15 + $0x2b20] ss:$28 sps:$4 sm:$0xff]  }
 0x3cf   : > { %10321 = vmatpush1.bf16.msra.mxu1 %v15768_v59  ;;  %v15819_v59 = vld [vmem:[%s16480_s15 + $0x1468] ss:$28 sps:$4 sm:$0xff]  }
 0x3d0   : > { %10592 = vmatpush1.bf16.msra.mxu0 %v15771_v0  ;;  %10322 = vmatprep.subr.bf16.mxu1 %v15776_v7  ;;  %v15824_v0 = vld [vmem:[%s16480_s15 + $0x2b5c] ss:$28 sps:$4 sm:$0xff]   ;;  %v15827_v7 = vld [vmem:[%s16480_s15 + $0x14a4] ss:$28 sps:$4 sm:$0xff]  }
 0x3d1   : > { %10593 = vmatprep.subr.bf16.mxu0 %v15779_v8  ;;  %v15822_v8 = vld [vmem:[%s16480_s15 + $0x2b58] ss:$28 sps:$4 sm:$0xff]  }
 0x3d3   : > { %10323 = vmatpush1.bf16.msra.mxu1 %v15774_v19  ;;  %v15825_v19 = vld [vmem:[%s16480_s15 + $0x14a0] ss:$28 sps:$4 sm:$0xff]  }
 0x3d4   : > { %10594 = vmatpush1.bf16.msra.mxu0 %v15777_v35  ;;  %10324 = vmatprep.subr.bf16.mxu1 %v15782_v13  ;;  %v15830_v35 = vld [vmem:[%s16480_s15 + $0x2b94] ss:$28 sps:$4 sm:$0xff]   ;;  %v15833_v13 = vld [vmem:[%s16480_s15 + $0x14dc] ss:$28 sps:$4 sm:$0xff]  }
 0x3d5   : > { %10595 = vmatprep.subr.bf16.mxu0 %v15785_v14  ;;  %v15828_v14 = vld [vmem:[%s16480_s15 + $0x2b90] ss:$28 sps:$4 sm:$0xff]  }
 0x3d7   : > { %10325 = vmatpush1.bf16.msra.mxu1 %v15780_v16  ;;  %v15831_v16 = vld [vmem:[%s16480_s15 + $0x14d8] ss:$28 sps:$4 sm:$0xff]  }
 0x3d8   : > { %10596 = vmatpush1.bf16.msra.mxu0 %v15783_v18  ;;  %10335 = vmatprep.subr.bf16.mxu1 %v15788_v3  ;;  %v15836_v18 = vld [vmem:[%s16480_s15 + $0x1514] ss:$28 sps:$4 sm:$0xff]  }
 0x3d9   : > { %10597 = vmatprep.subr.bf16.mxu0 %v15791_v40  ;;  %v15837_v3 = vld [vmem:[%s16480_s15 + $0x1d8] ss:$28 sps:$4 sm:$0xff]   ;;  %v15834_v40 = vld [vmem:[%s16480_s15 + $0x1510] ss:$28 sps:$4 sm:$0xff]  }
 0x3da   : > { %10327 = vmatmul.mubr.bf16.vlgmr.msra.gmra.mrb[4].mxu1 %v17253_v41 }
 0x3db   : > { %10336 = vmatpush1.bf16.msra.mxu1 %v15786_v4  ;;  %10367 = vmatprep.mubr.bf16.mxu1 %v16402_v63  ;;  %v15838_v4 = vld [vmem:[%s16480_s15 + $0x18] ss:$28 sps:$4 sm:$0xff]  }
 0x3dc   : > { %10598 = vmatpush1.bf16.msra.mxu0 %v15789_v23  ;;  %10337 = vmatprep.subr.bf16.mxu1 %v15794_v54  ;;  %v15841_v23 = vld [vmem:[%s16480_s15 + $0x154c] ss:$28 sps:$4 sm:$0xff]  }
 0x3dd   : > { %10599 = vmatprep.subr.bf16.mxu0 %v15797_v24  ;;  %v15842_v54 = vld [vmem:[%s16480_s15 + $0x210] ss:$28 sps:$4 sm:$0xff]   ;;  %v15839_v24 = vld [vmem:[%s16480_s15 + $0x1548] ss:$28 sps:$4 sm:$0xff]  }
 0x3df   : > { %10338 = vmatpush1.bf16.msra.mxu1 %v15792_v26  ;;  %v15843_v26 = vld [vmem:[%s16480_s15 + $0x50] ss:$28 sps:$4 sm:$0xff]  }
 0x3e0   : > { %10600 = vmatpush1.bf16.msra.mxu0 %v15795_v29  ;;  %10339 = vmatprep.subr.bf16.mxu1 %v15800_v30  ;;  %v15846_v29 = vld [vmem:[%s16480_s15 + $0x1584] ss:$28 sps:$4 sm:$0xff]  }
 0x3e1   : > { %10601 = vmatprep.subr.bf16.mxu0 %v15803_v31  ;;  %v15847_v30 = vld [vmem:[%s16480_s15 + $0x248] ss:$28 sps:$4 sm:$0xff]   ;;  %v15844_v31 = vld [vmem:[%s16480_s15 + $0x1580] ss:$28 sps:$4 sm:$0xff]  }
 0x3e3   : > { %10340 = vmatpush1.bf16.msra.mxu1 %v15798_v47  ;;  %v15848_v47 = vld [vmem:[%s16480_s15 + $0x88] ss:$28 sps:$4 sm:$0xff]  }
 0x3e4   : > { %10602 = vmatpush1.bf16.msra.mxu0 %v15801_v58  ;;  %10341 = vmatprep.subr.bf16.mxu1 %v15806_v36  ;;  %v15851_v58 = vld [vmem:[%s16480_s15 + $0x15bc] ss:$28 sps:$4 sm:$0xff]  }
 0x3e5   : > { %10603 = vmatprep.subr.bf16.mxu0 %v15809_v37  ;;  %v15852_v36 = vld [vmem:[%s16480_s15 + $0x280] ss:$28 sps:$4 sm:$0xff]   ;;  %v15849_v37 = vld [vmem:[%s16480_s15 + $0x15b8] ss:$28 sps:$4 sm:$0xff]  }
 0x3e7   : > { %10342 = vmatpush1.bf16.msra.mxu1 %v15804_v38  ;;  %v15856_v38 = vld [vmem:[%s16480_s15 + $0x15f4] ss:$28 sps:$4 sm:$0xff]  }
 0x3e8   : > { %10604 = vmatpush1.bf16.msra.mxu0 %v15807_v57  ;;  %10343 = vmatprep.subr.bf16.mxu1 %v15812_v45  ;;  %v15857_v57 = vld [vmem:[%s16480_s15 + $0x2b8] ss:$28 sps:$4 sm:$0xff]   ;;  %v15854_v45 = vld [vmem:[%s16480_s15 + $0x15f0] ss:$28 sps:$4 sm:$0xff]  }
 0x3e9   : > { %10605 = vmatprep.subr.bf16.mxu0 %v15815_v46  ;;  %v15858_v46 = vld [vmem:[%s16480_s15 + $0xf8] ss:$28 sps:$4 sm:$0xff]  }
 0x3eb   : > { %10344 = vmatpush1.bf16.msra.mxu1 %v15810_v55  ;;  %v15861_v55 = vld [vmem:[%s16480_s15 + $0x162c] ss:$28 sps:$4 sm:$0xff]  }
 0x3ec   : > { %10606 = vmatpush1.bf16.msra.mxu0 %v15813_v51  ;;  %10345 = vmatprep.subr.bf16.mxu1 %v15818_v15  ;;  %v15862_v51 = vld [vmem:[%s16480_s15 + $0x2f0] ss:$28 sps:$4 sm:$0xff]   ;;  %v15859_v15 = vld [vmem:[%s16480_s15 + $0x1628] ss:$28 sps:$4 sm:$0xff]  }
 0x3ed   : > { %10607 = vmatprep.subr.bf16.mxu0 %v15821_v52  ;;  %v15863_v52 = vld [vmem:[%s16480_s15 + $0x130] ss:$28 sps:$4 sm:$0xff]  }
 0x3ef   : > { %10346 = vmatpush1.bf16.msra.mxu1 %v15816_v53  ;;  %v15866_v53 = vld [vmem:[%s16480_s15 + $0x1664] ss:$28 sps:$4 sm:$0xff]  }
 0x3f0   : > { %10608 = vmatpush1.bf16.msra.mxu0 %v15819_v59  ;;  %10347 = vmatprep.subr.bf16.mxu1 %v15824_v0  ;;  %v15867_v59 = vld [vmem:[%s16480_s15 + $0x328] ss:$28 sps:$4 sm:$0xff]   ;;  %v15864_v0 = vld [vmem:[%s16480_s15 + $0x1660] ss:$28 sps:$4 sm:$0xff]  }
 0x3f1   : > { %10609 = vmatprep.subr.bf16.mxu0 %v15827_v7  ;;  %v15868_v7 = vld [vmem:[%s16480_s15 + $0x168] ss:$28 sps:$4 sm:$0xff]  }
 0x3f3   : > { %10348 = vmatpush1.bf16.msra.mxu1 %v15822_v8  ;;  %v15871_v8 = vld [vmem:[%s16480_s15 + $0x169c] ss:$28 sps:$4 sm:$0xff]  }
 0x3f4   : > { %10610 = vmatpush1.bf16.msra.mxu0 %v15825_v19  ;;  %10349 = vmatprep.subr.bf16.mxu1 %v15830_v35  ;;  %v15872_v19 = vld [vmem:[%s16480_s15 + $0x360] ss:$28 sps:$4 sm:$0xff]   ;;  %v15869_v35 = vld [vmem:[%s16480_s15 + $0x1698] ss:$28 sps:$4 sm:$0xff]  }
 0x3f5   : > { %10611 = vmatprep.subr.bf16.mxu0 %v15833_v13  ;;  %v15873_v13 = vld [vmem:[%s16480_s15 + $0x1a0] ss:$28 sps:$4 sm:$0xff]  }
 0x3f7   : > { %10350 = vmatpush1.bf16.msra.mxu1 %v15828_v14  ;;  %v15876_v14 = vld [vmem:[%s16480_s15 + $0x16d4] ss:$28 sps:$4 sm:$0xff]  }
 0x3f8   : > { %10612 = vmatpush1.bf16.msra.mxu0 %v15831_v16  ;;  %13581 = vmatprep.subr.bf16.mxu1 %v15837_v3  ;;  %v15877_v16 = vld [vmem:[%s16480_s15 + $0x558] ss:$28 sps:$4 sm:$0xff]  }
 0x3f9   : > { %10622 = vmatprep.subr.bf16.mxu0 %v15836_v18  ;;  %v15874_v18 = vld [vmem:[%s16480_s15 + $0x16d0] ss:$28 sps:$4 sm:$0xff]   ;;  %v15878_v3 = vld [vmem:[%s16480_s15 + $0x398] ss:$28 sps:$4 sm:$0xff]  }
 0x3fa   : > { %10368 = vmatmul.mubr.bf16.vlgmr.msra.gmra.mrb[4].mxu1 %v17292_v39 }
 0x3fb   : > { %10614 = vmatmul.mubr.bf16.vlgmr.msra.gmra.mrb[4].mxu0 %v16768_v6  ;;  %13582 = vmatpush3.bf16.msra.mxu1 %v15838_v4  ;;  %v15882_v4 = vld [vmem:[%s16480_s15 + $0x590] ss:$28 sps:$4 sm:$0xff]  }
 0x3fc   : > { %10623 = vmatpush1.bf16.msra.mxu0 %v15834_v40  ;;  %13583 = vmatprep.subr.bf16.mxu1 %v15842_v54  ;;  %v15881_v40 = vld [vmem:[%s16480_s15 + $0x170c] ss:$28 sps:$4 sm:$0xff]  }
 0x3fd   : > { %10624 = vmatprep.subr.bf16.mxu0 %v15841_v23  ;;  %10941 = vmatprep.mubr.bf16.mxu1 %v16545_v62  ;;  %v15853_v62 = vld [vmem:[%s16480_s15 + $0xc0] ss:$28 sps:$4 sm:$0xff]   ;;  %v15879_v23 = vld [vmem:[%s16480_s15 + $0x1708] ss:$28 sps:$4 sm:$0xff]   ;;  %v15883_v54 = vld [vmem:[%s16480_s15 + $0x3d0] ss:$28 sps:$4 sm:$0xff]  }
 0x3fe   : > { %10654 = vmatprep.mubr.bf16.mxu0 %v16772_v9 }
 0x3ff   : > { %13584 = vmatpush3.bf16.msra.mxu1 %v15843_v26  ;;  %v15887_v26 = vld [vmem:[%s16480_s15 + $0x5c8] ss:$28 sps:$4 sm:$0xff]  }
 0x400   : > { %10625 = vmatpush1.bf16.msra.mxu0 %v15839_v24  ;;  %13585 = vmatprep.subr.bf16.mxu1 %v15847_v30  ;;  %v15886_v24 = vld [vmem:[%s16480_s15 + $0x1744] ss:$28 sps:$4 sm:$0xff]   ;;  %v15891_v30 = vld [vmem:[%s16480_s15 + $0x177c] ss:$28 sps:$4 sm:$0xff]  }
 0x401   : > { %10626 = vmatprep.subr.bf16.mxu0 %v15846_v29  ;;  %v15884_v29 = vld [vmem:[%s16480_s15 + $0x1740] ss:$28 sps:$4 sm:$0xff]  }
 0x403   : > { %13586 = vmatpush3.bf16.msra.mxu1 %v15848_v47  ;;  %v15889_v47 = vld [vmem:[%s16480_s15 + $0x1778] ss:$28 sps:$4 sm:$0xff]  }
 0x404   : > { %10627 = vmatpush1.bf16.msra.mxu0 %v15844_v31  ;;  %13587 = vmatprep.subr.bf16.mxu1 %v15852_v36  ;;  %v15892_v31 = vld [vmem:[%s16480_s15 + $0x600] ss:$28 sps:$4 sm:$0xff]   ;;  %v15897_v36 = vld [vmem:[%s16480_s15 + $0x638] ss:$28 sps:$4 sm:$0xff]  }
 0x405   : > { %10628 = vmatprep.subr.bf16.mxu0 %v15851_v58  ;;  %v15893_v58 = vld [vmem:[%s16480_s15 + $0x440] ss:$28 sps:$4 sm:$0xff]  }
 0x407   : > { %13588 = vmatpush3.bf16.msra.mxu1 %v15853_v62  ;;  %v15898_v62 = vld [vmem:[%s16480_s15 + $0x478] ss:$28 sps:$4 sm:$0xff]  }
 0x408   : > { %10629 = vmatpush1.bf16.msra.mxu0 %v15849_v37  ;;  %13589 = vmatprep.subr.bf16.mxu1 %v15857_v57  ;;  %v15894_v37 = vld [vmem:[%s16480_s15 + $0x17b0] ss:$28 sps:$4 sm:$0xff]  }
 0x409   : > { %10630 = vmatprep.subr.bf16.mxu0 %v15856_v38  ;;  %v15901_v38 = vld [vmem:[%s16480_s15 + $0x17ec] ss:$28 sps:$4 sm:$0xff]  }
 0x40a   : > { %v15902_v57 = vld [vmem:[%s16480_s15 + $0x670] ss:$28 sps:$4 sm:$0xff]  }
 0x40b   : > { %13590 = vmatpush3.bf16.msra.mxu1 %v15858_v46  ;;  %v15903_v46 = vld [vmem:[%s16480_s15 + $0x4b0] ss:$28 sps:$4 sm:$0xff]  }
 0x40c   : > { %10631 = vmatpush1.bf16.msra.mxu0 %v15854_v45  ;;  %13591 = vmatprep.subr.bf16.mxu1 %v15862_v51  ;;  %v15899_v45 = vld [vmem:[%s16480_s15 + $0x17e8] ss:$28 sps:$4 sm:$0xff]  }
 0x40d   : > { %10632 = vmatprep.subr.bf16.mxu0 %v15861_v55  ;;  %v15906_v55 = vld [vmem:[%s16480_s15 + $0x1824] ss:$28 sps:$4 sm:$0xff]  }
 0x40e   : > { %v15907_v51 = vld [vmem:[%s16480_s15 + $0x6a8] ss:$28 sps:$4 sm:$0xff]  }
 0x40f   : > { %13592 = vmatpush3.bf16.msra.mxu1 %v15863_v52  ;;  %v15908_v52 = vld [vmem:[%s16480_s15 + $0x4e8] ss:$28 sps:$4 sm:$0xff]  }
 0x410   : > { %10633 = vmatpush1.bf16.msra.mxu0 %v15859_v15  ;;  %13593 = vmatprep.subr.bf16.mxu1 %v15867_v59  ;;  %v15904_v15 = vld [vmem:[%s16480_s15 + $0x1820] ss:$28 sps:$4 sm:$0xff]  }
 0x411   : > { %10634 = vmatprep.subr.bf16.mxu0 %v15866_v53  ;;  %v15911_v53 = vld [vmem:[%s16480_s15 + $0x185c] ss:$28 sps:$4 sm:$0xff]  }
 0x412   : > { %v15912_v59 = vld [vmem:[%s16480_s15 + $0x6e0] ss:$28 sps:$4 sm:$0xff]  }
 0x413   : > { %13594 = vmatpush3.bf16.msra.mxu1 %v15868_v7  ;;  %v15913_v7 = vld [vmem:[%s16480_s15 + $0x520] ss:$28 sps:$4 sm:$0xff]  }
 0x414   : > { %10635 = vmatpush1.bf16.msra.mxu0 %v15864_v0  ;;  %13595 = vmatprep.subr.bf16.mxu1 %v15872_v19  ;;  %v15909_v0 = vld [vmem:[%s16480_s15 + $0x1858] ss:$28 sps:$4 sm:$0xff]  }
 0x415   : > { %10636 = vmatprep.subr.bf16.mxu0 %v15871_v8  ;;  %v15916_v8 = vld [vmem:[%s16480_s15 + $0x1894] ss:$28 sps:$4 sm:$0xff]  }
 0x416   : > { %v15917_v19 = vld [vmem:[%s16480_s15 + $0x8d8] ss:$28 sps:$4 sm:$0xff]  }
 0x417   : > { %13596 = vmatpush3.bf16.msra.mxu1 %v15873_v13  ;;  %v15918_v13 = vld [vmem:[%s16480_s15 + $0x718] ss:$28 sps:$4 sm:$0xff]  }
 0x418   : > { %10637 = vmatpush1.bf16.msra.mxu0 %v15869_v35  ;;  %13603 = vmatprep.subr.bf16.mxu1 %v15877_v16  ;;  %v15914_v35 = vld [vmem:[%s16480_s15 + $0x1890] ss:$28 sps:$4 sm:$0xff]  }
 0x419   : > { %10638 = vmatprep.subr.bf16.mxu0 %v15876_v14  ;;  %v15921_v14 = vld [vmem:[%s16480_s15 + $0x18cc] ss:$28 sps:$4 sm:$0xff]  }
 0x41a   : > { %10942 = vmatmul.mubr.bf16.vlgmr.msra.gmra.mrb[8].mxu1 %v16573_v21  ;;  %v15888_v21 = vld [vmem:[%s16480_s15 + $0x408] ss:$28 sps:$4 sm:$0xff]   ;;  %v15922_v16 = vld [vmem:[%s16480_s15 + $0x910] ss:$28 sps:$4 sm:$0xff]  }
 0x41b   : > { %13604 = vmatpush3.bf16.msra.mxu1 %v15878_v3  ;;  %10981 = vmatprep.mubr.bf16.mxu1 %v16581_v27  ;;  %v15896_v27 = vld [vmem:[%s16480_s15 + $0x17b4] ss:$28 sps:$4 sm:$0xff]  }
 0x41c   : > { %10639 = vmatpush1.bf16.msra.mxu0 %v15874_v18  ;;  %13605 = vmatprep.subr.bf16.mxu1 %v15882_v4  ;;  %v15919_v18 = vld [vmem:[%s16480_s15 + $0x18c8] ss:$28 sps:$4 sm:$0xff]   ;;  %v15923_v3 = vld [vmem:[%s16480_s15 + $0x750] ss:$28 sps:$4 sm:$0xff]  }
 0x41d   : > { %10640 = vmatprep.subr.bf16.mxu0 %v15881_v40  ;;  %v15926_v40 = vld [vmem:[%s16480_s15 + $0x1904] ss:$28 sps:$4 sm:$0xff]  }
 0x41e   : > { %v15927_v4 = vld [vmem:[%s16480_s15 + $0x948] ss:$28 sps:$4 sm:$0xff]  }
 0x41f   : > { %13606 = vmatpush3.bf16.msra.mxu1 %v15883_v54  ;;  %v15931_v54 = vld [vmem:[%s16480_s15 + $0x193c] ss:$28 sps:$4 sm:$0xff]  }
 0x420   : > { %10641 = vmatpush1.bf16.msra.mxu0 %v15879_v23  ;;  %13607 = vmatprep.subr.bf16.mxu1 %v15887_v26  ;;  %v15928_v23 = vld [vmem:[%s16480_s15 + $0x788] ss:$28 sps:$4 sm:$0xff]   ;;  %v15929_v26 = vld [vmem:[%s16480_s15 + $0x1938] ss:$28 sps:$4 sm:$0xff]  }
 0x421   : > { %10642 = vmatprep.subr.bf16.mxu0 %v15886_v24  ;;  %v15932_v24 = vld [vmem:[%s16480_s15 + $0x980] ss:$28 sps:$4 sm:$0xff]  }
 0x423   : > { %13608 = vmatpush3.bf16.msra.mxu1 %v15888_v21  ;;  %v15937_v21 = vld [vmem:[%s16480_s15 + $0x9b8] ss:$28 sps:$4 sm:$0xff]  }
 0x424   : > { %10643 = vmatpush1.bf16.msra.mxu0 %v15884_v29  ;;  %13609 = vmatprep.subr.bf16.mxu1 %v15892_v31  ;;  %v15936_v29 = vld [vmem:[%s16480_s15 + $0x1974] ss:$28 sps:$4 sm:$0xff]  }
 0x425   : > { %10644 = vmatprep.subr.bf16.mxu0 %v15891_v30  ;;  %v15934_v30 = vld [vmem:[%s16480_s15 + $0x1970] ss:$28 sps:$4 sm:$0xff]   ;;  %v15938_v31 = vld [vmem:[%s16480_s15 + $0x7f8] ss:$28 sps:$4 sm:$0xff]  }
 0x427   : > { %13610 = vmatpush3.bf16.msra.mxu1 %v15893_v58  ;;  %v15942_v58 = vld [vmem:[%s16480_s15 + $0x9f0] ss:$28 sps:$4 sm:$0xff]  }
 0x428   : > { %10645 = vmatpush1.bf16.msra.mxu0 %v15889_v47  ;;  %13611 = vmatprep.subr.bf16.mxu1 %v15897_v36  ;;  %v15941_v47 = vld [vmem:[%s16480_s15 + $0x19ac] ss:$28 sps:$4 sm:$0xff]  }
 0x429   : > { %10646 = vmatprep.subr.bf16.mxu0 %v15896_v27  ;;  %v15939_v27 = vld [vmem:[%s16480_s15 + $0x19a8] ss:$28 sps:$4 sm:$0xff]   ;;  %v15943_v36 = vld [vmem:[%s16480_s15 + $0x830] ss:$28 sps:$4 sm:$0xff]  }
 0x42b   : > { %13612 = vmatpush3.bf16.msra.mxu1 %v15898_v62  ;;  %v15947_v62 = vld [vmem:[%s16480_s15 + $0xa28] ss:$28 sps:$4 sm:$0xff]  }
 0x42c   : > { %10647 = vmatpush1.bf16.msra.mxu0 %v15894_v37  ;;  %13613 = vmatprep.subr.bf16.mxu1 %v15902_v57  ;;  %v15946_v37 = vld [vmem:[%s16480_s15 + $0x19e4] ss:$28 sps:$4 sm:$0xff]  }
 0x42d   : > { %10648 = vmatprep.subr.bf16.mxu0 %v15901_v38  ;;  %v15944_v38 = vld [vmem:[%s16480_s15 + $0x19e0] ss:$28 sps:$4 sm:$0xff]   ;;  %v15948_v57 = vld [vmem:[%s16480_s15 + $0x868] ss:$28 sps:$4 sm:$0xff]  }
 0x42f   : > { %13614 = vmatpush3.bf16.msra.mxu1 %v15903_v46  ;;  %v15952_v46 = vld [vmem:[%s16480_s15 + $0xa60] ss:$28 sps:$4 sm:$0xff]  }
 0x430   : > { %10649 = vmatpush1.bf16.msra.mxu0 %v15899_v45  ;;  %13615 = vmatprep.subr.bf16.mxu1 %v15907_v51  ;;  %v15951_v45 = vld [vmem:[%s16480_s15 + $0x1a1c] ss:$28 sps:$4 sm:$0xff]  }
 0x431   : > { %10650 = vmatprep.subr.bf16.mxu0 %v15906_v55  ;;  %v15949_v55 = vld [vmem:[%s16480_s15 + $0x1a18] ss:$28 sps:$4 sm:$0xff]   ;;  %v15953_v51 = vld [vmem:[%s16480_s15 + $0x8a0] ss:$28 sps:$4 sm:$0xff]  }
 0x433   : > { %13616 = vmatpush3.bf16.msra.mxu1 %v15908_v52  ;;  %v15957_v52 = vld [vmem:[%s16480_s15 + $0xc58] ss:$28 sps:$4 sm:$0xff]  }
 0x434   : > { %10651 = vmatpush1.bf16.msra.mxu0 %v15904_v15  ;;  %13617 = vmatprep.subr.bf16.mxu1 %v15912_v59  ;;  %v15956_v15 = vld [vmem:[%s16480_s15 + $0x1a54] ss:$28 sps:$4 sm:$0xff]  }
 0x435   : > { %10652 = vmatprep.subr.bf16.mxu0 %v15911_v53  ;;  %v15954_v53 = vld [vmem:[%s16480_s15 + $0x1a50] ss:$28 sps:$4 sm:$0xff]   ;;  %v15958_v59 = vld [vmem:[%s16480_s15 + $0xa98] ss:$28 sps:$4 sm:$0xff]  }
 0x437   : > { %13618 = vmatpush3.bf16.msra.mxu1 %v15913_v7  ;;  %v15962_v7 = vld [vmem:[%s16480_s15 + $0xc90] ss:$28 sps:$4 sm:$0xff]  }
 0x438   : > { %10653 = vmatpush1.bf16.msra.mxu0 %v15909_v0  ;;  %13625 = vmatprep.subr.bf16.mxu1 %v15917_v19  ;;  %v15961_v0 = vld [vmem:[%s16480_s15 + $0x1a8c] ss:$28 sps:$4 sm:$0xff]  }
 0x439   : > { %10663 = vmatprep.subr.bf16.mxu0 %v15916_v8  ;;  %v15959_v8 = vld [vmem:[%s16480_s15 + $0x1a88] ss:$28 sps:$4 sm:$0xff]   ;;  %v15963_v19 = vld [vmem:[%s16480_s15 + $0xad0] ss:$28 sps:$4 sm:$0xff]  }
 0x43a   : > { %10982 = vmatmul.mubr.bf16.vlgmr.msra.gmra.mrb[12].mxu1 %v16674_v42  ;;  %v15924_v42 = vld [vmem:[%s16480_s15 + $0x1900] ss:$28 sps:$4 sm:$0xff]  }
 0x43b   : > { %10655 = vmatmul.mubr.bf16.vlgmr.msra.gmra.mrb[4].mxu0 %v16848_v28  ;;  %13626 = vmatpush3.bf16.msra.mxu1 %v15918_v13  ;;  %v15967_v13 = vld [vmem:[%s16480_s15 + $0xcc8] ss:$28 sps:$4 sm:$0xff]  }
 0x43c   : > { %10664 = vmatpush1.bf16.msra.mxu0 %v15914_v35  ;;  %13627 = vmatprep.subr.bf16.mxu1 %v15922_v16  ;;  %v15966_v35 = vld [vmem:[%s16480_s15 + $0x1ac4] ss:$28 sps:$4 sm:$0xff]   ;;  %v15971_v16 = vld [vmem:[%s16480_s15 + $0x1afc] ss:$28 sps:$4 sm:$0xff]  }
 0x43d   : > { %10665 = vmatprep.subr.bf16.mxu0 %v15921_v14  ;;  %11021 = vmatprep.mubr.bf16.mxu1 %v16683_v48  ;;  %v15933_v48 = vld [vmem:[%s16480_s15 + $0x7c0] ss:$28 sps:$4 sm:$0xff]  }
 0x43e   : > { %10695 = vmatprep.mubr.bf16.mxu0 %v16853_v32  ;;  %v15964_v14 = vld [vmem:[%s16480_s15 + $0x1ac0] ss:$28 sps:$4 sm:$0xff]  }
 0x43f   : > { %13628 = vmatpush3.bf16.msra.mxu1 %v15923_v3  ;;  %v15969_v3 = vld [vmem:[%s16480_s15 + $0x1af8] ss:$28 sps:$4 sm:$0xff]  }
 0x440   : > { %10666 = vmatpush1.bf16.msra.mxu0 %v15919_v18  ;;  %13629 = vmatprep.subr.bf16.mxu1 %v15927_v4  ;;  %v15972_v18 = vld [vmem:[%s16480_s15 + $0xd00] ss:$28 sps:$4 sm:$0xff]   ;;  %v15977_v4 = vld [vmem:[%s16480_s15 + $0xd38] ss:$28 sps:$4 sm:$0xff]  }
 0x441   : > { %10667 = vmatprep.subr.bf16.mxu0 %v15926_v40  ;;  %v15973_v40 = vld [vmem:[%s16480_s15 + $0xb40] ss:$28 sps:$4 sm:$0xff]  }
 0x443   : > { %13630 = vmatpush3.bf16.msra.mxu1 %v15928_v23  ;;  %v15978_v23 = vld [vmem:[%s16480_s15 + $0xb78] ss:$28 sps:$4 sm:$0xff]  }
 0x444   : > { %10668 = vmatpush1.bf16.msra.mxu0 %v15924_v42  ;;  %13631 = vmatprep.subr.bf16.mxu1 %v15932_v24  ;;  %v15974_v42 = vld [vmem:[%s16480_s15 + $0x1b30] ss:$28 sps:$4 sm:$0xff]  }
 0x445   : > { %10669 = vmatprep.subr.bf16.mxu0 %v15931_v54  ;;  %v15981_v54 = vld [vmem:[%s16480_s15 + $0x1b6c] ss:$28 sps:$4 sm:$0xff]  }
 0x446   : > { %v15982_v24 = vld [vmem:[%s16480_s15 + $0xd70] ss:$28 sps:$4 sm:$0xff]  }
 0x447   : > { %13632 = vmatpush3.bf16.msra.mxu1 %v15933_v48  ;;  %v15983_v48 = vld [vmem:[%s16480_s15 + $0xbb0] ss:$28 sps:$4 sm:$0xff]  }
 0x448   : > { %10670 = vmatpush1.bf16.msra.mxu0 %v15929_v26  ;;  %13633 = vmatprep.subr.bf16.mxu1 %v15937_v21  ;;  %v15979_v26 = vld [vmem:[%s16480_s15 + $0x1b68] ss:$28 sps:$4 sm:$0xff]  }
 0x449   : > { %10671 = vmatprep.subr.bf16.mxu0 %v15936_v29  ;;  %v15986_v29 = vld [vmem:[%s16480_s15 + $0x1ba4] ss:$28 sps:$4 sm:$0xff]  }
 0x44a   : > { %v15987_v21 = vld [vmem:[%s16480_s15 + $0xda8] ss:$28 sps:$4 sm:$0xff]  }
 0x44b   : > { %13634 = vmatpush3.bf16.msra.mxu1 %v15938_v31  ;;  %v15988_v31 = vld [vmem:[%s16480_s15 + $0xbe8] ss:$28 sps:$4 sm:$0xff]  }
 0x44c   : > { %10672 = vmatpush1.bf16.msra.mxu0 %v15934_v30  ;;  %13635 = vmatprep.subr.bf16.mxu1 %v15942_v58  ;;  %v15984_v30 = vld [vmem:[%s16480_s15 + $0x1ba0] ss:$28 sps:$4 sm:$0xff]  }
 0x44d   : > { %10673 = vmatprep.subr.bf16.mxu0 %v15941_v47  ;;  %v15991_v47 = vld [vmem:[%s16480_s15 + $0x1bdc] ss:$28 sps:$4 sm:$0xff]  }
 0x44e   : > { %v15992_v58 = vld [vmem:[%s16480_s15 + $0xde0] ss:$28 sps:$4 sm:$0xff]  }
 0x44f   : > { %13636 = vmatpush3.bf16.msra.mxu1 %v15943_v36  ;;  %v15993_v36 = vld [vmem:[%s16480_s15 + $0xc20] ss:$28 sps:$4 sm:$0xff]  }
 0x450   : > { %10674 = vmatpush1.bf16.msra.mxu0 %v15939_v27  ;;  %13637 = vmatprep.subr.bf16.mxu1 %v15947_v62  ;;  %v15989_v27 = vld [vmem:[%s16480_s15 + $0x1bd8] ss:$28 sps:$4 sm:$0xff]  }
 0x451   : > { %10675 = vmatprep.subr.bf16.mxu0 %v15946_v37  ;;  %v15996_v37 = vld [vmem:[%s16480_s15 + $0x1c14] ss:$28 sps:$4 sm:$0xff]  }
 0x452   : > { %v15997_v62 = vld [vmem:[%s16480_s15 + $0xfd8] ss:$28 sps:$4 sm:$0xff]  }
 0x453   : > { %13638 = vmatpush3.bf16.msra.mxu1 %v15948_v57  ;;  %v15998_v57 = vld [vmem:[%s16480_s15 + $0xe18] ss:$28 sps:$4 sm:$0xff]  }
 0x454   : > { %10676 = vmatpush1.bf16.msra.mxu0 %v15944_v38  ;;  %13639 = vmatprep.subr.bf16.mxu1 %v15952_v46  ;;  %v15994_v38 = vld [vmem:[%s16480_s15 + $0x1c10] ss:$28 sps:$4 sm:$0xff]  }
 0x455   : > { %10677 = vmatprep.subr.bf16.mxu0 %v15951_v45  ;;  %v16001_v45 = vld [vmem:[%s16480_s15 + $0x1c4c] ss:$28 sps:$4 sm:$0xff]  }
 0x456   : > { %v16002_v46 = vld [vmem:[%s16480_s15 + $0x1010] ss:$28 sps:$4 sm:$0xff]  }
 0x457   : > { %13640 = vmatpush3.bf16.msra.mxu1 %v15953_v51  ;;  %v16003_v51 = vld [vmem:[%s16480_s15 + $0xe50] ss:$28 sps:$4 sm:$0xff]  }
 0x458   : > { %10678 = vmatpush1.bf16.msra.mxu0 %v15949_v55  ;;  %13647 = vmatprep.subr.bf16.mxu1 %v15957_v52  ;;  %v15999_v55 = vld [vmem:[%s16480_s15 + $0x1c48] ss:$28 sps:$4 sm:$0xff]  }
 0x459   : > { %10679 = vmatprep.subr.bf16.mxu0 %v15956_v15  ;;  %v16006_v15 = vld [vmem:[%s16480_s15 + $0x1c84] ss:$28 sps:$4 sm:$0xff]  }
 0x45a   : > { %11022 = vmatmul.mubr.bf16.vlgmr.msra.gmra.mrb[16].mxu1 %v16762_v2  ;;  %v15968_v2 = vld [vmem:[%s16480_s15 + $0xb08] ss:$28 sps:$4 sm:$0xff]  }
 0x45b   : > { %13648 = vmatpush3.bf16.msra.mxu1 %v15958_v59  ;;  %11061 = vmatprep.mubr.bf16.mxu1 %v16553_v5  ;;  %v15976_v5 = vld [vmem:[%s16480_s15 + $0x1b34] ss:$28 sps:$4 sm:$0xff]   ;;  %v16007_v52 = vld [vmem:[%s16480_s15 + $0x1048] ss:$28 sps:$4 sm:$0xff]   ;;  %v16011_v59 = vld [vmem:[%s16480_s15 + $0x1cbc] ss:$28 sps:$4 sm:$0xff]  }
 0x45c   : > { %10680 = vmatpush1.bf16.msra.mxu0 %v15954_v53  ;;  %13649 = vmatprep.subr.bf16.mxu1 %v15962_v7  ;;  %v16008_v53 = vld [vmem:[%s16480_s15 + $0xe88] ss:$28 sps:$4 sm:$0xff]   ;;  %v16009_v7 = vld [vmem:[%s16480_s15 + $0x1cb8] ss:$28 sps:$4 sm:$0xff]  }
 0x45d   : > { %10681 = vmatprep.subr.bf16.mxu0 %v15961_v0  ;;  %v16012_v0 = vld [vmem:[%s16480_s15 + $0x1080] ss:$28 sps:$4 sm:$0xff]  }
 0x45f   : > { %13650 = vmatpush3.bf16.msra.mxu1 %v15963_v19  ;;  %v16017_v19 = vld [vmem:[%s16480_s15 + $0x10b8] ss:$28 sps:$4 sm:$0xff]  }
 0x460   : > { %10682 = vmatpush1.bf16.msra.mxu0 %v15959_v8  ;;  %13651 = vmatprep.subr.bf16.mxu1 %v15967_v13  ;;  %v16016_v8 = vld [vmem:[%s16480_s15 + $0x1cf4] ss:$28 sps:$4 sm:$0xff]  }
 0x461   : > { %10683 = vmatprep.subr.bf16.mxu0 %v15966_v35  ;;  %v16014_v35 = vld [vmem:[%s16480_s15 + $0x1cf0] ss:$28 sps:$4 sm:$0xff]   ;;  %v16018_v13 = vld [vmem:[%s16480_s15 + $0xef8] ss:$28 sps:$4 sm:$0xff]  }
 0x463   : > { %13652 = vmatpush3.bf16.msra.mxu1 %v15968_v2  ;;  %v16022_v2 = vld [vmem:[%s16480_s15 + $0x10f0] ss:$28 sps:$4 sm:$0xff]  }
 0x464   : > { %10684 = vmatpush1.bf16.msra.mxu0 %v15964_v14  ;;  %13653 = vmatprep.subr.bf16.mxu1 %v15972_v18  ;;  %v16021_v14 = vld [vmem:[%s16480_s15 + $0x1d2c] ss:$28 sps:$4 sm:$0xff]  }
 0x465   : > { %10685 = vmatprep.subr.bf16.mxu0 %v15971_v16  ;;  %v16019_v16 = vld [vmem:[%s16480_s15 + $0x1d28] ss:$28 sps:$4 sm:$0xff]   ;;  %v16023_v18 = vld [vmem:[%s16480_s15 + $0xf30] ss:$28 sps:$4 sm:$0xff]  }
 0x467   : > { %13654 = vmatpush3.bf16.msra.mxu1 %v15973_v40  ;;  %v16027_v40 = vld [vmem:[%s16480_s15 + $0x1128] ss:$28 sps:$4 sm:$0xff]  }
 0x468   : > { %10686 = vmatpush1.bf16.msra.mxu0 %v15969_v3  ;;  %13655 = vmatprep.subr.bf16.mxu1 %v15977_v4  ;;  %v16026_v3 = vld [vmem:[%s16480_s15 + $0x1d64] ss:$28 sps:$4 sm:$0xff]  }
 0x469   : > { %10687 = vmatprep.subr.bf16.mxu0 %v15976_v5  ;;  %v16024_v5 = vld [vmem:[%s16480_s15 + $0x1d60] ss:$28 sps:$4 sm:$0xff]   ;;  %v16028_v4 = vld [vmem:[%s16480_s15 + $0xf68] ss:$28 sps:$4 sm:$0xff]  }
 0x46b   : > { %13656 = vmatpush3.bf16.msra.mxu1 %v15978_v23  ;;  %v16032_v23 = vld [vmem:[%s16480_s15 + $0x1160] ss:$28 sps:$4 sm:$0xff]  }
 0x46c   : > { %10688 = vmatpush1.bf16.msra.mxu0 %v15974_v42  ;;  %13657 = vmatprep.subr.bf16.mxu1 %v15982_v24  ;;  %v16031_v42 = vld [vmem:[%s16480_s15 + $0x1d9c] ss:$28 sps:$4 sm:$0xff]  }
 0x46d   : > { %10689 = vmatprep.subr.bf16.mxu0 %v15981_v54  ;;  %v16029_v54 = vld [vmem:[%s16480_s15 + $0x1d98] ss:$28 sps:$4 sm:$0xff]   ;;  %v16033_v24 = vld [vmem:[%s16480_s15 + $0xfa0] ss:$28 sps:$4 sm:$0xff]  }
 0x46f   : > { %13658 = vmatpush3.bf16.msra.mxu1 %v15983_v48  ;;  %v16037_v48 = vld [vmem:[%s16480_s15 + $0x1358] ss:$28 sps:$4 sm:$0xff]  }
 0x470   : > { %10690 = vmatpush1.bf16.msra.mxu0 %v15979_v26  ;;  %13659 = vmatprep.subr.bf16.mxu1 %v15987_v21  ;;  %v16036_v26 = vld [vmem:[%s16480_s15 + $0x1dd4] ss:$28 sps:$4 sm:$0xff]  }
 0x471   : > { %10691 = vmatprep.subr.bf16.mxu0 %v15986_v29  ;;  %v16034_v29 = vld [vmem:[%s16480_s15 + $0x1dd0] ss:$28 sps:$4 sm:$0xff]   ;;  %v16038_v21 = vld [vmem:[%s16480_s15 + $0x1198] ss:$28 sps:$4 sm:$0xff]  }
 0x473   : > { %13660 = vmatpush3.bf16.msra.mxu1 %v15988_v31  ;;  %v16042_v31 = vld [vmem:[%s16480_s15 + $0x1390] ss:$28 sps:$4 sm:$0xff]  }
 0x474   : > { %10692 = vmatpush1.bf16.msra.mxu0 %v15984_v30  ;;  %13661 = vmatprep.subr.bf16.mxu1 %v15992_v58  ;;  %v16041_v30 = vld [vmem:[%s16480_s15 + $0x1e0c] ss:$28 sps:$4 sm:$0xff]  }
 0x475   : > { %10693 = vmatprep.subr.bf16.mxu0 %v15991_v47  ;;  %v16039_v47 = vld [vmem:[%s16480_s15 + $0x1e08] ss:$28 sps:$4 sm:$0xff]   ;;  %v16043_v58 = vld [vmem:[%s16480_s15 + $0x11d0] ss:$28 sps:$4 sm:$0xff]  }
 0x477   : > { %13662 = vmatpush3.bf16.msra.mxu1 %v15993_v36  ;;  %v16047_v36 = vld [vmem:[%s16480_s15 + $0x13c8] ss:$28 sps:$4 sm:$0xff]  }
 0x478   : > { %10694 = vmatpush1.bf16.msra.mxu0 %v15989_v27  ;;  %13669 = vmatprep.subr.bf16.mxu1 %v15997_v62  ;;  %v16046_v27 = vld [vmem:[%s16480_s15 + $0x1e44] ss:$28 sps:$4 sm:$0xff]   ;;  %v16051_v62 = vld [vmem:[%s16480_s15 + $0x1e7c] ss:$28 sps:$4 sm:$0xff]  }
 0x479   : > { %10704 = vmatprep.subr.bf16.mxu0 %v15996_v37  ;;  %v16044_v37 = vld [vmem:[%s16480_s15 + $0x1e40] ss:$28 sps:$4 sm:$0xff]  }
 0x47a   : > { %11062 = vmatmul.mubr.bf16.vlgmr.msra.gmra.mrb[20].mxu1 %v16575_v22  ;;  %v16004_v22 = vld [vmem:[%s16480_s15 + $0x1c80] ss:$28 sps:$4 sm:$0xff]  }
 0x47b   : > { %10696 = vmatmul.mubr.bf16.vlgmr.msra.gmra.mrb[4].mxu0 %v16930_v56  ;;  %13670 = vmatpush3.bf16.msra.mxu1 %v15998_v57  ;;  %v16049_v57 = vld [vmem:[%s16480_s15 + $0x1e78] ss:$28 sps:$4 sm:$0xff]  }
 0x47c   : > { %10705 = vmatpush1.bf16.msra.mxu0 %v15994_v38  ;;  %13671 = vmatprep.subr.bf16.mxu1 %v16002_v46  ;;  %v16052_v38 = vld [vmem:[%s16480_s15 + $0x1400] ss:$28 sps:$4 sm:$0xff]   ;;  %v16057_v46 = vld [vmem:[%s16480_s15 + $0x1438] ss:$28 sps:$4 sm:$0xff]  }
 0x47d   : > { %10706 = vmatprep.subr.bf16.mxu0 %v16001_v45  ;;  %11101 = vmatprep.mubr.bf16.mxu1 %v16622_v61  ;;  %v16013_v61 = vld [vmem:[%s16480_s15 + $0xec0] ss:$28 sps:$4 sm:$0xff]  }
 0x47e   : > { %10736 = vmatprep.mubr.bf16.mxu0 %v16936_v1  ;;  %v16053_v45 = vld [vmem:[%s16480_s15 + $0x1240] ss:$28 sps:$4 sm:$0xff]  }
 0x47f   : > { %13672 = vmatpush3.bf16.msra.mxu1 %v16003_v51  ;;  %v16058_v51 = vld [vmem:[%s16480_s15 + $0x1278] ss:$28 sps:$4 sm:$0xff]  }
 0x480   : > { %10707 = vmatpush1.bf16.msra.mxu0 %v15999_v55  ;;  %13673 = vmatprep.subr.bf16.mxu1 %v16007_v52  ;;  %v16054_v55 = vld [vmem:[%s16480_s15 + $0x1eb0] ss:$28 sps:$4 sm:$0xff]  }
 0x481   : > { %10708 = vmatprep.subr.bf16.mxu0 %v16006_v15  ;;  %v16061_v15 = vld [vmem:[%s16480_s15 + $0x1eec] ss:$28 sps:$4 sm:$0xff]  }
 0x482   : > { %v16062_v52 = vld [vmem:[%s16480_s15 + $0x1470] ss:$28 sps:$4 sm:$0xff]  }
 0x483   : > { %13674 = vmatpush3.bf16.msra.mxu1 %v16008_v53  ;;  %v16063_v53 = vld [vmem:[%s16480_s15 + $0x12b0] ss:$28 sps:$4 sm:$0xff]  }
 0x484   : > { %10709 = vmatpush1.bf16.msra.mxu0 %v16004_v22  ;;  %13675 = vmatprep.subr.bf16.mxu1 %v16012_v0  ;;  %v16059_v22 = vld [vmem:[%s16480_s15 + $0x1ee8] ss:$28 sps:$4 sm:$0xff]  }
 0x485   : > { %10710 = vmatprep.subr.bf16.mxu0 %v16011_v59  ;;  %v16066_v59 = vld [vmem:[%s16480_s15 + $0x1f24] ss:$28 sps:$4 sm:$0xff]  }
 0x486   : > { %v16067_v0 = vld [vmem:[%s16480_s15 + $0x14a8] ss:$28 sps:$4 sm:$0xff]  }
 0x487   : > { %13676 = vmatpush3.bf16.msra.mxu1 %v16013_v61  ;;  %v16068_v61 = vld [vmem:[%s16480_s15 + $0x12e8] ss:$28 sps:$4 sm:$0xff]  }
 0x488   : > { %10711 = vmatpush1.bf16.msra.mxu0 %v16009_v7  ;;  %13677 = vmatprep.subr.bf16.mxu1 %v16017_v19  ;;  %v16064_v7 = vld [vmem:[%s16480_s15 + $0x1f20] ss:$28 sps:$4 sm:$0xff]  }
 0x489   : > { %10712 = vmatprep.subr.bf16.mxu0 %v16016_v8  ;;  %v16071_v8 = vld [vmem:[%s16480_s15 + $0x1f5c] ss:$28 sps:$4 sm:$0xff]  }
 0x48a   : > { %v16072_v19 = vld [vmem:[%s16480_s15 + $0x14e0] ss:$28 sps:$4 sm:$0xff]  }
 0x48b   : > { %13678 = vmatpush3.bf16.msra.mxu1 %v16018_v13  ;;  %v16073_v13 = vld [vmem:[%s16480_s15 + $0x1320] ss:$28 sps:$4 sm:$0xff]  }
 0x48c   : > { %10713 = vmatpush1.bf16.msra.mxu0 %v16014_v35  ;;  %13679 = vmatprep.subr.bf16.mxu1 %v16022_v2  ;;  %v16069_v35 = vld [vmem:[%s16480_s15 + $0x1f58] ss:$28 sps:$4 sm:$0xff]  }
 0x48d   : > { %10714 = vmatprep.subr.bf16.mxu0 %v16021_v14  ;;  %v16076_v14 = vld [vmem:[%s16480_s15 + $0x1f94] ss:$28 sps:$4 sm:$0xff]  }
 0x48e   : > { %v16077_v2 = vld [vmem:[%s16480_s15 + $0x16d8] ss:$28 sps:$4 sm:$0xff]  }
 0x48f   : > { %13680 = vmatpush3.bf16.msra.mxu1 %v16023_v18  ;;  %v16078_v18 = vld [vmem:[%s16480_s15 + $0x1518] ss:$28 sps:$4 sm:$0xff]  }
 0x490   : > { %10715 = vmatpush1.bf16.msra.mxu0 %v16019_v16  ;;  %13681 = vmatprep.subr.bf16.mxu1 %v16027_v40  ;;  %v16074_v16 = vld [vmem:[%s16480_s15 + $0x1f90] ss:$28 sps:$4 sm:$0xff]  }
 0x491   : > { %10716 = vmatprep.subr.bf16.mxu0 %v16026_v3  ;;  %v16081_v3 = vld [vmem:[%s16480_s15 + $0x1fcc] ss:$28 sps:$4 sm:$0xff]  }
 0x492   : > { %v16082_v40 = vld [vmem:[%s16480_s15 + $0x1710] ss:$28 sps:$4 sm:$0xff]  }
 0x493   : > { %13682 = vmatpush3.bf16.msra.mxu1 %v16028_v4  ;;  %v16083_v4 = vld [vmem:[%s16480_s15 + $0x1550] ss:$28 sps:$4 sm:$0xff]  }
 0x494   : > { %10717 = vmatpush1.bf16.msra.mxu0 %v16024_v5  ;;  %13683 = vmatprep.subr.bf16.mxu1 %v16032_v23  ;;  %v16079_v5 = vld [vmem:[%s16480_s15 + $0x1fc8] ss:$28 sps:$4 sm:$0xff]  }
 0x495   : > { %10718 = vmatprep.subr.bf16.mxu0 %v16031_v42  ;;  %v16086_v42 = vld [vmem:[%s16480_s15 + $0x2004] ss:$28 sps:$4 sm:$0xff]  }
 0x496   : > { %v16087_v23 = vld [vmem:[%s16480_s15 + $0x1748] ss:$28 sps:$4 sm:$0xff]  }
 0x497   : > { %13684 = vmatpush3.bf16.msra.mxu1 %v16033_v24  ;;  %v16091_v24 = vld [vmem:[%s16480_s15 + $0x203c] ss:$28 sps:$4 sm:$0xff]  }
 0x498   : > { %10719 = vmatpush1.bf16.msra.mxu0 %v16029_v54  ;;  %13691 = vmatprep.subr.bf16.mxu1 %v16037_v48  ;;  %v16088_v54 = vld [vmem:[%s16480_s15 + $0x1588] ss:$28 sps:$4 sm:$0xff]   ;;  %v16089_v48 = vld [vmem:[%s16480_s15 + $0x2038] ss:$28 sps:$4 sm:$0xff]  }
 0x499   : > { %10720 = vmatprep.subr.bf16.mxu0 %v16036_v26  ;;  %v16092_v26 = vld [vmem:[%s16480_s15 + $0x1780] ss:$28 sps:$4 sm:$0xff]  }
 0x49a   : > { %11102 = vmatmul.mubr.bf16.vlgmr.msra.gmra.mrb[24].mxu1 %v16678_v43  ;;  %v16048_v43 = vld [vmem:[%s16480_s15 + $0x1208] ss:$28 sps:$4 sm:$0xff]  }
 0x49b   : > { %13692 = vmatpush3.bf16.msra.mxu1 %v16038_v21  ;;  %11141 = vmatprep.mubr.bf16.mxu1 %v16685_v49  ;;  %v16056_v49 = vld [vmem:[%s16480_s15 + $0x1eb4] ss:$28 sps:$4 sm:$0xff]  }
 0x49c   : > { %10721 = vmatpush1.bf16.msra.mxu0 %v16034_v29  ;;  %13693 = vmatprep.subr.bf16.mxu1 %v16042_v31  ;;  %v16096_v29 = vld [vmem:[%s16480_s15 + $0x2074] ss:$28 sps:$4 sm:$0xff]  }
 0x49d   : > { %10722 = vmatprep.subr.bf16.mxu0 %v16041_v30  ;;  %v16097_v21 = vld [vmem:[%s16480_s15 + $0x17b8] ss:$28 sps:$4 sm:$0xff]   ;;  %v16094_v30 = vld [vmem:[%s16480_s15 + $0x2070] ss:$28 sps:$4 sm:$0xff]  }
 0x49e   : > { %v16098_v31 = vld [vmem:[%s16480_s15 + $0x15f8] ss:$28 sps:$4 sm:$0xff]  }
 0x49f   : > { %13694 = vmatpush3.bf16.msra.mxu1 %v16043_v58  ;;  %v16102_v58 = vld [vmem:[%s16480_s15 + $0x17f0] ss:$28 sps:$4 sm:$0xff]  }
 0x4a0   : > { %10723 = vmatpush1.bf16.msra.mxu0 %v16039_v47  ;;  %13695 = vmatprep.subr.bf16.mxu1 %v16047_v36  ;;  %v16101_v47 = vld [vmem:[%s16480_s15 + $0x20ac] ss:$28 sps:$4 sm:$0xff]  }
 0x4a1   : > { %10724 = vmatprep.subr.bf16.mxu0 %v16046_v27  ;;  %v16099_v27 = vld [vmem:[%s16480_s15 + $0x20a8] ss:$28 sps:$4 sm:$0xff]   ;;  %v16103_v36 = vld [vmem:[%s16480_s15 + $0x1630] ss:$28 sps:$4 sm:$0xff]  }
 0x4a3   : > { %13696 = vmatpush3.bf16.msra.mxu1 %v16048_v43  ;;  %v16107_v43 = vld [vmem:[%s16480_s15 + $0x1828] ss:$28 sps:$4 sm:$0xff]  }
 0x4a4   : > { %10725 = vmatpush1.bf16.msra.mxu0 %v16044_v37  ;;  %13697 = vmatprep.subr.bf16.mxu1 %v16052_v38  ;;  %v16106_v37 = vld [vmem:[%s16480_s15 + $0x20e4] ss:$28 sps:$4 sm:$0xff]  }
 0x4a5   : > { %10726 = vmatprep.subr.bf16.mxu0 %v16051_v62 }
 0x4a7   : > { %13698 = vmatpush3.bf16.msra.mxu1 %v16053_v45 }
 0x4a8   : > { %10727 = vmatpush1.bf16.msra.mxu0 %v16049_v57  ;;  %13699 = vmatprep.subr.bf16.mxu1 %v16057_v46  ;;  %v16108_v46 = vld [vmem:[%s16480_s15 + $0x1668] ss:$28 sps:$4 sm:$0xff]  }
 0x4a9   : > { %10728 = vmatprep.subr.bf16.mxu0 %v16056_v49  ;;  %v16104_v49 = vld [vmem:[%s16480_s15 + $0x20e0] ss:$28 sps:$4 sm:$0xff]  }
 0x4ab   : > { %13700 = vmatpush3.bf16.msra.mxu1 %v16058_v51  ;;  %v16111_v51 = vld [vmem:[%s16480_s15 + $0x211c] ss:$28 sps:$4 sm:$0xff]  }
 0x4ac   : > { %10729 = vmatpush1.bf16.msra.mxu0 %v16054_v55  ;;  %13701 = vmatprep.subr.bf16.mxu1 %v16062_v52  ;;  %v11444_v52 = vrot.slane %v11436_v20, %v16530_v50  ;;  %v16118_v20 = vld [vmem:[%s16480_s15 + $0x1898] ss:$28 sps:$4 sm:$0xff]  }
 0x4ad   : > { %10730 = vmatprep.subr.bf16.mxu0 %v16061_v15  ;;  %v16112_v15 = vld [vmem:[%s16480_s15 + $0x1860] ss:$28 sps:$4 sm:$0xff]  }
 0x4af   : > { %13702 = vmatpush3.bf16.msra.mxu1 %v16063_v53  ;;  %v335_v53 = vld [vmem:[#allocation2] sm:$0xff] }
 0x4b0   : > { %10731 = vmatpush1.bf16.msra.mxu0 %v16059_v22  ;;  %13703 = vmatprep.subr.bf16.mxu1 %v16067_v0  ;;  %v16109_v0 = vld [vmem:[%s16480_s15 + $0x2118] ss:$28 sps:$4 sm:$0xff]  }
 0x4b1   : > { %10732 = vmatprep.subr.bf16.mxu0 %v16066_v59 }
 0x4b3   : > { %13704 = vmatpush3.bf16.msra.mxu1 %v16068_v61  ;;  %v16116_v61 = vld [vmem:[%s16480_s15 + $0x2154] ss:$28 sps:$4 sm:$0xff]  }
 0x4b4   : > { %10733 = vmatpush1.bf16.msra.mxu0 %v16064_v7  ;;  %13705 = vmatprep.subr.bf16.mxu1 %v16072_v19  ;;  %v16113_v7 = vld [vmem:[%s16480_s15 + $0x16a0] ss:$28 sps:$4 sm:$0xff]   ;;  %v16121_v19 = vld [vmem:[%s16480_s15 + $0x218c] ss:$28 sps:$4 sm:$0xff]  }
 0x4b5   : > { %10734 = vmatprep.subr.bf16.mxu0 %v16071_v8  ;;  %v16117_v8 = vld [vmem:[%s16480_s15 + $0x1a58] ss:$28 sps:$4 sm:$0xff]  }
 0x4b7   : > { %13706 = vmatpush3.bf16.msra.mxu1 %v16073_v13  ;;  %v16119_v13 = vld [vmem:[%s16480_s15 + $0x2188] ss:$28 sps:$4 sm:$0xff]  }
 0x4b8   : > { %10735 = vmatpush1.bf16.msra.mxu0 %v16069_v35  ;;  %13713 = vmatprep.subr.bf16.mxu1 %v16077_v2  ;;  %v16122_v35 = vld [vmem:[%s16480_s15 + $0x1a90] ss:$28 sps:$4 sm:$0xff]   ;;  %v16126_v2 = vld [vmem:[%s16480_s15 + $0x21c4] ss:$28 sps:$4 sm:$0xff]  }
 0x4b9   : > { %10745 = vmatprep.subr.bf16.mxu0 %v16076_v14  ;;  %v16123_v14 = vld [vmem:[%s16480_s15 + $0x18d0] ss:$28 sps:$4 sm:$0xff]  }
 0x4ba   : > { %11142 = vmatmul.mubr.bf16.vlgmr.msra.gmra.mrb[28].mxu1 %v16768_v6  ;;  %v16084_v6 = vld [vmem:[%s16480_s15 + $0x2000] ss:$28 sps:$4 sm:$0xff]  }
 0x4bb   : > { %10737 = vmatmul.mubr.bf16.vlgmr.msra.gmra.mrb[4].mxu0 %v17011_v25  ;;  %13714 = vmatpush3.bf16.msra.mxu1 %v16078_v18  ;;  %v16124_v18 = vld [vmem:[%s16480_s15 + $0x21c0] ss:$28 sps:$4 sm:$0xff]  }
 0x4bc   : > { %10746 = vmatpush1.bf16.msra.mxu0 %v16074_v16  ;;  %13715 = vmatprep.subr.bf16.mxu1 %v16082_v40  ;;  %v16127_v16 = vld [vmem:[%s16480_s15 + $0x1ac8] ss:$28 sps:$4 sm:$0xff]   ;;  %v16132_v40 = vld [vmem:[%s16480_s15 + $0x1b00] ss:$28 sps:$4 sm:$0xff]  }
 0x4bd   : > { %10747 = vmatprep.subr.bf16.mxu0 %v16081_v3  ;;  %11181 = vmatprep.mubr.bf16.mxu1 %v16772_v9  ;;  %v16093_v9 = vld [vmem:[%s16480_s15 + $0x15c0] ss:$28 sps:$4 sm:$0xff]  }
 0x4be   : > { %10777 = vmatprep.mubr.bf16.mxu0 %v17017_v33  ;;  %v16131_v3 = vld [vmem:[%s16480_s15 + $0x21fc] ss:$28 sps:$4 sm:$0xff]  }
 0x4bf   : > { %13716 = vmatpush3.bf16.msra.mxu1 %v16083_v4  ;;  %v16133_v4 = vld [vmem:[%s16480_s15 + $0x1940] ss:$28 sps:$4 sm:$0xff]  }
 0x4c0   : > { %10748 = vmatpush1.bf16.msra.mxu0 %v16079_v5  ;;  %13717 = vmatprep.subr.bf16.mxu1 %v16087_v23  ;;  %v16129_v5 = vld [vmem:[%s16480_s15 + $0x21f8] ss:$28 sps:$4 sm:$0xff]   ;;  %v16134_v23 = vld [vmem:[%s16480_s15 + $0x2230] ss:$28 sps:$4 sm:$0xff]  }
 0x4c1   : > { %10749 = vmatprep.subr.bf16.mxu0 %v16086_v42  ;;  %v16137_v42 = vld [vmem:[%s16480_s15 + $0x1b38] ss:$28 sps:$4 sm:$0xff]  }
 0x4c3   : > { %13718 = vmatpush3.bf16.msra.mxu1 %v16088_v54  ;;  %v16141_v54 = vld [vmem:[%s16480_s15 + $0x226c] ss:$28 sps:$4 sm:$0xff]  }
 0x4c4   : > { %10750 = vmatpush1.bf16.msra.mxu0 %v16084_v6  ;;  %13719 = vmatprep.subr.bf16.mxu1 %v16092_v26  ;;  %v16138_v6 = vld [vmem:[%s16480_s15 + $0x1978] ss:$28 sps:$4 sm:$0xff]   ;;  %v16139_v26 = vld [vmem:[%s16480_s15 + $0x2268] ss:$28 sps:$4 sm:$0xff]  }
 0x4c5   : > { %10751 = vmatprep.subr.bf16.mxu0 %v16091_v24  ;;  %v16142_v24 = vld [vmem:[%s16480_s15 + $0x1b70] ss:$28 sps:$4 sm:$0xff]  }
 0x4c7   : > { %13720 = vmatpush3.bf16.msra.mxu1 %v16093_v9  ;;  %v16146_v9 = vld [vmem:[%s16480_s15 + $0x22a4] ss:$28 sps:$4 sm:$0xff]  }
 0x4c8   : > { %10752 = vmatpush1.bf16.msra.mxu0 %v16089_v48  ;;  %13721 = vmatprep.subr.bf16.mxu1 %v16097_v21  ;;  %v16143_v48 = vld [vmem:[%s16480_s15 + $0x19b0] ss:$28 sps:$4 sm:$0xff]  }
 0x4c9   : > { %10753 = vmatprep.subr.bf16.mxu0 %v16096_v29  ;;  %v16147_v29 = vld [vmem:[%s16480_s15 + $0x1ba8] ss:$28 sps:$4 sm:$0xff]  }
 0x4cb   : > { %13722 = vmatpush3.bf16.msra.mxu1 %v16098_v31 }
 0x4cc   : > { %10754 = vmatpush1.bf16.msra.mxu0 %v16094_v30  ;;  %13723 = vmatprep.subr.bf16.mxu1 %v16102_v58  ;;  %v16144_v58 = vld [vmem:[%s16480_s15 + $0x22a0] ss:$28 sps:$4 sm:$0xff]  }
 0x4cd   : > { %10755 = vmatprep.subr.bf16.mxu0 %v16101_v47  ;;  %v10369_v62 = vpop.f32.mrb[4].mxu1 }
 0x4ce   : > { %v10371_v38 = vpop.f32.mrb[5].mxu1 }
 0x4cf   : > { %v11437_v57 = vcombine.low %v10369_v62, %v10371_v38  ;;  %v10373_v45 = vpop.f32.mrb[6].mxu1  ;;  %13724 = vmatpush3.bf16.msra.mxu1 %v16103_v36  ;;  %v16149_v62 = vld [vmem:[%s16480_s15 + $0x22d8] ss:$28 sps:$4 sm:$0xff]   ;;  %v16153_v38 = vld [vmem:[%s16480_s15 + $0x1a20] ss:$28 sps:$4 sm:$0xff]  }
 0x4d0   : > { %10756 = vmatpush1.bf16.msra.mxu0 %v16099_v27  ;;  %v10374_v55 = vpop.f32.mrb[7].mxu1  ;;  %13725 = vmatprep.subr.bf16.mxu1 %v16107_v43  ;;  %v16148_v27 = vld [vmem:[%s16480_s15 + $0x19e8] ss:$28 sps:$4 sm:$0xff]   ;;  %v16152_v43 = vld [vmem:[%s16480_s15 + $0x1be0] ss:$28 sps:$4 sm:$0xff]  }
 0x4d1   : > { %10757 = vmatprep.subr.bf16.mxu0 %v16106_v37  ;;  %v11451_v22 = vrot.slane %v11437_v57, %v16530_v50  ;;  %v16151_v37 = vld [vmem:[%s16480_s15 + $0x22dc] ss:$28 sps:$4 sm:$0xff]   ;;  %v16156_v57 = vld [vmem:[%s16480_s15 + $0x2314] ss:$28 sps:$4 sm:$0xff]   ;;  %v16161_v55 = vld [vmem:[%s16480_s15 + $0x234c] ss:$28 sps:$4 sm:$0xff]  }
 0x4d2   : > { %v16157_v45 = vld [vmem:[%s16480_s15 + $0x1dd8] ss:$28 sps:$4 sm:$0xff]  }
 0x4d3   : > { %v11452_v59 = vcombine.low %v11444_v52, %v11451_v22  ;;  %13726 = vmatpush3.bf16.msra.mxu1 %v16108_v46  ;;  %v16158_v46 = vld [vmem:[%s16480_s15 + $0x1c18] ss:$28 sps:$4 sm:$0xff]   ;;  %v16163_v52 = vld [vmem:[%s16480_s15 + $0x1c50] ss:$28 sps:$4 sm:$0xff]   ;;  %v16166_v22 = vld [vmem:[%s16480_s15 + $0x2384] ss:$28 sps:$4 sm:$0xff]  }
 0x4d4   : > { %10758 = vmatpush1.bf16.msra.mxu0 %v16104_v49  ;;  %13727 = vmatprep.subr.bf16.mxu1 %v16112_v15  ;;  %v16154_v49 = vld [vmem:[%s16480_s15 + $0x2310] ss:$28 sps:$4 sm:$0xff]   ;;  %v16159_v15 = vld [vmem:[%s16480_s15 + $0x2348] ss:$28 sps:$4 sm:$0xff]  }
 0x4d5   : > { %10759 = vmatprep.subr.bf16.mxu0 %v16111_v51  ;;  %v11471_v10 = vadd.f32 %v11452_v59, %v335_v53  ;;  %v16162_v51 = vld [vmem:[%s16480_s15 + $0x1e10] ss:$28 sps:$4 sm:$0xff]   ;;  %v16167_v53 = vld [vmem:[%s16480_s15 + $0x1e48] ss:$28 sps:$4 sm:$0xff]  }
 0x4d6   : > { %v16168_v59 = vld [vmem:[%s16480_s15 + $0x1c88] ss:$28 sps:$4 sm:$0xff]  }
 0x4d7   : > { %11473 = vst [vmem:[#allocation2] sm:$0xff] %v11471_v10  ;;  %13728 = vmatpush3.bf16.msra.mxu1 %v16113_v7  ;;  %v16172_v7 = vld [vmem:[%s16480_s15 + $0x1e80] ss:$28 sps:$4 sm:$0xff]   ;;  %v16177_v10 = vld [vmem:[%s16480_s15 + $0x1eb8] ss:$28 sps:$4 sm:$0xff]  }
 0x4d8   : > { %10760 = vmatpush1.bf16.msra.mxu0 %v16109_v0  ;;  %13735 = vmatprep.subr.bf16.mxu1 %v16117_v8  ;;  %v16171_v0 = vld [vmem:[%s16480_s15 + $0x23bc] ss:$28 sps:$4 sm:$0xff]   ;;  %v16176_v8 = vld [vmem:[%s16480_s15 + $0x23f4] ss:$28 sps:$4 sm:$0xff]  }
 0x4d9   : > { %10761 = vmatprep.subr.bf16.mxu0 %v16116_v61  ;;  %v16169_v61 = vld [vmem:[%s16480_s15 + $0x23b8] ss:$28 sps:$4 sm:$0xff]  }
 0x4da   : > { %11182 = vmatmul.mubr.bf16.vlgmr.msra.gmra.mrb[32].mxu1 %v16848_v28  ;;  %v16128_v28 = vld [vmem:[%s16480_s15 + $0x1908] ss:$28 sps:$4 sm:$0xff]  }
 0x4db   : > { %13736 = vmatpush3.bf16.msra.mxu1 %v16118_v20  ;;  %11221 = vmatprep.mubr.bf16.mxu1 %v16853_v32  ;;  %v16136_v32 = vld [vmem:[%s16480_s15 + $0x2234] ss:$28 sps:$4 sm:$0xff]  }
 0x4dc   : > { %10762 = vmatpush1.bf16.msra.mxu0 %v16114_v12  ;;  %13737 = vmatprep.subr.bf16.mxu1 %v16122_v35  ;;  %v16174_v12 = vld [vmem:[%s16480_s15 + $0x23f0] ss:$28 sps:$4 sm:$0xff]   ;;  %v16178_v20 = vld [vmem:[%s16480_s15 + $0x1cf8] ss:$28 sps:$4 sm:$0xff]  }
 0x4dd   : > { %10763 = vmatprep.subr.bf16.mxu0 %v16121_v19  ;;  %v16181_v19 = vld [vmem:[%s16480_s15 + $0x242c] ss:$28 sps:$4 sm:$0xff]  }
 0x4de   : > { %v16182_v35 = vld [vmem:[%s16480_s15 + $0x1ef0] ss:$28 sps:$4 sm:$0xff]  }
 0x4df   : > { %13738 = vmatpush3.bf16.msra.mxu1 %v16123_v14  ;;  %v16183_v14 = vld [vmem:[%s16480_s15 + $0x1d30] ss:$28 sps:$4 sm:$0xff]  }
 0x4e0   : > { %10764 = vmatpush1.bf16.msra.mxu0 %v16119_v13  ;;  %13739 = vmatprep.subr.bf16.mxu1 %v16127_v16  ;;  %v16179_v13 = vld [vmem:[%s16480_s15 + $0x2428] ss:$28 sps:$4 sm:$0xff]  }
 0x4e1   : > { %10765 = vmatprep.subr.bf16.mxu0 %v16126_v2  ;;  %v16186_v2 = vld [vmem:[%s16480_s15 + $0x2464] ss:$28 sps:$4 sm:$0xff]  }
 0x4e2   : > { %v16187_v16 = vld [vmem:[%s16480_s15 + $0x1f28] ss:$28 sps:$4 sm:$0xff]  }
 0x4e3   : > { %13740 = vmatpush3.bf16.msra.mxu1 %v16128_v28 }
 0x4e4   : > { %10766 = vmatpush1.bf16.msra.mxu0 %v16124_v18  ;;  %13741 = vmatprep.subr.bf16.mxu1 %v16132_v40 }
 0x4e5   : > { %10767 = vmatprep.subr.bf16.mxu0 %v16131_v3 }
 0x4e7   : > { %13742 = vmatpush3.bf16.msra.mxu1 %v16133_v4  ;;  %v16188_v4 = vld [vmem:[%s16480_s15 + $0x1d68] ss:$28 sps:$4 sm:$0xff]  }
 0x4e8   : > { %10768 = vmatpush1.bf16.msra.mxu0 %v16129_v5  ;;  %13743 = vmatprep.subr.bf16.mxu1 %v16137_v42  ;;  %v16184_v5 = vld [vmem:[%s16480_s15 + $0x2460] ss:$28 sps:$4 sm:$0xff]  }
 0x4e9   : > { %10769 = vmatprep.subr.bf16.mxu0 %v16136_v32  ;;  %v16191_v42 = vld [vmem:[%s16480_s15 + $0x249c] ss:$28 sps:$4 sm:$0xff]  }
 0x4eb   : > { %13744 = vmatpush3.bf16.msra.mxu1 %v16138_v6 }
 0x4ec   : > { %10770 = vmatpush1.bf16.msra.mxu0 %v16134_v23  ;;  %13745 = vmatprep.subr.bf16.mxu1 %v16142_v24  ;;  %v16192_v23 = vld [vmem:[%s16480_s15 + $0x1f60] ss:$28 sps:$4 sm:$0xff]  }
 0x4ed   : > { %10771 = vmatprep.subr.bf16.mxu0 %v16141_v54  ;;  %v13597_v21 = vpop.f32.mrb[8].mxu1  ;;  %v16189_v54 = vld [vmem:[%s16480_s15 + $0x2498] ss:$28 sps:$4 sm:$0xff]   ;;  %v16193_v24 = vld [vmem:[%s16480_s15 + $0x1da0] ss:$28 sps:$4 sm:$0xff]  }
 0x4ee   : > { %v13598_v30 = vpop.f32.mrb[9].mxu1 }
 0x4ef   : > { %v17987_v31 = vadd.f32 %v13598_v30, %v13597_v21  ;;  %v13600_v47 = vpop.f32.mrb[10].mxu1  ;;  %13746 = vmatpush3.bf16.msra.mxu1 %v16143_v48  ;;  %v16197_v48 = vld [vmem:[%s16480_s15 + $0x2158] ss:$28 sps:$4 sm:$0xff]   ;;  %v16201_v21 = vld [vmem:[%s16480_s15 + $0x250c] ss:$28 sps:$4 sm:$0xff]  }
 0x4f0   : > { %10772 = vmatpush1.bf16.msra.mxu0 %v16139_v26  ;;  %v13601_v36 = vpop.f32.mrb[11].mxu1  ;;  %13747 = vmatprep.subr.bf16.mxu1 %v16147_v29  ;;  %v16196_v26 = vld [vmem:[%s16480_s15 + $0x24d4] ss:$28 sps:$4 sm:$0xff]  }
 0x4f1   : > { %10773 = vmatprep.subr.bf16.mxu0 %v16146_v9  ;;  %v16194_v9 = vld [vmem:[%s16480_s15 + $0x24d0] ss:$28 sps:$4 sm:$0xff]   ;;  %v16198_v29 = vld [vmem:[%s16480_s15 + $0x1f98] ss:$28 sps:$4 sm:$0xff]   ;;  %v16204_v36 = vld [vmem:[%s16480_s15 + $0x2540] ss:$28 sps:$4 sm:$0xff]  }
 0x4f2   : > { %v16202_v30 = vld [vmem:[%s16480_s15 + $0x2190] ss:$28 sps:$4 sm:$0xff]  }
 0x4f3   : > { %13748 = vmatpush3.bf16.msra.mxu1 %v16148_v27  ;;  %v16203_v47 = vld [vmem:[%s16480_s15 + $0x1fd0] ss:$28 sps:$4 sm:$0xff]   ;;  %v16207_v27 = vld [vmem:[%s16480_s15 + $0x21c8] ss:$28 sps:$4 sm:$0xff]  }
 0x4f4   : > { %10774 = vmatpush1.bf16.msra.mxu0 %v16144_v58  ;;  %13749 = vmatprep.subr.bf16.mxu1 %v16152_v43  ;;  %v16206_v58 = vld [vmem:[%s16480_s15 + $0x2544] ss:$28 sps:$4 sm:$0xff]  }
 0x4f5   : > { %10775 = vmatprep.subr.bf16.mxu0 %v16151_v37  ;;  %v16211_v37 = vld [vmem:[%s16480_s15 + $0x257c] ss:$28 sps:$4 sm:$0xff]  }
 0x4f6   : > { %v16212_v43 = vld [vmem:[%s16480_s15 + $0x2200] ss:$28 sps:$4 sm:$0xff]  }
 0x4f7   : > { %13750 = vmatpush3.bf16.msra.mxu1 %v16153_v38  ;;  %v16213_v38 = vld [vmem:[%s16480_s15 + $0x2040] ss:$28 sps:$4 sm:$0xff]  }
 0x4f8   : > { %10776 = vmatpush1.bf16.msra.mxu0 %v16149_v62  ;;  %13757 = vmatprep.subr.bf16.mxu1 %v16157_v45  ;;  %v16209_v62 = vld [vmem:[%s16480_s15 + $0x2578] ss:$28 sps:$4 sm:$0xff]   ;;  %v16214_v45 = vld [vmem:[%s16480_s15 + $0x25b0] ss:$28 sps:$4 sm:$0xff]  }
 0x4f9   : > { %10786 = vmatprep.subr.bf16.mxu0 %v16156_v57  ;;  %v16217_v57 = vld [vmem:[%s16480_s15 + $0x2238] ss:$28 sps:$4 sm:$0xff]  }
 0x4fa   : > { %11222 = vmatmul.mubr.bf16.vlgmr.msra.gmra.mrb[36].mxu1 %v16930_v56  ;;  %v16164_v56 = vld [vmem:[%s16480_s15 + $0x2380] ss:$28 sps:$4 sm:$0xff]  }
 0x4fb   : > { %10778 = vmatmul.mubr.bf16.vlgmr.msra.gmra.mrb[4].mxu0 %v17098_v11  ;;  %13758 = vmatpush3.bf16.msra.mxu1 %v16158_v46  ;;  %v16221_v46 = vld [vmem:[%s16480_s15 + $0x25ec] ss:$28 sps:$4 sm:$0xff]  }
 0x4fc   : > { %10787 = vmatpush1.bf16.msra.mxu0 %v16154_v49  ;;  %13759 = vmatprep.subr.bf16.mxu1 %v16162_v51  ;;  %v16218_v49 = vld [vmem:[%s16480_s15 + $0x2078] ss:$28 sps:$4 sm:$0xff]   ;;  %v16219_v51 = vld [vmem:[%s16480_s15 + $0x25e8] ss:$28 sps:$4 sm:$0xff]  }
 0x4fd   : > { %10788 = vmatprep.subr.bf16.mxu0 %v16161_v55  ;;  %11261 = vmatprep.mubr.bf16.mxu1 %v16936_v1  ;;  %v16173_v1 = vld [vmem:[%s16480_s15 + $0x1cc0] ss:$28 sps:$4 sm:$0xff]   ;;  %v16222_v55 = vld [vmem:[%s16480_s15 + $0x2270] ss:$28 sps:$4 sm:$0xff]  }
 0x4fe   : > { %10818 = vmatprep.mubr.bf16.mxu0 %v17104_v17 }
 0x4ff   : > { %13760 = vmatpush3.bf16.msra.mxu1 %v16163_v52  ;;  %v16226_v52 = vld [vmem:[%s16480_s15 + $0x2624] ss:$28 sps:$4 sm:$0xff]  }
 0x500   : > { %10789 = vmatpush1.bf16.msra.mxu0 %v16159_v15  ;;  %13761 = vmatprep.subr.bf16.mxu1 %v16167_v53  ;;  %v16223_v15 = vld [vmem:[%s16480_s15 + $0x20b0] ss:$28 sps:$4 sm:$0xff]  }
 0x501   : > { %10790 = vmatprep.subr.bf16.mxu0 %v16166_v22  ;;  %v16227_v22 = vld [vmem:[%s16480_s15 + $0x22a8] ss:$28 sps:$4 sm:$0xff]  }
 0x503   : > { %13762 = vmatpush3.bf16.msra.mxu1 %v16168_v59 }
 0x504   : > { %10791 = vmatpush1.bf16.msra.mxu0 %v16164_v56  ;;  %13763 = vmatprep.subr.bf16.mxu1 %v16172_v7  ;;  %v16224_v7 = vld [vmem:[%s16480_s15 + $0x2620] ss:$28 sps:$4 sm:$0xff]  }
 0x505   : > { %10792 = vmatprep.subr.bf16.mxu0 %v16171_v0 }
 0x507   : > { %13764 = vmatpush3.bf16.msra.mxu1 %v16173_v1 }
 0x508   : > { %10793 = vmatpush1.bf16.msra.mxu0 %v16169_v61  ;;  %13765 = vmatprep.subr.bf16.mxu1 %v16177_v10  ;;  %v16228_v61 = vld [vmem:[%s16480_s15 + $0x20e8] ss:$28 sps:$4 sm:$0xff]   ;;  %v16232_v10 = vld [vmem:[%s16480_s15 + $0x22e0] ss:$28 sps:$4 sm:$0xff]  }
 0x509   : > { %10794 = vmatprep.subr.bf16.mxu0 %v16176_v8  ;;  %v16231_v8 = vld [vmem:[%s16480_s15 + $0x265c] ss:$28 sps:$4 sm:$0xff]  }
 0x50b   : > { %13766 = vmatpush3.bf16.msra.mxu1 %v16178_v20  ;;  %v16229_v20 = vld [vmem:[%s16480_s15 + $0x2658] ss:$28 sps:$4 sm:$0xff]  }
 0x50c   : > { %10795 = vmatpush1.bf16.msra.mxu0 %v16174_v12  ;;  %13767 = vmatprep.subr.bf16.mxu1 %v16182_v35  ;;  %v16236_v35 = vld [vmem:[%s16480_s15 + $0x2694] ss:$28 sps:$4 sm:$0xff]  }
 0x50d   : > { %10796 = vmatprep.subr.bf16.mxu0 %v16181_v19  ;;  %v13619_v18 = vpop.f32.mrb[12].mxu1  ;;  %v16233_v19 = vld [vmem:[%s16480_s15 + $0x2120] ss:$28 sps:$4 sm:$0xff]  }
 0x50e   : > { %v13620_v28 = vpop.f32.mrb[13].mxu1 }
 0x50f   : > { %v13621_v3 = vadd.f32 %v13620_v28, %v13619_v18  ;;  %v13622_v40 = vpop.f32.mrb[14].mxu1  ;;  %13768 = vmatpush3.bf16.msra.mxu1 %v16183_v14  ;;  %v16234_v14 = vld [vmem:[%s16480_s15 + $0x2690] ss:$28 sps:$4 sm:$0xff]   ;;  %v16239_v28 = vld [vmem:[%s16480_s15 + $0x26c8] ss:$28 sps:$4 sm:$0xff]  }
 0x510   : > { %10797 = vmatpush1.bf16.msra.mxu0 %v16179_v13  ;;  %v13623_v32 = vpop.f32.mrb[15].mxu1  ;;  %13769 = vmatprep.subr.bf16.mxu1 %v16187_v16  ;;  %v16237_v13 = vld [vmem:[%s16480_s15 + $0x24d8] ss:$28 sps:$4 sm:$0xff]   ;;  %v16241_v16 = vld [vmem:[%s16480_s15 + $0x26cc] ss:$28 sps:$4 sm:$0xff]  }
 0x511   : > { %10798 = vmatprep.subr.bf16.mxu0 %v16186_v2  ;;  %v18030_v6 = vadd.f32 %v13621_v3, %v17987_v31  ;;  %v16199_v31 = vld [vmem:[%s16480_s15 + $0x2508] ss:$28 sps:$4 sm:$0xff]   ;;  %v16238_v2 = vld [vmem:[%s16480_s15 + $0x2318] ss:$28 sps:$4 sm:$0xff]   ;;  %v16242_v18 = vld [vmem:[%s16480_s15 + $0x2510] ss:$28 sps:$4 sm:$0xff]  }
 0x512   : > { %v16243_v3 = vld [vmem:[%s16480_s15 + $0x2350] ss:$28 sps:$4 sm:$0xff]   ;;  %v16246_v40 = vld [vmem:[%s16480_s15 + $0x2704] ss:$28 sps:$4 sm:$0xff]   ;;  %v16251_v32 = vld [vmem:[%s16480_s15 + $0x273c] ss:$28 sps:$4 sm:$0xff]  }
 0x513   : > { %13770 = vmatpush3.bf16.msra.mxu1 %v16188_v4  ;;  %v16248_v4 = vld [vmem:[%s16480_s15 + $0x2388] ss:$28 sps:$4 sm:$0xff]  }
 0x514   : > { %10799 = vmatpush1.bf16.msra.mxu0 %v16184_v5  ;;  %13771 = vmatprep.subr.bf16.mxu1 %v16192_v23  ;;  %v16247_v5 = vld [vmem:[%s16480_s15 + $0x2548] ss:$28 sps:$4 sm:$0xff]   ;;  %v16249_v23 = vld [vmem:[%s16480_s15 + $0x2738] ss:$28 sps:$4 sm:$0xff]  }
 0x515   : > { %10800 = vmatprep.subr.bf16.mxu0 %v16191_v42  ;;  %v16252_v42 = vld [vmem:[%s16480_s15 + $0x2580] ss:$28 sps:$4 sm:$0xff]  }
 0x517   : > { %13772 = vmatpush3.bf16.msra.mxu1 %v16193_v24  ;;  %v16254_v24 = vld [vmem:[%s16480_s15 + $0x2770] ss:$28 sps:$4 sm:$0xff]  }
 0x518   : > { %10801 = vmatpush1.bf16.msra.mxu0 %v16189_v54  ;;  %13779 = vmatprep.subr.bf16.mxu1 %v16197_v48  ;;  %v16257_v54 = vld [vmem:[%s16480_s15 + $0x25b8] ss:$28 sps:$4 sm:$0xff]   ;;  %v16261_v48 = vld [vmem:[%s16480_s15 + $0x27ac] ss:$28 sps:$4 sm:$0xff]  }
 0x519   : > { %10802 = vmatprep.subr.bf16.mxu0 %v16196_v26  ;;  %v16258_v26 = vld [vmem:[%s16480_s15 + $0x23f8] ss:$28 sps:$4 sm:$0xff]  }
 0x51a   : > { %11262 = vmatmul.mubr.bf16.vlgmr.msra.gmra.mrb[40].mxu1 %v17011_v25  ;;  %v16208_v25 = vld [vmem:[%s16480_s15 + $0x2008] ss:$28 sps:$4 sm:$0xff]  }
 0x51b   : > { %13780 = vmatpush3.bf16.msra.mxu1 %v16198_v29  ;;  %11301 = vmatprep.mubr.bf16.mxu1 %v17017_v33  ;;  %v16216_v33 = vld [vmem:[%s16480_s15 + $0x25b4] ss:$28 sps:$4 sm:$0xff]   ;;  %v16259_v29 = vld [vmem:[%s16480_s15 + $0x27a8] ss:$28 sps:$4 sm:$0xff]  }
 0x51c   : > { %10803 = vmatpush1.bf16.msra.mxu0 %v16194_v9  ;;  %13781 = vmatprep.subr.bf16.mxu1 %v16202_v30  ;;  %v16262_v9 = vld [vmem:[%s16480_s15 + $0x25f0] ss:$28 sps:$4 sm:$0xff]   ;;  %v16266_v30 = vld [vmem:[%s16480_s15 + $0x27e4] ss:$28 sps:$4 sm:$0xff]  }
 0x51d   : > { %10804 = vmatprep.subr.bf16.mxu0 %v16201_v21  ;;  %v16263_v21 = vld [vmem:[%s16480_s15 + $0x2430] ss:$28 sps:$4 sm:$0xff]  }
 0x51f   : > { %13782 = vmatpush3.bf16.msra.mxu1 %v16203_v47 }
 0x520   : > { %10805 = vmatpush1.bf16.msra.mxu0 %v16199_v31  ;;  %13783 = vmatprep.subr.bf16.mxu1 %v16207_v27  ;;  %v16267_v31 = vld [vmem:[%s16480_s15 + $0x2628] ss:$28 sps:$4 sm:$0xff]  }
 0x521   : > { %10806 = vmatprep.subr.bf16.mxu0 %v16206_v58 }
 0x523   : > { %13784 = vmatpush3.bf16.msra.mxu1 %v16208_v25  ;;  %v16264_v25 = vld [vmem:[%s16480_s15 + $0x27e0] ss:$28 sps:$4 sm:$0xff]  }
 0x524   : > { %10807 = vmatpush1.bf16.msra.mxu0 %v16204_v36  ;;  %13785 = vmatprep.subr.bf16.mxu1 %v16212_v43 }
 0x525   : > { %10808 = vmatprep.subr.bf16.mxu0 %v16211_v37  ;;  %v16268_v37 = vld [vmem:[%s16480_s15 + $0x2468] ss:$28 sps:$4 sm:$0xff]  }
 0x527   : > { %13786 = vmatpush3.bf16.msra.mxu1 %v16213_v38  ;;  %v16272_v38 = vld [vmem:[%s16480_s15 + $0x2660] ss:$28 sps:$4 sm:$0xff]  }
 0x528   : > { %10809 = vmatpush1.bf16.msra.mxu0 %v16209_v62  ;;  %13787 = vmatprep.subr.bf16.mxu1 %v16217_v57  ;;  %v16271_v62 = vld [vmem:[%s16480_s15 + $0x281c] ss:$28 sps:$4 sm:$0xff]  }
 0x529   : > { %10810 = vmatprep.subr.bf16.mxu0 %v16216_v33  ;;  %v16269_v57 = vld [vmem:[%s16480_s15 + $0x2818] ss:$28 sps:$4 sm:$0xff]  }
 0x52b   : > { %13788 = vmatpush3.bf16.msra.mxu1 %v16218_v49  ;;  %v16276_v49 = vld [vmem:[%s16480_s15 + $0x2854] ss:$28 sps:$4 sm:$0xff]  }
 0x52c   : > { %10811 = vmatpush1.bf16.msra.mxu0 %v16214_v45  ;;  %13789 = vmatprep.subr.bf16.mxu1 %v16222_v55  ;;  %v16273_v45 = vld [vmem:[%s16480_s15 + $0x24a0] ss:$28 sps:$4 sm:$0xff]   ;;  %v16274_v55 = vld [vmem:[%s16480_s15 + $0x2850] ss:$28 sps:$4 sm:$0xff]  }
 0x52d   : > { %10812 = vmatprep.subr.bf16.mxu0 %v16221_v46  ;;  %v13641_v53 = vpop.f32.mrb[16].mxu1  ;;  %v16277_v46 = vld [vmem:[%s16480_s15 + $0x2858] ss:$28 sps:$4 sm:$0xff]  }
 0x52e   : > { %v13642_v56 = vpop.f32.mrb[17].mxu1 }
 0x52f   : > { %v13643_v59 = vadd.f32 %v13642_v56, %v13641_v53  ;;  %v13644_v0 = vpop.f32.mrb[18].mxu1  ;;  %13790 = vmatpush3.bf16.msra.mxu1 %v16223_v15  ;;  %v16281_v15 = vld [vmem:[%s16480_s15 + $0x288c] ss:$28 sps:$4 sm:$0xff]   ;;  %v16286_v56 = vld [vmem:[%s16480_s15 + $0x28c4] ss:$28 sps:$4 sm:$0xff]  }
 0x530   : > { %10813 = vmatpush1.bf16.msra.mxu0 %v16219_v51  ;;  %v13645_v1 = vpop.f32.mrb[19].mxu1  ;;  %13791 = vmatprep.subr.bf16.mxu1 %v16227_v22  ;;  %v16278_v51 = vld [vmem:[%s16480_s15 + $0x2698] ss:$28 sps:$4 sm:$0xff]   ;;  %v16279_v22 = vld [vmem:[%s16480_s15 + $0x2888] ss:$28 sps:$4 sm:$0xff]  }
 0x531   : > { %10814 = vmatprep.subr.bf16.mxu0 %v16226_v52  ;;  %v18067_v12 = vadd.f32 %v13643_v59, %v18030_v6  ;;  %v16256_v6 = vld [vmem:[%s16480_s15 + $0x2774] ss:$28 sps:$4 sm:$0xff]   ;;  %v16287_v59 = vld [vmem:[%s16480_s15 + $0x28c8] ss:$28 sps:$4 sm:$0xff]   ;;  %v16284_v0 = vld [vmem:[%s16480_s15 + $0x28c0] ss:$28 sps:$4 sm:$0xff]  }
 0x532   : > { %v16282_v52 = vld [vmem:[%s16480_s15 + $0x2890] ss:$28 sps:$4 sm:$0xff]   ;;  %v16289_v1 = vld [vmem:[%s16480_s15 + $0x28f8] ss:$28 sps:$4 sm:$0xff]  }
 0x533   : > { %13792 = vmatpush3.bf16.msra.mxu1 %v16228_v61  ;;  %v16283_v53 = vld [vmem:[%s16480_s15 + $0x26d0] ss:$28 sps:$4 sm:$0xff]   ;;  %v16292_v61 = vld [vmem:[%s16480_s15 + $0x2900] ss:$28 sps:$4 sm:$0xff]  }
 0x534   : > { %10815 = vmatpush1.bf16.msra.mxu0 %v16224_v7  ;;  %13793 = vmatprep.subr.bf16.mxu1 %v16232_v10  ;;  %v16291_v7 = vld [vmem:[%s16480_s15 + $0x28fc] ss:$28 sps:$4 sm:$0xff]  }
 0x535   : > { %10816 = vmatprep.subr.bf16.mxu0 %v16231_v8  ;;  %v16293_v8 = vld [vmem:[%s16480_s15 + $0x2740] ss:$28 sps:$4 sm:$0xff]   ;;  %v16297_v10 = vld [vmem:[%s16480_s15 + $0x2938] ss:$28 sps:$4 sm:$0xff]  }
 0x537   : > { %13794 = vmatpush3.bf16.msra.mxu1 %v16233_v19  ;;  %v16301_v19 = vld [vmem:[%s16480_s15 + $0x296c] ss:$28 sps:$4 sm:$0xff]  }
 0x538   : > { %10817 = vmatpush1.bf16.msra.mxu0 %v16229_v20  ;;  %13801 = vmatprep.subr.bf16.mxu1 %v16237_v13  ;;  %v16298_v20 = vld [vmem:[%s16480_s15 + $0x2778] ss:$28 sps:$4 sm:$0xff]   ;;  %v16299_v13 = vld [vmem:[%s16480_s15 + $0x2968] ss:$28 sps:$4 sm:$0xff]  }
 0x539   : > { %10827 = vmatprep.subr.bf16.mxu0 %v16236_v35  ;;  %v16302_v35 = vld [vmem:[%s16480_s15 + $0x2970] ss:$28 sps:$4 sm:$0xff]  }
 0x53a   : > { %11302 = vmatmul.mubr.bf16.vlgmr.msra.gmra.mrb[44].mxu1 %v17098_v11  ;;  %v16244_v11 = vld [vmem:[%s16480_s15 + $0x2700] ss:$28 sps:$4 sm:$0xff]  }
 0x53b   : > { %10819 = vmatmul.mubr.bf16.vlgmr.msra.gmra.mrb[4].mxu0 %v17179_v60  ;;  %13802 = vmatpush3.bf16.msra.mxu1 %v16238_v2  ;;  %v16306_v2 = vld [vmem:[%s16480_s15 + $0x29a4] ss:$28 sps:$4 sm:$0xff]  }
 0x53c   : > { %10828 = vmatpush1.bf16.msra.mxu0 %v16234_v14  ;;  %13803 = vmatprep.subr.bf16.mxu1 %v16242_v18  ;;  %v16303_v14 = vld [vmem:[%s16480_s15 + $0x27b0] ss:$28 sps:$4 sm:$0xff]  }
 0x53d   : > { %10829 = vmatprep.subr.bf16.mxu0 %v16241_v16  ;;  %11341 = vmatprep.mubr.bf16.mxu1 %v17104_v17  ;;  %v16253_v17 = vld [vmem:[%s16480_s15 + $0x23c0] ss:$28 sps:$4 sm:$0xff]   ;;  %v16307_v16 = vld [vmem:[%s16480_s15 + $0x29a8] ss:$28 sps:$4 sm:$0xff]  }
 0x53e   : > { %10859 = vmatprep.mubr.bf16.mxu0 %v17185_v34 }
 0x53f   : > { %13804 = vmatpush3.bf16.msra.mxu1 %v16243_v3 }
 0x540   : > { %10830 = vmatpush1.bf16.msra.mxu0 %v16239_v28  ;;  %13805 = vmatprep.subr.bf16.mxu1 %v16247_v5  ;;  %v16304_v5 = vld [vmem:[%s16480_s15 + $0x29a0] ss:$28 sps:$4 sm:$0xff]  }
 0x541   : > { %10831 = vmatprep.subr.bf16.mxu0 %v16246_v40 }
 0x543   : > { %13806 = vmatpush3.bf16.msra.mxu1 %v16248_v4 }
 0x544   : > { %10832 = vmatpush1.bf16.msra.mxu0 %v16244_v11  ;;  %13807 = vmatprep.subr.bf16.mxu1 %v16252_v42  ;;  %v16308_v11 = vld [vmem:[%s16480_s15 + $0x27e8] ss:$28 sps:$4 sm:$0xff]   ;;  %v16312_v42 = vld [vmem:[%s16480_s15 + $0x29e0] ss:$28 sps:$4 sm:$0xff]  }
 0x545   : > { %10833 = vmatprep.subr.bf16.mxu0 %v16251_v32  ;;  %v16311_v32 = vld [vmem:[%s16480_s15 + $0x29dc] ss:$28 sps:$4 sm:$0xff]  }
 0x547   : > { %13808 = vmatpush3.bf16.msra.mxu1 %v16253_v17  ;;  %v16309_v17 = vld [vmem:[%s16480_s15 + $0x29d8] ss:$28 sps:$4 sm:$0xff]  }
 0x548   : > { %10834 = vmatpush1.bf16.msra.mxu0 %v16249_v23  ;;  %13809 = vmatprep.subr.bf16.mxu1 %v16257_v54  ;;  %v16316_v54 = vld [vmem:[%s16480_s15 + $0x2a14] ss:$28 sps:$4 sm:$0xff]  }
 0x549   : > { %10835 = vmatprep.subr.bf16.mxu0 %v16256_v6  ;;  %v16313_v6 = vld [vmem:[%s16480_s15 + $0x2820] ss:$28 sps:$4 sm:$0xff]  }
 0x54b   : > { %13810 = vmatpush3.bf16.msra.mxu1 %v16258_v26  ;;  %v16317_v26 = vld [vmem:[%s16480_s15 + $0x2a18] ss:$28 sps:$4 sm:$0xff]  }
 0x54c   : > { %10836 = vmatpush1.bf16.msra.mxu0 %v16254_v24  ;;  %13811 = vmatprep.subr.bf16.mxu1 %v16262_v9  ;;  %v16314_v24 = vld [vmem:[%s16480_s15 + $0x2a10] ss:$28 sps:$4 sm:$0xff]  }
 0x54d   : > { %10837 = vmatprep.subr.bf16.mxu0 %v16261_v48  ;;  %v13663_v47 = vpop.f32.mrb[20].mxu1  ;;  %v16403_v48 = vmov 0.0   ;;  %v16320_v9 = vld [vmem:[%s16480_s15 + $0x2a4c] ss:$28 sps:$4 sm:$0xff]  }
 0x54e   : > { %v13664_v58 = vpop.f32.mrb[21].mxu1 }
 0x54f   : > { %v13665_v27 = vadd.f32 %v13664_v58, %v13663_v47  ;;  %v13666_v36 = vpop.f32.mrb[22].mxu1  ;;  %13812 = vmatpush3.bf16.msra.mxu1 %v16263_v21  ;;  %v16321_v21 = vld [vmem:[%s16480_s15 + $0x2a50] ss:$28 sps:$4 sm:$0xff]   ;;  %v16328_v47 = vld [vmem:[%s16480_s15 + $0x2abc] ss:$28 sps:$4 sm:$0xff]  }
 0x550   : > { %10838 = vmatpush1.bf16.msra.mxu0 %v16259_v29  ;;  %v13667_v43 = vpop.f32.mrb[23].mxu1  ;;  %13813 = vmatprep.subr.bf16.mxu1 %v16267_v31  ;;  %v16318_v29 = vld [vmem:[%s16480_s15 + $0x2a48] ss:$28 sps:$4 sm:$0xff]   ;;  %v16326_v58 = vld [vmem:[%s16480_s15 + $0x2ab8] ss:$28 sps:$4 sm:$0xff]  }
 0x551   : > { %10839 = vmatprep.subr.bf16.mxu0 %v16266_v30  ;;  %v18106_v33 = vadd.f32 %v13665_v27, %v18067_v12  ;;  %v16294_v12 = vld [vmem:[%s16480_s15 + $0x2930] ss:$28 sps:$4 sm:$0xff]   ;;  %v16324_v30 = vld [vmem:[%s16480_s15 + $0x2a84] ss:$28 sps:$4 sm:$0xff]  }
 0x552   : > { %v16325_v31 = vld [vmem:[%s16480_s15 + $0x2a88] ss:$28 sps:$4 sm:$0xff]   ;;  %v16329_v27 = vld [vmem:[%s16480_s15 + $0x2ac0] ss:$28 sps:$4 sm:$0xff]   ;;  %v16330_v36 = vld [vmem:[%s16480_s15 + $0x2af0] ss:$28 sps:$4 sm:$0xff]  }
 0x553   : > { %13814 = vmatpush3.bf16.msra.mxu1 %v16268_v37  ;;  %v16336_v37 = vld [vmem:[%s16480_s15 + $0x2b2c] ss:$28 sps:$4 sm:$0xff]  }
 0x554   : > { %10840 = vmatpush1.bf16.msra.mxu0 %v16264_v25  ;;  %13815 = vmatprep.subr.bf16.mxu1 %v16272_v38  ;;  %v16333_v25 = vld [vmem:[%s16480_s15 + $0x2af8] ss:$28 sps:$4 sm:$0xff]   ;;  %v16334_v43 = vld [vmem:[%s16480_s15 + $0x2b28] ss:$28 sps:$4 sm:$0xff]  }
 0x555   : > { %10841 = vmatprep.subr.bf16.mxu0 %v16271_v62  ;;  %v16337_v62 = vld [vmem:[%s16480_s15 + $0x2b30] ss:$28 sps:$4 sm:$0xff]   ;;  %v16340_v38 = vld [vmem:[%s16480_s15 + $0x2b64] ss:$28 sps:$4 sm:$0xff]  }
 0x557   : > { %13816 = vmatpush3.bf16.msra.mxu1 %v16273_v45 }
 0x558   : > { %10842 = vmatpush1.bf16.msra.mxu0 %v16269_v57  ;;  %13823 = vmatprep.subr.bf16.mxu1 %v16277_v46  ;;  %v16338_v46 = vld [vmem:[%s16480_s15 + $0x2b60] ss:$28 sps:$4 sm:$0xff]  }
 0x559   : > { %10843 = vmatprep.subr.bf16.mxu0 %v16276_v49 }
 0x55a   : > { %11342 = vmatmul.mubr.bf16.vlgmr.msra.gmra.mrb[48].mxu1 %v17179_v60  ;;  %v16288_v60 = vld [vmem:[%s16480_s15 + $0x2708] ss:$28 sps:$4 sm:$0xff]  }
 0x55b   : > { %13824 = vmatpush3.bf16.msra.mxu1 %v16278_v51  ;;  %11381 = vmatprep.mubr.bf16.mxu1 %v17185_v34  ;;  %v16296_v34 = vld [vmem:[%s16480_s15 + $0x2934] ss:$28 sps:$4 sm:$0xff]  }
 0x55c   : > { %10844 = vmatpush1.bf16.msra.mxu0 %v16274_v55  ;;  %13825 = vmatprep.subr.bf16.mxu1 %v16282_v52  ;;  %v16341_v55 = vld [vmem:[%s16480_s15 + $0x2b68] ss:$28 sps:$4 sm:$0xff]  }
 0x55d   : > { %10845 = vmatprep.subr.bf16.mxu0 %v16281_v15  ;;  %v16344_v15 = vld [vmem:[%s16480_s15 + $0x2b9c] ss:$28 sps:$4 sm:$0xff]  }
 0x55f   : > { %13826 = vmatpush3.bf16.msra.mxu1 %v16283_v53  ;;  %v16345_v53 = vld [vmem:[%s16480_s15 + $0x2ba0] ss:$28 sps:$4 sm:$0xff]  }
 0x560   : > { %10846 = vmatpush1.bf16.msra.mxu0 %v16279_v22  ;;  %13827 = vmatprep.subr.bf16.mxu1 %v16287_v59  ;;  %v16342_v22 = vld [vmem:[%s16480_s15 + $0x2b98] ss:$28 sps:$4 sm:$0xff]  }
 0x561   : > { %10847 = vmatprep.subr.bf16.mxu0 %v16286_v56 }
 0x563   : > { %13828 = vmatpush3.bf16.msra.mxu1 %v16288_v60 }
 0x564   : > { %10848 = vmatpush1.bf16.msra.mxu0 %v16284_v0  ;;  %13829 = vmatprep.subr.bf16.mxu1 %v16292_v61 }
 0x565   : > { %10849 = vmatprep.subr.bf16.mxu0 %v16291_v7 }
 0x567   : > { %13830 = vmatpush3.bf16.msra.mxu1 %v16293_v8 }
 0x568   : > { %10850 = vmatpush1.bf16.msra.mxu0 %v16289_v1  ;;  %13831 = vmatprep.subr.bf16.mxu1 %v16297_v10 }
 0x569   : > { %10851 = vmatprep.subr.bf16.mxu0 %v16296_v34 }
 0x56b   : > { %13832 = vmatpush3.bf16.msra.mxu1 %v16298_v20 }
 0x56c   : > { %10852 = vmatpush1.bf16.msra.mxu0 %v16294_v12  ;;  %13833 = vmatprep.subr.bf16.mxu1 %v16302_v35 }
 0x56d   : > { %10853 = vmatprep.subr.bf16.mxu0 %v16301_v19  ;;  %v13685_v18 = vpop.f32.mrb[24].mxu1 }
 0x56e   : > { %v13686_v28 = vpop.f32.mrb[25].mxu1 }
 0x56f   : > { %v13687_v3 = vadd.f32 %v13686_v28, %v13685_v18  ;;  %v13688_v40 = vpop.f32.mrb[26].mxu1  ;;  %13834 = vmatpush3.bf16.msra.mxu1 %v16303_v14 }
 0x570   : > { %10854 = vmatpush1.bf16.msra.mxu0 %v16299_v13  ;;  %v13689_v4 = vpop.f32.mrb[27].mxu1  ;;  %13835 = vmatprep.subr.bf16.mxu1 %v16307_v16 }
 0x571   : > { %10855 = vmatprep.subr.bf16.mxu0 %v16306_v2  ;;  %v18143_v23 = vadd.f32 %v13687_v3, %v18106_v33 }
 0x573   : > { %13836 = vmatpush3.bf16.msra.mxu1 %v16308_v11 }
 0x574   : > { %10856 = vmatpush1.bf16.msra.mxu0 %v16304_v5  ;;  %13837 = vmatprep.subr.bf16.mxu1 %v16312_v42 }
 0x575   : > { %10857 = vmatprep.subr.bf16.mxu0 %v16311_v32 }
 0x577   : > { %13838 = vmatpush3.bf16.msra.mxu1 %v16313_v6 }
 0x578   : > { %10858 = vmatpush1.bf16.msra.mxu0 %v16309_v17  ;;  %13978 = vmatprep.subr.bf16.mxu1 %v16403_v48 }
 0x579   : > { %10868 = vmatprep.subr.bf16.mxu0 %v16316_v54 }
 0x57a   : > { %11382 = vmatmul.mubr.bf16.vlgmr.msra.gmra.mrb[52].mxu1 %v17253_v41 }
 0x57b   : > { %10860 = vmatmul.mubr.bf16.vlgmr.msra.gmra.mrb[4].mxu0 %v17253_v41  ;;  %13979 = vmatpush3.bf16.msra.mxu1 %v16317_v26  ;;  %v16322_v41 = vld [vmem:[%s16480_s15 + $0x2a80] ss:$28 sps:$4 sm:$0xff]  }
 0x57c   : > { %10869 = vmatpush1.bf16.msra.mxu0 %v16314_v24  ;;  %13980 = vmatprep.subr.bf16.mxu1 %v16403_v48 }
 0x57d   : > { %10870 = vmatprep.subr.bf16.mxu0 %v16320_v9  ;;  %10900 = vmatprep.mubr.bf16.mxu0 %v16402_v63  ;;  %v16332_v63 = vld [vmem:[%s16480_s15 + $0x2af4] ss:$28 sps:$4 sm:$0xff]  }
 0x57e   : > { %13994 = vmatprep.mubr.msk.bf16.mxu1 %vm16404_vm5, %v16403_v48 }
 0x57f   : > { %13981 = vmatpush3.bf16.msra.mxu1 %v16321_v21 }
 0x580   : > { %10871 = vmatpush1.bf16.msra.mxu0 %v16318_v29  ;;  %13982 = vmatprep.subr.bf16.mxu1 %v16403_v48 }
 0x581   : > { %10872 = vmatprep.subr.bf16.mxu0 %v16324_v30 }
 0x583   : > { %13983 = vmatpush3.bf16.msra.mxu1 %v16325_v31 }
 0x584   : > { %10873 = vmatpush1.bf16.msra.mxu0 %v16322_v41  ;;  %13984 = vmatprep.subr.bf16.mxu1 %v16403_v48 }
 0x585   : > { %10874 = vmatprep.subr.bf16.mxu0 %v16328_v47 }
 0x587   : > { %13985 = vmatpush3.bf16.msra.mxu1 %v16329_v27 }
 0x588   : > { %10875 = vmatpush1.bf16.msra.mxu0 %v16326_v58  ;;  %13986 = vmatprep.subr.bf16.mxu1 %v16403_v48 }
 0x589   : > { %10876 = vmatprep.subr.bf16.mxu0 %v16332_v63 }
 0x58b   : > { %13987 = vmatpush3.bf16.msra.mxu1 %v16333_v25 }
 0x58c   : > { %10877 = vmatpush1.bf16.msra.mxu0 %v16330_v36  ;;  %13988 = vmatprep.subr.bf16.mxu1 %v16403_v48 }
 0x58d   : > { %10878 = vmatprep.subr.bf16.mxu0 %v16336_v37  ;;  %v13707_v33 = vpop.f32.mrb[28].mxu1 }
 0x58e   : > { %v13708_v57 = vpop.f32.mrb[29].mxu1 }
 0x58f   : > { %v13709_v45 = vadd.f32 %v13708_v57, %v13707_v33  ;;  %v13710_v49 = vpop.f32.mrb[30].mxu1  ;;  %13989 = vmatpush3.bf16.msra.mxu1 %v16337_v62  ;;  %v11571_v33 = vld [vmem:[%s18601_s3 + $0x80] sm:$0xff] (!%p13571_p7)  ;;  %v11572_v57 = vld [vmem:[%s18601_s3 + $0x88] sm:$0xff] (!%p13571_p7) }
 0x590   : > { %10879 = vmatpush1.bf16.msra.mxu0 %v16334_v43  ;;  %v13711_v51 = vpop.f32.mrb[31].mxu1  ;;  %13990 = vmatprep.subr.bf16.mxu1 %v16403_v48  ;;  %v336_v43 = vld [vmem:[#allocation2 + $0x8] sm:$0x3f]  ;;  %v14038_v49 = vpack.c.bf16 (!%p13571_p7), %v11572_v57, %v11571_v33  ;;  %v11565_v57 = vld [vmem:[%s18601_s3 + $0x50] sm:$0xff] (!%p13571_p7) }
 0x591   : > { %10880 = vmatprep.subr.bf16.mxu0 %v16340_v38  ;;  %v11144_v52 = vadd.f32 %v13709_v45, %v18143_v23  ;;  %v11555_v45 = vld [vmem:[%s18601_s3] sm:$0xff] (!%p13571_p7)  ;;  %v11604_v51 = vld [vmem:[%s18601_s3 + $0x188] sm:$0xff] (!%p13571_p7) }
 0x593   : > { %13991 = vmatpush3.bf16.msra.mxu1 %v16341_v55  ;;  %v11603_v55 = vld [vmem:[%s18601_s3 + $0x180] sm:$0xff] (!%p13571_p7) }
 0x594   : > { %10881 = vmatpush1.bf16.msra.mxu0 %v16338_v46  ;;  %13992 = vmatprep.subr.bf16.mxu1 %v16403_v48  ;;  %v11556_v46 = vld [vmem:[%s18601_s3 + $0x8] sm:$0xff] (!%p13571_p7) }
 0x595   : > { %10882 = vmatprep.subr.bf16.mxu0 %v16344_v15  ;;  %v14040_v15 = vpack.c.bf16 (!%p13571_p7), %v11556_v46, %v11555_v45  ;;  %v11566_v45 = vld [vmem:[%s18601_s3 + $0x58] sm:$0xff] (!%p13571_p7) }
 0x597   : > { %13993 = vmatpush3.bf16.msra.mxu1 %v16345_v53  ;;  %v11588_v53 = vld [vmem:[%s18601_s3 + $0x108] sm:$0xff] (!%p13571_p7) }
 0x598   : > { %10883 = vmatpush1.bf16.msra.mxu0 %v16342_v22  ;;  %v11587_v22 = vld [vmem:[%s18601_s3 + $0x100] sm:$0xff] (!%p13571_p7) }
 0x599   : > { %14039 = vmatprep.subr.bf16.mxu0 (!%p13571_p7), %v14038_v49 }
 0x59a   : > { %13995 = vmatmul.mubr.bf16.vlgmr.msra.gmra.mrb[56].mxu1 %v17292_v39 }
 0x59b   : > { %10901 = vmatmul.mubr.bf16.vlgmr.msra.gmra.mrb[4].mxu0 %v17292_v39 }
 0x59c   : > { %14041 = vmatpush3.bf16.msra.mxu0 (!%p13571_p7), %v14040_v15  ;;  %v11583_v15 = vld [vmem:[%s18601_s3 + $0xe0] sm:$0xff] (!%p13571_p7) }
 0x5ad   : > { %v13729_v56 = vpop.f32.mrb[32].mxu1 }
 0x5ae   : > { %v13730_v59 = vpop.f32.mrb[33].mxu1 }
 0x5af   : > { %v13731_v0 = vadd.f32 %v13730_v59, %v13729_v56  ;;  %v13732_v60 = vpop.f32.mrb[34].mxu1  ;;  %v11573_v56 = vld [vmem:[%s18601_s3 + $0x90] sm:$0xff] (!%p13571_p7)  ;;  %v14072_v59 = vpack.c.bf16 (!%p13571_p7), %v11588_v53, %v11587_v22  ;;  %v11584_v53 = vld [vmem:[%s18601_s3 + $0xe8] sm:$0xff] (!%p13571_p7) }
 0x5b0   : > { %v13733_v7 = vpop.f32.mrb[35].mxu1  ;;  %v11557_v60 = vld [vmem:[%s18601_s3 + $0x10] sm:$0xff] (!%p13571_p7) }
 0x5b1   : > { %v11184_v61 = vadd.f32 %v13731_v0, %v11144_v52  ;;  %v14070_v52 = vpack.c.bf16 (!%p13571_p7), %v11604_v51, %v11603_v55  ;;  %v11574_v0 = vld [vmem:[%s18601_s3 + $0x98] sm:$0xff] (!%p13571_p7)  ;;  %v11597_v55 = vld [vmem:[%s18601_s3 + $0x150] sm:$0xff] (!%p13571_p7) }
 0x5b2   : > { %v11558_v7 = vld [vmem:[%s18601_s3 + $0x18] sm:$0xff] (!%p13571_p7) }
 0x5b3   : > { %14071 = vmatprep.subr.bf16.mxu1 (!%p13571_p7), %v14070_v52  ;;  %v11598_v51 = vld [vmem:[%s18601_s3 + $0x158] sm:$0xff] (!%p13571_p7)  ;;  %v11490_v52 = vsub.s32 (!%p13571_p7), 0, %v16522_v44 }
 0x5b4   : > { %14073 = vmatpush3.bf16.msra.mxu1 (!%p13571_p7), %v14072_v59  ;;  %v11616_v59 = vld [vmem:[%s18601_s3 + $0x1e8] sm:$0xff] (!%p13571_p7) }
 0x5cd   : > { %v13751_v1 = vpop.f32.mrb[36].mxu1 }
 0x5ce   : > { %v13752_v8 = vpop.f32.mrb[37].mxu1 }
 0x5cf   : > { %v13753_v34 = vadd.f32 %v13752_v8, %v13751_v1  ;;  %v13754_v10 = vpop.f32.mrb[38].mxu1  ;;  %v14044_v1 = vpack.c.bf16 (!%p13571_p7), %v11558_v7, %v11557_v60  ;;  %v11605_v8 = vld [vmem:[%s18601_s3 + $0x190] sm:$0xff] (!%p13571_p7)  ;;  %v11498_v60 = vsub.s32 (!%p13571_p7), 2, %v16522_v44  ;;  %v11502_v7 = vsub.s32 (!%p13571_p7), 3, %v16522_v44 }
 0x5d0   : > { %v13755_v12 = vpop.f32.mrb[39].mxu1  ;;  %v11589_v10 = vld [vmem:[%s18601_s3 + $0x110] sm:$0xff] (!%p13571_p7) }
 0x5d1   : > { %v11224_v20 = vadd.f32 %v13753_v34, %v11184_v61  ;;  %v14042_v61 = vpack.c.bf16 (!%p13571_p7), %v11574_v0, %v11573_v56  ;;  %v11606_v34 = vld [vmem:[%s18601_s3 + $0x198] sm:$0xff] (!%p13571_p7)  ;;  %v11615_v56 = vld [vmem:[%s18601_s3 + $0x1e0] sm:$0xff] (!%p13571_p7)  ;;  %v11494_v0 = vsub.s32 (!%p13571_p7), 1, %v16522_v44 }
 0x5d2   : > { %v14074_v12 = vpack.c.bf16 (!%p13571_p7), %v11606_v34, %v11605_v8  ;;  %v14060_v8 = vpack.c.bf16 (!%p13571_p7), %v11566_v45, %v11565_v57  ;;  %v11567_v34 = vld [vmem:[%s18601_s3 + $0x60] sm:$0xff] (!%p13571_p7)  ;;  %v11620_v45 = vld [vmem:[%s18601_s3 + $0x208] sm:$0xff] (!%p13571_p7) }
 0x5d3   : > { %14043 = vmatprep.subr.bf16.mxu0 (!%p13571_p7), %v14042_v61  ;;  %v11506_v61 = vsub.s32 (!%p13571_p7), 4, %v16522_v44  ;;  %v11619_v57 = vld [vmem:[%s18601_s3 + $0x200] sm:$0xff] (!%p13571_p7) }
 0x5d4   : > { %14075 = vmatprep.subr.bf16.mxu1 (!%p13571_p7), %v14074_v12  ;;  %14045 = vmatpush3.bf16.msra.mxu0 (!%p13571_p7), %v14044_v1  ;;  %v11510_v1 = vsub.s32 (!%p13571_p7), 5, %v16522_v44  ;;  %v14092_v12 = vpack.c.bf16 (!%p13571_p7), %v11598_v51, %v11597_v55  ;;  %v11637_v51 = vld [vmem:[%s18601_s3 + $0x290] sm:$0xff] (!%p13571_p7) }
 0x5ed   : > { %v13773_v19 = vpop.f32.mrb[40].mxu1 }
 0x5ee   : > { %v13774_v35 = vpop.f32.mrb[41].mxu1 }
 0x5ef   : > { %v13775_v13 = vadd.f32 %v13774_v35, %v13773_v19  ;;  %v13776_v14 = vpop.f32.mrb[42].mxu1  ;;  %v11575_v19 = vld [vmem:[%s18601_s3 + $0xa0] sm:$0xff] (!%p13571_p7)  ;;  %v11576_v35 = vld [vmem:[%s18601_s3 + $0xa8] sm:$0xff] (!%p13571_p7) }
 0x5f0   : > { %v13777_v2 = vpop.f32.mrb[43].mxu1  ;;  %v14046_v14 = vpack.c.bf16 (!%p13571_p7), %v11576_v35, %v11575_v19  ;;  %v14094_v19 = vpack.c.bf16 (!%p13571_p7), %v11616_v59, %v11615_v56  ;;  %v11599_v35 = vld [vmem:[%s18601_s3 + $0x160] sm:$0xff] (!%p13571_p7)  ;;  %v11652_v56 = vld [vmem:[%s18601_s3 + $0x308] sm:$0xff] (!%p13571_p7) }
 0x5f1   : > { %v11264_v16 = vadd.f32 %v13775_v13, %v11224_v20  ;;  %v11590_v20 = vld [vmem:[%s18601_s3 + $0x118] sm:$0xff] (!%p13571_p7)  ;;  %v11559_v2 = vld [vmem:[%s18601_s3 + $0x20] sm:$0xff] (!%p13571_p7) }
 0x5f2   : > { %v14076_v13 = vpack.c.bf16 (!%p13571_p7), %v11590_v20, %v11589_v10  ;;  %14047 = vmatprep.subr.bf16.mxu0 (!%p13571_p7), %v14046_v14  ;;  %v11568_v10 = vld [vmem:[%s18601_s3 + $0x68] sm:$0xff] (!%p13571_p7)  ;;  %v14062_v20 = vpack.c.bf16 (!%p13571_p7), %v11584_v53, %v11583_v15  ;;  %v11486_v14 = vld [vmem:[%s18600_s2] sm:$0x7f] (!%p13571_p7)  ;;  %v11638_v15 = vld [vmem:[%s18601_s3 + $0x298] sm:$0xff] (!%p13571_p7) }
 0x5f3   : > { %v11651_v53 = vld [vmem:[%s18601_s3 + $0x300] sm:$0xff] (!%p13571_p7) }
 0x5f4   : > { %14077 = vmatpush3.bf16.msra.mxu1 (!%p13571_p7), %v14076_v13  ;;  %v11600_v13 = vld [vmem:[%s18601_s3 + $0x168] sm:$0xff] (!%p13571_p7) }
 0x60d   : > { %v13795_v18 = vpop.f32.mrb[44].mxu1 }
 0x60e   : > { %v13796_v39 = vpop.f32.mrb[45].mxu1 }
 0x60f   : > { %v13797_v28 = vadd.f32 %v13796_v39, %v13795_v18  ;;  %v13798_v3 = vpop.f32.mrb[46].mxu1  ;;  %v11607_v18 = vld [vmem:[%s18601_s3 + $0x1a0] sm:$0xff] (!%p13571_p7)  ;;  %v11608_v39 = vld [vmem:[%s18601_s3 + $0x1a8] sm:$0xff] (!%p13571_p7) }
 0x610   : > { %v13799_v40 = vpop.f32.mrb[47].mxu1  ;;  %v11592_v3 = vld [vmem:[%s18601_s3 + $0x128] sm:$0xff] (!%p13571_p7) }
 0x611   : > { %v11304_v5 = vadd.f32 %v13797_v28, %v11264_v16  ;;  %v11560_v16 = vld [vmem:[%s18601_s3 + $0x28] sm:$0xff] (!%p13571_p7)  ;;  %v11591_v28 = vld [vmem:[%s18601_s3 + $0x120] sm:$0xff] (!%p13571_p7) }
 0x612   : > { %v14048_v40 = vpack.c.bf16 (!%p13571_p7), %v11560_v16, %v11559_v2  ;;  %v11514_v2 = vsub.s32 (!%p13571_p7), 6, %v16522_v44  ;;  %v11585_v16 = vld [vmem:[%s18601_s3 + $0xf0] sm:$0xff] (!%p13571_p7)  ;;  %v11618_v44 = vld [vmem:[%s18601_s3 + $0x1f8] sm:$0xff] (!%p13571_p7) }
 0x614   : > { %14049 = vmatpush3.bf16.msra.mxu0 (!%p13571_p7), %v14048_v40  ;;  %v11503_v40 = vrot.slane (!%p13571_p7), %v11486_v14, %v11502_v7 }
 0x62d   : > { %v13817_v11 = vpop.f32.mrb[48].mxu1 }
 0x62e   : > { %v13818_v4 = vpop.f32.mrb[49].mxu1 }
 0x62f   : > { %v13819_v32 = vadd.f32 %v13818_v4, %v13817_v11  ;;  %v13820_v42 = vpop.f32.mrb[50].mxu1  ;;  %v11577_v11 = vld [vmem:[%s18601_s3 + $0xb0] sm:$0xff] (!%p13571_p7)  ;;  %v11578_v4 = vld [vmem:[%s18601_s3 + $0xb8] sm:$0xff] (!%p13571_p7) }
 0x630   : > { %v13821_v23 = vpop.f32.mrb[51].mxu1  ;;  %v14080_v42 = vpack.c.bf16 (!%p13571_p7), %v11592_v3, %v11591_v28  ;;  %v11495_v28 = vrot.slane (!%p13571_p7), %v11486_v14, %v11494_v0  ;;  %v11499_v3 = vrot.slane (!%p13571_p7), %v11486_v14, %v11498_v60  ;;  %v14104_v60 = vpack.c.bf16 (!%p13571_p7), %v11620_v45, %v11619_v57  ;;  %v11987_v45 = vld [vmem:[%s18603_s5] sm:$0xff] (!%p13571_p7) }
 0x631   : > { %v11344_v17 = vadd.f32 %v13819_v32, %v11304_v5  ;;  %v14078_v5 = vpack.c.bf16 (!%p13571_p7), %v11608_v39, %v11607_v18  ;;  %v11561_v32 = vld [vmem:[%s18601_s3 + $0x30] sm:$0xff] (!%p13571_p7)  ;;  %v14050_v23 = vpack.c.bf16 (!%p13571_p7), %v11578_v4, %v11577_v11  ;;  %v11586_v18 = vld [vmem:[%s18601_s3 + $0xf8] sm:$0xff] (!%p13571_p7)  ;;  %v11491_v39 = vrot.slane (!%p13571_p7), %v11486_v14, %v11490_v52 }
 0x632   : > { %v11507_v11 = vrot.slane (!%p13571_p7), %v11486_v14, %v11506_v61  ;;  %v11511_v4 = vrot.slane (!%p13571_p7), %v11486_v14, %v11510_v1  ;;  %v16405_v52 = vmov (!%p13571_p7), 0.0|0.0   ;;  %v14106_v61 = vpack.c.bf16 (!%p13571_p7), %v11638_v15, %v11637_v51  ;;  %v11621_v1 = vld [vmem:[%s18601_s3 + $0x210] sm:$0xff] (!%p13571_p7)  ;;  %v11990_v51 = vld [vmem:[%s18603_s5 + $0x18] sm:$0xff] (!%p13571_p7) }
 0x633   : > { %14079 = vmatprep.subr.bf16.mxu1 (!%p13571_p7), %v14078_v5  ;;  %14051 = vmatprep.subr.bf16.mxu0 (!%p13571_p7), %v14050_v23  ;;  %v11617_v5 = vld [vmem:[%s18601_s3 + $0x1f0] sm:$0xff] (!%p13571_p7)  ;;  %v11516_v23 = vcombine.low (!%p13571_p7), %v11491_v39, %v11495_v28  ;;  %v11624_v39 = vld [vmem:[%s18601_s3 + $0x228] sm:$0xff] (!%p13571_p7) }
 0x634   : > { %14081 = vmatpush3.bf16.msra.mxu1 (!%p13571_p7), %v14080_v42  ;;  %v14096_v42 = vpack.c.bf16 (!%p13571_p7), %v11600_v13, %v11599_v35  ;;  %v11653_v35 = vld [vmem:[%s18601_s3 + $0x310] sm:$0xff] (!%p13571_p7)  ;;  %v11654_v13 = vld [vmem:[%s18601_s3 + $0x318] sm:$0xff] (!%p13571_p7) }
 0x64d   : > { %v13839_v6 = vpop.f32.mrb[52].mxu1 }
 0x64e   : > { %v13840_v54 = vpop.f32.mrb[53].mxu1 }
 0x64f   : > { %v13841_v24 = vadd.f32 %v13840_v54, %v13839_v6  ;;  %v13842_v26 = vpop.f32.mrb[54].mxu1  ;;  %v11609_v6 = vld [vmem:[%s18601_s3 + $0x1b0] sm:$0xff] (!%p13571_p7)  ;;  %v11610_v54 = vld [vmem:[%s18601_s3 + $0x1b8] sm:$0xff] (!%p13571_p7) }
 0x650   : > { %v13843_v48 = vpop.f32.mrb[55].mxu1  ;;  %v11593_v26 = vld [vmem:[%s18601_s3 + $0x130] sm:$0xff] (!%p13571_p7) }
 0x651   : > { %v11384_v9 = vadd.f32 %v13841_v24, %v11344_v17  ;;  %v11562_v17 = vld [vmem:[%s18601_s3 + $0x38] sm:$0xff] (!%p13571_p7)  ;;  %v14082_v24 = vpack.c.bf16 (!%p13571_p7), %v11610_v54, %v11609_v6  ;;  %v14066_v6 = vpack.c.bf16 (!%p13571_p7), %v11586_v18, %v11585_v16  ;;  %v11569_v54 = vld [vmem:[%s18601_s3 + $0x70] sm:$0xff] (!%p13571_p7)  ;;  %v11623_v18 = vld [vmem:[%s18601_s3 + $0x220] sm:$0xff] (!%p13571_p7) }
 0x652   : > { %v11594_v48 = vld [vmem:[%s18601_s3 + $0x138] sm:$0xff] (!%p13571_p7) }
 0x653   : > { %14083 = vmatprep.subr.bf16.mxu1 (!%p13571_p7), %v14082_v24  ;;  %v11570_v24 = vld [vmem:[%s18601_s3 + $0x78] sm:$0xff] (!%p13571_p7) }
 0x66d   : > { %v11423_v21 = vpop.f32.mrb[56].mxu1 }
 0x66e   : > { %v10902_v29 = vpop.f32.mrb[4].mxu0  ;;  %v11424_v30 = vadd.f32 %v11423_v21, %v11384_v9  ;;  %v13996_v31 = vpop.f32.mrb[57].mxu1  ;;  %v11579_v9 = vld [vmem:[%s18601_s3 + $0xc0] sm:$0xff] (!%p13571_p7)  ;;  %v14052_v21 = vpack.c.bf16 (!%p13571_p7), %v11562_v17, %v11561_v32  ;;  %v14064_v32 = vpack.c.bf16 (!%p13571_p7), %v11568_v10, %v11567_v34  ;;  %v11517_v17 = vcombine.low (!%p13571_p7), %v11499_v3, %v11503_v40  ;;  %v11641_v3 = vld [vmem:[%s18601_s3 + $0x2b0] sm:$0xff] (!%p13571_p7)  ;;  %v11642_v40 = vld [vmem:[%s18601_s3 + $0x2b8] sm:$0xff] (!%p13571_p7) }
 0x66f   : > { %v10904_v41 = vpop.f32.mrb[5].mxu0  ;;  %v11426_v27 = vpop.f32.mrb[58].mxu1  ;;  %v14084_v31 = vpack.c.bf16 (!%p13571_p7), %v11594_v48, %v11593_v26  ;;  %v11601_v26 = vld [vmem:[%s18601_s3 + $0x170] sm:$0xff] (!%p13571_p7)  ;;  %v11515_v48 = vrot.slane (!%p13571_p7), %v11486_v14, %v11514_v2  ;;  %v11639_v10 = vld [vmem:[%s18601_s3 + $0x2a0] sm:$0xff] (!%p13571_p7) }
 0x670   : > { %v11453_v47 = vcombine.low %v10902_v29, %v10904_v41  ;;  %v10906_v58 = vpop.f32.mrb[6].mxu0  ;;  %v11467_v63 = vrot.slane %v11424_v30, %v16530_v50  ;;  %v13997_v25 = vpop.f32.mrb[59].mxu1  ;;  %v11580_v29 = vld [vmem:[%s18601_s3 + $0xc8] sm:$0xff] (!%p13571_p7)  ;;  %v11611_v30 = vld [vmem:[%s18601_s3 + $0x1c0] sm:$0xff] (!%p13571_p7)  ;;  %14053 = vmatpush3.bf16.msra.mxu0 (!%p13571_p7), %v14052_v21  ;;  %v11524_v21 = vrot.slane (!%p13571_p7), %v11516_v23, %v16530_v50 }
 0x671   : > { %v10907_v36 = vpop.f32.mrb[7].mxu0  ;;  %v11612_v41 = vld [vmem:[%s18601_s3 + $0x1c8] sm:$0xff] (!%p13571_p7)  ;;  %v11563_v58 = vld [vmem:[%s18601_s3 + $0x40] sm:$0xff] (!%p13571_p7)  ;;  %14085 = vmatpush3.bf16.msra.mxu1 (!%p13571_p7), %v14084_v31 }
 0x672   : > { %v11460_v37 = vrot.slane %v11453_v47, %v16530_v50  ;;  %11483 = sbr.rel (%p13571_p7) target bundleno = 2137 (0x859), region = 56  ;;  %v14054_v47 = vpack.c.bf16 (!%p13571_p7), %v11580_v29, %v11579_v9  ;;  %v11564_v27 = vld [vmem:[%s18601_s3 + $0x48] sm:$0xff] (!%p13571_p7)  ;;  %v14086_v36 = vpack.c.bf16 (!%p13571_p7), %v11612_v41, %v11611_v30  ;;  %v11533_v9 = vcombine.low (!%p13571_p7), %v11507_v11, %v11511_v4  ;;  %v11602_v41 = vld [vmem:[%s18601_s3 + $0x178] sm:$0xff] (!%p13571_p7)  ;;  %v11635_v31 = vld [vmem:[%s18601_s3 + $0x280] sm:$0xff] (!%p13571_p7) }
 0x673   : > { %v11596_v25 = vld [vmem:[%s18601_s3 + $0x148] sm:$0xff] (!%p13571_p7)  ;;  %v14056_v33 = vpack.c.bf16 (!%p13571_p7), %v11564_v27, %v11563_v58  ;;  %v14098_v29 = vpack.c.bf16 (!%p13571_p7), %v11618_v44, %v11617_v5  ;;  %v11531_v30 = vrot.slane (!%p13571_p7), %v11517_v17, %v16530_v50  ;;  %v11484_v58 = vld [vmem:[#allocation2] sm:$0xff] (!%p13571_p7)  ;;  %v14138_v5 = vpack.c.bf16 (!%p13571_p7), %v11654_v13, %v11653_v35 }
 0x674   : > { %v11468_v62 = vcombine.low %v11460_v37, %v11467_v63  ;;  %v11595_v63 = vld [vmem:[%s18601_s3 + $0x140] sm:$0xff] (!%p13571_p7)  ;;  %v11581_v37 = vld [vmem:[%s18601_s3 + $0xd0] sm:$0xff] (!%p13571_p7)  ;;  %14055 = vmatprep.subr.bf16.mxu0 (!%p13571_p7), %v14054_v47  ;;  %14087 = vmatprep.subr.bf16.mxu1 (!%p13571_p7), %v14086_v36  ;;  %v11636_v47 = vld [vmem:[%s18601_s3 + $0x288] sm:$0xff] (!%p13571_p7)  ;;  %v11540_v27 = vrot.slane (!%p13571_p7), %v11533_v9, %v16530_v50  ;;  %v14068_v36 = vpack.c.bf16 (!%p13571_p7), %v11570_v24, %v11569_v54  ;;  %v16407_v44 = vmov (!%p13571_p7), 0.0  }
 0x675   : > { %v14088_v49 = vpack.c.bf16 (!%p13571_p7), %v11596_v25, %v11595_v63  ;;  %14057 = vmatpush3.bf16.msra.mxu0 (!%p13571_p7), %v14056_v33  ;;  %v11547_v63 = vrot.slane (!%p13571_p7), %v11515_v48, %v16530_v50  ;;  %v11532_v25 = vcombine.low (!%p13571_p7), %v11524_v21, %v11531_v30  ;;  %v14112_v11 = vpack.c.bf16 (!%p13571_p7), %v11624_v39, %v11623_v18  ;;  %v11643_v17 = vld [vmem:[%s18601_s3 + $0x2c0] sm:$0xff] (!%p13571_p7)  ;;  %v11645_v48 = vld [vmem:[%s18601_s3 + $0x2d0] sm:$0xff] (!%p13571_p7)  ;;  %v11646_v9 = vld [vmem:[%s18601_s3 + $0x2d8] sm:$0xff] (!%p13571_p7) }
 0x676   : > { %v11472_v38 = vadd.f32 %v11468_v62, %v336_v43  ;;  %v11582_v43 = vld [vmem:[%s18601_s3 + $0xd8] sm:$0xff] (!%p13571_p7)  ;;  %v11613_v62 = vld [vmem:[%s18601_s3 + $0x1d0] sm:$0xff] (!%p13571_p7)  ;;  %v14114_v4 = vpack.c.bf16 (!%p13571_p7), %v11642_v40, %v11641_v3  ;;  %v14122_v21 = vpack.c.bf16 (!%p13571_p7), %v11646_v9, %v11645_v48 }
 0x677   : > { %v14058_v46 = vpack.c.bf16 (!%p13571_p7), %v11582_v43, %v11581_v37  ;;  %14089 = vmatpush3.bf16.msra.mxu1 (!%p13571_p7), %v14088_v49  ;;  %v14100_v37 = vpack.c.bf16 (!%p13571_p7), %v11602_v41, %v11601_v26  ;;  %v14102_v43 = vpack.c.bf16 (!%p13571_p7), %v11636_v47, %v11635_v31  ;;  %v11628_v26 = vld [vmem:[%s18601_s3 + $0x248] sm:$0xff] (!%p13571_p7)  ;;  %v11629_v30 = vld [vmem:[%s18601_s3 + $0x250] sm:$0xff] (!%p13571_p7)  ;;  %v11630_v41 = vld [vmem:[%s18601_s3 + $0x258] sm:$0xff] (!%p13571_p7) }
 0x678   : > { %11479 = vst.msk [vmem:[#allocation2 + $0x8] sm:$0x3f] %vm11478_vm10, %v11472_v38  ;;  %v11614_v38 = vld [vmem:[%s18601_s3 + $0x1d8] sm:$0xff] (!%p13571_p7)  ;;  %v11647_v31 = vld [vmem:[%s18601_s3 + $0x2e0] sm:$0xff] (!%p13571_p7)  ;;  %v11648_v47 = vld [vmem:[%s18601_s3 + $0x2e8] sm:$0xff] (!%p13571_p7) }
 0x679   : > { %v14090_v22 = vpack.c.bf16 %v11614_v38, %v11613_v62  ;;  %14059 = vmatprep.subr.bf16.mxu0 %v14058_v46  ;;  %v11551_v62 = vadd.f32 %v11532_v25, %v11484_v58  ;;  %v11548_v38 = vcombine.low %v11540_v27, %v11547_v63  ;;  %v14124_v58 = vpack.c.bf16 %v11630_v41, %v11629_v30  ;;  %v11631_v63 = vld [vmem:[%s18601_s3 + $0x260] sm:$0xff]  ;;  %v11649_v25 = vld [vmem:[%s18601_s3 + $0x2f0] sm:$0xff] }
 0x67a   : > { %14061 = vmatpush3.bf16.msra.mxu0 %v14060_v8  ;;  %v11622_v8 = vld [vmem:[%s18601_s3 + $0x218] sm:$0xff]  ;;  %v14126_v27 = vpack.c.bf16 %v11648_v47, %v11647_v31 }
 0x67b   : > { %14091 = vmatprep.subr.bf16.mxu1 %v14090_v22  ;;  %14063 = vmatprep.subr.bf16.mxu0 %v14062_v20  ;;  %v11553_v33 = vmax.f32 %v11551_v62, 0.0  ;;  %v14135_v20 = vpack.c.bf16 %v11652_v56, %v11651_v53  ;;  %v14108_v14 = vpack.c.bf16 %v11622_v8, %v11621_v1  ;;  %v11992_v53 = vld [vmem:[%s18603_s5 + $0x28] sm:$0xff]  ;;  %v11997_v8 = vld [vmem:[%s18603_s5 + $0x50] sm:$0xff] }
 0x67c   : > { %14093 = vmatpush3.bf16.msra.mxu1 %v14092_v12  ;;  %v11640_v12 = vld [vmem:[%s18601_s3 + $0x2a8] sm:$0xff] }
 0x67d   : > { %14095 = vmatprep.subr.bf16.mxu1 %v14094_v19  ;;  %v11671_v46 = vrot.slane %v11553_v33, %v16530_v50  ;;  %v11664_v55 = vcombine.high %v11553_v33, %v11553_v33  ;;  %v14110_v16 = vpack.c.bf16 %v11640_v12, %v11639_v10  ;;  %v11634_v33 = vld [vmem:[%s18601_s3 + $0x278] sm:$0xff]  ;;  %v11999_v12 = vld [vmem:[%s18603_s5 + $0x60] sm:$0xf] }
 0x67e   : > { %14065 = vmatpush3.bf16.msra.mxu0 %v14064_v32  ;;  %v11625_v32 = vld [vmem:[%s18601_s3 + $0x230] sm:$0xff] }
 0x67f   : > { %14067 = vmatprep.subr.bf16.mxu0 %v14066_v6  ;;  %v11485_v49 = vld [vmem:[#allocation2 + $0x8] sm:$0x3f]  ;;  %v11679_v59 = vcombine.high %v11671_v46, %v11671_v46  ;;  %v11678_v0 = vrot.slane %v11664_v55, %v16530_v50 }
 0x680   : > { %14097 = vmatpush3.bf16.msra.mxu1 %v14096_v42  ;;  %v11552_v22 = vadd.f32 %v11548_v38, %v11485_v49  ;;  %v11626_v42 = vld [vmem:[%s18601_s3 + $0x238] sm:$0xff]  ;;  %v11644_v6 = vld [vmem:[%s18601_s3 + $0x2c8] sm:$0xff]  ;;  %v11633_v38 = vld [vmem:[%s18601_s3 + $0x270] sm:$0xff] }
 0x681   : > { %14099 = vmatprep.subr.bf16.mxu1 %v14098_v29  ;;  %11770 = vmatprep.mubr.f32.mxu0 %v11679_v59  ;;  %v11680_v34 = vcombine.high %v11678_v0, %v11678_v0  ;;  %v14116_v54 = vpack.c.bf16 %v11626_v42, %v11625_v32  ;;  %v14118_v24 = vpack.c.bf16 %v11644_v6, %v11643_v17  ;;  %v11988_v49 = vld [vmem:[%s18603_s5 + $0x8] sm:$0xff]  ;;  %v11993_v59 = vld [vmem:[%s18603_s5 + $0x30] sm:$0xff]  ;;  %v13574_v32 = vld [vmem:[%s18604_s6] ss:$0 sm:$0xff] }
 0x682   : > { %14069 = vmatpush3.bf16.msra.mxu0 %v14068_v36  ;;  %v11554_v7 = vmax.f32 %v11552_v22, 0.0  ;;  %v11632_v36 = vld [vmem:[%s18601_s3 + $0x268] sm:$0xff]  ;;  %v14132_v57 = vpack.c.bf16 %v11634_v33, %v11633_v38  ;;  %v14141_v55 = vpack.c.bf16 %v11988_v49, %v11987_v45  ;;  %v11991_v22 = vld [vmem:[%s18603_s5 + $0x20] sm:$0xff] }
 0x683   : > { %14103 = vmatprep.subr.bf16.mxu0 %v14102_v43  ;;  %11840 = vmatprep.mubr.f32.mxu1 %v11680_v34  ;;  %v14128_v43 = vpack.c.bf16 %v11632_v36, %v11631_v63  ;;  %v14147_v56 = vpack.c.bf16 %v11992_v53, %v11991_v22  ;;  %v11998_v34 = vld [vmem:[%s18603_s5 + $0x58] sm:$0xff] }
 0x684   : > { %14101 = vmatpush3.bf16.msra.mxu1 %v14100_v37  ;;  %v18426_v19 = vrot.slane %v11554_v7, %v16530_v50  ;;  %v11681_v28 = vcombine.high %v11554_v7, %v11554_v7  ;;  %v11650_v37 = vld [vmem:[%s18601_s3 + $0x2f8] sm:$0xff]  ;;  %v11995_v7 = vld [vmem:[%s18603_s5 + $0x40] sm:$0xff]  ;;  %v14156_v10 = vpack.c.bf16 %v11998_v34, %v11997_v8 }
 0x685   : > { %14134 = vmatprep.subr.bf16.mxu1 %v16405_v52  ;;  %11771 = vmatmul.mubr.f32.vlgmr.msra.gmra.mrb[0].mxu0 %v11671_v46  ;;  %v14130_v62 = vpack.c.bf16 %v11650_v37, %v11649_v25  ;;  %v11989_v46 = vld [vmem:[%s18603_s5 + $0x10] sm:$0xff] }
 0x686   : > { %14105 = vmatpush3.bf16.msra.mxu0 %v14104_v60  ;;  %v11696_v2 = vcombine.high %v18426_v19, %v18426_v19  ;;  %v11695_v23 = vrot.slane %v11681_v28, %v16530_v50  ;;  %v11627_v50 = vld [vmem:[%s18601_s3 + $0x240] sm:$0xff]  ;;  %v14144_v15 = vpack.c.bf16 %v11990_v51, %v11989_v46 }
 0x687   : > { %11841 = vmatmul.mubr.f32.vlgmr.msra.gmra.mrb[0].mxu1 %v11678_v0  ;;  %14107 = vmatprep.subr.bf16.mxu0 %v14106_v61  ;;  %v14120_v29 = vpack.c.bf16 %v11628_v26, %v11627_v50  ;;  %v11994_v0 = vld [vmem:[%s18603_s5 + $0x38] sm:$0xff]  ;;  %v11996_v61 = vld [vmem:[%s18603_s5 + $0x48] sm:$0xff] }
 0x688   : > { %14136 = vmatpush3.bf16.msra.mxu1 %v14135_v20  ;;  %11910 = vmatprep.mubr.f32.mxu0 %v11696_v2  ;;  %v14150_v60 = vpack.c.bf16 %v11994_v0, %v11993_v59  ;;  %v14153_v1 = vpack.c.bf16 %v11996_v61, %v11995_v7 }
 0x689   : > { %14137 = vmatprep.subr.bf16.mxu1 %v16405_v52  ;;  %14006 = vmatprep.mubr.msk.f32.mxu1 %vm16406_vm11, %v16407_v44 }
 0x68a   : > { %14109 = vmatpush3.bf16.msra.mxu0 %v14108_v14 }
 0x68b   : > { %14111 = vmatprep.subr.bf16.mxu0 %v14110_v16 }
 0x68c   : > { %14139 = vmatpush3.bf16.msra.mxu1 %v14138_v5 }
 0x68d   : > { %14140 = vmatprep.subr.bf16.mxu1 %v16405_v52 }
 0x68e   : > { %14113 = vmatpush3.bf16.msra.mxu0 %v14112_v11 }
 0x68f   : > { %14115 = vmatprep.subr.bf16.mxu0 %v14114_v4  ;;  %14007 = vmatmul.mubr.msk.f32.vlgmr.msra.gmra.mrb[2].mxu1 %vm11703_vm12, %v11695_v23 }
 0x690   : > { %14035 = vmatprep.mubr.msk.f32.mxu1 %vm16406_vm11, %v16407_v44  ;;  %14142 = vmatpush3.bf16.msra.mxu1 %v14141_v55 }
 0x691   : > { %14143 = vmatprep.subr.bf16.mxu1 %v16405_v52 }
 0x692   : > { %14117 = vmatpush3.bf16.msra.mxu0 %v14116_v54 }
 0x693   : > { %14119 = vmatprep.subr.bf16.mxu0 %v14118_v24 }
 0x694   : > { %14145 = vmatpush3.bf16.msra.mxu1 %v14144_v15 }
 0x695   : > { %14146 = vmatprep.subr.bf16.mxu1 %v16405_v52 }
 0x696   : > { %14121 = vmatpush3.bf16.msra.mxu0 %v14120_v29 }
 0x697   : > { %14123 = vmatprep.subr.bf16.mxu0 %v14122_v21 }
 0x698   : > { %14148 = vmatpush3.bf16.msra.mxu1 %v14147_v56 }
 0x699   : > { %14149 = vmatprep.subr.bf16.mxu1 %v16405_v52 }
 0x69a   : > { %14125 = vmatpush3.bf16.msra.mxu0 %v14124_v58 }
 0x69b   : > { %14127 = vmatprep.subr.bf16.mxu0 %v14126_v27 }
 0x69c   : > { %14151 = vmatpush3.bf16.msra.mxu1 %v14150_v60 }
 0x69d   : > { %14152 = vmatprep.subr.bf16.mxu1 %v16405_v52 }
 0x69e   : > { %14129 = vmatpush3.bf16.msra.mxu0 %v14128_v43 }
 0x69f   : > { %14131 = vmatprep.subr.bf16.mxu0 %v14130_v62 }
 0x6a0   : > { %14154 = vmatpush3.bf16.msra.mxu1 %v14153_v1 }
 0x6a1   : > { %14155 = vmatprep.subr.bf16.mxu1 %v16405_v52  ;;  %v13572_v52 = vld [vmem:[%s18602_s4] ss:$0 sm:$0xff] }
 0x6a2   : > { %14133 = vmatpush3.bf16.msra.mxu0 %v14132_v57 }
 0x6a4   : > { %14157 = vmatpush3.bf16.msra.mxu1 %v14156_v10 }
 0x6a5   : > { %11911 = vmatmul.mubr.f32.vlgmr.msra.gmra.mrb[2].mxu0 %v18426_v19  ;;  %14033 = vmatprep.subr.mxu1 %v16407_v44 }
 0x6a8   : > { %14034 = vmatpush3.msk.msra.mxu1 %vm12011_vm13, %v11999_v12 }
 0x758   : > { %v13886_v20 = vpop.f32.mrb[0].mxu0 }
 0x759   : > { %v13887_v19 = vpop.f32.mrb[1].mxu0 }
 0x75a   : > { %v13888_v35 = vadd.f32 %v13887_v19, %v13886_v20  ;;  %v13921_v13 = vpop.f32.mrb[0].mxu1 }
 0x75b   : > { %v13922_v14 = vpop.f32.mrb[1].mxu1 }
 0x75c   : > { %v11773_v2 = vadd.f32 %v13888_v35, %v13572_v52  ;;  %v13923_v16 = vadd.f32 %v13922_v14, %v13921_v13 }
 0x75e   : > { %v11843_v18 = vadd.f32 %v13923_v16, %v11773_v2 }
 0x762   : > { %v11982_v39 = vpop.f32.mrb[2].mxu1 }
 0x763   : > { %v14008_v28 = vpop.f32.mrb[3].mxu1 }
 0x778   : > { %v13956_v3 = vpop.f32.mrb[2].mxu0 }
 0x779   : > { %v13957_v40 = vpop.f32.mrb[3].mxu0 }
 0x77a   : > { %v13958_v5 = vadd.f32 %v13957_v40, %v13956_v3 }
 0x77c   : > { %v11913_v44 = vadd.f32 %v13958_v5, %v11843_v18 }
 0x77e   : > { %v11983_v11 = vadd.f32 %v11982_v39, %v11913_v44 }
 0x780   : > { %v11986_v4 = vmax.f32 %v11983_v11, 0.0 }
 0x782   : > { %14036 = vmatmul.mubr.msk.f32.vlgmr.msra.gmra.mrb[4].mxu1 %vm12007_vm14, %v11986_v4 }
 0x855   : > { %v12081_v42 = vpop.f32.mrb[4].mxu1 }
 0x856   : > { %v12082_v23 = vadd.f32 %v13574_v32, %v12081_v42  ;;  %v14037_v17 = vpop.f32.mrb[5].mxu1 }
 0x858   : > { %12085 = vst [vmem:[#allocation3] sm:$0x3] %v12082_v23 }
 0x859 PF: > { %p18563_p8 = scmp.eq.s32.totalorder %s12163_s27, 1  ;;  %s16408_s21 = smov [#allocation3]  }
 0x85a   : > { %s12095_s22 = sshll.u32 %s16408_s21, 4  ;;  %s12096_s22 = int_to_ptr.vmem [resolvable:$true] %s12095_s22 }
 0x85b   : > { %s16346_s23 = scalar_lea.vmem %s12096_s22, 32  ;;  %p16353_p12 = scmp.lt.s32.totalorder %s12096_s22, %s12096_s22 }
 0x85c   : > { %p16347_p9 = scmp.ne.s32.totalorder %s12096_s22, %s16346_s23  ;;  %p16354_p13 = scmp.lt.s32.totalorder %s16346_s23, %s16346_s23 }
 0x85e   : > { %p16348_p10 = pnand %p16347_p9, %p18563_p8  ;;  %p16355_p0 = por %p16354_p13, %p16353_p12 }
 0x860   : > { %p16349_p11 = pneg %p16348_p10 }
 0x862   : > { %p16356_p1 = pnand %p16355_p0, %p16349_p11 }
 0x864   : > { %16359 = shalt.err (!%p16356_p1)
}
 0x865   : > { %s16360_s27 = scalar_lea.hbm %s18605_s7, 32 }
 0x866   : > { %p16361_p2 = scmp.ne.s32.totalorder %s18605_s7, %s16360_s27  ;;  %p16366_p5 = scmp.lt.u32.totalorder %s16360_s27, %s18605_s7 }
 0x868   : > { %p16362_p3 = pnand %p16361_p2, %p18563_p8 }
 0x86a   : > { %p16363_p4 = pneg %p16362_p3 }
 0x86c   : > { %p16368_p6 = pnand %p16366_p5, %p16363_p4 }
 0x86e   : > { %16371 = shalt.err (!%p16368_p6)
}
 0x86f   : > { %14302 = dma.vmem_to_hbm [thread:$0]  (%p18563_p8), %s12096_s22, 32, %s18605_s7, [#allocation4]  }
 0x870   : > { %16385 = dma.done.wait (%p18563_p8), [#allocation4], 32  }
 0x871   : > { %16387 = vsyncadd (%p18563_p8), [#allocation4], 4294967264 }
 0x872 PF: > { %s18_s26 = sadd.s32 1, %s16398_s26   ;;  %s18607_s24 = smov %s16394_s25 }
 0x873   : > { %p15_p7 = scmp.ge.s32.totalorder %s18_s26, 4   ;;  %s18608_s25 = smov %s18610_s28 }
 0x875   :  { %17 = sbr.rel (!%p15_p7) target bundleno = 2 (0x2), region = 87 }
 0x87c   :  { %12108 = vsyncpa [#allocation4], 1 }
 0x87d   :  { %12110 = vsyncpa [#allocation4 + $0x1], 1 }

</bundles_post_ra>
